<compile_context>
chip_gen: v7x
topology: tpu7x:2x2x1
jax: 0.10.0
libtpu: 0.0.40
codegen_flags: <defaults>
</compile_context>

<pallas_src>
import functools
import math

import jax
import jax.numpy as jnp
from jax.experimental import pallas as pl
from jax.experimental.pallas import tpu as pltpu


_VMEM = pl.BlockSpec(memory_space=pltpu.MemorySpace.VMEM)

# MXU operand dtype (accumulation is always f32 via preferred_element_type).
_MXU_DTYPE = jnp.bfloat16


def _mxdot(a, b):
    """MXU matmul: bf16 operands, f32 accumulation."""
    return jnp.dot(a.astype(_MXU_DTYPE), b.astype(_MXU_DTYPE),
                   preferred_element_type=jnp.float32)


def _mxdot_tB(a, b):
    """a @ b^T (contract dim 1 with dim 1) without materializing a transpose."""
    return jax.lax.dot_general(a.astype(_MXU_DTYPE), b.astype(_MXU_DTYPE),
                               (((1,), (1,)), ((), ())),
                               preferred_element_type=jnp.float32)


# ----------------------------------------------------------------------------
# The single fused kernel
# ----------------------------------------------------------------------------
def _guenc_kernel(*refs, num_layers, pool_ratio, hid, num_heads):
    it = iter(refs)
    x_ref, adj_ref = next(it), next(it)
    down_w = [next(it) for _ in range(num_layers + 1)]
    down_b = [next(it) for _ in range(num_layers + 1)]
    pool_w = [next(it) for _ in range(num_layers)]
    up_w = [next(it) for _ in range(num_layers)]
    up_b = [next(it) for _ in range(num_layers)]
    (lin1_w, lin1_b, pma1_S,
     p1_wq, p1_bq, p1_wk, p1_bk, p1_wv, p1_bv, p1_wo, p1_bo,
     sab_wq, sab_bq, sab_wk, sab_bk, sab_wv, sab_bv, sab_wo, sab_bo,
     pma2_S,
     p2_wq, p2_bq, p2_wk, p2_bk, p2_wv, p2_bv, p2_wo, p2_bo,
     lin2_w, lin2_b, cls_w, cls_b) = [next(it) for _ in range(32)]
    o_ref = next(it)

    # ---- trace-time memoized constants (one build per distinct size) ----
    eye_memo, rep_memo, mask_memo = {}, {}, {}

    def eye(n):
        if n not in eye_memo:
            r = jax.lax.broadcasted_iota(jnp.int32, (n, n), 0)
            c = jax.lax.broadcasted_iota(jnp.int32, (n, n), 1)
            eye_memo[n] = (r == c).astype(jnp.float32)
        return eye_memo[n]

    def head_stack_consts(nk):
        # One-hot replication matrix R (H*nk, nk): R[h*nk + j, j] = 1, plus the per-head
        # lane mask (H*nk, hid).  No sublane concat/reshape and no integer div/mod.
        if nk not in rep_memo:
            dh = hid // num_heads
            rr = jax.lax.broadcasted_iota(jnp.int32, (num_heads * nk, nk), 0)
            cc = jax.lax.broadcasted_iota(jnp.int32, (num_heads * nk, nk), 1)
            rows = jax.lax.broadcasted_iota(jnp.int32, (num_heads * nk, hid), 0)
            lanes = jax.lax.broadcasted_iota(jnp.int32, (num_heads * nk, hid), 1)
            sel, msk = None, None
            for h in range(num_heads):
                s_h = (rr == cc + h * nk)
                m_h = ((rows >= h * nk) & (rows < (h + 1) * nk)
                       & (lanes >= h * dh) & (lanes < (h + 1) * dh))
                sel = s_h if sel is None else (sel | s_h)
                msk = m_h if msk is None else (msk | m_h)
            rep_memo[nk] = sel.astype(jnp.float32)
            mask_memo[nk] = msk.astype(jnp.float32)
        return rep_memo[nk], mask_memo[nk]

    # ---- helpers ----
    def norm_adj(a, fill):
        """D^-1/2 (A + fill*I) D^-1/2 for a dense SYMMETRIC adjacency."""
        n = a.shape[0]
        a_hat = a + fill * eye(n)
        # symmetry: one sublane-axis degree reduction; the column orientation comes from
        # an exact MXU matvec (entries are 0/1/fill) instead of a second cross-lane
        # reduction or a transpose.
        deg_r = jnp.sum(a_hat, axis=0, keepdims=True)                        # (1, n)
        deg_c = _mxdot(a_hat, jnp.ones((n, 1), jnp.float32))                 # (n, 1)
        dr = jnp.where(deg_r > 0, jax.lax.rsqrt(deg_r), 0.0)
        dc = jnp.where(deg_c > 0, jax.lax.rsqrt(deg_c), 0.0)
        return dc * a_hat * dr

    def lin(a, w_ref, b_ref):
        return _mxdot(a, w_ref[...]) + b_ref[...]

    def gcn(hh, na, w_ref, b_ref, act):
        out = _mxdot(na, _mxdot(hh, w_ref[...])) + b_ref[...]
        return jnp.maximum(out, 0.0) if act else out

    def topk_pool(hh, a, pw, kk):
        """PyG TopKPooling on dense tensors, fully in-kernel (rank + one-hot matmuls)."""
        n = hh.shape[0]
        e = eye(n)
        inv_norm = jax.lax.rsqrt(jnp.sum(pw * pw, axis=(0, 1), keepdims=True))
        s_col = jnp.tanh(_mxdot(hh, pw) * inv_norm)                          # (n, 1)
        # exact col->row re-orientation (diag select + sublane reduce): both orientations
        # are bit-identical, keeping the pairwise ranking below self-consistent.
        s_row = jnp.sum(e * s_col, axis=0, keepdims=True)                    # (1, n)
        ii = jax.lax.broadcasted_iota(jnp.int32, (n, n), 0)
        jj = jax.lax.broadcasted_iota(jnp.int32, (n, n), 1)
        # TODO(synk): index tie-break may differ from torch.topk at exactly equal scores.
        beats = (s_col > s_row) | ((s_col == s_row) & (ii < jj))   # node i beats node j
        beaten = (s_row > s_col) | ((s_row == s_col) & (jj < ii))  # node j beats node i
        rank_row = jnp.sum(beats.astype(jnp.int32), axis=0, keepdims=True)   # (1, n)
        rank_col = jnp.sum(beaten.astype(jnp.int32), axis=1, keepdims=True)  # (n, 1)
        p_mat = (jax.lax.broadcasted_iota(jnp.int32, (kk, n), 0)
                 == rank_row).astype(jnp.float32)                            # P   (kk, n)
        p_mat_t = (jax.lax.broadcasted_iota(jnp.int32, (n, kk), 1)
                   == rank_col).astype(jnp.float32)                          # P^T (n, kk)
        h_pool = _mxdot(p_mat * s_row, hh)                 # x[perm] * score[perm]
        a_pool = _mxdot(_mxdot(p_mat, a), p_mat_t)         # adj[perm][:, perm]
        return h_pool, a_pool, p_mat_t

    def mha(q, k, v):
        """GMT MAB attention, all heads in one QK^T and one PV MXU pass.

        Masked per-head K/V are stacked along the sublane axis (row block h = K * m_h);
        the (nq, H*nk) score matrix keeps heads in disjoint lane blocks, so the softmax
        over the QUERY axis (PyG 2.0.x GMT semantics) never mixes heads and p @ V_stack
        recombines each head into its own lane block (== concat over heads)."""
        nk = k.shape[0]
        rep, msk = head_stack_consts(nk)
        k_stack = _mxdot(rep, k) * msk                                       # (H*nk, hid)
        v_stack = _mxdot(rep, v) * msk
        s = _mxdot_tB(q, k_stack) * (1.0 / math.sqrt(hid))                   # (nq, H*nk)
        s = s - jnp.max(s, axis=0, keepdims=True)
        p = jnp.exp(s)
        p = p * pl.reciprocal(jnp.sum(p, axis=0, keepdims=True), approx=True)
        return q + _mxdot(p, v_stack)

    # ------------------------------------------------------------------
    x = x_ref[...]
    adj0 = adj_ref[...]

    # ---- Graph U-Net: down path ----
    na = norm_adj(adj0, 2.0)                             # improved GCNConv -> fill = 2
    h = gcn(x, na, down_w[0], down_b[0], True)
    res_stack, na_stack, pt_stack = [h], [na], []
    cur_adj = adj0
    for i in range(1, num_layers + 1):
        kk = int(math.ceil(pool_ratio * h.shape[0]))     # static per level
        h, cur_adj, p_t = topk_pool(h, cur_adj, pool_w[i - 1][...], kk)
        na = norm_adj(cur_adj, 2.0)
        h = gcn(h, na, down_w[i], down_b[i], True)       # deepest na used once, not saved
        pt_stack.append(p_t)
        if i < num_layers:
            res_stack.append(h)
            na_stack.append(na)

    # ---- Graph U-Net: up path (sum_res skip connections) ----
    # TODO(synk): sum_res=False (concat skip) needs 2*hid up-conv / GMT dims; not wired.
    for t in range(num_layers):
        j = num_layers - 1 - t
        up = _mxdot(pt_stack[j], h)                      # unpool scatter: up[perm] = h
        h = gcn(res_stack[j] + up, na_stack[j], up_w[t], up_b[t], t < num_layers - 1)

    # ---- GMT readout (lin1 -> GMPool_G -> SelfAtt -> GMPool_I -> lin2) + classifier ----
    na_g = norm_adj(adj0, 1.0)                           # layer_k/layer_v: plain GCNConvs
    hg = lin(h, lin1_w, lin1_b)

    # GMPool_G: PMA (75 seeds), K/V from GCNConv on (lin1(x), adj)
    q = lin(pma1_S[...], p1_wq, p1_bq)
    k = _mxdot(na_g, _mxdot(hg, p1_wk[...])) + p1_bk[...]
    v = _mxdot(na_g, _mxdot(hg, p1_wv[...])) + p1_bv[...]
    a = mha(q, k, v)
    hg = a + jnp.maximum(lin(a, p1_wo, p1_bo), 0.0)

    # SelfAtt (SAB)
    a = mha(lin(hg, sab_wq, sab_bq), lin(hg, sab_wk, sab_bk), lin(hg, sab_wv, sab_bv))
    hg = a + jnp.maximum(lin(a, sab_wo, sab_bo), 0.0)

    # GMPool_I: PMA (1 seed)
    a = mha(lin(pma2_S[...], p2_wq, p2_bq), lin(hg, p2_wk, p2_bk), lin(hg, p2_wv, p2_bv))
    hg = a + jnp.maximum(lin(a, p2_wo, p2_bo), 0.0)

    hg = lin(hg, lin2_w, lin2_b)
    o_ref[...] = lin(hg, cls_w, cls_b)


# ----------------------------------------------------------------------------
# Wrapper: one pallas_call for the whole forward pass
# ----------------------------------------------------------------------------
def gu_enc_forward(x, adj, params, *, num_layers, pool_ratio, sum_res=True, num_heads=4):
    assert sum_res, "TODO(synk): sum_res=False (concat skips) not wired in init/up weights."
    p = params
    g = p["gmt"]
    hid = g["lin1_w"].shape[1]
    num_labels = g["cls_w"].shape[1]
    attn_keys = ("wq", "bq", "wk", "bk", "wv", "bv", "wo", "bo")
    inputs = ([x, adj]
              + list(p["down_w"]) + list(p["down_b"]) + list(p["pool_w"])
              + list(p["up_w"]) + list(p["up_b"])
              + [g["lin1_w"], g["lin1_b"], g["pma1_S"]]
              + [g["pma1"][n] for n in attn_keys]
              + [g["sab"][n] for n in attn_keys]
              + [g["pma2_S"]]
              + [g["pma2"][n] for n in attn_keys]
              + [g["lin2_w"], g["lin2_b"], g["cls_w"], g["cls_b"]])
    kernel = functools.partial(_guenc_kernel, num_layers=int(num_layers),
                               pool_ratio=float(pool_ratio), hid=int(hid),
                               num_heads=int(num_heads))
    return pl.pallas_call(
        kernel,
        out_shape=jax.ShapeDtypeStruct((1, num_labels), jnp.float32),
        in_specs=[_VMEM] * len(inputs),
        out_specs=_VMEM,
    )(*inputs)


# ----------------------------------------------------------------------------
# Deterministic parameter init (shapes per GUEnc.__init__; Q/K/V kept as separate refs)
# ----------------------------------------------------------------------------
def init_params(key, in_dim, hid, num_labels, num_layers, num_seeds=75):
    keys = iter(jax.random.split(key, 64))

    def w(shape, scale=0.1):
        return (scale * jax.random.normal(next(keys), shape)).astype(jnp.float32)

    def b(dim):
        return jnp.zeros((1, dim), jnp.float32)

    def attn_p(d):
        return dict(wq=w((d, d)), bq=b(d), wk=w((d, d)), bk=b(d),
                    wv=w((d, d)), bv=b(d), wo=w((d, d)), bo=b(d))

    return dict(
        down_w=[w((in_dim, hid))] + [w((hid, hid)) for _ in range(num_layers)],
        down_b=[b(hid) for _ in range(num_layers + 1)],
        pool_w=[w((hid, 1)) for _ in range(num_layers)],
        up_w=[w((hid, hid)) for _ in range(num_layers)],       # sum_res=True -> (hid, hid)
        up_b=[b(hid) for _ in range(num_layers)],
        gmt=dict(
            lin1_w=w((hid, hid)), lin1_b=b(hid),
            pma1_S=w((num_seeds, hid)),                        # ceil(300 * 0.25) = 75 seeds
            pma1=attn_p(hid),
            sab=attn_p(hid),
            pma2_S=w((1, hid)),
            pma2=attn_p(hid),
            lin2_w=w((hid, hid)), lin2_b=b(hid),
            cls_w=w((hid, num_labels)), cls_b=b(num_labels),
        ),
    )


if __name__ == "__main__":
    N = 12                  # nodes (single graph, batch = zeros)
    IN_DIM, HID, NUM_LABELS = 8, 16, 3
    NUM_LAYERS, POOL_RATIO = 2, 0.5

    key = jax.random.PRNGKey(0)
    kx, ka, kp = jax.random.split(key, 3)
    x = jax.random.normal(kx, (N, IN_DIM), dtype=jnp.float32)
    upper = jnp.triu((jax.random.uniform(ka, (N, N)) < 0.35).astype(jnp.float32), k=1)
    adj = upper + upper.T                                      # symmetric 0/1, zero diagonal

    params = init_params(kp, IN_DIM, HID, NUM_LABELS, NUM_LAYERS)
    fwd = jax.jit(functools.partial(gu_enc_forward, num_layers=NUM_LAYERS,
                                    pool_ratio=POOL_RATIO, sum_res=True))
    pred = jax.block_until_ready(fwd(x, adj, params))
    assert pred.shape == (1, NUM_LABELS)
    print("KERNEL_OK")
</pallas_src>

<mosaic_0001>
module attributes {stable_mosaic.version = 11 : i64} {
  func.func @_guenc_kernel(%arg0: memref<12x8xf32, #tpu.memory_space<vmem>>, %arg1: memref<12x12xf32, #tpu.memory_space<vmem>>, %arg2: memref<8x16xf32, #tpu.memory_space<vmem>>, %arg3: memref<16x16xf32, #tpu.memory_space<vmem>>, %arg4: memref<16x16xf32, #tpu.memory_space<vmem>>, %arg5: memref<1x16xf32, #tpu.memory_space<vmem>>, %arg6: memref<1x16xf32, #tpu.memory_space<vmem>>, %arg7: memref<1x16xf32, #tpu.memory_space<vmem>>, %arg8: memref<16x1xf32, #tpu.memory_space<vmem>>, %arg9: memref<16x1xf32, #tpu.memory_space<vmem>>, %arg10: memref<16x16xf32, #tpu.memory_space<vmem>>, %arg11: memref<16x16xf32, #tpu.memory_space<vmem>>, %arg12: memref<1x16xf32, #tpu.memory_space<vmem>>, %arg13: memref<1x16xf32, #tpu.memory_space<vmem>>, %arg14: memref<16x16xf32, #tpu.memory_space<vmem>>, %arg15: memref<1x16xf32, #tpu.memory_space<vmem>>, %arg16: memref<75x16xf32, #tpu.memory_space<vmem>>, %arg17: memref<16x16xf32, #tpu.memory_space<vmem>>, %arg18: memref<1x16xf32, #tpu.memory_space<vmem>>, %arg19: memref<16x16xf32, #tpu.memory_space<vmem>>, %arg20: memref<1x16xf32, #tpu.memory_space<vmem>>, %arg21: memref<16x16xf32, #tpu.memory_space<vmem>>, %arg22: memref<1x16xf32, #tpu.memory_space<vmem>>, %arg23: memref<16x16xf32, #tpu.memory_space<vmem>>, %arg24: memref<1x16xf32, #tpu.memory_space<vmem>>, %arg25: memref<16x16xf32, #tpu.memory_space<vmem>>, %arg26: memref<1x16xf32, #tpu.memory_space<vmem>>, %arg27: memref<16x16xf32, #tpu.memory_space<vmem>>, %arg28: memref<1x16xf32, #tpu.memory_space<vmem>>, %arg29: memref<16x16xf32, #tpu.memory_space<vmem>>, %arg30: memref<1x16xf32, #tpu.memory_space<vmem>>, %arg31: memref<16x16xf32, #tpu.memory_space<vmem>>, %arg32: memref<1x16xf32, #tpu.memory_space<vmem>>, %arg33: memref<1x16xf32, #tpu.memory_space<vmem>>, %arg34: memref<16x16xf32, #tpu.memory_space<vmem>>, %arg35: memref<1x16xf32, #tpu.memory_space<vmem>>, %arg36: memref<16x16xf32, #tpu.memory_space<vmem>>, %arg37: memref<1x16xf32, #tpu.memory_space<vmem>>, %arg38: memref<16x16xf32, #tpu.memory_space<vmem>>, %arg39: memref<1x16xf32, #tpu.memory_space<vmem>>, %arg40: memref<16x16xf32, #tpu.memory_space<vmem>>, %arg41: memref<1x16xf32, #tpu.memory_space<vmem>>, %arg42: memref<16x16xf32, #tpu.memory_space<vmem>>, %arg43: memref<1x16xf32, #tpu.memory_space<vmem>>, %arg44: memref<16x3xf32, #tpu.memory_space<vmem>>, %arg45: memref<1x3xf32, #tpu.memory_space<vmem>>, %arg46: memref<1x3xf32, #tpu.memory_space<vmem>>) attributes {dimension_semantics = [], scalar_prefetch = 0 : i64, scratch_operands = 0 : i64, tpu.core_type = #tpu.core_type<tc>} {
    %c0 = arith.constant 0 : index
    %c0_0 = arith.constant 0 : index
    %0 = vector.load %arg0[%c0, %c0_0] : memref<12x8xf32, #tpu.memory_space<vmem>>, vector<12x8xf32>
    %c0_1 = arith.constant 0 : index
    %c0_2 = arith.constant 0 : index
    %1 = vector.load %arg1[%c0_1, %c0_2] : memref<12x12xf32, #tpu.memory_space<vmem>>, vector<12x12xf32>
    %2 = tpu.iota {dimensions = array<i32: 0>} : vector<12x12xi32>
    %3 = tpu.iota {dimensions = array<i32: 1>} : vector<12x12xi32>
    %4 = arith.cmpi eq, %2, %3 : vector<12x12xi32>
    %5 = arith.extui %4 : vector<12x12xi1> to vector<12x12xi32>
    %6 = arith.sitofp %5 : vector<12x12xi32> to vector<12x12xf32>
    %cst = arith.constant 2.000000e+00 : f32
    %7 = vector.broadcast %cst : f32 to vector<12x12xf32>
    %8 = arith.mulf %7, %6 : vector<12x12xf32>
    %9 = arith.addf %1, %8 : vector<12x12xf32>
    %cst_3 = arith.constant dense<0.000000e+00> : vector<12xf32>
    %10 = vector.multi_reduction <add>, %9, %cst_3 [0] : vector<12x12xf32> to vector<12xf32>
    %11 = vector.shape_cast %10 : vector<12xf32> to vector<1x12xf32>
    %cst_4 = arith.constant 1.000000e+00 : f32
    %12 = vector.broadcast %cst_4 : f32 to vector<12x1xf32>
    %13 = arith.truncf %9 : vector<12x12xf32> to vector<12x12xbf16>
    %14 = arith.truncf %12 : vector<12x1xf32> to vector<12x1xbf16>
    %cst_5 = arith.constant dense<0.000000e+00> : vector<12x1xf32>
    %15 = tpu.matmul %13, %14, %cst_5 {dimension_numbers = #tpu.dot_dimension_numbers<[1], [0], [0], [1], [0, 0, 1, 1], [], []>} : vector<12x12xbf16>, vector<12x1xbf16>, vector<12x1xf32> -> vector<12x1xf32>
    %cst_6 = arith.constant 0.000000e+00 : f32
    %16 = vector.broadcast %cst_6 : f32 to vector<1x12xf32>
    %17 = arith.cmpf ogt, %11, %16 : vector<1x12xf32>
    %18 = math.rsqrt %11 : vector<1x12xf32>
    %cst_7 = arith.constant 0.000000e+00 : f32
    %19 = vector.broadcast %cst_7 : f32 to vector<1x12xf32>
    %20 = arith.select %17, %18, %19 : vector<1x12xi1>, vector<1x12xf32>
    %cst_8 = arith.constant 0.000000e+00 : f32
    %21 = vector.broadcast %cst_8 : f32 to vector<12x1xf32>
    %22 = arith.cmpf ogt, %15, %21 : vector<12x1xf32>
    %23 = math.rsqrt %15 : vector<12x1xf32>
    %cst_9 = arith.constant 0.000000e+00 : f32
    %24 = vector.broadcast %cst_9 : f32 to vector<12x1xf32>
    %25 = arith.select %22, %23, %24 : vector<12x1xi1>, vector<12x1xf32>
    %26 = vector.broadcast %25 : vector<12x1xf32> to vector<12x12xf32>
    %27 = arith.mulf %26, %9 : vector<12x12xf32>
    %28 = vector.broadcast %20 : vector<1x12xf32> to vector<12x12xf32>
    %29 = arith.mulf %27, %28 : vector<12x12xf32>
    %c0_10 = arith.constant 0 : index
    %c0_11 = arith.constant 0 : index
    %30 = vector.load %arg2[%c0_10, %c0_11] : memref<8x16xf32, #tpu.memory_space<vmem>>, vector<8x16xf32>
    %31 = arith.truncf %0 : vector<12x8xf32> to vector<12x8xbf16>
    %32 = arith.truncf %30 : vector<8x16xf32> to vector<8x16xbf16>
    %cst_12 = arith.constant dense<0.000000e+00> : vector<12x16xf32>
    %33 = tpu.matmul %31, %32, %cst_12 {dimension_numbers = #tpu.dot_dimension_numbers<[1], [0], [0], [1], [0, 0, 1, 1], [], []>} : vector<12x8xbf16>, vector<8x16xbf16>, vector<12x16xf32> -> vector<12x16xf32>
    %34 = arith.truncf %29 : vector<12x12xf32> to vector<12x12xbf16>
    %35 = arith.truncf %33 : vector<12x16xf32> to vector<12x16xbf16>
    %cst_13 = arith.constant dense<0.000000e+00> : vector<12x16xf32>
    %36 = tpu.matmul %34, %35, %cst_13 {dimension_numbers = #tpu.dot_dimension_numbers<[1], [0], [0], [1], [0, 0, 1, 1], [], []>} : vector<12x12xbf16>, vector<12x16xbf16>, vector<12x16xf32> -> vector<12x16xf32>
    %c0_14 = arith.constant 0 : index
    %c0_15 = arith.constant 0 : index
    %37 = vector.load %arg5[%c0_14, %c0_15] : memref<1x16xf32, #tpu.memory_space<vmem>>, vector<1x16xf32>
    %38 = vector.broadcast %37 : vector<1x16xf32> to vector<12x16xf32>
    %39 = arith.addf %36, %38 : vector<12x16xf32>
    %cst_16 = arith.constant 0.000000e+00 : f32
    %40 = vector.broadcast %cst_16 : f32 to vector<12x16xf32>
    %41 = arith.maximumf %39, %40 : vector<12x16xf32>
    %c0_17 = arith.constant 0 : index
    %c0_18 = arith.constant 0 : index
    %42 = vector.load %arg8[%c0_17, %c0_18] : memref<16x1xf32, #tpu.memory_space<vmem>>, vector<16x1xf32>
    %43 = arith.mulf %42, %42 : vector<16x1xf32>
    %44 = vector.shape_cast %43 : vector<16x1xf32> to vector<1x16x1xf32>
    %cst_19 = arith.constant dense<0.000000e+00> : vector<1xf32>
    %45 = vector.multi_reduction <add>, %44, %cst_19 [1, 2] : vector<1x16x1xf32> to vector<1xf32>
    %46 = vector.shape_cast %45 : vector<1xf32> to vector<1x1x1xf32>
    %47 = vector.extract %46[0, 0, 0] : f32 from vector<1x1x1xf32>
    %48 = vector.broadcast %47 : f32 to vector<1x1xf32>
    %49 = math.rsqrt %48 : vector<1x1xf32>
    %50 = arith.truncf %41 : vector<12x16xf32> to vector<12x16xbf16>
    %51 = arith.truncf %42 : vector<16x1xf32> to vector<16x1xbf16>
    %cst_20 = arith.constant dense<0.000000e+00> : vector<12x1xf32>
    %52 = tpu.matmul %50, %51, %cst_20 {dimension_numbers = #tpu.dot_dimension_numbers<[1], [0], [0], [1], [0, 0, 1, 1], [], []>} : vector<12x16xbf16>, vector<16x1xbf16>, vector<12x1xf32> -> vector<12x1xf32>
    %53 = vector.broadcast %49 : vector<1x1xf32> to vector<12x1xf32>
    %54 = arith.mulf %52, %53 : vector<12x1xf32>
    %55 = math.tanh %54 : vector<12x1xf32>
    %56 = vector.broadcast %55 : vector<12x1xf32> to vector<12x12xf32>
    %57 = arith.mulf %6, %56 : vector<12x12xf32>
    %cst_21 = arith.constant dense<0.000000e+00> : vector<12xf32>
    %58 = vector.multi_reduction <add>, %57, %cst_21 [0] : vector<12x12xf32> to vector<12xf32>
    %59 = vector.shape_cast %58 : vector<12xf32> to vector<1x12xf32>
    %60 = tpu.iota {dimensions = array<i32: 0>} : vector<12x12xi32>
    %61 = tpu.iota {dimensions = array<i32: 1>} : vector<12x12xi32>
    %62 = vector.broadcast %55 : vector<12x1xf32> to vector<12x12xf32>
    %63 = vector.broadcast %59 : vector<1x12xf32> to vector<12x12xf32>
    %64 = arith.cmpf ogt, %62, %63 : vector<12x12xf32>
    %65 = vector.broadcast %55 : vector<12x1xf32> to vector<12x12xf32>
    %66 = vector.broadcast %59 : vector<1x12xf32> to vector<12x12xf32>
    %67 = arith.cmpf oeq, %65, %66 : vector<12x12xf32>
    %68 = arith.cmpi slt, %60, %61 : vector<12x12xi32>
    %69 = arith.andi %67, %68 : vector<12x12xi1>
    %70 = arith.ori %64, %69 : vector<12x12xi1>
    %71 = vector.broadcast %59 : vector<1x12xf32> to vector<12x12xf32>
    %72 = vector.broadcast %55 : vector<12x1xf32> to vector<12x12xf32>
    %73 = arith.cmpf ogt, %71, %72 : vector<12x12xf32>
    %74 = vector.broadcast %59 : vector<1x12xf32> to vector<12x12xf32>
    %75 = vector.broadcast %55 : vector<12x1xf32> to vector<12x12xf32>
    %76 = arith.cmpf oeq, %74, %75 : vector<12x12xf32>
    %77 = arith.cmpi slt, %61, %60 : vector<12x12xi32>
    %78 = arith.andi %76, %77 : vector<12x12xi1>
    %79 = arith.ori %73, %78 : vector<12x12xi1>
    %80 = arith.extui %70 : vector<12x12xi1> to vector<12x12xi32>
    %cst_22 = arith.constant dense<0> : vector<12xi32>
    %81 = vector.multi_reduction <add>, %80, %cst_22 [0] : vector<12x12xi32> to vector<12xi32>
    %82 = vector.shape_cast %81 : vector<12xi32> to vector<1x12xi32>
    %83 = arith.extui %79 : vector<12x12xi1> to vector<12x12xi32>
    %cst_23 = arith.constant dense<0> : vector<12xi32>
    %84 = vector.multi_reduction <add>, %83, %cst_23 [1] : vector<12x12xi32> to vector<12xi32>
    %85 = vector.shape_cast %84 : vector<12xi32> to vector<12x1xi32>
    %86 = tpu.iota {dimensions = array<i32: 0>} : vector<6x12xi32>
    %87 = vector.broadcast %82 : vector<1x12xi32> to vector<6x12xi32>
    %88 = arith.cmpi eq, %86, %87 : vector<6x12xi32>
    %89 = arith.extui %88 : vector<6x12xi1> to vector<6x12xi32>
    %90 = arith.sitofp %89 : vector<6x12xi32> to vector<6x12xf32>
    %91 = tpu.iota {dimensions = array<i32: 1>} : vector<12x6xi32>
    %92 = vector.broadcast %85 : vector<12x1xi32> to vector<12x6xi32>
    %93 = arith.cmpi eq, %91, %92 : vector<12x6xi32>
    %94 = arith.extui %93 : vector<12x6xi1> to vector<12x6xi32>
    %95 = arith.sitofp %94 : vector<12x6xi32> to vector<12x6xf32>
    %96 = vector.broadcast %59 : vector<1x12xf32> to vector<6x12xf32>
    %97 = arith.mulf %90, %96 : vector<6x12xf32>
    %98 = arith.truncf %97 : vector<6x12xf32> to vector<6x12xbf16>
    %99 = arith.truncf %41 : vector<12x16xf32> to vector<12x16xbf16>
    %cst_24 = arith.constant dense<0.000000e+00> : vector<6x16xf32>
    %100 = tpu.matmul %98, %99, %cst_24 {dimension_numbers = #tpu.dot_dimension_numbers<[1], [0], [0], [1], [0, 0, 1, 1], [], []>} : vector<6x12xbf16>, vector<12x16xbf16>, vector<6x16xf32> -> vector<6x16xf32>
    %101 = arith.truncf %90 : vector<6x12xf32> to vector<6x12xbf16>
    %102 = arith.truncf %1 : vector<12x12xf32> to vector<12x12xbf16>
    %cst_25 = arith.constant dense<0.000000e+00> : vector<6x12xf32>
    %103 = tpu.matmul %101, %102, %cst_25 {dimension_numbers = #tpu.dot_dimension_numbers<[1], [0], [0], [1], [0, 0, 1, 1], [], []>} : vector<6x12xbf16>, vector<12x12xbf16>, vector<6x12xf32> -> vector<6x12xf32>
    %104 = arith.truncf %103 : vector<6x12xf32> to vector<6x12xbf16>
    %105 = arith.truncf %95 : vector<12x6xf32> to vector<12x6xbf16>
    %cst_26 = arith.constant dense<0.000000e+00> : vector<6x6xf32>
    %106 = tpu.matmul %104, %105, %cst_26 {dimension_numbers = #tpu.dot_dimension_numbers<[1], [0], [0], [1], [0, 0, 1, 1], [], []>} : vector<6x12xbf16>, vector<12x6xbf16>, vector<6x6xf32> -> vector<6x6xf32>
    %107 = tpu.iota {dimensions = array<i32: 0>} : vector<6x6xi32>
    %108 = tpu.iota {dimensions = array<i32: 1>} : vector<6x6xi32>
    %109 = arith.cmpi eq, %107, %108 : vector<6x6xi32>
    %110 = arith.extui %109 : vector<6x6xi1> to vector<6x6xi32>
    %111 = arith.sitofp %110 : vector<6x6xi32> to vector<6x6xf32>
    %cst_27 = arith.constant 2.000000e+00 : f32
    %112 = vector.broadcast %cst_27 : f32 to vector<6x6xf32>
    %113 = arith.mulf %112, %111 : vector<6x6xf32>
    %114 = arith.addf %106, %113 : vector<6x6xf32>
    %cst_28 = arith.constant dense<0.000000e+00> : vector<6xf32>
    %115 = vector.multi_reduction <add>, %114, %cst_28 [0] : vector<6x6xf32> to vector<6xf32>
    %116 = vector.shape_cast %115 : vector<6xf32> to vector<1x6xf32>
    %cst_29 = arith.constant 1.000000e+00 : f32
    %117 = vector.broadcast %cst_29 : f32 to vector<6x1xf32>
    %118 = arith.truncf %114 : vector<6x6xf32> to vector<6x6xbf16>
    %119 = arith.truncf %117 : vector<6x1xf32> to vector<6x1xbf16>
    %cst_30 = arith.constant dense<0.000000e+00> : vector<6x1xf32>
    %120 = tpu.matmul %118, %119, %cst_30 {dimension_numbers = #tpu.dot_dimension_numbers<[1], [0], [0], [1], [0, 0, 1, 1], [], []>} : vector<6x6xbf16>, vector<6x1xbf16>, vector<6x1xf32> -> vector<6x1xf32>
    %cst_31 = arith.constant 0.000000e+00 : f32
    %121 = vector.broadcast %cst_31 : f32 to vector<1x6xf32>
    %122 = arith.cmpf ogt, %116, %121 : vector<1x6xf32>
    %123 = math.rsqrt %116 : vector<1x6xf32>
    %cst_32 = arith.constant 0.000000e+00 : f32
    %124 = vector.broadcast %cst_32 : f32 to vector<1x6xf32>
    %125 = arith.select %122, %123, %124 : vector<1x6xi1>, vector<1x6xf32>
    %cst_33 = arith.constant 0.000000e+00 : f32
    %126 = vector.broadcast %cst_33 : f32 to vector<6x1xf32>
    %127 = arith.cmpf ogt, %120, %126 : vector<6x1xf32>
    %128 = math.rsqrt %120 : vector<6x1xf32>
    %cst_34 = arith.constant 0.000000e+00 : f32
    %129 = vector.broadcast %cst_34 : f32 to vector<6x1xf32>
    %130 = arith.select %127, %128, %129 : vector<6x1xi1>, vector<6x1xf32>
    %131 = vector.broadcast %130 : vector<6x1xf32> to vector<6x6xf32>
    %132 = arith.mulf %131, %114 : vector<6x6xf32>
    %133 = vector.broadcast %125 : vector<1x6xf32> to vector<6x6xf32>
    %134 = arith.mulf %132, %133 : vector<6x6xf32>
    %c0_35 = arith.constant 0 : index
    %c0_36 = arith.constant 0 : index
    %135 = vector.load %arg3[%c0_35, %c0_36] : memref<16x16xf32, #tpu.memory_space<vmem>>, vector<16x16xf32>
    %136 = arith.truncf %100 : vector<6x16xf32> to vector<6x16xbf16>
    %137 = arith.truncf %135 : vector<16x16xf32> to vector<16x16xbf16>
    %cst_37 = arith.constant dense<0.000000e+00> : vector<6x16xf32>
    %138 = tpu.matmul %136, %137, %cst_37 {dimension_numbers = #tpu.dot_dimension_numbers<[1], [0], [0], [1], [0, 0, 1, 1], [], []>} : vector<6x16xbf16>, vector<16x16xbf16>, vector<6x16xf32> -> vector<6x16xf32>
    %139 = arith.truncf %134 : vector<6x6xf32> to vector<6x6xbf16>
    %140 = arith.truncf %138 : vector<6x16xf32> to vector<6x16xbf16>
    %cst_38 = arith.constant dense<0.000000e+00> : vector<6x16xf32>
    %141 = tpu.matmul %139, %140, %cst_38 {dimension_numbers = #tpu.dot_dimension_numbers<[1], [0], [0], [1], [0, 0, 1, 1], [], []>} : vector<6x6xbf16>, vector<6x16xbf16>, vector<6x16xf32> -> vector<6x16xf32>
    %c0_39 = arith.constant 0 : index
    %c0_40 = arith.constant 0 : index
    %142 = vector.load %arg6[%c0_39, %c0_40] : memref<1x16xf32, #tpu.memory_space<vmem>>, vector<1x16xf32>
    %143 = vector.broadcast %142 : vector<1x16xf32> to vector<6x16xf32>
    %144 = arith.addf %141, %143 : vector<6x16xf32>
    %cst_41 = arith.constant 0.000000e+00 : f32
    %145 = vector.broadcast %cst_41 : f32 to vector<6x16xf32>
    %146 = arith.maximumf %144, %145 : vector<6x16xf32>
    %c0_42 = arith.constant 0 : index
    %c0_43 = arith.constant 0 : index
    %147 = vector.load %arg9[%c0_42, %c0_43] : memref<16x1xf32, #tpu.memory_space<vmem>>, vector<16x1xf32>
    %148 = arith.mulf %147, %147 : vector<16x1xf32>
    %149 = vector.shape_cast %148 : vector<16x1xf32> to vector<1x16x1xf32>
    %cst_44 = arith.constant dense<0.000000e+00> : vector<1xf32>
    %150 = vector.multi_reduction <add>, %149, %cst_44 [1, 2] : vector<1x16x1xf32> to vector<1xf32>
    %151 = vector.shape_cast %150 : vector<1xf32> to vector<1x1x1xf32>
    %152 = vector.extract %151[0, 0, 0] : f32 from vector<1x1x1xf32>
    %153 = vector.broadcast %152 : f32 to vector<1x1xf32>
    %154 = math.rsqrt %153 : vector<1x1xf32>
    %155 = arith.truncf %146 : vector<6x16xf32> to vector<6x16xbf16>
    %156 = arith.truncf %147 : vector<16x1xf32> to vector<16x1xbf16>
    %cst_45 = arith.constant dense<0.000000e+00> : vector<6x1xf32>
    %157 = tpu.matmul %155, %156, %cst_45 {dimension_numbers = #tpu.dot_dimension_numbers<[1], [0], [0], [1], [0, 0, 1, 1], [], []>} : vector<6x16xbf16>, vector<16x1xbf16>, vector<6x1xf32> -> vector<6x1xf32>
    %158 = vector.broadcast %154 : vector<1x1xf32> to vector<6x1xf32>
    %159 = arith.mulf %157, %158 : vector<6x1xf32>
    %160 = math.tanh %159 : vector<6x1xf32>
    %161 = vector.broadcast %160 : vector<6x1xf32> to vector<6x6xf32>
    %162 = arith.mulf %111, %161 : vector<6x6xf32>
    %cst_46 = arith.constant dense<0.000000e+00> : vector<6xf32>
    %163 = vector.multi_reduction <add>, %162, %cst_46 [0] : vector<6x6xf32> to vector<6xf32>
    %164 = vector.shape_cast %163 : vector<6xf32> to vector<1x6xf32>
    %165 = tpu.iota {dimensions = array<i32: 0>} : vector<6x6xi32>
    %166 = tpu.iota {dimensions = array<i32: 1>} : vector<6x6xi32>
    %167 = vector.broadcast %160 : vector<6x1xf32> to vector<6x6xf32>
    %168 = vector.broadcast %164 : vector<1x6xf32> to vector<6x6xf32>
    %169 = arith.cmpf ogt, %167, %168 : vector<6x6xf32>
    %170 = vector.broadcast %160 : vector<6x1xf32> to vector<6x6xf32>
    %171 = vector.broadcast %164 : vector<1x6xf32> to vector<6x6xf32>
    %172 = arith.cmpf oeq, %170, %171 : vector<6x6xf32>
    %173 = arith.cmpi slt, %165, %166 : vector<6x6xi32>
    %174 = arith.andi %172, %173 : vector<6x6xi1>
    %175 = arith.ori %169, %174 : vector<6x6xi1>
    %176 = vector.broadcast %164 : vector<1x6xf32> to vector<6x6xf32>
    %177 = vector.broadcast %160 : vector<6x1xf32> to vector<6x6xf32>
    %178 = arith.cmpf ogt, %176, %177 : vector<6x6xf32>
    %179 = vector.broadcast %164 : vector<1x6xf32> to vector<6x6xf32>
    %180 = vector.broadcast %160 : vector<6x1xf32> to vector<6x6xf32>
    %181 = arith.cmpf oeq, %179, %180 : vector<6x6xf32>
    %182 = arith.cmpi slt, %166, %165 : vector<6x6xi32>
    %183 = arith.andi %181, %182 : vector<6x6xi1>
    %184 = arith.ori %178, %183 : vector<6x6xi1>
    %185 = arith.extui %175 : vector<6x6xi1> to vector<6x6xi32>
    %cst_47 = arith.constant dense<0> : vector<6xi32>
    %186 = vector.multi_reduction <add>, %185, %cst_47 [0] : vector<6x6xi32> to vector<6xi32>
    %187 = vector.shape_cast %186 : vector<6xi32> to vector<1x6xi32>
    %188 = arith.extui %184 : vector<6x6xi1> to vector<6x6xi32>
    %cst_48 = arith.constant dense<0> : vector<6xi32>
    %189 = vector.multi_reduction <add>, %188, %cst_48 [1] : vector<6x6xi32> to vector<6xi32>
    %190 = vector.shape_cast %189 : vector<6xi32> to vector<6x1xi32>
    %191 = tpu.iota {dimensions = array<i32: 0>} : vector<3x6xi32>
    %192 = vector.broadcast %187 : vector<1x6xi32> to vector<3x6xi32>
    %193 = arith.cmpi eq, %191, %192 : vector<3x6xi32>
    %194 = arith.extui %193 : vector<3x6xi1> to vector<3x6xi32>
    %195 = arith.sitofp %194 : vector<3x6xi32> to vector<3x6xf32>
    %196 = tpu.iota {dimensions = array<i32: 1>} : vector<6x3xi32>
    %197 = vector.broadcast %190 : vector<6x1xi32> to vector<6x3xi32>
    %198 = arith.cmpi eq, %196, %197 : vector<6x3xi32>
    %199 = arith.extui %198 : vector<6x3xi1> to vector<6x3xi32>
    %200 = arith.sitofp %199 : vector<6x3xi32> to vector<6x3xf32>
    %201 = vector.broadcast %164 : vector<1x6xf32> to vector<3x6xf32>
    %202 = arith.mulf %195, %201 : vector<3x6xf32>
    %203 = arith.truncf %202 : vector<3x6xf32> to vector<3x6xbf16>
    %204 = arith.truncf %146 : vector<6x16xf32> to vector<6x16xbf16>
    %cst_49 = arith.constant dense<0.000000e+00> : vector<3x16xf32>
    %205 = tpu.matmul %203, %204, %cst_49 {dimension_numbers = #tpu.dot_dimension_numbers<[1], [0], [0], [1], [0, 0, 1, 1], [], []>} : vector<3x6xbf16>, vector<6x16xbf16>, vector<3x16xf32> -> vector<3x16xf32>
    %206 = arith.truncf %195 : vector<3x6xf32> to vector<3x6xbf16>
    %207 = arith.truncf %106 : vector<6x6xf32> to vector<6x6xbf16>
    %cst_50 = arith.constant dense<0.000000e+00> : vector<3x6xf32>
    %208 = tpu.matmul %206, %207, %cst_50 {dimension_numbers = #tpu.dot_dimension_numbers<[1], [0], [0], [1], [0, 0, 1, 1], [], []>} : vector<3x6xbf16>, vector<6x6xbf16>, vector<3x6xf32> -> vector<3x6xf32>
    %209 = arith.truncf %208 : vector<3x6xf32> to vector<3x6xbf16>
    %210 = arith.truncf %200 : vector<6x3xf32> to vector<6x3xbf16>
    %cst_51 = arith.constant dense<0.000000e+00> : vector<3x3xf32>
    %211 = tpu.matmul %209, %210, %cst_51 {dimension_numbers = #tpu.dot_dimension_numbers<[1], [0], [0], [1], [0, 0, 1, 1], [], []>} : vector<3x6xbf16>, vector<6x3xbf16>, vector<3x3xf32> -> vector<3x3xf32>
    %212 = tpu.iota {dimensions = array<i32: 0>} : vector<3x3xi32>
    %213 = tpu.iota {dimensions = array<i32: 1>} : vector<3x3xi32>
    %214 = arith.cmpi eq, %212, %213 : vector<3x3xi32>
    %215 = arith.extui %214 : vector<3x3xi1> to vector<3x3xi32>
    %216 = arith.sitofp %215 : vector<3x3xi32> to vector<3x3xf32>
    %cst_52 = arith.constant 2.000000e+00 : f32
    %217 = vector.broadcast %cst_52 : f32 to vector<3x3xf32>
    %218 = arith.mulf %217, %216 : vector<3x3xf32>
    %219 = arith.addf %211, %218 : vector<3x3xf32>
    %cst_53 = arith.constant dense<0.000000e+00> : vector<3xf32>
    %220 = vector.multi_reduction <add>, %219, %cst_53 [0] : vector<3x3xf32> to vector<3xf32>
    %221 = vector.shape_cast %220 : vector<3xf32> to vector<1x3xf32>
    %cst_54 = arith.constant 1.000000e+00 : f32
    %222 = vector.broadcast %cst_54 : f32 to vector<3x1xf32>
    %223 = arith.truncf %219 : vector<3x3xf32> to vector<3x3xbf16>
    %224 = arith.truncf %222 : vector<3x1xf32> to vector<3x1xbf16>
    %cst_55 = arith.constant dense<0.000000e+00> : vector<3x1xf32>
    %225 = tpu.matmul %223, %224, %cst_55 {dimension_numbers = #tpu.dot_dimension_numbers<[1], [0], [0], [1], [0, 0, 1, 1], [], []>} : vector<3x3xbf16>, vector<3x1xbf16>, vector<3x1xf32> -> vector<3x1xf32>
    %cst_56 = arith.constant 0.000000e+00 : f32
    %226 = vector.broadcast %cst_56 : f32 to vector<1x3xf32>
    %227 = arith.cmpf ogt, %221, %226 : vector<1x3xf32>
    %228 = math.rsqrt %221 : vector<1x3xf32>
    %cst_57 = arith.constant 0.000000e+00 : f32
    %229 = vector.broadcast %cst_57 : f32 to vector<1x3xf32>
    %230 = arith.select %227, %228, %229 : vector<1x3xi1>, vector<1x3xf32>
    %cst_58 = arith.constant 0.000000e+00 : f32
    %231 = vector.broadcast %cst_58 : f32 to vector<3x1xf32>
    %232 = arith.cmpf ogt, %225, %231 : vector<3x1xf32>
    %233 = math.rsqrt %225 : vector<3x1xf32>
    %cst_59 = arith.constant 0.000000e+00 : f32
    %234 = vector.broadcast %cst_59 : f32 to vector<3x1xf32>
    %235 = arith.select %232, %233, %234 : vector<3x1xi1>, vector<3x1xf32>
    %236 = vector.broadcast %235 : vector<3x1xf32> to vector<3x3xf32>
    %237 = arith.mulf %236, %219 : vector<3x3xf32>
    %238 = vector.broadcast %230 : vector<1x3xf32> to vector<3x3xf32>
    %239 = arith.mulf %237, %238 : vector<3x3xf32>
    %c0_60 = arith.constant 0 : index
    %c0_61 = arith.constant 0 : index
    %240 = vector.load %arg4[%c0_60, %c0_61] : memref<16x16xf32, #tpu.memory_space<vmem>>, vector<16x16xf32>
    %241 = arith.truncf %205 : vector<3x16xf32> to vector<3x16xbf16>
    %242 = arith.truncf %240 : vector<16x16xf32> to vector<16x16xbf16>
    %cst_62 = arith.constant dense<0.000000e+00> : vector<3x16xf32>
    %243 = tpu.matmul %241, %242, %cst_62 {dimension_numbers = #tpu.dot_dimension_numbers<[1], [0], [0], [1], [0, 0, 1, 1], [], []>} : vector<3x16xbf16>, vector<16x16xbf16>, vector<3x16xf32> -> vector<3x16xf32>
    %244 = arith.truncf %239 : vector<3x3xf32> to vector<3x3xbf16>
    %245 = arith.truncf %243 : vector<3x16xf32> to vector<3x16xbf16>
    %cst_63 = arith.constant dense<0.000000e+00> : vector<3x16xf32>
    %246 = tpu.matmul %244, %245, %cst_63 {dimension_numbers = #tpu.dot_dimension_numbers<[1], [0], [0], [1], [0, 0, 1, 1], [], []>} : vector<3x3xbf16>, vector<3x16xbf16>, vector<3x16xf32> -> vector<3x16xf32>
    %c0_64 = arith.constant 0 : index
    %c0_65 = arith.constant 0 : index
    %247 = vector.load %arg7[%c0_64, %c0_65] : memref<1x16xf32, #tpu.memory_space<vmem>>, vector<1x16xf32>
    %248 = vector.broadcast %247 : vector<1x16xf32> to vector<3x16xf32>
    %249 = arith.addf %246, %248 : vector<3x16xf32>
    %cst_66 = arith.constant 0.000000e+00 : f32
    %250 = vector.broadcast %cst_66 : f32 to vector<3x16xf32>
    %251 = arith.maximumf %249, %250 : vector<3x16xf32>
    %252 = arith.truncf %200 : vector<6x3xf32> to vector<6x3xbf16>
    %253 = arith.truncf %251 : vector<3x16xf32> to vector<3x16xbf16>
    %cst_67 = arith.constant dense<0.000000e+00> : vector<6x16xf32>
    %254 = tpu.matmul %252, %253, %cst_67 {dimension_numbers = #tpu.dot_dimension_numbers<[1], [0], [0], [1], [0, 0, 1, 1], [], []>} : vector<6x3xbf16>, vector<3x16xbf16>, vector<6x16xf32> -> vector<6x16xf32>
    %255 = arith.addf %146, %254 : vector<6x16xf32>
    %c0_68 = arith.constant 0 : index
    %c0_69 = arith.constant 0 : index
    %256 = vector.load %arg10[%c0_68, %c0_69] : memref<16x16xf32, #tpu.memory_space<vmem>>, vector<16x16xf32>
    %257 = arith.truncf %255 : vector<6x16xf32> to vector<6x16xbf16>
    %258 = arith.truncf %256 : vector<16x16xf32> to vector<16x16xbf16>
    %cst_70 = arith.constant dense<0.000000e+00> : vector<6x16xf32>
    %259 = tpu.matmul %257, %258, %cst_70 {dimension_numbers = #tpu.dot_dimension_numbers<[1], [0], [0], [1], [0, 0, 1, 1], [], []>} : vector<6x16xbf16>, vector<16x16xbf16>, vector<6x16xf32> -> vector<6x16xf32>
    %260 = arith.truncf %134 : vector<6x6xf32> to vector<6x6xbf16>
    %261 = arith.truncf %259 : vector<6x16xf32> to vector<6x16xbf16>
    %cst_71 = arith.constant dense<0.000000e+00> : vector<6x16xf32>
    %262 = tpu.matmul %260, %261, %cst_71 {dimension_numbers = #tpu.dot_dimension_numbers<[1], [0], [0], [1], [0, 0, 1, 1], [], []>} : vector<6x6xbf16>, vector<6x16xbf16>, vector<6x16xf32> -> vector<6x16xf32>
    %c0_72 = arith.constant 0 : index
    %c0_73 = arith.constant 0 : index
    %263 = vector.load %arg12[%c0_72, %c0_73] : memref<1x16xf32, #tpu.memory_space<vmem>>, vector<1x16xf32>
    %264 = vector.broadcast %263 : vector<1x16xf32> to vector<6x16xf32>
    %265 = arith.addf %262, %264 : vector<6x16xf32>
    %cst_74 = arith.constant 0.000000e+00 : f32
    %266 = vector.broadcast %cst_74 : f32 to vector<6x16xf32>
    %267 = arith.maximumf %265, %266 : vector<6x16xf32>
    %268 = arith.truncf %95 : vector<12x6xf32> to vector<12x6xbf16>
    %269 = arith.truncf %267 : vector<6x16xf32> to vector<6x16xbf16>
    %cst_75 = arith.constant dense<0.000000e+00> : vector<12x16xf32>
    %270 = tpu.matmul %268, %269, %cst_75 {dimension_numbers = #tpu.dot_dimension_numbers<[1], [0], [0], [1], [0, 0, 1, 1], [], []>} : vector<12x6xbf16>, vector<6x16xbf16>, vector<12x16xf32> -> vector<12x16xf32>
    %271 = arith.addf %41, %270 : vector<12x16xf32>
    %c0_76 = arith.constant 0 : index
    %c0_77 = arith.constant 0 : index
    %272 = vector.load %arg11[%c0_76, %c0_77] : memref<16x16xf32, #tpu.memory_space<vmem>>, vector<16x16xf32>
    %273 = arith.truncf %271 : vector<12x16xf32> to vector<12x16xbf16>
    %274 = arith.truncf %272 : vector<16x16xf32> to vector<16x16xbf16>
    %cst_78 = arith.constant dense<0.000000e+00> : vector<12x16xf32>
    %275 = tpu.matmul %273, %274, %cst_78 {dimension_numbers = #tpu.dot_dimension_numbers<[1], [0], [0], [1], [0, 0, 1, 1], [], []>} : vector<12x16xbf16>, vector<16x16xbf16>, vector<12x16xf32> -> vector<12x16xf32>
    %276 = arith.truncf %29 : vector<12x12xf32> to vector<12x12xbf16>
    %277 = arith.truncf %275 : vector<12x16xf32> to vector<12x16xbf16>
    %cst_79 = arith.constant dense<0.000000e+00> : vector<12x16xf32>
    %278 = tpu.matmul %276, %277, %cst_79 {dimension_numbers = #tpu.dot_dimension_numbers<[1], [0], [0], [1], [0, 0, 1, 1], [], []>} : vector<12x12xbf16>, vector<12x16xbf16>, vector<12x16xf32> -> vector<12x16xf32>
    %c0_80 = arith.constant 0 : index
    %c0_81 = arith.constant 0 : index
    %279 = vector.load %arg13[%c0_80, %c0_81] : memref<1x16xf32, #tpu.memory_space<vmem>>, vector<1x16xf32>
    %280 = vector.broadcast %279 : vector<1x16xf32> to vector<12x16xf32>
    %281 = arith.addf %278, %280 : vector<12x16xf32>
    %cst_82 = arith.constant 1.000000e+00 : f32
    %282 = vector.broadcast %cst_82 : f32 to vector<12x12xf32>
    %283 = arith.mulf %282, %6 : vector<12x12xf32>
    %284 = arith.addf %1, %283 : vector<12x12xf32>
    %cst_83 = arith.constant dense<0.000000e+00> : vector<12xf32>
    %285 = vector.multi_reduction <add>, %284, %cst_83 [0] : vector<12x12xf32> to vector<12xf32>
    %286 = vector.shape_cast %285 : vector<12xf32> to vector<1x12xf32>
    %cst_84 = arith.constant 1.000000e+00 : f32
    %287 = vector.broadcast %cst_84 : f32 to vector<12x1xf32>
    %288 = arith.truncf %284 : vector<12x12xf32> to vector<12x12xbf16>
    %289 = arith.truncf %287 : vector<12x1xf32> to vector<12x1xbf16>
    %cst_85 = arith.constant dense<0.000000e+00> : vector<12x1xf32>
    %290 = tpu.matmul %288, %289, %cst_85 {dimension_numbers = #tpu.dot_dimension_numbers<[1], [0], [0], [1], [0, 0, 1, 1], [], []>} : vector<12x12xbf16>, vector<12x1xbf16>, vector<12x1xf32> -> vector<12x1xf32>
    %cst_86 = arith.constant 0.000000e+00 : f32
    %291 = vector.broadcast %cst_86 : f32 to vector<1x12xf32>
    %292 = arith.cmpf ogt, %286, %291 : vector<1x12xf32>
    %293 = math.rsqrt %286 : vector<1x12xf32>
    %cst_87 = arith.constant 0.000000e+00 : f32
    %294 = vector.broadcast %cst_87 : f32 to vector<1x12xf32>
    %295 = arith.select %292, %293, %294 : vector<1x12xi1>, vector<1x12xf32>
    %cst_88 = arith.constant 0.000000e+00 : f32
    %296 = vector.broadcast %cst_88 : f32 to vector<12x1xf32>
    %297 = arith.cmpf ogt, %290, %296 : vector<12x1xf32>
    %298 = math.rsqrt %290 : vector<12x1xf32>
    %cst_89 = arith.constant 0.000000e+00 : f32
    %299 = vector.broadcast %cst_89 : f32 to vector<12x1xf32>
    %300 = arith.select %297, %298, %299 : vector<12x1xi1>, vector<12x1xf32>
    %301 = vector.broadcast %300 : vector<12x1xf32> to vector<12x12xf32>
    %302 = arith.mulf %301, %284 : vector<12x12xf32>
    %303 = vector.broadcast %295 : vector<1x12xf32> to vector<12x12xf32>
    %304 = arith.mulf %302, %303 : vector<12x12xf32>
    %c0_90 = arith.constant 0 : index
    %c0_91 = arith.constant 0 : index
    %305 = vector.load %arg14[%c0_90, %c0_91] : memref<16x16xf32, #tpu.memory_space<vmem>>, vector<16x16xf32>
    %306 = arith.truncf %281 : vector<12x16xf32> to vector<12x16xbf16>
    %307 = arith.truncf %305 : vector<16x16xf32> to vector<16x16xbf16>
    %cst_92 = arith.constant dense<0.000000e+00> : vector<12x16xf32>
    %308 = tpu.matmul %306, %307, %cst_92 {dimension_numbers = #tpu.dot_dimension_numbers<[1], [0], [0], [1], [0, 0, 1, 1], [], []>} : vector<12x16xbf16>, vector<16x16xbf16>, vector<12x16xf32> -> vector<12x16xf32>
    %c0_93 = arith.constant 0 : index
    %c0_94 = arith.constant 0 : index
    %309 = vector.load %arg15[%c0_93, %c0_94] : memref<1x16xf32, #tpu.memory_space<vmem>>, vector<1x16xf32>
    %310 = vector.broadcast %309 : vector<1x16xf32> to vector<12x16xf32>
    %311 = arith.addf %308, %310 : vector<12x16xf32>
    %c0_95 = arith.constant 0 : index
    %c0_96 = arith.constant 0 : index
    %312 = vector.load %arg16[%c0_95, %c0_96] : memref<75x16xf32, #tpu.memory_space<vmem>>, vector<75x16xf32>
    %c0_97 = arith.constant 0 : index
    %c0_98 = arith.constant 0 : index
    %313 = vector.load %arg17[%c0_97, %c0_98] : memref<16x16xf32, #tpu.memory_space<vmem>>, vector<16x16xf32>
    %314 = arith.truncf %312 : vector<75x16xf32> to vector<75x16xbf16>
    %315 = arith.truncf %313 : vector<16x16xf32> to vector<16x16xbf16>
    %cst_99 = arith.constant dense<0.000000e+00> : vector<75x16xf32>
    %316 = tpu.matmul %314, %315, %cst_99 {dimension_numbers = #tpu.dot_dimension_numbers<[1], [0], [0], [1], [0, 0, 1, 1], [], []>} : vector<75x16xbf16>, vector<16x16xbf16>, vector<75x16xf32> -> vector<75x16xf32>
    %c0_100 = arith.constant 0 : index
    %c0_101 = arith.constant 0 : index
    %317 = vector.load %arg18[%c0_100, %c0_101] : memref<1x16xf32, #tpu.memory_space<vmem>>, vector<1x16xf32>
    %318 = vector.broadcast %317 : vector<1x16xf32> to vector<75x16xf32>
    %319 = arith.addf %316, %318 : vector<75x16xf32>
    %c0_102 = arith.constant 0 : index
    %c0_103 = arith.constant 0 : index
    %320 = vector.load %arg19[%c0_102, %c0_103] : memref<16x16xf32, #tpu.memory_space<vmem>>, vector<16x16xf32>
    %321 = arith.truncf %311 : vector<12x16xf32> to vector<12x16xbf16>
    %322 = arith.truncf %320 : vector<16x16xf32> to vector<16x16xbf16>
    %cst_104 = arith.constant dense<0.000000e+00> : vector<12x16xf32>
    %323 = tpu.matmul %321, %322, %cst_104 {dimension_numbers = #tpu.dot_dimension_numbers<[1], [0], [0], [1], [0, 0, 1, 1], [], []>} : vector<12x16xbf16>, vector<16x16xbf16>, vector<12x16xf32> -> vector<12x16xf32>
    %324 = arith.truncf %304 : vector<12x12xf32> to vector<12x12xbf16>
    %325 = arith.truncf %323 : vector<12x16xf32> to vector<12x16xbf16>
    %cst_105 = arith.constant dense<0.000000e+00> : vector<12x16xf32>
    %326 = tpu.matmul %324, %325, %cst_105 {dimension_numbers = #tpu.dot_dimension_numbers<[1], [0], [0], [1], [0, 0, 1, 1], [], []>} : vector<12x12xbf16>, vector<12x16xbf16>, vector<12x16xf32> -> vector<12x16xf32>
    %c0_106 = arith.constant 0 : index
    %c0_107 = arith.constant 0 : index
    %327 = vector.load %arg20[%c0_106, %c0_107] : memref<1x16xf32, #tpu.memory_space<vmem>>, vector<1x16xf32>
    %328 = vector.broadcast %327 : vector<1x16xf32> to vector<12x16xf32>
    %329 = arith.addf %326, %328 : vector<12x16xf32>
    %c0_108 = arith.constant 0 : index
    %c0_109 = arith.constant 0 : index
    %330 = vector.load %arg21[%c0_108, %c0_109] : memref<16x16xf32, #tpu.memory_space<vmem>>, vector<16x16xf32>
    %331 = arith.truncf %311 : vector<12x16xf32> to vector<12x16xbf16>
    %332 = arith.truncf %330 : vector<16x16xf32> to vector<16x16xbf16>
    %cst_110 = arith.constant dense<0.000000e+00> : vector<12x16xf32>
    %333 = tpu.matmul %331, %332, %cst_110 {dimension_numbers = #tpu.dot_dimension_numbers<[1], [0], [0], [1], [0, 0, 1, 1], [], []>} : vector<12x16xbf16>, vector<16x16xbf16>, vector<12x16xf32> -> vector<12x16xf32>
    %334 = arith.truncf %304 : vector<12x12xf32> to vector<12x12xbf16>
    %335 = arith.truncf %333 : vector<12x16xf32> to vector<12x16xbf16>
    %cst_111 = arith.constant dense<0.000000e+00> : vector<12x16xf32>
    %336 = tpu.matmul %334, %335, %cst_111 {dimension_numbers = #tpu.dot_dimension_numbers<[1], [0], [0], [1], [0, 0, 1, 1], [], []>} : vector<12x12xbf16>, vector<12x16xbf16>, vector<12x16xf32> -> vector<12x16xf32>
    %c0_112 = arith.constant 0 : index
    %c0_113 = arith.constant 0 : index
    %337 = vector.load %arg22[%c0_112, %c0_113] : memref<1x16xf32, #tpu.memory_space<vmem>>, vector<1x16xf32>
    %338 = vector.broadcast %337 : vector<1x16xf32> to vector<12x16xf32>
    %339 = arith.addf %336, %338 : vector<12x16xf32>
    %340 = tpu.iota {dimensions = array<i32: 0>} : vector<48x12xi32>
    %341 = tpu.iota {dimensions = array<i32: 1>} : vector<48x12xi32>
    %342 = tpu.iota {dimensions = array<i32: 0>} : vector<48x16xi32>
    %343 = tpu.iota {dimensions = array<i32: 1>} : vector<48x16xi32>
    %c0_i32 = arith.constant 0 : i32
    %344 = vector.broadcast %c0_i32 : i32 to vector<48x12xi32>
    %345 = arith.addi %341, %344 : vector<48x12xi32>
    %346 = arith.cmpi eq, %340, %345 : vector<48x12xi32>
    %c0_i32_114 = arith.constant 0 : i32
    %347 = vector.broadcast %c0_i32_114 : i32 to vector<48x16xi32>
    %348 = arith.cmpi sge, %342, %347 : vector<48x16xi32>
    %c12_i32 = arith.constant 12 : i32
    %349 = vector.broadcast %c12_i32 : i32 to vector<48x16xi32>
    %350 = arith.cmpi slt, %342, %349 : vector<48x16xi32>
    %351 = arith.andi %348, %350 : vector<48x16xi1>
    %c0_i32_115 = arith.constant 0 : i32
    %352 = vector.broadcast %c0_i32_115 : i32 to vector<48x16xi32>
    %353 = arith.cmpi sge, %343, %352 : vector<48x16xi32>
    %354 = arith.andi %351, %353 : vector<48x16xi1>
    %c4_i32 = arith.constant 4 : i32
    %355 = vector.broadcast %c4_i32 : i32 to vector<48x16xi32>
    %356 = arith.cmpi slt, %343, %355 : vector<48x16xi32>
    %357 = arith.andi %354, %356 : vector<48x16xi1>
    %c12_i32_116 = arith.constant 12 : i32
    %358 = vector.broadcast %c12_i32_116 : i32 to vector<48x12xi32>
    %359 = arith.addi %341, %358 : vector<48x12xi32>
    %360 = arith.cmpi eq, %340, %359 : vector<48x12xi32>
    %c12_i32_117 = arith.constant 12 : i32
    %361 = vector.broadcast %c12_i32_117 : i32 to vector<48x16xi32>
    %362 = arith.cmpi sge, %342, %361 : vector<48x16xi32>
    %c24_i32 = arith.constant 24 : i32
    %363 = vector.broadcast %c24_i32 : i32 to vector<48x16xi32>
    %364 = arith.cmpi slt, %342, %363 : vector<48x16xi32>
    %365 = arith.andi %362, %364 : vector<48x16xi1>
    %c4_i32_118 = arith.constant 4 : i32
    %366 = vector.broadcast %c4_i32_118 : i32 to vector<48x16xi32>
    %367 = arith.cmpi sge, %343, %366 : vector<48x16xi32>
    %368 = arith.andi %365, %367 : vector<48x16xi1>
    %c8_i32 = arith.constant 8 : i32
    %369 = vector.broadcast %c8_i32 : i32 to vector<48x16xi32>
    %370 = arith.cmpi slt, %343, %369 : vector<48x16xi32>
    %371 = arith.andi %368, %370 : vector<48x16xi1>
    %372 = arith.ori %346, %360 : vector<48x12xi1>
    %373 = arith.ori %357, %371 : vector<48x16xi1>
    %c24_i32_119 = arith.constant 24 : i32
    %374 = vector.broadcast %c24_i32_119 : i32 to vector<48x12xi32>
    %375 = arith.addi %341, %374 : vector<48x12xi32>
    %376 = arith.cmpi eq, %340, %375 : vector<48x12xi32>
    %c24_i32_120 = arith.constant 24 : i32
    %377 = vector.broadcast %c24_i32_120 : i32 to vector<48x16xi32>
    %378 = arith.cmpi sge, %342, %377 : vector<48x16xi32>
    %c36_i32 = arith.constant 36 : i32
    %379 = vector.broadcast %c36_i32 : i32 to vector<48x16xi32>
    %380 = arith.cmpi slt, %342, %379 : vector<48x16xi32>
    %381 = arith.andi %378, %380 : vector<48x16xi1>
    %c8_i32_121 = arith.constant 8 : i32
    %382 = vector.broadcast %c8_i32_121 : i32 to vector<48x16xi32>
    %383 = arith.cmpi sge, %343, %382 : vector<48x16xi32>
    %384 = arith.andi %381, %383 : vector<48x16xi1>
    %c12_i32_122 = arith.constant 12 : i32
    %385 = vector.broadcast %c12_i32_122 : i32 to vector<48x16xi32>
    %386 = arith.cmpi slt, %343, %385 : vector<48x16xi32>
    %387 = arith.andi %384, %386 : vector<48x16xi1>
    %388 = arith.ori %372, %376 : vector<48x12xi1>
    %389 = arith.ori %373, %387 : vector<48x16xi1>
    %c36_i32_123 = arith.constant 36 : i32
    %390 = vector.broadcast %c36_i32_123 : i32 to vector<48x12xi32>
    %391 = arith.addi %341, %390 : vector<48x12xi32>
    %392 = arith.cmpi eq, %340, %391 : vector<48x12xi32>
    %c36_i32_124 = arith.constant 36 : i32
    %393 = vector.broadcast %c36_i32_124 : i32 to vector<48x16xi32>
    %394 = arith.cmpi sge, %342, %393 : vector<48x16xi32>
    %c48_i32 = arith.constant 48 : i32
    %395 = vector.broadcast %c48_i32 : i32 to vector<48x16xi32>
    %396 = arith.cmpi slt, %342, %395 : vector<48x16xi32>
    %397 = arith.andi %394, %396 : vector<48x16xi1>
    %c12_i32_125 = arith.constant 12 : i32
    %398 = vector.broadcast %c12_i32_125 : i32 to vector<48x16xi32>
    %399 = arith.cmpi sge, %343, %398 : vector<48x16xi32>
    %400 = arith.andi %397, %399 : vector<48x16xi1>
    %c16_i32 = arith.constant 16 : i32
    %401 = vector.broadcast %c16_i32 : i32 to vector<48x16xi32>
    %402 = arith.cmpi slt, %343, %401 : vector<48x16xi32>
    %403 = arith.andi %400, %402 : vector<48x16xi1>
    %404 = arith.ori %388, %392 : vector<48x12xi1>
    %405 = arith.ori %389, %403 : vector<48x16xi1>
    %406 = arith.extui %404 : vector<48x12xi1> to vector<48x12xi32>
    %407 = arith.sitofp %406 : vector<48x12xi32> to vector<48x12xf32>
    %408 = arith.extui %405 : vector<48x16xi1> to vector<48x16xi32>
    %409 = arith.sitofp %408 : vector<48x16xi32> to vector<48x16xf32>
    %410 = arith.truncf %407 : vector<48x12xf32> to vector<48x12xbf16>
    %411 = arith.truncf %329 : vector<12x16xf32> to vector<12x16xbf16>
    %cst_126 = arith.constant dense<0.000000e+00> : vector<48x16xf32>
    %412 = tpu.matmul %410, %411, %cst_126 {dimension_numbers = #tpu.dot_dimension_numbers<[1], [0], [0], [1], [0, 0, 1, 1], [], []>} : vector<48x12xbf16>, vector<12x16xbf16>, vector<48x16xf32> -> vector<48x16xf32>
    %413 = arith.mulf %412, %409 : vector<48x16xf32>
    %414 = arith.truncf %407 : vector<48x12xf32> to vector<48x12xbf16>
    %415 = arith.truncf %339 : vector<12x16xf32> to vector<12x16xbf16>
    %cst_127 = arith.constant dense<0.000000e+00> : vector<48x16xf32>
    %416 = tpu.matmul %414, %415, %cst_127 {dimension_numbers = #tpu.dot_dimension_numbers<[1], [0], [0], [1], [0, 0, 1, 1], [], []>} : vector<48x12xbf16>, vector<12x16xbf16>, vector<48x16xf32> -> vector<48x16xf32>
    %417 = arith.mulf %416, %409 : vector<48x16xf32>
    %418 = arith.truncf %319 : vector<75x16xf32> to vector<75x16xbf16>
    %419 = arith.truncf %413 : vector<48x16xf32> to vector<48x16xbf16>
    %cst_128 = arith.constant dense<0.000000e+00> : vector<75x48xf32>
    %420 = tpu.matmul %418, %419, %cst_128 {dimension_numbers = #tpu.dot_dimension_numbers<[1], [1], [0], [0], [0, 0, 1, 0], [], []>} : vector<75x16xbf16>, vector<48x16xbf16>, vector<75x48xf32> -> vector<75x48xf32>
    %cst_129 = arith.constant 2.500000e-01 : f32
    %421 = vector.broadcast %cst_129 : f32 to vector<75x48xf32>
    %422 = arith.mulf %420, %421 : vector<75x48xf32>
    %cst_130 = arith.constant dense<0xFF800000> : vector<48xf32>
    %423 = vector.multi_reduction <maximumf>, %422, %cst_130 [0] : vector<75x48xf32> to vector<48xf32>
    %424 = vector.shape_cast %423 : vector<48xf32> to vector<1x48xf32>
    %425 = vector.broadcast %424 : vector<1x48xf32> to vector<75x48xf32>
    %426 = arith.subf %422, %425 : vector<75x48xf32>
    %427 = math.exp %426 : vector<75x48xf32>
    %cst_131 = arith.constant dense<0.000000e+00> : vector<48xf32>
    %428 = vector.multi_reduction <add>, %427, %cst_131 [0] : vector<75x48xf32> to vector<48xf32>
    %429 = vector.shape_cast %428 : vector<48xf32> to vector<1x48xf32>
    %430 = tpu.reciprocal %429 {approx = true} : vector<1x48xf32> -> vector<1x48xf32>
    %431 = vector.broadcast %430 : vector<1x48xf32> to vector<75x48xf32>
    %432 = arith.mulf %427, %431 : vector<75x48xf32>
    %433 = arith.truncf %432 : vector<75x48xf32> to vector<75x48xbf16>
    %434 = arith.truncf %417 : vector<48x16xf32> to vector<48x16xbf16>
    %cst_132 = arith.constant dense<0.000000e+00> : vector<75x16xf32>
    %435 = tpu.matmul %433, %434, %cst_132 {dimension_numbers = #tpu.dot_dimension_numbers<[1], [0], [0], [1], [0, 0, 1, 1], [], []>} : vector<75x48xbf16>, vector<48x16xbf16>, vector<75x16xf32> -> vector<75x16xf32>
    %436 = arith.addf %319, %435 : vector<75x16xf32>
    %c0_133 = arith.constant 0 : index
    %c0_134 = arith.constant 0 : index
    %437 = vector.load %arg23[%c0_133, %c0_134] : memref<16x16xf32, #tpu.memory_space<vmem>>, vector<16x16xf32>
    %438 = arith.truncf %436 : vector<75x16xf32> to vector<75x16xbf16>
    %439 = arith.truncf %437 : vector<16x16xf32> to vector<16x16xbf16>
    %cst_135 = arith.constant dense<0.000000e+00> : vector<75x16xf32>
    %440 = tpu.matmul %438, %439, %cst_135 {dimension_numbers = #tpu.dot_dimension_numbers<[1], [0], [0], [1], [0, 0, 1, 1], [], []>} : vector<75x16xbf16>, vector<16x16xbf16>, vector<75x16xf32> -> vector<75x16xf32>
    %c0_136 = arith.constant 0 : index
    %c0_137 = arith.constant 0 : index
    %441 = vector.load %arg24[%c0_136, %c0_137] : memref<1x16xf32, #tpu.memory_space<vmem>>, vector<1x16xf32>
    %442 = vector.broadcast %441 : vector<1x16xf32> to vector<75x16xf32>
    %443 = arith.addf %440, %442 : vector<75x16xf32>
    %cst_138 = arith.constant 0.000000e+00 : f32
    %444 = vector.broadcast %cst_138 : f32 to vector<75x16xf32>
    %445 = arith.maximumf %443, %444 : vector<75x16xf32>
    %446 = arith.addf %436, %445 : vector<75x16xf32>
    %c0_139 = arith.constant 0 : index
    %c0_140 = arith.constant 0 : index
    %447 = vector.load %arg25[%c0_139, %c0_140] : memref<16x16xf32, #tpu.memory_space<vmem>>, vector<16x16xf32>
    %448 = arith.truncf %446 : vector<75x16xf32> to vector<75x16xbf16>
    %449 = arith.truncf %447 : vector<16x16xf32> to vector<16x16xbf16>
    %cst_141 = arith.constant dense<0.000000e+00> : vector<75x16xf32>
    %450 = tpu.matmul %448, %449, %cst_141 {dimension_numbers = #tpu.dot_dimension_numbers<[1], [0], [0], [1], [0, 0, 1, 1], [], []>} : vector<75x16xbf16>, vector<16x16xbf16>, vector<75x16xf32> -> vector<75x16xf32>
    %c0_142 = arith.constant 0 : index
    %c0_143 = arith.constant 0 : index
    %451 = vector.load %arg26[%c0_142, %c0_143] : memref<1x16xf32, #tpu.memory_space<vmem>>, vector<1x16xf32>
    %452 = vector.broadcast %451 : vector<1x16xf32> to vector<75x16xf32>
    %453 = arith.addf %450, %452 : vector<75x16xf32>
    %c0_144 = arith.constant 0 : index
    %c0_145 = arith.constant 0 : index
    %454 = vector.load %arg27[%c0_144, %c0_145] : memref<16x16xf32, #tpu.memory_space<vmem>>, vector<16x16xf32>
    %455 = arith.truncf %446 : vector<75x16xf32> to vector<75x16xbf16>
    %456 = arith.truncf %454 : vector<16x16xf32> to vector<16x16xbf16>
    %cst_146 = arith.constant dense<0.000000e+00> : vector<75x16xf32>
    %457 = tpu.matmul %455, %456, %cst_146 {dimension_numbers = #tpu.dot_dimension_numbers<[1], [0], [0], [1], [0, 0, 1, 1], [], []>} : vector<75x16xbf16>, vector<16x16xbf16>, vector<75x16xf32> -> vector<75x16xf32>
    %c0_147 = arith.constant 0 : index
    %c0_148 = arith.constant 0 : index
    %458 = vector.load %arg28[%c0_147, %c0_148] : memref<1x16xf32, #tpu.memory_space<vmem>>, vector<1x16xf32>
    %459 = vector.broadcast %458 : vector<1x16xf32> to vector<75x16xf32>
    %460 = arith.addf %457, %459 : vector<75x16xf32>
    %c0_149 = arith.constant 0 : index
    %c0_150 = arith.constant 0 : index
    %461 = vector.load %arg29[%c0_149, %c0_150] : memref<16x16xf32, #tpu.memory_space<vmem>>, vector<16x16xf32>
    %462 = arith.truncf %446 : vector<75x16xf32> to vector<75x16xbf16>
    %463 = arith.truncf %461 : vector<16x16xf32> to vector<16x16xbf16>
    %cst_151 = arith.constant dense<0.000000e+00> : vector<75x16xf32>
    %464 = tpu.matmul %462, %463, %cst_151 {dimension_numbers = #tpu.dot_dimension_numbers<[1], [0], [0], [1], [0, 0, 1, 1], [], []>} : vector<75x16xbf16>, vector<16x16xbf16>, vector<75x16xf32> -> vector<75x16xf32>
    %c0_152 = arith.constant 0 : index
    %c0_153 = arith.constant 0 : index
    %465 = vector.load %arg30[%c0_152, %c0_153] : memref<1x16xf32, #tpu.memory_space<vmem>>, vector<1x16xf32>
    %466 = vector.broadcast %465 : vector<1x16xf32> to vector<75x16xf32>
    %467 = arith.addf %464, %466 : vector<75x16xf32>
    %468 = tpu.iota {dimensions = array<i32: 0>} : vector<300x75xi32>
    %469 = tpu.iota {dimensions = array<i32: 1>} : vector<300x75xi32>
    %470 = tpu.iota {dimensions = array<i32: 0>} : vector<300x16xi32>
    %471 = tpu.iota {dimensions = array<i32: 1>} : vector<300x16xi32>
    %c0_i32_154 = arith.constant 0 : i32
    %472 = vector.broadcast %c0_i32_154 : i32 to vector<300x75xi32>
    %473 = arith.addi %469, %472 : vector<300x75xi32>
    %474 = arith.cmpi eq, %468, %473 : vector<300x75xi32>
    %c0_i32_155 = arith.constant 0 : i32
    %475 = vector.broadcast %c0_i32_155 : i32 to vector<300x16xi32>
    %476 = arith.cmpi sge, %470, %475 : vector<300x16xi32>
    %c75_i32 = arith.constant 75 : i32
    %477 = vector.broadcast %c75_i32 : i32 to vector<300x16xi32>
    %478 = arith.cmpi slt, %470, %477 : vector<300x16xi32>
    %479 = arith.andi %476, %478 : vector<300x16xi1>
    %c0_i32_156 = arith.constant 0 : i32
    %480 = vector.broadcast %c0_i32_156 : i32 to vector<300x16xi32>
    %481 = arith.cmpi sge, %471, %480 : vector<300x16xi32>
    %482 = arith.andi %479, %481 : vector<300x16xi1>
    %c4_i32_157 = arith.constant 4 : i32
    %483 = vector.broadcast %c4_i32_157 : i32 to vector<300x16xi32>
    %484 = arith.cmpi slt, %471, %483 : vector<300x16xi32>
    %485 = arith.andi %482, %484 : vector<300x16xi1>
    %c75_i32_158 = arith.constant 75 : i32
    %486 = vector.broadcast %c75_i32_158 : i32 to vector<300x75xi32>
    %487 = arith.addi %469, %486 : vector<300x75xi32>
    %488 = arith.cmpi eq, %468, %487 : vector<300x75xi32>
    %c75_i32_159 = arith.constant 75 : i32
    %489 = vector.broadcast %c75_i32_159 : i32 to vector<300x16xi32>
    %490 = arith.cmpi sge, %470, %489 : vector<300x16xi32>
    %c150_i32 = arith.constant 150 : i32
    %491 = vector.broadcast %c150_i32 : i32 to vector<300x16xi32>
    %492 = arith.cmpi slt, %470, %491 : vector<300x16xi32>
    %493 = arith.andi %490, %492 : vector<300x16xi1>
    %c4_i32_160 = arith.constant 4 : i32
    %494 = vector.broadcast %c4_i32_160 : i32 to vector<300x16xi32>
    %495 = arith.cmpi sge, %471, %494 : vector<300x16xi32>
    %496 = arith.andi %493, %495 : vector<300x16xi1>
    %c8_i32_161 = arith.constant 8 : i32
    %497 = vector.broadcast %c8_i32_161 : i32 to vector<300x16xi32>
    %498 = arith.cmpi slt, %471, %497 : vector<300x16xi32>
    %499 = arith.andi %496, %498 : vector<300x16xi1>
    %500 = arith.ori %474, %488 : vector<300x75xi1>
    %501 = arith.ori %485, %499 : vector<300x16xi1>
    %c150_i32_162 = arith.constant 150 : i32
    %502 = vector.broadcast %c150_i32_162 : i32 to vector<300x75xi32>
    %503 = arith.addi %469, %502 : vector<300x75xi32>
    %504 = arith.cmpi eq, %468, %503 : vector<300x75xi32>
    %c150_i32_163 = arith.constant 150 : i32
    %505 = vector.broadcast %c150_i32_163 : i32 to vector<300x16xi32>
    %506 = arith.cmpi sge, %470, %505 : vector<300x16xi32>
    %c225_i32 = arith.constant 225 : i32
    %507 = vector.broadcast %c225_i32 : i32 to vector<300x16xi32>
    %508 = arith.cmpi slt, %470, %507 : vector<300x16xi32>
    %509 = arith.andi %506, %508 : vector<300x16xi1>
    %c8_i32_164 = arith.constant 8 : i32
    %510 = vector.broadcast %c8_i32_164 : i32 to vector<300x16xi32>
    %511 = arith.cmpi sge, %471, %510 : vector<300x16xi32>
    %512 = arith.andi %509, %511 : vector<300x16xi1>
    %c12_i32_165 = arith.constant 12 : i32
    %513 = vector.broadcast %c12_i32_165 : i32 to vector<300x16xi32>
    %514 = arith.cmpi slt, %471, %513 : vector<300x16xi32>
    %515 = arith.andi %512, %514 : vector<300x16xi1>
    %516 = arith.ori %500, %504 : vector<300x75xi1>
    %517 = arith.ori %501, %515 : vector<300x16xi1>
    %c225_i32_166 = arith.constant 225 : i32
    %518 = vector.broadcast %c225_i32_166 : i32 to vector<300x75xi32>
    %519 = arith.addi %469, %518 : vector<300x75xi32>
    %520 = arith.cmpi eq, %468, %519 : vector<300x75xi32>
    %c225_i32_167 = arith.constant 225 : i32
    %521 = vector.broadcast %c225_i32_167 : i32 to vector<300x16xi32>
    %522 = arith.cmpi sge, %470, %521 : vector<300x16xi32>
    %c300_i32 = arith.constant 300 : i32
    %523 = vector.broadcast %c300_i32 : i32 to vector<300x16xi32>
    %524 = arith.cmpi slt, %470, %523 : vector<300x16xi32>
    %525 = arith.andi %522, %524 : vector<300x16xi1>
    %c12_i32_168 = arith.constant 12 : i32
    %526 = vector.broadcast %c12_i32_168 : i32 to vector<300x16xi32>
    %527 = arith.cmpi sge, %471, %526 : vector<300x16xi32>
    %528 = arith.andi %525, %527 : vector<300x16xi1>
    %c16_i32_169 = arith.constant 16 : i32
    %529 = vector.broadcast %c16_i32_169 : i32 to vector<300x16xi32>
    %530 = arith.cmpi slt, %471, %529 : vector<300x16xi32>
    %531 = arith.andi %528, %530 : vector<300x16xi1>
    %532 = arith.ori %516, %520 : vector<300x75xi1>
    %533 = arith.ori %517, %531 : vector<300x16xi1>
    %534 = arith.extui %532 : vector<300x75xi1> to vector<300x75xi32>
    %535 = arith.sitofp %534 : vector<300x75xi32> to vector<300x75xf32>
    %536 = arith.extui %533 : vector<300x16xi1> to vector<300x16xi32>
    %537 = arith.sitofp %536 : vector<300x16xi32> to vector<300x16xf32>
    %538 = arith.truncf %535 : vector<300x75xf32> to vector<300x75xbf16>
    %539 = arith.truncf %460 : vector<75x16xf32> to vector<75x16xbf16>
    %cst_170 = arith.constant dense<0.000000e+00> : vector<300x16xf32>
    %540 = tpu.matmul %538, %539, %cst_170 {dimension_numbers = #tpu.dot_dimension_numbers<[1], [0], [0], [1], [0, 0, 1, 1], [], []>} : vector<300x75xbf16>, vector<75x16xbf16>, vector<300x16xf32> -> vector<300x16xf32>
    %541 = arith.mulf %540, %537 : vector<300x16xf32>
    %542 = arith.truncf %535 : vector<300x75xf32> to vector<300x75xbf16>
    %543 = arith.truncf %467 : vector<75x16xf32> to vector<75x16xbf16>
    %cst_171 = arith.constant dense<0.000000e+00> : vector<300x16xf32>
    %544 = tpu.matmul %542, %543, %cst_171 {dimension_numbers = #tpu.dot_dimension_numbers<[1], [0], [0], [1], [0, 0, 1, 1], [], []>} : vector<300x75xbf16>, vector<75x16xbf16>, vector<300x16xf32> -> vector<300x16xf32>
    %545 = arith.mulf %544, %537 : vector<300x16xf32>
    %546 = arith.truncf %453 : vector<75x16xf32> to vector<75x16xbf16>
    %547 = arith.truncf %541 : vector<300x16xf32> to vector<300x16xbf16>
    %cst_172 = arith.constant dense<0.000000e+00> : vector<75x300xf32>
    %548 = tpu.matmul %546, %547, %cst_172 {dimension_numbers = #tpu.dot_dimension_numbers<[1], [1], [0], [0], [0, 0, 1, 0], [], []>} : vector<75x16xbf16>, vector<300x16xbf16>, vector<75x300xf32> -> vector<75x300xf32>
    %cst_173 = arith.constant 2.500000e-01 : f32
    %549 = vector.broadcast %cst_173 : f32 to vector<75x300xf32>
    %550 = arith.mulf %548, %549 : vector<75x300xf32>
    %cst_174 = arith.constant dense<0xFF800000> : vector<300xf32>
    %551 = vector.multi_reduction <maximumf>, %550, %cst_174 [0] : vector<75x300xf32> to vector<300xf32>
    %552 = vector.shape_cast %551 : vector<300xf32> to vector<1x300xf32>
    %553 = vector.broadcast %552 : vector<1x300xf32> to vector<75x300xf32>
    %554 = arith.subf %550, %553 : vector<75x300xf32>
    %555 = math.exp %554 : vector<75x300xf32>
    %cst_175 = arith.constant dense<0.000000e+00> : vector<300xf32>
    %556 = vector.multi_reduction <add>, %555, %cst_175 [0] : vector<75x300xf32> to vector<300xf32>
    %557 = vector.shape_cast %556 : vector<300xf32> to vector<1x300xf32>
    %558 = tpu.reciprocal %557 {approx = true} : vector<1x300xf32> -> vector<1x300xf32>
    %559 = vector.broadcast %558 : vector<1x300xf32> to vector<75x300xf32>
    %560 = arith.mulf %555, %559 : vector<75x300xf32>
    %561 = arith.truncf %560 : vector<75x300xf32> to vector<75x300xbf16>
    %562 = arith.truncf %545 : vector<300x16xf32> to vector<300x16xbf16>
    %cst_176 = arith.constant dense<0.000000e+00> : vector<75x16xf32>
    %563 = tpu.matmul %561, %562, %cst_176 {dimension_numbers = #tpu.dot_dimension_numbers<[1], [0], [0], [1], [0, 0, 1, 1], [], []>} : vector<75x300xbf16>, vector<300x16xbf16>, vector<75x16xf32> -> vector<75x16xf32>
    %564 = arith.addf %453, %563 : vector<75x16xf32>
    %c0_177 = arith.constant 0 : index
    %c0_178 = arith.constant 0 : index
    %565 = vector.load %arg31[%c0_177, %c0_178] : memref<16x16xf32, #tpu.memory_space<vmem>>, vector<16x16xf32>
    %566 = arith.truncf %564 : vector<75x16xf32> to vector<75x16xbf16>
    %567 = arith.truncf %565 : vector<16x16xf32> to vector<16x16xbf16>
    %cst_179 = arith.constant dense<0.000000e+00> : vector<75x16xf32>
    %568 = tpu.matmul %566, %567, %cst_179 {dimension_numbers = #tpu.dot_dimension_numbers<[1], [0], [0], [1], [0, 0, 1, 1], [], []>} : vector<75x16xbf16>, vector<16x16xbf16>, vector<75x16xf32> -> vector<75x16xf32>
    %c0_180 = arith.constant 0 : index
    %c0_181 = arith.constant 0 : index
    %569 = vector.load %arg32[%c0_180, %c0_181] : memref<1x16xf32, #tpu.memory_space<vmem>>, vector<1x16xf32>
    %570 = vector.broadcast %569 : vector<1x16xf32> to vector<75x16xf32>
    %571 = arith.addf %568, %570 : vector<75x16xf32>
    %cst_182 = arith.constant 0.000000e+00 : f32
    %572 = vector.broadcast %cst_182 : f32 to vector<75x16xf32>
    %573 = arith.maximumf %571, %572 : vector<75x16xf32>
    %574 = arith.addf %564, %573 : vector<75x16xf32>
    %c0_183 = arith.constant 0 : index
    %c0_184 = arith.constant 0 : index
    %575 = vector.load %arg33[%c0_183, %c0_184] : memref<1x16xf32, #tpu.memory_space<vmem>>, vector<1x16xf32>
    %c0_185 = arith.constant 0 : index
    %c0_186 = arith.constant 0 : index
    %576 = vector.load %arg34[%c0_185, %c0_186] : memref<16x16xf32, #tpu.memory_space<vmem>>, vector<16x16xf32>
    %577 = arith.truncf %575 : vector<1x16xf32> to vector<1x16xbf16>
    %578 = arith.truncf %576 : vector<16x16xf32> to vector<16x16xbf16>
    %cst_187 = arith.constant dense<0.000000e+00> : vector<1x16xf32>
    %579 = tpu.matmul %577, %578, %cst_187 {dimension_numbers = #tpu.dot_dimension_numbers<[1], [0], [0], [1], [0, 0, 1, 1], [], []>} : vector<1x16xbf16>, vector<16x16xbf16>, vector<1x16xf32> -> vector<1x16xf32>
    %c0_188 = arith.constant 0 : index
    %c0_189 = arith.constant 0 : index
    %580 = vector.load %arg35[%c0_188, %c0_189] : memref<1x16xf32, #tpu.memory_space<vmem>>, vector<1x16xf32>
    %581 = arith.addf %579, %580 : vector<1x16xf32>
    %c0_190 = arith.constant 0 : index
    %c0_191 = arith.constant 0 : index
    %582 = vector.load %arg36[%c0_190, %c0_191] : memref<16x16xf32, #tpu.memory_space<vmem>>, vector<16x16xf32>
    %583 = arith.truncf %574 : vector<75x16xf32> to vector<75x16xbf16>
    %584 = arith.truncf %582 : vector<16x16xf32> to vector<16x16xbf16>
    %cst_192 = arith.constant dense<0.000000e+00> : vector<75x16xf32>
    %585 = tpu.matmul %583, %584, %cst_192 {dimension_numbers = #tpu.dot_dimension_numbers<[1], [0], [0], [1], [0, 0, 1, 1], [], []>} : vector<75x16xbf16>, vector<16x16xbf16>, vector<75x16xf32> -> vector<75x16xf32>
    %c0_193 = arith.constant 0 : index
    %c0_194 = arith.constant 0 : index
    %586 = vector.load %arg37[%c0_193, %c0_194] : memref<1x16xf32, #tpu.memory_space<vmem>>, vector<1x16xf32>
    %587 = vector.broadcast %586 : vector<1x16xf32> to vector<75x16xf32>
    %588 = arith.addf %585, %587 : vector<75x16xf32>
    %c0_195 = arith.constant 0 : index
    %c0_196 = arith.constant 0 : index
    %589 = vector.load %arg38[%c0_195, %c0_196] : memref<16x16xf32, #tpu.memory_space<vmem>>, vector<16x16xf32>
    %590 = arith.truncf %574 : vector<75x16xf32> to vector<75x16xbf16>
    %591 = arith.truncf %589 : vector<16x16xf32> to vector<16x16xbf16>
    %cst_197 = arith.constant dense<0.000000e+00> : vector<75x16xf32>
    %592 = tpu.matmul %590, %591, %cst_197 {dimension_numbers = #tpu.dot_dimension_numbers<[1], [0], [0], [1], [0, 0, 1, 1], [], []>} : vector<75x16xbf16>, vector<16x16xbf16>, vector<75x16xf32> -> vector<75x16xf32>
    %c0_198 = arith.constant 0 : index
    %c0_199 = arith.constant 0 : index
    %593 = vector.load %arg39[%c0_198, %c0_199] : memref<1x16xf32, #tpu.memory_space<vmem>>, vector<1x16xf32>
    %594 = vector.broadcast %593 : vector<1x16xf32> to vector<75x16xf32>
    %595 = arith.addf %592, %594 : vector<75x16xf32>
    %596 = arith.truncf %535 : vector<300x75xf32> to vector<300x75xbf16>
    %597 = arith.truncf %588 : vector<75x16xf32> to vector<75x16xbf16>
    %cst_200 = arith.constant dense<0.000000e+00> : vector<300x16xf32>
    %598 = tpu.matmul %596, %597, %cst_200 {dimension_numbers = #tpu.dot_dimension_numbers<[1], [0], [0], [1], [0, 0, 1, 1], [], []>} : vector<300x75xbf16>, vector<75x16xbf16>, vector<300x16xf32> -> vector<300x16xf32>
    %599 = arith.mulf %598, %537 : vector<300x16xf32>
    %600 = arith.truncf %535 : vector<300x75xf32> to vector<300x75xbf16>
    %601 = arith.truncf %595 : vector<75x16xf32> to vector<75x16xbf16>
    %cst_201 = arith.constant dense<0.000000e+00> : vector<300x16xf32>
    %602 = tpu.matmul %600, %601, %cst_201 {dimension_numbers = #tpu.dot_dimension_numbers<[1], [0], [0], [1], [0, 0, 1, 1], [], []>} : vector<300x75xbf16>, vector<75x16xbf16>, vector<300x16xf32> -> vector<300x16xf32>
    %603 = arith.mulf %602, %537 : vector<300x16xf32>
    %604 = arith.truncf %581 : vector<1x16xf32> to vector<1x16xbf16>
    %605 = arith.truncf %599 : vector<300x16xf32> to vector<300x16xbf16>
    %cst_202 = arith.constant dense<0.000000e+00> : vector<1x300xf32>
    %606 = tpu.matmul %604, %605, %cst_202 {dimension_numbers = #tpu.dot_dimension_numbers<[1], [1], [0], [0], [0, 0, 1, 0], [], []>} : vector<1x16xbf16>, vector<300x16xbf16>, vector<1x300xf32> -> vector<1x300xf32>
    %cst_203 = arith.constant 2.500000e-01 : f32
    %607 = vector.broadcast %cst_203 : f32 to vector<1x300xf32>
    %608 = arith.mulf %606, %607 : vector<1x300xf32>
    %cst_204 = arith.constant dense<0xFF800000> : vector<300xf32>
    %609 = vector.multi_reduction <maximumf>, %608, %cst_204 [0] : vector<1x300xf32> to vector<300xf32>
    %610 = vector.shape_cast %609 : vector<300xf32> to vector<1x300xf32>
    %611 = arith.subf %608, %610 : vector<1x300xf32>
    %612 = math.exp %611 : vector<1x300xf32>
    %cst_205 = arith.constant dense<0.000000e+00> : vector<300xf32>
    %613 = vector.multi_reduction <add>, %612, %cst_205 [0] : vector<1x300xf32> to vector<300xf32>
    %614 = vector.shape_cast %613 : vector<300xf32> to vector<1x300xf32>
    %615 = tpu.reciprocal %614 {approx = true} : vector<1x300xf32> -> vector<1x300xf32>
    %616 = arith.mulf %612, %615 : vector<1x300xf32>
    %617 = arith.truncf %616 : vector<1x300xf32> to vector<1x300xbf16>
    %618 = arith.truncf %603 : vector<300x16xf32> to vector<300x16xbf16>
    %cst_206 = arith.constant dense<0.000000e+00> : vector<1x16xf32>
    %619 = tpu.matmul %617, %618, %cst_206 {dimension_numbers = #tpu.dot_dimension_numbers<[1], [0], [0], [1], [0, 0, 1, 1], [], []>} : vector<1x300xbf16>, vector<300x16xbf16>, vector<1x16xf32> -> vector<1x16xf32>
    %620 = arith.addf %581, %619 : vector<1x16xf32>
    %c0_207 = arith.constant 0 : index
    %c0_208 = arith.constant 0 : index
    %621 = vector.load %arg40[%c0_207, %c0_208] : memref<16x16xf32, #tpu.memory_space<vmem>>, vector<16x16xf32>
    %622 = arith.truncf %620 : vector<1x16xf32> to vector<1x16xbf16>
    %623 = arith.truncf %621 : vector<16x16xf32> to vector<16x16xbf16>
    %cst_209 = arith.constant dense<0.000000e+00> : vector<1x16xf32>
    %624 = tpu.matmul %622, %623, %cst_209 {dimension_numbers = #tpu.dot_dimension_numbers<[1], [0], [0], [1], [0, 0, 1, 1], [], []>} : vector<1x16xbf16>, vector<16x16xbf16>, vector<1x16xf32> -> vector<1x16xf32>
    %c0_210 = arith.constant 0 : index
    %c0_211 = arith.constant 0 : index
    %625 = vector.load %arg41[%c0_210, %c0_211] : memref<1x16xf32, #tpu.memory_space<vmem>>, vector<1x16xf32>
    %626 = arith.addf %624, %625 : vector<1x16xf32>
    %cst_212 = arith.constant 0.000000e+00 : f32
    %627 = vector.broadcast %cst_212 : f32 to vector<1x16xf32>
    %628 = arith.maximumf %626, %627 : vector<1x16xf32>
    %629 = arith.addf %620, %628 : vector<1x16xf32>
    %c0_213 = arith.constant 0 : index
    %c0_214 = arith.constant 0 : index
    %630 = vector.load %arg42[%c0_213, %c0_214] : memref<16x16xf32, #tpu.memory_space<vmem>>, vector<16x16xf32>
    %631 = arith.truncf %629 : vector<1x16xf32> to vector<1x16xbf16>
    %632 = arith.truncf %630 : vector<16x16xf32> to vector<16x16xbf16>
    %cst_215 = arith.constant dense<0.000000e+00> : vector<1x16xf32>
    %633 = tpu.matmul %631, %632, %cst_215 {dimension_numbers = #tpu.dot_dimension_numbers<[1], [0], [0], [1], [0, 0, 1, 1], [], []>} : vector<1x16xbf16>, vector<16x16xbf16>, vector<1x16xf32> -> vector<1x16xf32>
    %c0_216 = arith.constant 0 : index
    %c0_217 = arith.constant 0 : index
    %634 = vector.load %arg43[%c0_216, %c0_217] : memref<1x16xf32, #tpu.memory_space<vmem>>, vector<1x16xf32>
    %635 = arith.addf %633, %634 : vector<1x16xf32>
    %c0_218 = arith.constant 0 : index
    %c0_219 = arith.constant 0 : index
    %636 = vector.load %arg44[%c0_218, %c0_219] : memref<16x3xf32, #tpu.memory_space<vmem>>, vector<16x3xf32>
    %637 = arith.truncf %635 : vector<1x16xf32> to vector<1x16xbf16>
    %638 = arith.truncf %636 : vector<16x3xf32> to vector<16x3xbf16>
    %cst_220 = arith.constant dense<0.000000e+00> : vector<1x3xf32>
    %639 = tpu.matmul %637, %638, %cst_220 {dimension_numbers = #tpu.dot_dimension_numbers<[1], [0], [0], [1], [0, 0, 1, 1], [], []>} : vector<1x16xbf16>, vector<16x3xbf16>, vector<1x3xf32> -> vector<1x3xf32>
    %c0_221 = arith.constant 0 : index
    %c0_222 = arith.constant 0 : index
    %640 = vector.load %arg45[%c0_221, %c0_222] : memref<1x3xf32, #tpu.memory_space<vmem>>, vector<1x3xf32>
    %641 = arith.addf %639, %640 : vector<1x3xf32>
    %c0_223 = arith.constant 0 : index
    %c0_224 = arith.constant 0 : index
    %642 = vector.load %arg46[%c0_223, %c0_224] : memref<1x3xf32, #tpu.memory_space<vmem>>, vector<1x3xf32>
    tpu.vector_store %arg46[%c0_223, %c0_224], %641 {strides = array<i32>} : memref<1x3xf32, #tpu.memory_space<vmem>>, vector<1x3xf32>,
    return
  }
}

</mosaic_0001>

<bundles_post_ra>
// kernel: gu_enc_forward.1
= control target key start
LH: loop header
LB: loop body
LE: loop exit
PB: predicated region body
PF: predicated region fallthrough
CT: control target
= control target key end

     0   :  { %s9411_s6 = smov 1   ;;  %s9412_s10 = smov 2   ;;  %s12205_s0 = inlined_call_operand.smem [shape: u32[47], index: -1, kind: input, shape index: {}] }
   0x1   :  { %s9489_s5 = sld [smem:[%s12205_s0]]   ;;  %s9413_s14 = smov 3  }
   0x2   :  { %s9494_s9 = sld [smem:[%s12205_s0 + %s9411_s6]]   ;;  %s9414_s18 = smov 4  }
   0x3   :  { %s9499_s13 = sld [smem:[%s12205_s0 + %s9412_s10]]   ;;  %s9415_s22 = smov 5  }
   0x4   :  { %s9504_s17 = sld [smem:[%s12205_s0 + %s9413_s14]]   ;;  %s9416_s26 = smov 6  }
   0x5   :  { %s9509_s21 = sld [smem:[%s12205_s0 + %s9414_s18]]   ;;  %s9417_s30 = smov 7  }
   0x6   :  { %s9514_s25 = sld [smem:[%s12205_s0 + %s9415_s22]]   ;;  %s9418_s4 = smov 8  }
   0x7   :  { %12289 = sst [smem:[#allocation40_spill]] %s9489_s5  ;;  %s9419_s10 = smov 9  }
   0x8   :  { %12290 = sst [smem:[#allocation41_spill]] %s9494_s9  ;;  %s9420_s15 = smov 10  }
   0x9   :  { %s9519_s29 = sld [smem:[%s12205_s0 + %s9416_s26]]   ;;  %s9421_s20 = smov 11  }
   0xa   :  { %12291 = sst [smem:[#allocation42_spill]] %s9504_s17  ;;  %s9422_s26 = smov 12  }
   0xb   :  { %12292 = sst [smem:[#allocation43_spill]] %s9509_s21  ;;  %s9423_s1 = smov 13  }
   0xc   :  { %s9524_s3 = sld [smem:[%s12205_s0 + %s9417_s30]]   ;;  %s9424_s7 = smov 14  }
   0xd   :  { %s9529_s8 = sld [smem:[%s12205_s0 + %s9418_s4]]   ;;  %s9426_s22 = smov 16  }
   0xe   :  { %s9534_s14 = sld [smem:[%s12205_s0 + %s9419_s10]]   ;;  %s9427_s28 = smov 17  }
   0xf   :  { %s9539_s19 = sld [smem:[%s12205_s0 + %s9420_s15]]   ;;  %s9425_s15 = smov 15  }
  0x10   :  { %s9544_s24 = sld [smem:[%s12205_s0 + %s9421_s20]]  }
  0x11   :  { %s9549_s30 = sld [smem:[%s12205_s0 + %s9422_s26]]  }
  0x12   :  { %s9554_s6 = sld [smem:[%s12205_s0 + %s9423_s1]]  }
  0x13   :  { %12293 = sst [smem:[#allocation44_spill]] %s9529_s8 }
  0x14   :  { %12294 = sst [smem:[#allocation45_spill]] %s9534_s14 }
  0x15   :  { %12295 = sst [smem:[#allocation46_spill]] %s9539_s19 }
  0x16   :  { %12296 = sst [smem:[#allocation47_spill]] %s9544_s24 }
  0x17   :  { %12297 = sst [smem:[#allocation48_spill]] %s9549_s30 }
  0x18   :  { %12298 = sst [smem:[#allocation49_spill]] %s9554_s6 }
  0x19   :  { %s9559_s12 = sld [smem:[%s12205_s0 + %s9424_s7]]   ;;  %s9428_s7 = smov 18  }
  0x1a   :  { %s9564_s20 = sld [smem:[%s12205_s0 + %s9425_s15]]   ;;  %s9429_s15 = smov 19  }
  0x1b   :  { %s9569_s27 = sld [smem:[%s12205_s0 + %s9426_s22]]   ;;  %s9430_s22 = smov 20  }
  0x1c   :  { %s9574_s4 = sld [smem:[%s12205_s0 + %s9427_s28]]   ;;  %s9431_s28 = smov 21  }
  0x1d   :  { %s9579_s6 = sld [smem:[%s12205_s0 + %s9428_s7]]   ;;  %s9432_s7 = smov 22  }
  0x1e   :  { %s9599_s24 = sld [smem:[%s12205_s0 + %s9432_s7]]   ;;  %s9436_s7 = smov 26  }
  0x1f   :  { %12299 = sst [smem:[#allocation50_spill]] %s9559_s12 }
  0x20   :  { %s9584_s12 = sld [smem:[%s12205_s0 + %s9429_s15]]   ;;  %s9433_s15 = smov 23  }
  0x21   :  { %12300 = sst [smem:[#allocation51_spill]] %s9569_s27 }
  0x22   :  { %12301 = sst [smem:[#allocation52_spill]] %s9574_s4 }
  0x23   :  { %s9589_s27 = sld [smem:[%s12205_s0 + %s9430_s22]]   ;;  %s9434_s22 = smov 24  }
  0x24   :  { %s9594_s4 = sld [smem:[%s12205_s0 + %s9431_s28]]   ;;  %s9435_s28 = smov 25  }
  0x25   :  { %s9609_s30 = sld [smem:[%s12205_s0 + %s9434_s22]]   ;;  %s9438_s22 = smov 28  }
  0x26   :  { %12302 = sst [smem:[#allocation53_spill]] %s9584_s12 }
  0x27   :  { %s9604_s12 = sld [smem:[%s12205_s0 + %s9433_s15]]   ;;  %s9437_s15 = smov 27  }
  0x28   :  { %s9619_s19 = sld [smem:[%s12205_s0 + %s9436_s7]]   ;;  %s9440_s7 = smov 30  }
  0x29   :  { %s9629_s21 = sld [smem:[%s12205_s0 + %s9438_s22]]   ;;  %s9442_s22 = smov 32  }
  0x2a   :  { %12303 = sst [smem:[#allocation54_spill]] %s9594_s4 }
  0x2b   :  { %s9614_s4 = sld [smem:[%s12205_s0 + %s9435_s28]]   ;;  %s9439_s28 = smov 29  }
  0x2d   :  { %12304 = sst [smem:[#allocation55_spill]] %s9604_s12 }
  0x2e   :  { %12306 = sst [smem:[#allocation57_spill]] %s9619_s19 }
  0x2f   :  { %s9624_s12 = sld [smem:[%s12205_s0 + %s9437_s15]]   ;;  %s9441_s15 = smov 31  }
  0x30   :  { %12308 = sst [smem:[#allocation59_spill]] %s9629_s21 }
  0x31   :  { %12305 = sst [smem:[#allocation56_spill]] %s9614_s4 }
  0x32   :  { %s9634_s4 = sld [smem:[%s12205_s0 + %s9439_s28]]   ;;  %s9443_s28 = smov 33  }
  0x33   :  { %s9639_s19 = sld [smem:[%s12205_s0 + %s9440_s7]]   ;;  %s9444_s7 = smov 34  }
  0x34   :  { %s9649_s21 = sld [smem:[%s12205_s0 + %s9442_s22]]   ;;  %s9446_s22 = smov 36  }
  0x35   :  { %12307 = sst [smem:[#allocation58_spill]] %s9624_s12 }
  0x36   :  { %s9644_s12 = sld [smem:[%s12205_s0 + %s9441_s15]]   ;;  %s9445_s15 = smov 35  }
  0x38   :  { %12309 = sst [smem:[#allocation60_spill]] %s9634_s4 }
  0x39   :  { %12310 = sst [smem:[#allocation61_spill]] %s9639_s19 }
  0x3a   :  { %12312 = sst [smem:[#allocation63_spill]] %s9649_s21 }
  0x3b   :  { %s9654_s4 = sld [smem:[%s12205_s0 + %s9443_s28]]   ;;  %s9447_s28 = smov 37  }
  0x3c   :  { %12311 = sst [smem:[#allocation62_spill]] %s9644_s12 }
  0x3d   :  { %s9659_s19 = sld [smem:[%s12205_s0 + %s9444_s7]]   ;;  %s9448_s7 = smov 38  }
  0x3e   :  { %s9664_s12 = sld [smem:[%s12205_s0 + %s9445_s15]]   ;;  %s9449_s15 = smov 39  }
  0x3f   :  { %s9669_s21 = sld [smem:[%s12205_s0 + %s9446_s22]]   ;;  %s9450_s22 = smov 40  }
  0x40   :  { %s9684_s14 = sld [smem:[%s12205_s0 + %s9449_s15]]   ;;  %s9453_s15 = smov 43  }
  0x41   :  { %12313 = sst [smem:[#allocation64_spill]] %s9654_s4 }
  0x42   :  { %s9674_s4 = sld [smem:[%s12205_s0 + %s9447_s28]]   ;;  %s9451_s28 = smov 41  }
  0x43   :  { %12314 = sst [smem:[#allocation65_spill]] %s9659_s19 }
  0x44   :  { %s9679_s19 = sld [smem:[%s12205_s0 + %s9448_s7]]   ;;  %s9452_s7 = smov 42  }
  0x45   :  { %12315 = sst [smem:[#allocation66_spill]] %s9669_s21 }
  0x46   :  { %s9689_s21 = sld [smem:[%s12205_s0 + %s9450_s22]]   ;;  %s9454_s22 = smov 44  }
  0x47   :  { %s9694_s17 = sld [smem:[%s12205_s0 + %s9451_s28]]   ;;  %s9455_s28 = smov 45  }
  0x48   :  { %s9704_s8 = sld [smem:[%s12205_s0 + %s9453_s15]]  }
  0x49   :  { %s9709_s5 = sld [smem:[%s12205_s0 + %s9454_s22]]  }
  0x4a   :  { %12316 = sst [smem:[#allocation67_spill]] %s9679_s19 }
  0x4b   :  { %s9699_s19 = sld [smem:[%s12205_s0 + %s9452_s7]]   ;;  %s9456_s7 = smov 46  }
  0x4c   :  { %s9714_s9 = sld [smem:[%s12205_s0 + %s9455_s28]]  }
  0x51   :  { %12317 = sst [smem:[#allocation68_spill]] %s9699_s19 }
  0x52   :  { %s9719_s19 = sld [smem:[%s12205_s0 + %s9456_s7]]  }
  0x53   :  { %98 = vsyncpa [#allocation3], 0 }
  0x54   :  { %99 = vsyncpa [#allocation6], 0 }
  0x55   :  { %100 = vsyncpa [#allocation9], 0 }
  0x56   :  { %101 = vsyncpa [#allocation12], 0 }
  0x57   :  { %102 = vsyncpa [#allocation15], 0 }
  0x58   :  { %103 = vsyncpa [#allocation18], 0 }
  0x59   :  { %104 = vsyncpa [#allocation21], 0 }
  0x5a   :  { %105 = vsyncpa [#allocation24], 0 }
  0x5b   :  { %106 = vsyncpa [#allocation27], 0 }
  0x5c   :  { %107 = vsyncpa [#allocation4], 0  ;;  %s9457_s15 = smov [#allocation5]   ;;  %s9458_s18 = smov [#allocation8]  }
  0x5d   :  { %s132_s16 = sshll.u32 %s9457_s15, 4  ;;  %s152_s22 = sshll.u32 %s9458_s18, 4  ;;  %s133_s16 = int_to_ptr.vmem [resolvable:$true] %s132_s16  ;;  %s153_s22 = int_to_ptr.vmem [resolvable:$true] %s152_s22 }
  0x5e   :  { %s8995_s0 = scalar_lea.hbm %s9514_s25, 16 }
  0x5f   :  { %p8996_p0 = scmp.ne.s32.totalorder %s9514_s25, %s8995_s0  ;;  %p8999_p1 = scmp.lt.u32.totalorder %s8995_s0, %s9514_s25 }
  0x61   :  { %p9001_p2 = pnand %p8999_p1, %p8996_p0 }
  0x63   :  { %9004 = shalt.err (!%p9001_p2)
}
  0x64   :  { %s9005_s23 = scalar_lea.vmem %s133_s16, 16  ;;  %s9009_s26 = scalar_lea.vmem %s133_s16, 32 }
  0x65   :  { %p9006_p3 = scmp.ne.s32.totalorder %s133_s16, %s9005_s23  ;;  %p9010_p4 = scmp.lt.s32.totalorder %s133_s16, %s133_s16 }
  0x66   :  { %p9011_p5 = scmp.lt.s32.totalorder %s9009_s26, %s9005_s23 }
  0x68   :  { %p9012_p6 = por %p9011_p5, %p9010_p4 }
  0x6a   :  { %p9013_p7 = pnand %p9012_p6, %p9006_p3 }
  0x6c   :  { %9016 = shalt.err (!%p9013_p7)
}
  0x6d   :  { %135 = dma.hbm_to_vmem [thread:$0]  %s9514_s25, 16, %s133_s16, [#allocation6]  }
  0x6e   :  { %s9017_s28 = scalar_lea.hbm %s9524_s3, 16 }
  0x6f   :  { %p9018_p8 = scmp.ne.s32.totalorder %s9524_s3, %s9017_s28  ;;  %p9021_p9 = scmp.lt.u32.totalorder %s9017_s28, %s9524_s3 }
  0x71   :  { %p9023_p10 = pnand %p9021_p9, %p9018_p8 }
  0x73   :  { %9026 = shalt.err (!%p9023_p10)
}
  0x74   :  { %s9027_s1 = scalar_lea.vmem %s153_s22, 16  ;;  %s9031_s2 = scalar_lea.vmem %s153_s22, 32 }
  0x75   :  { %p9028_p11 = scmp.ne.s32.totalorder %s153_s22, %s9027_s1  ;;  %p9032_p12 = scmp.lt.s32.totalorder %s153_s22, %s153_s22 }
  0x76   :  { %p9033_p13 = scmp.lt.s32.totalorder %s9031_s2, %s9027_s1 }
  0x78   :  { %p9034_p0 = por %p9033_p13, %p9032_p12 }
  0x7a   :  { %p9035_p1 = pnand %p9034_p0, %p9028_p11 }
  0x7c   :  { %9038 = shalt.err (!%p9035_p1)
}
  0x7d   :  { %155 = dma.hbm_to_vmem [thread:$0]  %s9524_s3, 16, %s153_s22, [#allocation9]  }
  0x7e   :  { %s9459_s7 = smov [#allocation11]   ;;  %s9460_s10 = smov [#allocation14]  }
  0x7f   :  { %s190_s25 = sshll.u32 %s9459_s7, 4  ;;  %s214_s11 = sshll.u32 %s9460_s10, 4  ;;  %s191_s25 = int_to_ptr.vmem [resolvable:$true] %s190_s25  ;;  %s215_s11 = int_to_ptr.vmem [resolvable:$true] %s214_s11 }
  0x80   :  { %s9039_s15 = scalar_lea.hbm %s9579_s6, 16 }
  0x81   :  { %p9040_p2 = scmp.ne.s32.totalorder %s9579_s6, %s9039_s15  ;;  %p9043_p3 = scmp.lt.u32.totalorder %s9039_s15, %s9579_s6 }
  0x83   :  { %p9045_p4 = pnand %p9043_p3, %p9040_p2 }
  0x85   :  { %9048 = shalt.err (!%p9045_p4)
}
  0x86   :  { %s9049_s16 = scalar_lea.vmem %s191_s25, 16  ;;  %s9053_s18 = scalar_lea.vmem %s191_s25, 32 }
  0x87   :  { %p9050_p5 = scmp.ne.s32.totalorder %s191_s25, %s9049_s16  ;;  %p9054_p6 = scmp.lt.s32.totalorder %s191_s25, %s191_s25 }
  0x88   :  { %p9055_p7 = scmp.lt.s32.totalorder %s9053_s18, %s9049_s16 }
  0x8a   :  { %p9056_p8 = por %p9055_p7, %p9054_p6 }
  0x8c   :  { %p9057_p9 = pnand %p9056_p8, %p9050_p5 }
  0x8e   :  { %9060 = shalt.err (!%p9057_p9)
}
  0x8f   :  { %193 = dma.hbm_to_vmem [thread:$0]  %s9579_s6, 16, %s191_s25, [#allocation12]  }
  0x90   :  { %s9061_s3 = scalar_lea.hbm %s9599_s24, 16 }
  0x91   :  { %p9062_p10 = scmp.ne.s32.totalorder %s9599_s24, %s9061_s3  ;;  %p9065_p11 = scmp.lt.u32.totalorder %s9061_s3, %s9599_s24 }
  0x93   :  { %p9067_p12 = pnand %p9065_p11, %p9062_p10 }
  0x95   :  { %9070 = shalt.err (!%p9067_p12)
}
  0x96   :  { %s9071_s22 = scalar_lea.vmem %s215_s11, 16  ;;  %s9075_s0 = scalar_lea.vmem %s215_s11, 32 }
  0x97   :  { %p9072_p13 = scmp.ne.s32.totalorder %s215_s11, %s9071_s22  ;;  %p9076_p0 = scmp.lt.s32.totalorder %s215_s11, %s215_s11 }
  0x98   :  { %p9077_p1 = scmp.lt.s32.totalorder %s9075_s0, %s9071_s22 }
  0x9a   :  { %p9078_p2 = por %p9077_p1, %p9076_p0 }
  0x9c   :  { %p9079_p3 = pnand %p9078_p2, %p9072_p13 }
  0x9e   :  { %9082 = shalt.err (!%p9079_p3)
}
  0x9f   :  { %217 = dma.hbm_to_vmem [thread:$0]  %s9599_s24, 16, %s215_s11, [#allocation15]  }
  0xa0   :  { %s9461_s23 = smov [#allocation17]   ;;  %s9462_s26 = smov [#allocation20]  }
  0xa1   :  { %s256_s6 = sshll.u32 %s9461_s23, 4  ;;  %s280_s28 = sshll.u32 %s9462_s26, 4  ;;  %s257_s6 = int_to_ptr.vmem [resolvable:$true] %s256_s6  ;;  %s281_s28 = int_to_ptr.vmem [resolvable:$true] %s280_s28 }
  0xa2   :  { %s9083_s1 = scalar_lea.hbm %s9664_s12, 16 }
  0xa3   :  { %p9084_p4 = scmp.ne.s32.totalorder %s9664_s12, %s9083_s1  ;;  %p9087_p5 = scmp.lt.u32.totalorder %s9083_s1, %s9664_s12 }
  0xa5   :  { %p9089_p6 = pnand %p9087_p5, %p9084_p4 }
  0xa7   :  { %9092 = shalt.err (!%p9089_p6)
}
  0xa8   :  { %s9093_s2 = scalar_lea.vmem %s257_s6, 16  ;;  %s9097_s7 = scalar_lea.vmem %s257_s6, 32 }
  0xa9   :  { %p9094_p7 = scmp.ne.s32.totalorder %s257_s6, %s9093_s2  ;;  %p9098_p8 = scmp.lt.s32.totalorder %s257_s6, %s257_s6 }
  0xaa   :  { %p9099_p9 = scmp.lt.s32.totalorder %s9097_s7, %s9093_s2 }
  0xac   :  { %p9100_p10 = por %p9099_p9, %p9098_p8 }
  0xae   :  { %p9101_p11 = pnand %p9100_p10, %p9094_p7 }
  0xb0   :  { %9104 = shalt.err (!%p9101_p11)
}
  0xb1   :  { %259 = dma.hbm_to_vmem [thread:$0]  %s9664_s12, 16, %s257_s6, [#allocation18]  }
  0xb2   :  { %s9105_s24 = scalar_lea.hbm %s9684_s14, 16 }
  0xb3   :  { %p9106_p12 = scmp.ne.s32.totalorder %s9684_s14, %s9105_s24  ;;  %p9109_p13 = scmp.lt.u32.totalorder %s9105_s24, %s9684_s14 }
  0xb5   :  { %p9111_p0 = pnand %p9109_p13, %p9106_p12 }
  0xb7   :  { %9114 = shalt.err (!%p9111_p0)
}
  0xb8   :  { %s9115_s25 = scalar_lea.vmem %s281_s28, 16  ;;  %s9119_s10 = scalar_lea.vmem %s281_s28, 32 }
  0xb9   :  { %p9116_p1 = scmp.ne.s32.totalorder %s281_s28, %s9115_s25  ;;  %p9120_p2 = scmp.lt.s32.totalorder %s281_s28, %s281_s28 }
  0xba   :  { %p9121_p3 = scmp.lt.s32.totalorder %s9119_s10, %s9115_s25 }
  0xbc   :  { %p9122_p4 = por %p9121_p3, %p9120_p2 }
  0xbe   :  { %p9123_p5 = pnand %p9122_p4, %p9116_p1 }
  0xc0   :  { %9126 = shalt.err (!%p9123_p5)
}
  0xc1   :  { %283 = dma.hbm_to_vmem [thread:$0]  %s9684_s14, 16, %s281_s28, [#allocation21]  }
  0xc2   :  { %s9463_s11 = smov [#allocation23]   ;;  %s9464_s15 = smov [#allocation26]  }
  0xc3   :  { %s302_s12 = sshll.u32 %s9463_s11, 4  ;;  %s324_s16 = sshll.u32 %s9464_s15, 4  ;;  %s303_s12 = int_to_ptr.vmem [resolvable:$true] %s302_s12  ;;  %s325_s16 = int_to_ptr.vmem [resolvable:$true] %s324_s16 }
  0xc4   :  { %s9127_s18 = scalar_lea.hbm %s9694_s17, 16 }
  0xc5   :  { %p9128_p6 = scmp.ne.s32.totalorder %s9694_s17, %s9127_s18  ;;  %p9131_p7 = scmp.lt.u32.totalorder %s9127_s18, %s9694_s17 }
  0xc7   :  { %p9133_p8 = pnand %p9131_p7, %p9128_p6 }
  0xc9   :  { %9136 = shalt.err (!%p9133_p8)
}
  0xca   :  { %s9137_s3 = scalar_lea.vmem %s303_s12, 16  ;;  %s9141_s22 = scalar_lea.vmem %s303_s12, 32 }
  0xcb   :  { %p9138_p9 = scmp.ne.s32.totalorder %s303_s12, %s9137_s3  ;;  %p9142_p10 = scmp.lt.s32.totalorder %s303_s12, %s303_s12 }
  0xcc   :  { %p9143_p11 = scmp.lt.s32.totalorder %s9141_s22, %s9137_s3 }
  0xce   :  { %p9144_p12 = por %p9143_p11, %p9142_p10 }
  0xd0   :  { %p9145_p13 = pnand %p9144_p12, %p9138_p9 }
  0xd2   :  { %9148 = shalt.err (!%p9145_p13)
}
  0xd3   :  { %305 = dma.hbm_to_vmem [thread:$0]  %s9694_s17, 16, %s303_s12, [#allocation24]  }
  0xd4   :  { %s9149_s14 = scalar_lea.hbm %s9704_s8, 16 }
  0xd5   :  { %p9150_p0 = scmp.ne.s32.totalorder %s9704_s8, %s9149_s14  ;;  %p9153_p1 = scmp.lt.u32.totalorder %s9149_s14, %s9704_s8 }
  0xd7   :  { %p9155_p2 = pnand %p9153_p1, %p9150_p0 }
  0xd9   :  { %9158 = shalt.err (!%p9155_p2)
}
  0xda   :  { %s9159_s0 = scalar_lea.vmem %s325_s16, 16  ;;  %s9163_s23 = scalar_lea.vmem %s325_s16, 32 }
  0xdb   :  { %p9160_p3 = scmp.ne.s32.totalorder %s325_s16, %s9159_s0  ;;  %p9164_p4 = scmp.lt.s32.totalorder %s325_s16, %s325_s16 }
  0xdc   :  { %p9165_p5 = scmp.lt.s32.totalorder %s9163_s23, %s9159_s0 }
  0xde   :  { %p9166_p6 = por %p9165_p5, %p9164_p4 }
  0xe0   :  { %p9167_p7 = pnand %p9166_p6, %p9160_p3 }
  0xe2   :  { %9170 = shalt.err (!%p9167_p7)
}
  0xe3   :  { %327 = dma.hbm_to_vmem [thread:$0]  %s9704_s8, 16, %s325_s16, [#allocation27]  }
  0xe4   :  { %s9465_s6 = smov [#allocation2]   ;;  %s9466_s26 = smov [#allocation7]  }
  0xe5   :  { %s118_s17 = sshll.u32 %s9465_s6, 4  ;;  %s142_s28 = sshll.u32 %s9466_s26, 4  ;;  %s119_s17 = int_to_ptr.vmem [resolvable:$true] %s118_s17  ;;  %s143_s28 = int_to_ptr.vmem [resolvable:$true] %s142_s28 }
  0xe6   :  { %s9171_s1 = scalar_lea.hbm %s9499_s13, 128 }
  0xe7   :  { %p9172_p8 = scmp.ne.s32.totalorder %s9499_s13, %s9171_s1  ;;  %p9175_p9 = scmp.lt.u32.totalorder %s9171_s1, %s9499_s13 }
  0xe9   :  { %p9177_p10 = pnand %p9175_p9, %p9172_p8 }
  0xeb   :  { %9180 = shalt.err (!%p9177_p10)
}
  0xec   :  { %s9181_s2 = scalar_lea.vmem %s119_s17, 128  ;;  %p9186_p12 = scmp.lt.s32.totalorder %s119_s17, %s119_s17 }
  0xed   :  { %p9182_p11 = scmp.ne.s32.totalorder %s119_s17, %s9181_s2  ;;  %p9187_p13 = scmp.lt.s32.totalorder %s9181_s2, %s9181_s2 }
  0xef   :  { %p9188_p0 = por %p9187_p13, %p9186_p12 }
  0xf1   :  { %p9189_p1 = pnand %p9188_p0, %p9182_p11 }
  0xf3   :  { %9192 = shalt.err (!%p9189_p1)
}
  0xf4   :  { %121 = dma.hbm_to_vmem [thread:$0]  %s9499_s13, 128, %s119_s17, [#allocation3]  }
  0xf5   :  { %s9193_s8 = scalar_lea.hbm %s9519_s29, 16 }
  0xf6   :  { %p9194_p2 = scmp.ne.s32.totalorder %s9519_s29, %s9193_s8  ;;  %p9197_p3 = scmp.lt.u32.totalorder %s9193_s8, %s9519_s29 }
  0xf8   :  { %p9199_p4 = pnand %p9197_p3, %p9194_p2 }
  0xfa   :  { %9202 = shalt.err (!%p9199_p4)
}
  0xfb   :  { %s9203_s7 = scalar_lea.vmem %s143_s28, 16  ;;  %s9207_s24 = scalar_lea.vmem %s143_s28, 32 }
  0xfc   :  { %p9204_p5 = scmp.ne.s32.totalorder %s143_s28, %s9203_s7  ;;  %p9208_p6 = scmp.lt.s32.totalorder %s143_s28, %s143_s28 }
  0xfd   :  { %p9209_p7 = scmp.lt.s32.totalorder %s9207_s24, %s9203_s7 }
  0xff   :  { %p9210_p8 = por %p9209_p7, %p9208_p6 }
 0x101   :  { %p9211_p9 = pnand %p9210_p8, %p9204_p5 }
 0x103   :  { %9214 = shalt.err (!%p9211_p9)
}
 0x104   :  { %145 = dma.hbm_to_vmem [thread:$0]  %s9519_s29, 16, %s143_s28, [#allocation6]  }
 0x105   :  { %s9467_s25 = smov [#allocation10]   ;;  %s9468_s10 = smov [#allocation13]  }
 0x106   :  { %s176_s13 = sshll.u32 %s9467_s25, 4  ;;  %s202_s11 = sshll.u32 %s9468_s10, 4  ;;  %s177_s13 = int_to_ptr.vmem [resolvable:$true] %s176_s13  ;;  %s203_s11 = int_to_ptr.vmem [resolvable:$true] %s202_s11 }
 0x107   :  { %s9215_s12 = scalar_lea.hbm %s9564_s20, 16 }
 0x108   :  { %p9216_p10 = scmp.ne.s32.totalorder %s9564_s20, %s9215_s12  ;;  %p9219_p11 = scmp.lt.u32.totalorder %s9215_s12, %s9564_s20 }
 0x10a   :  { %p9221_p12 = pnand %p9219_p11, %p9216_p10 }
 0x10c   :  { %9224 = shalt.err (!%p9221_p12)
}
 0x10d   :  { %s9225_s15 = scalar_lea.vmem %s177_s13, 16  ;;  %s9229_s16 = scalar_lea.vmem %s177_s13, 32 }
 0x10e   :  { %p9226_p13 = scmp.ne.s32.totalorder %s177_s13, %s9225_s15  ;;  %p9230_p0 = scmp.lt.s32.totalorder %s177_s13, %s177_s13 }
 0x10f   :  { %p9231_p1 = scmp.lt.s32.totalorder %s9229_s16, %s9225_s15 }
 0x111   :  { %p9232_p2 = por %p9231_p1, %p9230_p0 }
 0x113   :  { %p9233_p3 = pnand %p9232_p2, %p9226_p13 }
 0x115   :  { %9236 = shalt.err (!%p9233_p3)
}
 0x116   :  { %179 = dma.hbm_to_vmem [thread:$0]  %s9564_s20, 16, %s177_s13, [#allocation9]  }
 0x117   :  { %s9237_s29 = scalar_lea.hbm %s9589_s27, 16 }
 0x118   :  { %p9238_p4 = scmp.ne.s32.totalorder %s9589_s27, %s9237_s29  ;;  %p9241_p5 = scmp.lt.u32.totalorder %s9237_s29, %s9589_s27 }
 0x11a   :  { %p9243_p6 = pnand %p9241_p5, %p9238_p4 }
 0x11c   :  { %9246 = shalt.err (!%p9243_p6)
}
 0x11d   :  { %s9247_s18 = scalar_lea.vmem %s203_s11, 16  ;;  %s9251_s3 = scalar_lea.vmem %s203_s11, 32 }
 0x11e   :  { %p9248_p7 = scmp.ne.s32.totalorder %s203_s11, %s9247_s18  ;;  %p9252_p8 = scmp.lt.s32.totalorder %s203_s11, %s203_s11 }
 0x11f   :  { %p9253_p9 = scmp.lt.s32.totalorder %s9251_s3, %s9247_s18 }
 0x121   :  { %p9254_p10 = por %p9253_p9, %p9252_p8 }
 0x123   :  { %p9255_p11 = pnand %p9254_p10, %p9248_p7 }
 0x125   :  { %9258 = shalt.err (!%p9255_p11)
}
 0x126   :  { %205 = dma.hbm_to_vmem [thread:$0]  %s9589_s27, 16, %s203_s11, [#allocation12]  }
 0x127   :  { %s9469_s22 = smov [#allocation16]   ;;  %s9470_s14 = smov [#allocation19]  }
 0x128   :  { %s226_s20 = sshll.u32 %s9469_s22, 4  ;;  %s268_s0 = sshll.u32 %s9470_s14, 4  ;;  %s227_s20 = int_to_ptr.vmem [resolvable:$true] %s226_s20  ;;  %s269_s0 = int_to_ptr.vmem [resolvable:$true] %s268_s0 }
 0x129   :  { %s9259_s23 = scalar_lea.hbm %s9609_s30, 16 }
 0x12a   :  { %p9260_p12 = scmp.ne.s32.totalorder %s9609_s30, %s9259_s23  ;;  %p9263_p13 = scmp.lt.u32.totalorder %s9259_s23, %s9609_s30 }
 0x12c   :  { %p9265_p0 = pnand %p9263_p13, %p9260_p12 }
 0x12e   :  { %9268 = shalt.err (!%p9265_p0)
}
 0x12f   :  { %s9269_s6 = scalar_lea.vmem %s227_s20, 16  ;;  %s9273_s17 = scalar_lea.vmem %s227_s20, 32 }
 0x130   :  { %p9270_p1 = scmp.ne.s32.totalorder %s227_s20, %s9269_s6  ;;  %p9274_p2 = scmp.lt.s32.totalorder %s227_s20, %s227_s20 }
 0x131   :  { %p9275_p3 = scmp.lt.s32.totalorder %s9273_s17, %s9269_s6 }
 0x133   :  { %p9276_p4 = por %p9275_p3, %p9274_p2 }
 0x135   :  { %p9277_p5 = pnand %p9276_p4, %p9270_p1 }
 0x137   :  { %9280 = shalt.err (!%p9277_p5)
}
 0x138   :  { %229 = dma.hbm_to_vmem [thread:$0]  %s9609_s30, 16, %s227_s20, [#allocation15]  }
 0x139   :  { %s9281_s27 = scalar_lea.hbm %s9674_s4, 16 }
 0x13a   :  { %p9282_p6 = scmp.ne.s32.totalorder %s9674_s4, %s9281_s27  ;;  %p9285_p7 = scmp.lt.u32.totalorder %s9281_s27, %s9674_s4 }
 0x13c   :  { %p9287_p8 = pnand %p9285_p7, %p9282_p6 }
 0x13e   :  { %9290 = shalt.err (!%p9287_p8)
}
 0x13f   :  { %s9291_s26 = scalar_lea.vmem %s269_s0, 16  ;;  %s9295_s28 = scalar_lea.vmem %s269_s0, 32 }
 0x140   :  { %p9292_p9 = scmp.ne.s32.totalorder %s269_s0, %s9291_s26  ;;  %p9296_p10 = scmp.lt.s32.totalorder %s269_s0, %s269_s0 }
 0x141   :  { %p9297_p11 = scmp.lt.s32.totalorder %s9295_s28, %s9291_s26 }
 0x143   :  { %p9298_p12 = por %p9297_p11, %p9296_p10 }
 0x145   :  { %p9299_p13 = pnand %p9298_p12, %p9292_p9 }
 0x147   :  { %9302 = shalt.err (!%p9299_p13)
}
 0x148   :  { %271 = dma.hbm_to_vmem [thread:$0]  %s9674_s4, 16, %s269_s0, [#allocation18]  }
 0x149   :  { %s9471_s1 = smov [#allocation22]   ;;  %s9303_s2 = scalar_lea.hbm %s9689_s21, 256 }
 0x14a   :  { %s289_s30 = sshll.u32 %s9471_s1, 4  ;;  %p9304_p0 = scmp.ne.s32.totalorder %s9689_s21, %s9303_s2  ;;  %s290_s30 = int_to_ptr.vmem [resolvable:$true] %s289_s30 }
 0x14b   :  { %p9307_p1 = scmp.lt.u32.totalorder %s9303_s2, %s9689_s21 }
 0x14d   :  { %p9309_p2 = pnand %p9307_p1, %p9304_p0 }
 0x14f   :  { %9312 = shalt.err (!%p9309_p2)
}
 0x150   :  { %s9313_s8 = scalar_lea.vmem %s290_s30, 256  ;;  %p9318_p4 = scmp.lt.s32.totalorder %s290_s30, %s290_s30 }
 0x151   :  { %p9314_p3 = scmp.ne.s32.totalorder %s290_s30, %s9313_s8  ;;  %p9319_p5 = scmp.lt.s32.totalorder %s9313_s8, %s9313_s8 }
 0x153   :  { %p9320_p6 = por %p9319_p5, %p9318_p4 }
 0x155   :  { %p9321_p7 = pnand %p9320_p6, %p9314_p3 }
 0x157   :  { %9324 = shalt.err (!%p9321_p7)
}
 0x158   :  { %s9472_s7 = smov 128   ;;  %s12318_s24 = sld [smem:[#allocation68_spill]] }
 0x159   :  { %s9473_s4 = smov 8   ;;  %s9474_s25 = smov [#allocation25]  }
 0x15a   :  { %295 = dma.hbm_to_vmem [thread:$0]  %s9689_s21, 256, %s290_s30, [#allocation21], %s9472_s7, %s9472_s7, %s9473_s4  }
 0x15b   :  { %s311_s13 = sshll.u32 %s9474_s25, 4  ;;  %s9475_s10 = smov [#allocation28]   ;;  %s312_s13 = int_to_ptr.vmem [resolvable:$true] %s311_s13 }
 0x15c   :  { %s336_s11 = sshll.u32 %s9475_s10, 4  ;;  %s337_s11 = int_to_ptr.vmem [resolvable:$true] %s336_s11 }
 0x15e   :  { %s9325_s12 = scalar_lea.hbm %s12318_s24, 256 }
 0x15f   :  { %p9326_p8 = scmp.ne.s32.totalorder %s12318_s24, %s9325_s12  ;;  %p9329_p9 = scmp.lt.u32.totalorder %s9325_s12, %s12318_s24 }
 0x161   :  { %p9331_p10 = pnand %p9329_p9, %p9326_p8 }
 0x163   :  { %9334 = shalt.err (!%p9331_p10)
}
 0x164   :  { %s9335_s15 = scalar_lea.vmem %s312_s13, 256  ;;  %p9340_p12 = scmp.lt.s32.totalorder %s312_s13, %s312_s13 }
 0x165   :  { %p9336_p11 = scmp.ne.s32.totalorder %s312_s13, %s9335_s15  ;;  %p9341_p13 = scmp.lt.s32.totalorder %s9335_s15, %s9335_s15 }
 0x167   :  { %p9342_p0 = por %p9341_p13, %p9340_p12 }
 0x169   :  { %p9343_p1 = pnand %p9342_p0, %p9336_p11 }
 0x16b   :  { %9346 = shalt.err (!%p9343_p1)
}
 0x16c   :  { %317 = dma.hbm_to_vmem [thread:$0]  %s12318_s24, 256, %s312_s13, [#allocation24], %s9472_s7, %s9472_s7, %s9473_s4  }
 0x16d   :  { %s9347_s21 = scalar_lea.hbm %s9714_s9, 16 }
 0x16e   :  { %p9348_p2 = scmp.ne.s32.totalorder %s9714_s9, %s9347_s21  ;;  %p9351_p3 = scmp.lt.u32.totalorder %s9347_s21, %s9714_s9 }
 0x170   :  { %p9353_p4 = pnand %p9351_p3, %p9348_p2 }
 0x172   :  { %9356 = shalt.err (!%p9353_p4)
}
 0x173   :  { %s9357_s16 = scalar_lea.vmem %s337_s11, 16  ;;  %s9361_s29 = scalar_lea.vmem %s337_s11, 32 }
 0x174   :  { %p9358_p5 = scmp.ne.s32.totalorder %s337_s11, %s9357_s16  ;;  %p9362_p6 = scmp.lt.s32.totalorder %s337_s11, %s337_s11 }
 0x175   :  { %p9363_p7 = scmp.lt.s32.totalorder %s9361_s29, %s9357_s16 }
 0x177   :  { %p9364_p8 = por %p9363_p7, %p9362_p6 }
 0x179   :  { %p9365_p9 = pnand %p9364_p8, %p9358_p5 }
 0x17b   :  { %9368 = shalt.err (!%p9365_p9)
}
 0x17c   :  { %339 = dma.hbm_to_vmem [thread:$0]  %s9714_s9, 16, %s337_s11, [#allocation27]  }
 0x17d   :  { %9391 = dma.done.wait [#allocation3], 128  }
 0x17e   :  { %9392 = vsyncadd [#allocation3], 4294967168 }
 0x17f   :  { %9393 = dma.done.wait [#allocation6], 32  }
 0x180   :  { %9394 = vsyncadd [#allocation6], 4294967264 }
 0x181   :  { %9395 = dma.done.wait [#allocation9], 32  }
 0x182   :  { %9396 = vsyncadd [#allocation9], 4294967264 }
 0x183   :  { %9397 = dma.done.wait [#allocation12], 32  }
 0x184   :  { %9398 = vsyncadd [#allocation12], 4294967264 }
 0x185   :  { %9399 = dma.done.wait [#allocation15], 32  }
 0x186   :  { %9400 = vsyncadd [#allocation15], 4294967264 }
 0x187   :  { %9401 = dma.done.wait [#allocation18], 32  }
 0x188   :  { %9402 = vsyncadd [#allocation18], 4294967264 }
 0x189   :  { %9403 = dma.done.wait [#allocation21], 272  }
 0x18a   :  { %9404 = vsyncadd [#allocation21], 4294967024 }
 0x18b   :  { %9405 = dma.done.wait [#allocation24], 272  }
 0x18c   :  { %9406 = vsyncadd [#allocation24], 4294967024 }
 0x18d   :  { %9407 = dma.done.wait [#allocation27], 32  }
 0x18e   :  { %9408 = vsyncadd [#allocation27], 4294967264  ;;  %vm12231_vm0 = vcmask 1045504   ;;  %v12241_v0 = vmov 0.0   ;;  %v9477_v1 = vmov 0   ;;  %s12319_s9 = sld [smem:[#allocation41_spill]]  ;;  %v397_v3 = vlaneseq }
 0x18f   :  { %7901 = vmatprep.subr.bf16.mxu0 %v12241_v0  ;;  %v9792_v2 = vsel %vm12231_vm0, 1065369472, %v9477_v1  ;;  %vm12232_vm1 = vmmov 0   ;;  %7907 = vmatprep.subr.bf16.mxu1 %v12241_v0  ;;  %s12320_s18 = sld [smem:[#allocation40_spill]]  ;;  %v495_v10 = vld [vmem:[#allocation2] sm:$0xff]  ;;  %vm502_vm4 = vcmask 1043456  }
 0x190   :  { %7903 = vmatprep.mubr.msk.bf16.mxu0 %vm12232_vm1, %v12241_v0  ;;  %7902 = vmatpush3.bf16.msra.mxu0 %v9792_v2  ;;  %v9798_v4 = vshrl.u32 %v397_v3, 7  ;;  %v9800_v5 = vand.u32 127, %v397_v3  ;;  %v497_v13 = vpack.c.bf16 %v495_v10, %v495_v10  ;;  %vm498_vm5 = vcmask 64512   ;;  %s12321_s3 = sld [smem:[#allocation44_spill]]  ;;  %v7241_v62 = vld [vmem:[#allocation5] ss:$0 sm:$0xff] }
 0x191   :  { %7909 = vmatprep.mubr.msk.bf16.mxu1 %vm12232_vm1, %v12241_v0  ;;  %8861 = vset.pattern.permute.xlu0 %v9477_v1  ;;  %vm412_vm6 = vcmask 97280   ;;  %vm12234_vm9 = vcmask 93184   ;;  %vm12229_vm11 = vcmask 7168   ;;  %vm12230_vm12 = vcmask 130048   ;;  %s12325_s20 = sld [smem:[#allocation42_spill]]  ;;  %s12328_s14 = sld [smem:[#allocation45_spill]] }
 0x192   :  { %7913 = vmatprep.subr.bf16.mxu0 %v12241_v0  ;;  %8862 = vset.pattern.permute.xlu1 %v9477_v1  ;;  %v9808_v6 = vadd.s32 8, %v9798_v4  ;;  %vm402_vm2 = vcmp.eq.s32.totalorder %v9798_v4, %v9800_v5  ;;  %v504_v18 = vsel %vm502_vm4, %v497_v13, 0  ;;  %vm12235_vm13 = vcmp.lt.s32.totalorder %v9798_v4, %v9800_v5  ;;  %s12333_s23 = sld [smem:[#allocation43_spill]]  ;;  %s12334_s6 = sld [smem:[#allocation46_spill]] }
 0x193   :  { %v9813_v7 = vsel %vm402_vm2, 1.0, %v12241_v0  ;;  %7908 = vmatpush3.bf16.msra.mxu1 %v504_v18  ;;  %s12335_s17 = sld [smem:[#allocation48_spill]]  ;;  %s12337_s27 = sld [smem:[#allocation47_spill]] }
 0x194   :  { %v9816_v8 = vld [vmem:[%s12319_s9] sm:$0xff]  ;;  %vm12228_vm3 = vcmp.eq.s32.totalorder %v9808_v6, %v9800_v5  ;;  %v9821_v9 = vmul.f32 2.0, %v9813_v7  ;;  %v9824_v11 = vld [vmem:[%s12319_s9 + $0x8] sm:$0xf]  ;;  %7919 = vmatprep.subr.bf16.mxu1 %v12241_v0  ;;  %vm701_vm14 = vcmp.lt.s32.totalorder %v9808_v6, %v9800_v5  ;;  %s12340_s26 = sld [smem:[#allocation50_spill]]  ;;  %s12341_s28 = sld [smem:[#allocation49_spill]] }
 0x195   :  { %v9830_v12 = vsel %vm12228_vm3, 1.0, %v12241_v0  ;;  %v393_v14 = vld [vmem:[%s12320_s18] sm:$0xff]  ;;  %v394_v15 = vld [vmem:[%s12320_s18 + $0x8] sm:$0xf]  ;;  %vm711_vm3 = vcmp.lt.s32.totalorder %v9800_v5, %v9808_v6  ;;  %s12342_s1 = sld [smem:[#allocation53_spill]]  ;;  %s12345_s30 = sld [smem:[#allocation54_spill]] }
 0x196   :  { %v409_v16 = vmul.f32 2.0, %v9830_v12  ;;  %v410_v17 = vadd.f32 %v9821_v9, %v9816_v8  ;;  %v496_v19 = vpack.c.bf16 %v394_v15, %v393_v14  ;;  %v605_v54 = vld [vmem:[%s12321_s3] sm:$0xff]  ;;  %v606_v55 = vld [vmem:[%s12321_s3 + $0x8] sm:$0xff]  ;;  %s12346_s2 = sld [smem:[#allocation52_spill]]  ;;  %s12347_s8 = sld [smem:[#allocation51_spill]] }
 0x197   :  { %v607_v56 = vmul.f32 %v605_v54, %v605_v54  ;;  %v608_v57 = vmul.f32 %v606_v55, %v606_v55  ;;  %v625_v61 = vpack.c.bf16 %v606_v55, %v605_v54  ;;  %s12371_s7 = sld [smem:[#allocation55_spill]]  ;;  %s12375_s24 = sld [smem:[#allocation56_spill]] }
 0x198   :  { %v411_v20 = vadd.f32 %v409_v16, %v9824_v11  ;;  %7910 = vmatmul.mubr.msk.bf16.vlgmr.msra.gmra.mrb[0].mxu1 %vm498_vm5, %v496_v19  ;;  %v413_v37 = vsel %vm412_vm6, %v410_v17, 0.0  ;;  %s12376_s4 = sld [smem:[#allocation58_spill]]  ;;  %s12378_s25 = sld [smem:[#allocation60_spill]] }
 0x199   :  { %7921 = vmatprep.mubr.msk.bf16.mxu1 %vm12232_vm1, %v12241_v0  ;;  %v610_v58 = vsel %vm12229_vm11, %v607_v56, 0.0  ;;  %v611_v59 = vsel %vm12229_vm11, %v608_v57, 0.0  ;;  %7920 = vmatpush3.bf16.msra.mxu1 %v625_v61  ;;  %s12388_s13 = sld [smem:[#allocation59_spill]]  ;;  %s12394_s10 = sld [smem:[#allocation57_spill]] }
 0x19a   :  { %v423_v21 = vpack.c.bf16 %v411_v20, %v410_v17  ;;  %v415_v36 = vsel %vm12234_vm9, %v411_v20, 0.0  ;;  %v612_v60 = vadd.f32 %v611_v59, %v610_v58  ;;  %7931 = vmatprep.subr.bf16.mxu1 %v12241_v0  ;;  %s12395_s11 = sld [smem:[#allocation61_spill]]  ;;  %s12481_s12 = sld [smem:[#allocation62_spill]] }
 0x19b   :  { %v416_v38 = vadd.f32 %v415_v36, %v413_v37  ;;  %v808_v37 = vpack.c.bf16 %v9824_v11, %v9816_v8  ;;  %s12485_s15 = sld [smem:[#allocation65_spill]]  ;;  %s12486_s21 = sld [smem:[#allocation64_spill]] }
 0x19c   :  { %7904 = vmatmul.mubr.msk.bf16.vlgmr.msra.gmra.mrb[0].mxu0 %vm412_vm6, %v423_v21  ;;  %613 = vadd.xlane.f32.xlu1 %v612_v60  ;;  %s12488_s16 = sld [smem:[#allocation66_spill]]  ;;  %s12489_s29 = sld [smem:[#allocation67_spill]] }
 0x19d   :  { %7915 = vmatprep.mubr.msk.bf16.mxu0 %vm12232_vm1, %v12241_v0  ;;  %v417_v39 = vrot.slane %v416_v38, 4  ;;  %s9480_s18 = smov [#allocation29]  }
 0x19e   :  { %s7174_s3 = sshll.u32 %s9480_s18, 4  ;;  %s7175_s3 = int_to_ptr.vmem [resolvable:$true] %s7174_s3 }
 0x19f   :  { %v418_v40 = vadd.f32 %v417_v39, %v416_v38  ;;  %v813_v38 = vsel %vm12231_vm0, %v808_v37, 0  ;;  %p9374_p11 = scmp.lt.s32.totalorder %s7175_s3, %s7175_s3 }
 0x1a1   :  { %v419_v41 = vrot.slane %v418_v40, 2 }
 0x1a3   :  { %v420_v42 = vadd.f32 %v419_v41, %v418_v40 }
 0x1a5   :  { %v421_v43 = vrot.slane %v420_v42, 1 }
 0x1a7   :  { %v422_v44 = vadd.f32 %v421_v43, %v420_v42 }
 0x1a9   :  { %vm472_vm10 = vcmp.gt.f32.partialorder %v422_v44, 0.0 }
 0x26b   :  { %v540_v22 = vpop.f32.mrb[0].mxu1 }
 0x26c   :  { %v7911_v24 = vpop.f32.mrb[1].mxu1 }
 0x26d   :  { %v543_v31 = vpop.f32.mrb[2].mxu1 }
 0x26e   :  { %v7912_v32 = vpop.f32.mrb[3].mxu1  ;;  %v548_v33 = vpack.c.bf16 %v543_v31, %v540_v22 }
 0x26f   :  { %v465_v23 = vpop.f32.mrb[0].mxu0 }
 0x270   :  { %8863 = vrsqrt.f32 %v465_v23  ;;  %v7905_v25 = vpop.f32.mrb[1].mxu0  ;;  %vm475_vm7 = vcmp.gt.f32.partialorder %v465_v23, 0.0  ;;  %v560_v35 = vsel %vm12231_vm0, %v548_v33, 0 }
 0x271   :  { %v468_v26 = vpop.f32.mrb[2].mxu0  ;;  %7914 = vmatpush3.bf16.msra.mxu0 %v560_v35 }
 0x272   :  { %8865 = vrsqrt.f32 %v468_v26  ;;  %v7906_v27 = vpop.f32.mrb[3].mxu0  ;;  %vm476_vm8 = vcmp.gt.f32.partialorder %v468_v26, 0.0  ;;  %7925 = vmatprep.subr.bf16.mxu0 %v12241_v0 }
 0x273   :  { %8867 = vrsqrt.f32 %v422_v44 }
 0x27a   :  { %v8864_v28 = vpop.eup %8863 }
 0x27b   :  { %v479_v29 = vsel %vm475_vm7, %v8864_v28, 0.0 }
 0x27c   :  { %v8866_v30 = vpop.eup %8865  ;;  %483 = vperm.xlu0 %8861, %v479_v29  }
 0x27d   :  { %v480_v34 = vsel %vm476_vm8, %v8866_v30, 0.0  ;;  %v8868_v46 = vpop.eup %8867 }
 0x27e   :  { %v474_v48 = vsel %vm472_vm10, %v8868_v46, 0.0 }
 0x280   :  { %488 = vperm.xlu0 %8861, %v480_v34  }
 0x2fb   :  { %v484_v45 = vpop.permute.xlu0 %483 }
 0x2fc   :  { %v491_v47 = vmul.f32 %v484_v45, %v410_v17 }
 0x2fe   :  { %v493_v51 = vmul.f32 %v491_v47, %v474_v48 }
 0x2ff   :  { %v489_v49 = vpop.permute.xlu0 %488 }
 0x300   :  { %v492_v50 = vmul.f32 %v489_v49, %v411_v20  ;;  %v614_v20 = vpop.xlane.xlu1 %613 }
 0x301   :  { %v615_v21 = vrot.slane %v614_v20, 4 }
 0x302   :  { %v494_v52 = vmul.f32 %v492_v50, %v474_v48 }
 0x303   :  { %v616_v22 = vadd.f32 %v615_v21, %v614_v20 }
 0x304   :  { %v9848_v53 = vpack.c.bf16 %v494_v52, %v493_v51 }
 0x305   :  { %v617_v23 = vrot.slane %v616_v22, 2 }
 0x306   :  { %7916 = vmatmul.mubr.msk.bf16.vlgmr.msra.gmra.mrb[4].mxu0 %vm412_vm6, %v9848_v53 }
 0x307   :  { %7927 = vmatprep.mubr.msk.bf16.mxu0 %vm12232_vm1, %v12241_v0  ;;  %v618_v24 = vadd.f32 %v617_v23, %v616_v22 }
 0x309   :  { %v619_v25 = vrot.slane %v618_v24, 1 }
 0x30b   :  { %v620_v26 = vadd.f32 %v619_v25, %v618_v24 }
 0x30d   :  { %8787 = vpush %v620_v26 }
 0x33e   :  { %s8788_s22 = spop %8787 }
 0x33f   :  { %v622_v27 = vstv %s8788_s22  ;;  %s9373_s22 = scalar_lea.vmem %s7175_s3, 32 }
 0x340   :  { %8869 = vrsqrt.f32 %v622_v27 }
 0x34a   :  { %v8870_v28 = vpop.eup %8869 }
 0x3d9   :  { %v596_v63 = vpop.f32.mrb[4].mxu0 }
 0x3da   :  { %v9859_v3 = vadd.f32 %v7241_v62, %v596_v63  ;;  %v7917_v10 = vpop.f32.mrb[5].mxu0 }
 0x3db   :  { %v599_v13 = vpop.f32.mrb[6].mxu0 }
 0x3dc   :  { %v9861_v14 = vadd.f32 %v7241_v62, %v599_v13  ;;  %v7918_v15 = vpop.f32.mrb[7].mxu0  ;;  %v603_v16 = vmax.f32 %v9859_v3, 0.0 }
 0x3de   :  { %v604_v17 = vmax.f32 %v9861_v14, 0.0 }
 0x3e0   :  { %v624_v18 = vpack.c.bf16 %v604_v17, %v603_v16 }
 0x3e2   :  { %7922 = vmatmul.mubr.msk.bf16.vlgmr.msra.gmra.mrb[4].mxu1 %vm12230_vm12, %v624_v18  ;;  %v765_v19 = vsel %vm12231_vm0, %v624_v18, 0 }
 0x3e3   :  { %7926 = vmatpush3.bf16.msra.mxu0 %v765_v19  ;;  %7933 = vmatprep.mubr.msk.bf16.mxu1 %vm12232_vm1, %v12241_v0 }
 0x3e4   :  { %7937 = vmatprep.subr.bf16.mxu0 %v12241_v0  ;;  %7932 = vmatpush3.bf16.msra.mxu1 %v813_v38 }
 0x3e5   :  { %7943 = vmatprep.subr.bf16.mxu1 %v12241_v0 }
 0x4b5   :  { %v664_v29 = vpop.f32.mrb[4].mxu1 }
 0x4b6   :  { %v671_v30 = vmul.f32 %v8870_v28, %v664_v29  ;;  %v7923_v31 = vpop.f32.mrb[5].mxu1 }
 0x4b7   :  { %v667_v32 = vpop.f32.mrb[6].mxu1 }
 0x4b8   :  { %8871 = vtanh.f32 %v671_v30  ;;  %v672_v33 = vmul.f32 %v8870_v28, %v667_v32  ;;  %v7924_v34 = vpop.f32.mrb[7].mxu1 }
 0x4ba   :  { %8873 = vtanh.f32 %v672_v33 }
 0x4c2   :  { %v8872_v35 = vpop.eup %8871 }
 0x4c3   :  { %677 = vperm.xlu1 %8862, %v8872_v35  }
 0x4c4   :  { %v8874_v36 = vpop.eup %8873 }
 0x4c5   :  { %682 = vperm.xlu0 %8861, %v8874_v36  }
 0x542   :  { %v678_v39 = vpop.permute.xlu1 %677 }
 0x543   :  { %v685_v40 = vmul.f32 %v9813_v7, %v678_v39 }
 0x544   :  { %v683_v41 = vpop.permute.xlu0 %682 }
 0x545   :  { %v686_v42 = vmul.f32 %v9830_v12, %v683_v41  ;;  %v687_v43 = vsel %vm412_vm6, %v685_v40, 0.0 }
 0x547   :  { %v688_v44 = vsel %vm12234_vm9, %v686_v42, 0.0  ;;  %vm710_vm9 = vcmp.lt.s32.totalorder %v9800_v5, %v9798_v4 }
 0x548   :  { %v689_v45 = vadd.f32 %v688_v44, %v687_v43 }
 0x54a   :  { %v690_v46 = vrot.slane %v689_v45, 4 }
 0x54c   :  { %v691_v47 = vadd.f32 %v690_v46, %v689_v45  ;;  %v977_v45 = vld [vmem:[%s12325_s20] sm:$0xff]  ;;  %v978_v46 = vld [vmem:[%s12325_s20 + $0x8] sm:$0xff] }
 0x54e   :  { %v692_v48 = vrot.slane %v691_v47, 2 }
 0x550   :  { %v693_v8 = vadd.f32 %v692_v48, %v691_v47  ;;  %v980_v48 = vpack.c.bf16 %v978_v46, %v977_v45 }
 0x552   :  { %v694_v11 = vrot.slane %v693_v8, 1 }
 0x554   :  { %v695_v49 = vadd.f32 %v694_v11, %v693_v8 }
 0x556   :  { %vm696_vm15 = vcmp.gt.f32.partialorder %v678_v39, %v695_v49  ;;  %vm698_vm2 = vcmp.eq.f32.partialorder %v678_v39, %v695_v49  ;;  %vm699_vm4 = vcmp.eq.f32.partialorder %v683_v41, %v695_v49  ;;  %vm697_vm5 = vcmp.gt.f32.partialorder %v683_v41, %v695_v49 }
 0x557   :  { %vm702_vm7 = vmand %vm698_vm2, %vm12235_vm13  ;;  %vm709_vm10 = vcmp.eq.f32.partialorder %v695_v49, %v683_v41  ;;  %vm707_vm12 = vcmp.gt.f32.partialorder %v695_v49, %v683_v41  ;;  %vm708_vm1 = vcmp.eq.f32.partialorder %v695_v49, %v678_v39  ;;  %vm706_vm13 = vcmp.gt.f32.partialorder %v695_v49, %v678_v39 }
 0x558   :  { %vm703_vm8 = vmand %vm699_vm4, %vm701_vm14  ;;  %vm12322_vm14 = vcmask 93184  }
 0x559   :  { %vm704_vm11 = vmor %vm696_vm15, %vm702_vm7  ;;  %vm12327_vm7 = vcmask 130048  }
 0x55a   :  { %vm705_vm0 = vmor %vm697_vm5, %vm703_vm8  ;;  %v716_v50 = vsel %vm704_vm11, 1, %v9477_v1  ;;  %vm12236_vm8 = vcmask 1042432  }
 0x55b   :  { %v717_v51 = vsel %vm705_vm0, 1, %v9477_v1  ;;  %v718_v52 = vsel %vm412_vm6, %v716_v50, 0  ;;  %vm713_vm2 = vmand %vm709_vm10, %vm711_vm3  ;;  %vm917_vm10 = vcmask 48128  }
 0x55c   :  { %v719_v54 = vsel %vm12322_vm14, %v717_v51, 0  ;;  %vm715_vm4 = vmor %vm707_vm12, %vm713_vm2 }
 0x55d   :  { %v720_v55 = vadd.s32 %v719_v54, %v718_v52  ;;  %v728_v56 = vsel %vm715_vm4, 1, %v9477_v1  ;;  %vm712_vm11 = vmand %vm708_vm1, %vm710_vm9  ;;  %vm12324_vm1 = vmmov 0  }
 0x55e   :  { %vm12323_vm15 = vmmov %vm12322_vm14  ;;  %vm12329_vm14 = vcmask 7168  }
 0x55f   :  { %v742_v57 = vsel %vm12323_vm15, %v728_v56, 0  ;;  %vm714_vm5 = vmor %vm706_vm13, %vm712_vm11  ;;  %v721_v58 = vrot.slane %v720_v55, 4  ;;  %vm12326_vm13 = vcmask 1045504   ;;  %vm908_vm11 = vcmask 46080  }
 0x560   :  { %v744_v59 = vshrl.u32 %v742_v57, 16  ;;  %v727_v60 = vsel %vm714_vm5, 1, %v9477_v1  ;;  %v743_v21 = vand.u32 65535, %v742_v57  ;;  %v922_v57 = vsel %vm12236_vm8, 1065369472, %v9477_v1  ;;  %vm12330_vm4 = vmmov %vm12329_vm14 }
 0x561   :  { %v729_v61 = vsel %vm412_vm6, %v727_v60, 0  ;;  %v722_v62 = vadd.s32 %v721_v58, %v720_v55  ;;  %vm12331_vm5 = vmmov %vm12327_vm7 }
 0x562   :  { %v746_v63 = vcvt.s32.f32 %v744_v59  ;;  %v731_v10 = vshrl.u32 %v729_v61, 16  ;;  %v730_v18 = vand.u32 65535, %v729_v61  ;;  %v745_v24 = vcvt.s32.f32 %v743_v21 }
 0x563   :  { %v723_v13 = vrot.slane %v722_v62, 2 }
 0x564   :  { %749 = vadd.xlane.f32.xlu1 %v746_v63  ;;  %v733_v15 = vcvt.s32.f32 %v731_v10  ;;  %v732_v20 = vcvt.s32.f32 %v730_v18 }
 0x565   :  { %v724_v19 = vadd.s32 %v723_v13, %v722_v62 }
 0x566   :  { %736 = vadd.xlane.f32.xlu0 %v733_v15 }
 0x567   :  { %v725_v22 = vrot.slane %v724_v19, 1 }
 0x569   :  { %v726_v23 = vadd.s32 %v725_v22, %v724_v19 }
 0x56a   :  { %734 = vadd.xlane.f32.xlu0 %v732_v20 }
 0x56b   :  { %vm755_vm0 = vcmp.eq.s32.totalorder %v9798_v4, %v726_v23 }
 0x56c   :  { %v7244_v25 = vsel %vm755_vm0, 1.0, %v12241_v0 }
 0x56d   :  { %v807_v26 = vpack.c.bf16 %v7244_v25, %v7244_v25  ;;  %v760_v27 = vmul.f32 %v7244_v25, %v695_v49 }
 0x56e   :  { %747 = vadd.xlane.f32.xlu0 %v745_v24 }
 0x56f   :  { %7934 = vmatmul.mubr.msk.bf16.vlgmr.msra.gmra.mrb[8].mxu1 %vm412_vm6, %v807_v26  ;;  %v761_v28 = vpack.c.bf16 %v760_v27, %v760_v27  ;;  %v1080_v27 = vld [vmem:[%s12328_s14] sm:$0xff] }
 0x570   :  { %7945 = vmatprep.mubr.msk.bf16.mxu1 %vm12324_vm1, %v12241_v0  ;;  %7944 = vmatpush3.bf16.msra.mxu1 %v922_v57 }
 0x571   :  { %7928 = vmatmul.mubr.msk.bf16.vlgmr.msra.gmra.mrb[8].mxu0 %vm412_vm6, %v761_v28  ;;  %7955 = vmatprep.subr.bf16.mxu1 %v12241_v0  ;;  %v1081_v28 = vld [vmem:[%s12328_s14 + $0x8] sm:$0xff] }
 0x572   :  { %7939 = vmatprep.mubr.msk.bf16.mxu0 %vm12324_vm1, %v12241_v0 }
 0x5f1   :  { %v750_v31 = vpop.xlane.xlu1 %749 }
 0x5f2   :  { %v752_v33 = vcvt.f32.s32 %v750_v31  ;;  %v1099_v31 = vpack.c.bf16 %v1081_v28, %v1080_v27 }
 0x5f3   :  { %v737_v29 = vpop.xlane.xlu0 %736 }
 0x5f4   :  { %v739_v30 = vcvt.f32.s32 %v737_v29  ;;  %v753_v38 = vshll.u32 %v752_v33, 16  ;;  %v1082_v29 = vmul.f32 %v1080_v27, %v1080_v27 }
 0x5f6   :  { %v740_v34 = vshll.u32 %v739_v30, 16  ;;  %v1083_v30 = vmul.f32 %v1081_v28, %v1081_v28 }
 0x5f7   :  { %v735_v32 = vpop.xlane.xlu0 %734 }
 0x5f8   :  { %v738_v35 = vcvt.f32.s32 %v735_v32  ;;  %v1084_v32 = vsel %vm12329_vm14, %v1082_v29, 0.0  ;;  %v1085_v33 = vsel %vm12330_vm4, %v1083_v30, 0.0 }
 0x5fa   :  { %v741_v36 = vadd.s32 %v740_v34, %v738_v35  ;;  %v1086_v34 = vadd.f32 %v1085_v33, %v1084_v32 }
 0x5fb   :  { %v748_v37 = vpop.xlane.xlu0 %747 }
 0x5fc   :  { %v751_v39 = vcvt.f32.s32 %v748_v37  ;;  %vm758_vm3 = vcmp.eq.s32.totalorder %v9800_v5, %v741_v36  ;;  %1087 = vadd.xlane.f32.xlu1 %v1086_v34 }
 0x5fd   :  { %v7247_v41 = vsel %vm758_vm3, 1.0, %v12241_v0 }
 0x5fe   :  { %v754_v40 = vadd.s32 %v753_v38, %v751_v39 }
 0x600   :  { %vm759_vm12 = vcmp.eq.s32.totalorder %v9800_v5, %v754_v40 }
 0x601   :  { %v7248_v42 = vsel %vm759_vm12, 1.0, %v12241_v0 }
 0x602   :  { %v9916_v43 = vpack.c.bf16 %v7248_v42, %v7247_v41 }
 0x604   :  { %v865_v44 = vsel %vm12326_vm13, %v9916_v43, 0  ;;  %vm12332_vm13 = vcmp.lt.s32.totalorder %v9798_v4, %v9800_v5 }
 0x605   :  { %7938 = vmatpush3.bf16.msra.mxu0 %v865_v44 }
 0x606   :  { %7949 = vmatprep.subr.bf16.mxu0 %v12241_v0 }
 0x642   :  { %v849_v47 = vpop.f32.mrb[8].mxu1 }
 0x643   :  { %v855_v8 = vpack.c.bf16 %v849_v47, %v849_v47  ;;  %v7935_v11 = vpop.f32.mrb[9].mxu1 }
 0x644   :  { %v801_v49 = vpop.f32.mrb[8].mxu0  ;;  %v852_v50 = vpop.f32.mrb[10].mxu1 }
 0x645   :  { %v7929_v51 = vpop.f32.mrb[9].mxu0  ;;  %v7936_v52 = vpop.f32.mrb[11].mxu1  ;;  %7940 = vmatmul.mubr.msk.bf16.vlgmr.msra.gmra.mrb[12].mxu0 %vm412_vm6, %v855_v8  ;;  %v979_v56 = vpack.c.bf16 %v801_v49, %v801_v49 }
 0x646   :  { %v804_v54 = vpop.f32.mrb[10].mxu0  ;;  %7950 = vmatpush3.bf16.msra.mxu0 %v980_v48  ;;  %7951 = vmatprep.mubr.msk.bf16.mxu0 %vm12324_vm1, %v12241_v0 }
 0x647   :  { %v7930_v55 = vpop.f32.mrb[11].mxu0  ;;  %7961 = vmatprep.subr.bf16.mxu0 %v12241_v0 }
 0x648   :  { %v7252_v55 = vld [vmem:[#allocation7] ss:$0 sm:$0xff] }
 0x64d   :  { %7952 = vmatmul.mubr.msk.bf16.vlgmr.msra.gmra.mrb[16].mxu0 %vm12327_vm7, %v979_v56 }
 0x64e   :  { %7963 = vmatprep.mubr.msk.bf16.mxu0 %vm12324_vm1, %v12241_v0  ;;  %7962 = vmatpush3.bf16.msra.mxu0 %v1099_v31 }
 0x64f   :  { %7973 = vmatprep.subr.bf16.mxu0 %v12241_v0 }
 0x689   :  { %v1088_v8 = vpop.xlane.xlu1 %1087 }
 0x68a   :  { %v1089_v11 = vrot.slane %v1088_v8, 4 }
 0x68c   :  { %v1090_v49 = vadd.f32 %v1089_v11, %v1088_v8 }
 0x68e   :  { %v1091_v50 = vrot.slane %v1090_v49, 2 }
 0x690   :  { %v1092_v51 = vadd.f32 %v1091_v50, %v1090_v49 }
 0x692   :  { %v1093_v52 = vrot.slane %v1092_v51, 1 }
 0x694   :  { %v1094_v54 = vadd.f32 %v1093_v52, %v1092_v51 }
 0x696   :  { %8789 = vpush %v1094_v54 }
 0x6c7   :  { %s8790_s0 = spop %8789 }
 0x718   :  { %v9933_v58 = vpop.f32.mrb[12].mxu0 }
 0x719   :  { %v907_v59 = vadd.f32 %v9933_v58, %v9821_v9  ;;  %v7941_v60 = vpop.f32.mrb[13].mxu0 }
 0x71a   :  { %v904_v61 = vpop.f32.mrb[14].mxu0 }
 0x71b   :  { %v916_v62 = vpack.c.bf16 %v907_v59, %v907_v59  ;;  %v7942_v63 = vpop.f32.mrb[15].mxu0  ;;  %v909_v35 = vsel %vm908_vm11, %v907_v59, 0.0 }
 0x71c   :  { %v910_v36 = vrot.slane %v909_v35, 4  ;;  %v1240_v63 = vpack.c.bf16 %v9933_v58, %v9933_v58  ;;  %v1096_v58 = vstv %s8790_s0 }
 0x71d   :  { %7946 = vmatmul.mubr.msk.bf16.vlgmr.msra.gmra.mrb[12].mxu1 %vm917_vm10, %v916_v62 }
 0x71e   :  { %7957 = vmatprep.mubr.msk.bf16.mxu1 %vm12324_vm1, %v12241_v0  ;;  %v911_v37 = vadd.f32 %v910_v36, %v909_v35 }
 0x720   :  { %v1018_v10 = vpop.f32.mrb[16].mxu0  ;;  %v912_v38 = vrot.slane %v911_v37, 2 }
 0x721   :  { %v1025_v13 = vpack.c.bf16 %v1018_v10, %v1018_v10  ;;  %v7953_v15 = vpop.f32.mrb[17].mxu0 }
 0x722   :  { %v1021_v18 = vpop.f32.mrb[18].mxu0  ;;  %v913_v39 = vadd.f32 %v912_v38, %v911_v37 }
 0x723   :  { %v7954_v19 = vpop.f32.mrb[19].mxu0  ;;  %v1037_v20 = vsel %vm12236_vm8, %v1025_v13, 0  ;;  %v1245_v13 = vsel %vm12236_vm8, %v1240_v63, 0  ;;  %v1409_v63 = vld [vmem:[%s12333_s23] sm:$0xff] }
 0x724   :  { %7956 = vmatpush3.bf16.msra.mxu1 %v1037_v20  ;;  %v914_v40 = vrot.slane %v913_v39, 1 }
 0x725   :  { %7967 = vmatprep.subr.bf16.mxu1 %v12241_v0 }
 0x726   :  { %v915_v41 = vadd.f32 %v914_v40, %v913_v39 }
 0x728   :  { %vm964_vm15 = vcmp.gt.f32.partialorder %v915_v41, 0.0 }
 0x7f0   :  { %v958_v21 = vpop.f32.mrb[12].mxu1 }
 0x7f1   :  { %8875 = vrsqrt.f32 %v958_v21  ;;  %v7947_v22 = vpop.f32.mrb[13].mxu1  ;;  %vm967_vm2 = vcmp.gt.f32.partialorder %v958_v21, 0.0 }
 0x7f2   :  { %v961_v23 = vpop.f32.mrb[14].mxu1  ;;  %8877 = vrsqrt.f32 %v915_v41 }
 0x7f3   :  { %v7948_v24 = vpop.f32.mrb[15].mxu1  ;;  %8879 = vrsqrt.f32 %v1096_v58 }
 0x7fb   :  { %v8876_v25 = vpop.eup %8875 }
 0x7fc   :  { %v969_v26 = vsel %vm967_vm2, %v8876_v25, 0.0  ;;  %v8878_v42 = vpop.eup %8877 }
 0x7fd   :  { %972 = vperm.xlu0 %8861, %v969_v26   ;;  %v966_v46 = vsel %vm964_vm15, %v8878_v42, 0.0  ;;  %v8880_v18 = vpop.eup %8879 }
 0x87c   :  { %v973_v44 = vpop.permute.xlu0 %972 }
 0x87d   :  { %v975_v45 = vmul.f32 %v973_v44, %v907_v59 }
 0x87f   :  { %v976_v47 = vmul.f32 %v975_v45, %v966_v46 }
 0x881   :  { %v9948_v48 = vpack.c.bf16 %v976_v47, %v976_v47 }
 0x883   :  { %7958 = vmatmul.mubr.msk.bf16.vlgmr.msra.gmra.mrb[16].mxu1 %vm917_vm10, %v9948_v48 }
 0x884   :  { %7969 = vmatprep.mubr.msk.bf16.mxu1 %vm12324_vm1, %v12241_v0 }
 0x956   :  { %v1073_v56 = vpop.f32.mrb[16].mxu1 }
 0x957   :  { %v1074_v57 = vadd.f32 %v7252_v55, %v1073_v56  ;;  %v7959_v59 = vpop.f32.mrb[17].mxu1 }
 0x958   :  { %v1076_v60 = vpop.f32.mrb[18].mxu1 }
 0x959   :  { %v9954_v61 = vmax.f32 %v1074_v57, 0.0  ;;  %v7960_v62 = vpop.f32.mrb[19].mxu1 }
 0x95b   :  { %v1098_v10 = vpack.c.bf16 %v9954_v61, %v9954_v61 }
 0x95d   :  { %7964 = vmatmul.mubr.msk.bf16.vlgmr.msra.gmra.mrb[20].mxu0 %vm12331_vm5, %v1098_v10  ;;  %v1197_v15 = vsel %vm12236_vm8, %v1098_v10, 0  ;;  %v1410_v10 = vld [vmem:[%s12333_s23 + $0x8] sm:$0xff] }
 0x95e   :  { %7974 = vmatpush3.bf16.msra.mxu0 %v1245_v13  ;;  %7968 = vmatpush3.bf16.msra.mxu1 %v1197_v15  ;;  %v1412_v15 = vpack.c.bf16 %v1410_v10, %v1409_v63  ;;  %v7262_v63 = vld [vmem:[#allocation8] ss:$0 sm:$0xff] }
 0x95f   :  { %7975 = vmatprep.mubr.msk.bf16.mxu0 %vm12324_vm1, %v12241_v0  ;;  %7979 = vmatprep.subr.bf16.mxu1 %v12241_v0 }
 0x960   :  { %7985 = vmatprep.subr.bf16.mxu0 %v12241_v0 }
 0xa30   :  { %v1137_v19 = vpop.f32.mrb[20].mxu0 }
 0xa31   :  { %v1143_v20 = vmul.f32 %v8880_v18, %v1137_v19  ;;  %v7965_v21 = vpop.f32.mrb[21].mxu0 }
 0xa32   :  { %v1140_v22 = vpop.f32.mrb[22].mxu0 }
 0xa33   :  { %8881 = vtanh.f32 %v1143_v20  ;;  %v7966_v23 = vpop.f32.mrb[23].mxu0 }
 0xa3d   :  { %v8882_v24 = vpop.eup %8881 }
 0xa3e   :  { %1147 = vperm.xlu1 %8862, %v8882_v24  }
 0xabd   :  { %v1148_v25 = vpop.permute.xlu1 %1147 }
 0xabe   :  { %v1150_v26 = vmul.f32 %v9813_v7, %v1148_v25 }
 0xac0   :  { %v1151_v27 = vsel %vm908_vm11, %v1150_v26, 0.0  ;;  %v9479_v26 = vmov 65535  }
 0xac1   :  { %v1152_v28 = vrot.slane %v1151_v27, 4 }
 0xac3   :  { %v1153_v29 = vadd.f32 %v1152_v28, %v1151_v27 }
 0xac5   :  { %v1154_v30 = vrot.slane %v1153_v29, 2 }
 0xac7   :  { %v1155_v31 = vadd.f32 %v1154_v30, %v1153_v29 }
 0xac9   :  { %v1156_v32 = vrot.slane %v1155_v31, 1 }
 0xacb   :  { %v1157_v33 = vadd.f32 %v1156_v32, %v1155_v31 }
 0xacd   :  { %vm1158_vm0 = vcmp.gt.f32.partialorder %v1148_v25, %v1157_v33  ;;  %vm1159_vm3 = vcmp.eq.f32.partialorder %v1148_v25, %v1157_v33  ;;  %vm1163_vm12 = vcmp.eq.f32.partialorder %v1157_v33, %v1148_v25  ;;  %vm1162_vm2 = vcmp.gt.f32.partialorder %v1157_v33, %v1148_v25 }
 0xace   :  { %vm1160_vm7 = vmand %vm1159_vm3, %vm12332_vm13  ;;  %vm1351_vm3 = vcmask 1041408  }
 0xacf   :  { %vm1161_vm14 = vmor %vm1158_vm0, %vm1160_vm7  ;;  %vm1350_vm0 = vcmask 1040384   ;;  %vm1337_vm7 = vcmask 18432  }
 0xad0   :  { %v1166_v34 = vsel %vm1161_vm14, 1, %v9477_v1  ;;  %vm1164_vm4 = vmand %vm1163_vm12, %vm710_vm9  ;;  %v1352_v27 = vsel %vm1350_vm0, 4294967295, %v9479_v26  ;;  %vm1346_vm12 = vcmask 23552   ;;  %vm12344_vm0 = vcmask 93184  }
 0xad1   :  { %v1167_v35 = vsel %vm908_vm11, %v1166_v34, 0  ;;  %vm1165_vm15 = vmor %vm1162_vm2, %vm1164_vm4  ;;  %v1353_v28 = vsel %vm1351_vm3, %v1352_v27, 0  ;;  %vm12339_vm4 = vcmask 1045504  }
 0xad2   :  { %v1168_v36 = vrot.slane %v1167_v35, 4  ;;  %v1174_v37 = vsel %vm1165_vm15, 1, %v9477_v1  ;;  %v1354_v29 = vand.u32 1065369472, %v1353_v28  ;;  %vm12336_vm14 = vmmov %vm12331_vm5 }
 0xad3   :  { %v1175_v38 = vsel %vm908_vm11, %v1174_v37, 0 }
 0xad4   :  { %v1169_v39 = vadd.s32 %v1168_v36, %v1167_v35  ;;  %v1177_v40 = vshrl.u32 %v1175_v38, 16  ;;  %v1176_v41 = vand.u32 65535, %v1175_v38 }
 0xad6   :  { %v1170_v42 = vrot.slane %v1169_v39, 2  ;;  %v1179_v44 = vcvt.s32.f32 %v1177_v40  ;;  %v1178_v45 = vcvt.s32.f32 %v1176_v41 }
 0xad8   :  { %v1171_v46 = vadd.s32 %v1170_v42, %v1169_v39  ;;  %1182 = vadd.xlane.f32.xlu0 %v1179_v44  ;;  %1180 = vadd.xlane.f32.xlu1 %v1178_v45 }
 0xada   :  { %v1172_v47 = vrot.slane %v1171_v46, 1 }
 0xadc   :  { %v1173_v8 = vadd.s32 %v1172_v47, %v1171_v46 }
 0xade   :  { %vm1188_vm9 = vcmp.eq.s32.totalorder %v9798_v4, %v1173_v8 }
 0xadf   :  { %v7255_v11 = vsel %vm1188_vm9, 1.0, %v12241_v0 }
 0xae0   :  { %v1239_v49 = vpack.c.bf16 %v7255_v11, %v7255_v11  ;;  %v1192_v50 = vmul.f32 %v7255_v11, %v1157_v33 }
 0xae2   :  { %7976 = vmatmul.mubr.msk.bf16.vlgmr.msra.gmra.mrb[24].mxu0 %vm917_vm10, %v1239_v49  ;;  %v1193_v1 = vpack.c.bf16 %v1192_v50, %v1192_v50 }
 0xae3   :  { %7987 = vmatprep.mubr.msk.bf16.mxu0 %vm12324_vm1, %v12241_v0  ;;  %7986 = vmatpush3.bf16.msra.mxu0 %v1354_v29 }
 0xae4   :  { %7970 = vmatmul.mubr.msk.bf16.vlgmr.msra.gmra.mrb[20].mxu1 %vm917_vm10, %v1193_v1  ;;  %7997 = vmatprep.subr.bf16.mxu0 %v12241_v0 }
 0xae5   :  { %7981 = vmatprep.mubr.msk.bf16.mxu1 %vm12324_vm1, %v12241_v0 }
 0xb65   :  { %v1183_v51 = vpop.xlane.xlu0 %1182  ;;  %v1181_v52 = vpop.xlane.xlu1 %1180 }
 0xb66   :  { %v1185_v54 = vcvt.f32.s32 %v1183_v51  ;;  %v1184_v56 = vcvt.f32.s32 %v1181_v52 }
 0xb68   :  { %v1186_v55 = vshll.u32 %v1185_v54, 16 }
 0xb6a   :  { %v1187_v57 = vadd.s32 %v1186_v55, %v1184_v56 }
 0xb6c   :  { %vm1191_vm11 = vcmp.eq.s32.totalorder %v9800_v5, %v1187_v57 }
 0xb6d   :  { %v7258_v59 = vsel %vm1191_vm11, 1.0, %v12241_v0  ;;  %vm12343_vm11 = vmmov %vm12331_vm5 }
 0xb6e   :  { %v9989_v60 = vpack.c.bf16 %v7258_v59, %v7258_v59 }
 0xb70   :  { %v1295_v62 = vsel %vm12236_vm8, %v9989_v60, 0 }
 0xb71   :  { %7980 = vmatpush3.bf16.msra.mxu1 %v1295_v62 }
 0xb72   :  { %7991 = vmatprep.subr.bf16.mxu1 %v12241_v0 }
 0xbb5   :  { %v1281_v13 = vpop.f32.mrb[24].mxu0 }
 0xbb6   :  { %v1287_v58 = vpack.c.bf16 %v1281_v13, %v1281_v13  ;;  %v7977_v18 = vpop.f32.mrb[25].mxu0 }
 0xbb7   :  { %v1233_v19 = vpop.f32.mrb[20].mxu1  ;;  %v1284_v20 = vpop.f32.mrb[26].mxu0 }
 0xbb8   :  { %v7971_v21 = vpop.f32.mrb[21].mxu1  ;;  %v7978_v22 = vpop.f32.mrb[27].mxu0  ;;  %7982 = vmatmul.mubr.msk.bf16.vlgmr.msra.gmra.mrb[24].mxu1 %vm917_vm10, %v1287_v58  ;;  %v1411_v25 = vpack.c.bf16 %v1233_v19, %v1233_v19 }
 0xbb9   :  { %v1236_v23 = vpop.f32.mrb[22].mxu1  ;;  %7992 = vmatpush3.bf16.msra.mxu1 %v1412_v15  ;;  %7993 = vmatprep.mubr.msk.bf16.mxu1 %vm12324_vm1, %v12241_v0  ;;  %v1559_v22 = vld [vmem:[%s12334_s6] sm:$0xff] }
 0xbba   :  { %v7972_v24 = vpop.f32.mrb[23].mxu1  ;;  %8003 = vmatprep.subr.bf16.mxu1 %v12241_v0  ;;  %v1560_v23 = vld [vmem:[%s12334_s6 + $0x8] sm:$0xff] }
 0xbbb   :  { %v1562_v24 = vpack.c.bf16 %v1560_v23, %v1559_v22 }
 0xbc0   :  { %7994 = vmatmul.mubr.msk.bf16.vlgmr.msra.gmra.mrb[28].mxu1 %vm12331_vm5, %v1411_v25 }
 0xbc1   :  { %8005 = vmatprep.mubr.msk.bf16.mxu1 %vm12324_vm1, %v12241_v0 }
 0xc8b   :  { %v1331_v30 = vpop.f32.mrb[24].mxu1 }
 0xc8c   :  { %v1332_v31 = vadd.f32 %v1331_v30, %v9821_v9  ;;  %v7983_v32 = vpop.f32.mrb[25].mxu1 }
 0xc8d   :  { %v1334_v33 = vpop.f32.mrb[26].mxu1 }
 0xc8e   :  { %v1345_v34 = vpack.c.bf16 %v1332_v31, %v1332_v31  ;;  %v7984_v35 = vpop.f32.mrb[27].mxu1  ;;  %v1338_v8 = vsel %vm1337_vm7, %v1332_v31, 0.0  ;;  %vm12350_vm7 = vmmov %vm12331_vm5 }
 0xc8f   :  { %v1339_v11 = vrot.slane %v1338_v8, 4 }
 0xc90   :  { %7988 = vmatmul.mubr.msk.bf16.vlgmr.msra.gmra.mrb[28].mxu0 %vm1346_vm12, %v1345_v34 }
 0xc91   :  { %7999 = vmatprep.mubr.msk.bf16.mxu0 %vm12324_vm1, %v12241_v0  ;;  %v1340_v49 = vadd.f32 %v1339_v11, %v1338_v8 }
 0xc93   :  { %v1450_v36 = vpop.f32.mrb[28].mxu1  ;;  %v1341_v50 = vrot.slane %v1340_v49, 2 }
 0xc94   :  { %v1457_v37 = vpack.c.bf16 %v1450_v36, %v1450_v36  ;;  %v7995_v38 = vpop.f32.mrb[29].mxu1 }
 0xc95   :  { %v1453_v39 = vpop.f32.mrb[30].mxu1  ;;  %v1342_v1 = vadd.f32 %v1341_v50, %v1340_v49 }
 0xc96   :  { %v1469_v40 = vand.u32 %v1457_v37, %v1353_v28  ;;  %v7996_v41 = vpop.f32.mrb[31].mxu1 }
 0xc97   :  { %v1343_v51 = vrot.slane %v1342_v1, 1 }
 0xc98   :  { %7998 = vmatpush3.bf16.msra.mxu0 %v1469_v40 }
 0xc99   :  { %8009 = vmatprep.subr.bf16.mxu0 %v12241_v0  ;;  %v1344_v52 = vadd.f32 %v1343_v51, %v1342_v1  ;;  %v8993_v51 = vld [vmem:[%s12319_s9] sm:$0xff] }
 0xc9b   :  { %vm1396_vm2 = vcmp.gt.f32.partialorder %v1344_v52, 0.0 }
 0xd63   :  { %v1390_v9 = vpop.f32.mrb[28].mxu0 }
 0xd64   :  { %8883 = vrsqrt.f32 %v1390_v9  ;;  %v7989_v42 = vpop.f32.mrb[29].mxu0  ;;  %vm1399_vm13 = vcmp.gt.f32.partialorder %v1390_v9, 0.0 }
 0xd65   :  { %v1393_v44 = vpop.f32.mrb[30].mxu0  ;;  %8885 = vrsqrt.f32 %v1344_v52  ;;  %v10048_v52 = vadd.f32 %v8993_v51, %v9813_v7 }
 0xd66   :  { %v7990_v45 = vpop.f32.mrb[31].mxu0 }
 0xd67   :  { %v1708_v45 = vld [vmem:[%s12337_s27 + $0x8] sm:$0xff] }
 0xd6e   :  { %v8884_v46 = vpop.eup %8883 }
 0xd6f   :  { %v1401_v47 = vsel %vm1399_vm13, %v8884_v46, 0.0  ;;  %v8886_v54 = vpop.eup %8885  ;;  %vm12349_vm13 = vmmov %vm12331_vm5 }
 0xd70   :  { %1404 = vperm.xlu0 %8861, %v1401_v47   ;;  %v1398_v57 = vsel %vm1396_vm2, %v8886_v54, 0.0  ;;  %v8994_v54 = vld [vmem:[%s12319_s9 + $0x8] sm:$0xf]  ;;  %vm12351_vm2 = vmmov %vm12331_vm5  ;;  %s12490_s9 = sld [smem:[#allocation63_spill]] }
 0xdef   :  { %v1405_v55 = vpop.permute.xlu0 %1404 }
 0xdf0   :  { %v1407_v56 = vmul.f32 %v1405_v55, %v1332_v31  ;;  %v10052_v55 = vadd.f32 %v8994_v54, %v9830_v12 }
 0xdf2   :  { %v1408_v59 = vmul.f32 %v1407_v56, %v1398_v57  ;;  %v1818_v3 = vpack.c.bf16 %v10052_v55, %v10048_v52 }
 0xdf4   :  { %v1456_v62 = vpack.c.bf16 %v1408_v59, %v1408_v59 }
 0xdf6   :  { %8000 = vmatmul.mubr.msk.bf16.vlgmr.msra.gmra.mrb[32].mxu0 %vm1346_vm12, %v1456_v62 }
 0xdf7   :  { %8011 = vmatprep.mubr.msk.bf16.mxu0 %vm12324_vm1, %v12241_v0  ;;  %8010 = vmatpush3.bf16.msra.mxu0 %v1562_v24 }
 0xdf8   :  { %8021 = vmatprep.subr.bf16.mxu0 %v12241_v0 }
 0xec9   :  { %v1505_v10 = vpop.f32.mrb[32].mxu0 }
 0xeca   :  { %v1506_v13 = vadd.f32 %v7262_v63, %v1505_v10  ;;  %v8001_v15 = vpop.f32.mrb[33].mxu0 }
 0xecb   :  { %v1508_v58 = vpop.f32.mrb[34].mxu0 }
 0xecc   :  { %v1511_v18 = vmax.f32 %v1506_v13, 0.0  ;;  %v8002_v19 = vpop.f32.mrb[35].mxu0 }
 0xecd   :  { %v1886_v19 = vld [vmem:[%s12340_s26] sm:$0xff] }
 0xece   :  { %v1512_v20 = vpack.c.bf16 %v1511_v18, %v1511_v18 }
 0xed0   :  { %v1516_v21 = vand.u32 %v1512_v20, %v1353_v28 }
 0xed2   :  { %8004 = vmatpush3.bf16.msra.mxu1 %v1516_v21  ;;  %v7270_v21 = vld [vmem:[%s12341_s28] ss:$0 sm:$0xff] }
 0xed3   :  { %8015 = vmatprep.subr.bf16.mxu1 %v12241_v0 }
 0xed5   :  { %8006 = vmatmul.mubr.msk.bf16.vlgmr.msra.gmra.mrb[32].mxu1 %vm1346_vm12, %v9989_v60  ;;  %vm12348_vm12 = vmmov %vm12339_vm4 }
 0xed6   :  { %8017 = vmatprep.mubr.msk.bf16.mxu1 %vm12324_vm1, %v12241_v0 }
 0xfa8   :  { %v1552_v25 = vpop.f32.mrb[32].mxu1 }
 0xfa9   :  { %v1558_v27 = vadd.f32 %v1552_v25, %v9954_v61  ;;  %v8007_v29 = vpop.f32.mrb[33].mxu1  ;;  %v7266_v61 = vld [vmem:[%s12335_s17] ss:$0 sm:$0xff] }
 0xfaa   :  { %v1555_v28 = vpop.f32.mrb[34].mxu1 }
 0xfab   :  { %v1561_v30 = vpack.c.bf16 %v1558_v27, %v1558_v27  ;;  %v8008_v31 = vpop.f32.mrb[35].mxu1 }
 0xfac   :  { %v2055_v31 = vld [vmem:[%s12342_s1 + $0x8] sm:$0xff] }
 0xfad   :  { %8012 = vmatmul.mubr.msk.bf16.vlgmr.msra.gmra.mrb[36].mxu0 %vm12336_vm14, %v1561_v30  ;;  %v2054_v30 = vld [vmem:[%s12342_s1] sm:$0xff]  ;;  %vm12352_vm14 = vmmov %vm12351_vm2 }
 0xfae   :  { %8023 = vmatprep.mubr.msk.bf16.mxu0 %vm12324_vm1, %v12241_v0 }
0x1080   :  { %v1600_v60 = vpop.f32.mrb[36].mxu0 }
0x1081   :  { %v1606_v32 = vpack.c.bf16 %v1600_v60, %v1600_v60  ;;  %v8013_v33 = vpop.f32.mrb[37].mxu0  ;;  %v2057_v60 = vpack.c.bf16 %v2055_v31, %v2054_v30 }
0x1082   :  { %v1603_v34 = vpop.f32.mrb[38].mxu0 }
0x1083   :  { %v8014_v35 = vpop.f32.mrb[39].mxu0  ;;  %v1615_v36 = vsel %vm12236_vm8, %v1606_v32, 0  ;;  %v7273_v32 = vld [vmem:[#allocation10] ss:$0 sm:$0xff] }
0x1084   :  { %8016 = vmatpush3.bf16.msra.mxu1 %v1615_v36 }
0x1085   :  { %8027 = vmatprep.subr.bf16.mxu1 %v12241_v0 }
0x1087   :  { %8018 = vmatmul.mubr.msk.bf16.vlgmr.msra.gmra.mrb[36].mxu1 %vm917_vm10, %v9948_v48  ;;  %v1707_v48 = vld [vmem:[%s12337_s27] sm:$0xff] }
0x1088   :  { %8029 = vmatprep.mubr.msk.bf16.mxu1 %vm12324_vm1, %v12241_v0  ;;  %v1710_v46 = vpack.c.bf16 %v1708_v45, %v1707_v48 }
0x108a   :  { %8028 = vmatpush3.bf16.msra.mxu1 %v1710_v46 }
0x108b   :  { %8039 = vmatprep.subr.bf16.mxu1 %v12241_v0 }
0x115a   :  { %v1651_v37 = vpop.f32.mrb[36].mxu1 }
0x115b   :  { %v1652_v38 = vadd.f32 %v7266_v61, %v1651_v37  ;;  %v8019_v39 = vpop.f32.mrb[37].mxu1 }
0x115c   :  { %v1654_v40 = vpop.f32.mrb[38].mxu1  ;;  %v1809_v39 = vsel %vm412_vm6, %v10048_v52, 0.0 }
0x115d   :  { %v1657_v41 = vmax.f32 %v1652_v38, 0.0  ;;  %v8020_v9 = vpop.f32.mrb[39].mxu1  ;;  %v1810_v40 = vsel %vm12344_vm0, %v10052_v55, 0.0 }
0x115f   :  { %v1658_v42 = vpack.c.bf16 %v1657_v41, %v1657_v41  ;;  %v1811_v41 = vadd.f32 %v1810_v40, %v1809_v39 }
0x1161   :  { %v1662_v44 = vsel %vm12236_vm8, %v1658_v42, 0  ;;  %v1812_v9 = vrot.slane %v1811_v41, 4 }
0x1162   :  { %8022 = vmatpush3.bf16.msra.mxu0 %v1662_v44 }
0x1163   :  { %8033 = vmatprep.subr.bf16.mxu0 %v12241_v0  ;;  %v1813_v42 = vadd.f32 %v1812_v9, %v1811_v41  ;;  %v10131_v9 = vadd.s32 24, %v9798_v4 }
0x1165   :  { %8024 = vmatmul.mubr.msk.bf16.vlgmr.msra.gmra.mrb[40].mxu0 %vm917_vm10, %v9916_v43  ;;  %vm12338_vm10 = vmmov %vm12331_vm5  ;;  %v1814_v44 = vrot.slane %v1813_v42, 2 }
0x1166   :  { %8035 = vmatprep.mubr.msk.bf16.mxu0 %vm12324_vm1, %v12241_v0 }
0x1167   :  { %v1815_v48 = vadd.f32 %v1814_v44, %v1813_v42  ;;  %v10138_v42 = vadd.s32 16, %v9798_v4  ;;  %v2345_v44 = vadd.s32 24, %v9800_v5 }
0x1169   :  { %v1816_v45 = vrot.slane %v1815_v48, 1 }
0x116b   :  { %v1817_v46 = vadd.f32 %v1816_v45, %v1815_v48  ;;  %v10147_v45 = vadd.s32 32, %v9798_v4 }
0x116d   :  { %vm1863_vm3 = vcmp.gt.f32.partialorder %v1817_v46, 0.0 }
0x1238   :  { %v1698_v47 = vpop.f32.mrb[40].mxu0 }
0x1239   :  { %v8025_v8 = vpop.f32.mrb[41].mxu0  ;;  %v1705_v49 = vadd.f32 %v1698_v47, %v603_v16 }
0x123a   :  { %v1701_v11 = vpop.f32.mrb[42].mxu0 }
0x123b   :  { %v1706_v50 = vadd.f32 %v1701_v11, %v604_v17  ;;  %v8026_v43 = vpop.f32.mrb[43].mxu0 }
0x123d   :  { %v1709_v1 = vpack.c.bf16 %v1706_v50, %v1705_v49 }
0x123f   :  { %8030 = vmatmul.mubr.msk.bf16.vlgmr.msra.gmra.mrb[40].mxu1 %vm12338_vm10, %v1709_v1  ;;  %vm12353_vm10 = vmmov %vm12351_vm2 }
0x1240   :  { %8040 = vmatpush3.bf16.msra.mxu1 %v9792_v2  ;;  %8041 = vmatprep.mubr.msk.bf16.mxu1 %vm12324_vm1, %v12241_v0 }
0x1241   :  { %8051 = vmatprep.subr.bf16.mxu1 %v12241_v0 }
0x1247   :  { %8042 = vmatmul.mubr.msk.bf16.vlgmr.msra.gmra.mrb[44].mxu1 %vm412_vm6, %v1818_v3 }
0x1248   :  { %8053 = vmatprep.mubr.msk.bf16.mxu1 %vm12324_vm1, %v12241_v0 }
0x1312   :  { %v1748_v14 = vpop.f32.mrb[40].mxu1 }
0x1313   :  { %v8031_v16 = vpop.f32.mrb[41].mxu1 }
0x1314   :  { %v1751_v17 = vpop.f32.mrb[42].mxu1 }
0x1315   :  { %v1755_v56 = vpack.c.bf16 %v1751_v17, %v1748_v14  ;;  %v8032_v57 = vpop.f32.mrb[43].mxu1  ;;  %v2158_v17 = vld [vmem:[%s12345_s30] sm:$0xff] }
0x1317   :  { %v1764_v2 = vsel %vm12339_vm4, %v1755_v56, 0  ;;  %v2159_v56 = vld [vmem:[%s12345_s30 + $0x8] sm:$0xff]  ;;  %vm12354_vm4 = vmmov %vm12351_vm2 }
0x1318   :  { %8034 = vmatpush3.bf16.msra.mxu0 %v1764_v2 }
0x1319   :  { %8045 = vmatprep.subr.bf16.mxu0 %v12241_v0 }
0x131a   :  { %v1856_v59 = vpop.f32.mrb[44].mxu1 }
0x131b   :  { %8887 = vrsqrt.f32 %v1856_v59  ;;  %8036 = vmatmul.mubr.msk.bf16.vlgmr.msra.gmra.mrb[44].mxu0 %vm412_vm6, %v9848_v53  ;;  %v8043_v62 = vpop.f32.mrb[45].mxu1  ;;  %vm1866_vm15 = vcmp.gt.f32.partialorder %v1856_v59, 0.0  ;;  %v1887_v53 = vld [vmem:[%s12340_s26 + $0x8] sm:$0xff] }
0x131c   :  { %v1859_v63 = vpop.f32.mrb[46].mxu1  ;;  %8047 = vmatprep.mubr.msk.bf16.mxu0 %vm12324_vm1, %v12241_v0  ;;  %v1889_v20 = vpack.c.bf16 %v1887_v53, %v1886_v19  ;;  %v1952_v62 = vld [vmem:[%s12346_s2 + $0x8] sm:$0xff]  ;;  %v1945_v53 = vld [vmem:[%s12347_s8 + $0x20] sm:$0xff] }
0x131d   :  { %8889 = vrsqrt.f32 %v1859_v63  ;;  %v8044_v10 = vpop.f32.mrb[47].mxu1  ;;  %vm1867_vm9 = vcmp.gt.f32.partialorder %v1859_v63, 0.0 }
0x131e   :  { %8046 = vmatpush3.bf16.msra.mxu0 %v1889_v20  ;;  %8891 = vrsqrt.f32 %v1817_v46  ;;  %v1941_v10 = vld [vmem:[%s12347_s8] sm:$0xff]  ;;  %v1946_v20 = vld [vmem:[%s12347_s8 + $0x28] sm:$0xff] }
0x131f   :  { %8073 = vmatprep.subr.bf16.mxu0 %v12241_v0 }
0x1325   :  { %v8888_v13 = vpop.eup %8887 }
0x1326   :  { %v1870_v15 = vsel %vm1866_vm15, %v8888_v13, 0.0  ;;  %v1942_v13 = vld [vmem:[%s12347_s8 + $0x8] sm:$0xff] }
0x1327   :  { %v8890_v58 = vpop.eup %8889  ;;  %1874 = vperm.xlu1 %8862, %v1870_v15   ;;  %v1953_v15 = vpack.c.bf16 %v1942_v13, %v1941_v10 }
0x1328   :  { %v1871_v18 = vsel %vm1867_vm9, %v8890_v58, 0.0  ;;  %v8892_v11 = vpop.eup %8891  ;;  %v1943_v58 = vld [vmem:[%s12347_s8 + $0x10] sm:$0xff]  ;;  %vm12355_vm9 = vmmov %vm12348_vm12 }
0x1329   :  { %1879 = vperm.xlu0 %8861, %v1871_v18   ;;  %v1865_v51 = vsel %vm1863_vm3, %v8892_v11, 0.0  ;;  %v1944_v18 = vld [vmem:[%s12347_s8 + $0x18] sm:$0xff]  ;;  %vm12357_vm0 = vmmov %vm12355_vm9  ;;  %vm12238_vm3 = vcmp.eq.s32.totalorder %v10131_v9, %v9800_v5  ;;  %v2396_v11 = vadd.s32 36, %v9800_v5 }
0x132a   :  { %v1954_v19 = vpack.c.bf16 %v1944_v18, %v1943_v58 }
0x13a6   :  { %v1875_v8 = vpop.permute.xlu1 %1874 }
0x13a7   :  { %v1882_v43 = vmul.f32 %v1875_v8, %v10048_v52  ;;  %v1951_v52 = vld [vmem:[%s12346_s2] sm:$0xff] }
0x13a8   :  { %v1880_v47 = vpop.permute.xlu0 %1879  ;;  %v1958_v63 = vpack.c.bf16 %v1952_v62, %v1951_v52 }
0x13a9   :  { %v1883_v49 = vmul.f32 %v1880_v47, %v10052_v55  ;;  %v1884_v57 = vmul.f32 %v1882_v43, %v1865_v51  ;;  %v2160_v55 = vpack.c.bf16 %v2159_v56, %v2158_v17  ;;  %v10153_v47 = vadd.s32 40, %v9798_v4 }
0x13aa   :  { %8052 = vmatpush3.bf16.msra.mxu1 %v1958_v63 }
0x13ab   :  { %v1885_v3 = vmul.f32 %v1883_v49, %v1865_v51  ;;  %8111 = vmatprep.subr.bf16.mxu1 %v12241_v0  ;;  %vm2351_vm8 = vcmp.eq.s32.totalorder %v10153_v47, %v2345_v44 }
0x13ad   :  { %v2102_v59 = vpack.c.bf16 %v1885_v3, %v1884_v57  ;;  %8054 = vmatmul.mubr.msk.bf16.vlgmr.msra.gmra.mrb[48].mxu1 %vm12350_vm7, %v1953_v15 }
0x13ae   :  { %8057 = vmatprep.mubr.msk.bf16.mxu1 %vm12324_vm1, %v12241_v0 }
0x13b5   :  { %8058 = vmatmul.mubr.msk.bf16.gmra.mrb[52].mxu1 %vm12351_vm2, %v1954_v19 }
0x13b6   :  { %8061 = vmatprep.mubr.msk.bf16.mxu1 %vm12324_vm1, %v12241_v0 }
0x13ee   :  { %v1800_v22 = vpop.f32.mrb[44].mxu0 }
0x13ef   :  { %v8037_v23 = vpop.f32.mrb[45].mxu0  ;;  %v1801_v25 = vadd.f32 %v7270_v21, %v1800_v22  ;;  %v1947_v22 = vld [vmem:[%s12347_s8 + $0x30] sm:$0xff] }
0x13f0   :  { %v1803_v24 = vpop.f32.mrb[46].mxu0  ;;  %v1948_v23 = vld [vmem:[%s12347_s8 + $0x38] sm:$0xff] }
0x13f1   :  { %v1804_v27 = vadd.f32 %v7270_v21, %v1803_v24  ;;  %v8038_v29 = vpop.f32.mrb[47].mxu0  ;;  %v1955_v21 = vpack.c.bf16 %v1946_v20, %v1945_v53  ;;  %v1956_v24 = vpack.c.bf16 %v1948_v23, %v1947_v22 }
0x13f3   :  { %v1888_v28 = vpack.c.bf16 %v1804_v27, %v1801_v25  ;;  %8062 = vmatmul.mubr.msk.bf16.gmra.mrb[56].mxu1 %vm12352_vm14, %v1955_v21  ;;  %v1949_v25 = vld [vmem:[%s12347_s8 + $0x40] sm:$0xff]  ;;  %v1950_v27 = vld [vmem:[%s12347_s8 + $0x48] sm:$0x7]  ;;  %vm2349_vm14 = vcmp.eq.s32.totalorder %v10131_v9, %v2345_v44 }
0x13f4   :  { %8065 = vmatprep.mubr.msk.bf16.mxu1 %vm12324_vm1, %v12241_v0  ;;  %v1957_v29 = vpack.c.bf16 %v1950_v27, %v1949_v25  ;;  %v7285_v21 = vld [vmem:[#allocation14] ss:$0 sm:$0xff] }
0x13f5   :  { %8048 = vmatmul.mubr.msk.bf16.vlgmr.msra.gmra.mrb[48].mxu0 %vm12343_vm11, %v1888_v28  ;;  %v7282_v28 = vld [vmem:[#allocation13] ss:$0 sm:$0xff]  ;;  %vm12356_vm11 = vcmp.eq.s32.totalorder %v9808_v6, %v9800_v5 }
0x13f6   :  { %8075 = vmatprep.mubr.msk.bf16.mxu0 %vm12324_vm1, %v12241_v0  ;;  %8074 = vmatpush3.bf16.msra.mxu0 %v2057_v60 }
0x13f7   :  { %8079 = vmatprep.subr.bf16.mxu0 %v12241_v0 }
0x13fb   :  { %8066 = vmatmul.mubr.msk.bf16.gmra.mrb[60].mxu1 %vm12353_vm10, %v1956_v24  ;;  %vm12237_vm10 = vcmp.eq.s32.totalorder %v10147_v45, %v9800_v5 }
0x13fc   :  { %8069 = vmatprep.mubr.msk.bf16.mxu1 %vm12324_vm1, %v12241_v0 }
0x1403   :  { %8070 = vmatmul.mubr.msk.bf16.gmra.mrb[64].mxu1 %vm12354_vm4, %v1957_v29 }
0x1404   :  { %8113 = vmatprep.mubr.msk.bf16.mxu1 %vm12324_vm1, %v12241_v0 }
0x1480   :  { %v10206_v3 = vpop.f32.mrb[48].mxu1 }
0x14c8   :  { %v1934_v33 = vpop.f32.mrb[48].mxu0 }
0x14c9   :  { %v8049_v34 = vpop.f32.mrb[49].mxu0  ;;  %v1935_v36 = vadd.f32 %v7273_v32, %v1934_v33 }
0x14ca   :  { %v1937_v35 = vpop.f32.mrb[50].mxu0 }
0x14cb   :  { %v1938_v61 = vadd.f32 %v7273_v32, %v1937_v35  ;;  %v8050_v37 = vpop.f32.mrb[51].mxu0 }
0x14cd   :  { %v2056_v38 = vpack.c.bf16 %v1938_v61, %v1935_v36  ;;  %v2294_v61 = vadd.s32 12, %v9800_v5 }
0x14cf   :  { %8076 = vmatmul.mubr.msk.bf16.vlgmr.msra.gmra.mrb[52].mxu0 %vm12331_vm5, %v2056_v38  ;;  %vm2296_vm15 = vcmp.eq.s32.totalorder %v9808_v6, %v2294_v61  ;;  %vm2297_vm7 = vcmp.eq.s32.totalorder %v10138_v42, %v2294_v61  ;;  %vm2299_vm4 = vcmp.eq.s32.totalorder %v10147_v45, %v2294_v61 }
0x14d0   :  { %8081 = vmatprep.mubr.msk.bf16.mxu0 %vm12324_vm1, %v12241_v0  ;;  %vm2334_vm5 = vmor %vm12356_vm11, %vm2296_vm15  ;;  %vm2300_vm11 = vcmp.eq.s32.totalorder %v10153_v47, %v2294_v61 }
0x14d1   :  { %v7294_v46 = vsel %vm2334_vm5, 1.0, %v12241_v0 }
0x14d2   :  { %v10164_v8 = vpack.c.bf16 %v7294_v46, %v9813_v7 }
0x15a2   :  { %v2095_v50 = vpop.f32.mrb[52].mxu0 }
0x15a3   :  { %v8077_v1 = vpop.f32.mrb[53].mxu0 }
0x15a4   :  { %v2098_v54 = vpop.f32.mrb[54].mxu0 }
0x15a5   :  { %v2103_v14 = vpack.c.bf16 %v2098_v54, %v2095_v50  ;;  %v8078_v16 = vpop.f32.mrb[55].mxu0 }
0x15a7   :  { %v2115_v2 = vsel %vm12348_vm12, %v2103_v14, 0  ;;  %vm2298_vm12 = vcmp.eq.s32.totalorder %v10131_v9, %v2294_v61  ;;  %v8055_v14 = vpop.f32.mrb[49].mxu1 }
0x15a8   :  { %8080 = vmatpush3.bf16.msra.mxu0 %v2115_v2  ;;  %vm2336_vm2 = vmor %vm12238_vm3, %vm2298_vm12  ;;  %vm2350_vm12 = vcmp.eq.s32.totalorder %v10147_v45, %v2345_v44  ;;  %v10208_v16 = vpop.f32.mrb[50].mxu1 }
0x15a9   :  { %8085 = vmatprep.subr.bf16.mxu0 %v12241_v0  ;;  %vm2387_vm5 = vmor %vm2336_vm2, %vm2349_vm14  ;;  %vm2401_vm14 = vcmp.eq.s32.totalorder %v10147_v45, %v2396_v11  ;;  %v8056_v17 = vpop.f32.mrb[51].mxu1 }
0x15aa   :  { %v7296_v50 = vsel %vm2387_vm5, 1.0, %v12241_v0  ;;  %v10210_v56 = vpop.f32.mrb[52].mxu1 }
0x15ab   :  { %8082 = vmatmul.mubr.msk.bf16.vlgmr.msra.gmra.mrb[56].mxu0 %vm412_vm6, %v2102_v59  ;;  %v8059_v57 = vpop.f32.mrb[53].mxu1 }
0x15ac   :  { %8086 = vmatpush3.bf16.msra.mxu0 %v2160_v55  ;;  %8087 = vmatprep.mubr.msk.bf16.mxu0 %vm12324_vm1, %v12241_v0  ;;  %v10212_v2 = vpop.f32.mrb[54].mxu1 }
0x15ad   :  { %8091 = vmatprep.subr.bf16.mxu0 %v12241_v0  ;;  %v8060_v55 = vpop.f32.mrb[55].mxu1 }
0x15b3   :  { %8088 = vmatmul.mubr.msk.bf16.vlgmr.msra.gmra.mrb[60].mxu0 %vm12349_vm13, %v2056_v38  ;;  %vm12239_vm13 = vcmp.eq.s32.totalorder %v10138_v42, %v9800_v5 }
0x15b4   :  { %8093 = vmatprep.mubr.msk.bf16.mxu0 %vm12324_vm1, %v12241_v0  ;;  %vm2335_vm15 = vmor %vm12239_vm13, %vm2297_vm7 }
0x15b5   :  { %v7295_v49 = vsel %vm2335_vm15, 1.0, %v12241_v0 }
0x15b6   :  { %v10192_v43 = vpack.c.bf16 %v7296_v50, %v7295_v49 }
0x167e   :  { %v2151_v30 = vpop.f32.mrb[56].mxu0 }
0x167f   :  { %v8083_v31 = vpop.f32.mrb[57].mxu0  ;;  %v2152_v32 = vadd.f32 %v7282_v28, %v2151_v30 }
0x1680   :  { %v2154_v60 = vpop.f32.mrb[58].mxu0 }
0x1681   :  { %v2155_v33 = vadd.f32 %v7282_v28, %v2154_v60  ;;  %v8084_v34 = vpop.f32.mrb[59].mxu0 }
0x1683   :  { %v2474_v35 = vpack.c.bf16 %v2155_v33, %v2152_v32 }
0x1685   :  { %v2485_v48 = vsel %vm12357_vm0, %v2474_v35, 0  ;;  %vm2337_vm0 = vmor %vm12237_vm10, %vm2299_vm4  ;;  %vm2402_vm10 = vcmp.eq.s32.totalorder %v10153_v47, %v2396_v11 }
0x1686   :  { %v2195_v36 = vpop.f32.mrb[60].mxu0  ;;  %vm2388_vm2 = vmor %vm2337_vm0, %vm2350_vm12 }
0x1687   :  { %v8089_v37 = vpop.f32.mrb[61].mxu0  ;;  %vm2439_vm3 = vmor %vm2388_vm2, %vm2401_vm14  ;;  %vm2370_vm2 = vcmp.ge.s32.totalorder %v9800_v5, 8  ;;  %vm2377_vm14 = vcmp.lt.s32.totalorder %v9800_v5, 12 }
0x1688   :  { %v2198_v38 = vpop.f32.mrb[62].mxu0  ;;  %v7297_v1 = vsel %vm2439_vm3, 1.0, %v12241_v0  ;;  %vm2319_vm3 = vcmp.ge.s32.totalorder %v9800_v5, 4 }
0x1689   :  { %v2202_v39 = vpack.c.bf16 %v2198_v38, %v2195_v36  ;;  %v8090_v40 = vpop.f32.mrb[63].mxu0 }
0x168b   :  { %v2211_v41 = vsel %vm12355_vm9, %v2202_v39, 0  ;;  %vm2261_vm9 = vcmp.eq.s32.totalorder %v10153_v47, %v9800_v5 }
0x168c   :  { %8092 = vmatpush3.bf16.msra.mxu0 %v2211_v41  ;;  %vm2338_vm7 = vmor %vm2261_vm9, %vm2300_vm11  ;;  %vm12240_vm11 = vcmp.lt.s32.totalorder %v9800_v5, 8 }
0x168d   :  { %8097 = vmatprep.subr.bf16.mxu0 %v12241_v0  ;;  %vm2389_vm4 = vmor %vm2338_vm7, %vm2351_vm8  ;;  %vm2302_vm8 = vcmp.ge.s32.totalorder %v9808_v6, 12  ;;  %vm12358_vm7 = vcmask 1045504  }
0x168e   :  { %vm2440_vm13 = vmor %vm2389_vm4, %vm2402_vm10  ;;  %vm2269_vm10 = vcmp.lt.s32.totalorder %v9808_v6, 12  ;;  %vm2362_vm4 = vcmp.lt.s32.totalorder %v10147_v45, 36 }
0x168f   :  { %8094 = vmatmul.mubr.msk.bf16.vlgmr.msra.gmra.mrb[64].mxu0 %vm412_vm6, %v2102_v59  ;;  %v7298_v51 = vsel %vm2440_vm13, 1.0, %v12241_v0  ;;  %v10214_v59 = vpop.f32.mrb[56].mxu1  ;;  %vm2287_vm13 = vcmp.lt.s32.totalorder %v9800_v5, 4  ;;  %vm2321_vm15 = vmand %vm2302_vm8, %vm2319_vm3 }
0x1690   :  { %8098 = vmatpush3.bf16.msra.mxu0 %v2485_v48  ;;  %8099 = vmatprep.mubr.msk.bf16.mxu0 %vm12324_vm1, %v12241_v0  ;;  %v10200_v54 = vpack.c.bf16 %v7298_v51, %v7297_v1  ;;  %v8063_v52 = vpop.f32.mrb[57].mxu1  ;;  %vm2289_vm5 = vmand %vm2269_vm10, %vm2287_vm13  ;;  %v10241_v30 = vsel %vm2287_vm13, 1.0, %v12241_v0  ;;  %vm2407_vm10 = vcmp.ge.s32.totalorder %v10147_v45, 36 }
0x1691   :  { %8125 = vmatprep.subr.bf16.mxu0 %v12241_v0  ;;  %v10216_v62 = vpop.f32.mrb[58].mxu1  ;;  %vm2328_vm0 = vmand %vm2321_vm15, %vm12240_vm11  ;;  %12359 = vst [vmem:[#allocation69_spill] sm:$0xff] %v10241_v30  ;;  %vm2421_vm15 = vcmp.ge.s32.totalorder %v9800_v5, 12 }
0x1692   :  { %v8064_v63 = vpop.f32.mrb[59].mxu1  ;;  %vm2340_vm12 = vmor %vm2289_vm5, %vm2328_vm0 }
0x1693   :  { %v10218_v10 = vpop.f32.mrb[60].mxu1  ;;  %v10244_v60 = vsel %vm2340_vm12, 1.0, %v12241_v0  ;;  %vm2329_vm8 = vmand %vm2319_vm3, %vm12240_vm11  ;;  %vm12360_vm12 = vcmask 130048   ;;  %vm2428_vm11 = vcmp.lt.s32.totalorder %v9800_v5, 16  ;;  %v7275_v63 = vld [vmem:[#allocation11] ss:$0 sm:$0xff] }
0x1694   :  { %v8067_v13 = vpop.f32.mrb[61].mxu1  ;;  %vm2381_vm5 = vmand %vm2370_vm2, %vm2377_vm14  ;;  %v10273_v38 = vsel %vm2329_vm8, 1.0, %v12241_v0 }
0x1695   :  { %v10220_v15 = vpop.f32.mrb[62].mxu1  ;;  %vm2375_vm0 = vmand %vm2362_vm4, %vm2370_vm2  ;;  %12361 = vst [vmem:[#allocation70_spill] sm:$0xff] %v10273_v38  ;;  %v10276_v40 = vsel %vm2381_vm5, 1.0, %v12241_v0 }
0x1696   :  { %v8068_v58 = vpop.f32.mrb[63].mxu1  ;;  %12362 = vst [vmem:[#allocation71_spill] sm:$0xff] %v10276_v40  ;;  %vm2382_vm4 = vmand %vm2375_vm0, %vm2377_vm14 }
0x1697   :  { %8100 = vmatmul.mubr.msk.bf16.vlgmr.msra.gmra.mrb[68].mxu0 %vm412_vm6, %v10164_v8  ;;  %v10222_v18 = vpop.f32.mrb[64].mxu1  ;;  %vm2434_vm8 = vmand %vm2421_vm15, %vm2428_vm11  ;;  %v10306_v58 = vadd.f32 %v7275_v63, %v10206_v3 }
0x1698   :  { %8103 = vmatprep.mubr.msk.bf16.mxu0 %vm12324_vm1, %v12241_v0  ;;  %v8071_v19 = vpop.f32.mrb[65].mxu1  ;;  %vm12363_vm0 = vmmov %vm12360_vm12  ;;  %v10296_v1 = vsel %vm2434_vm8, 1.0, %v12241_v0 }
0x1699   :  { %v10224_v53 = vpop.f32.mrb[66].mxu1  ;;  %12364 = vst [vmem:[#allocation72_spill] sm:$0xff] %v10296_v1  ;;  %v10309_v19 = vadd.f32 %v7275_v63, %v10208_v16  ;;  %v10329_v16 = vadd.f32 %v7275_v63, %v10214_v59  ;;  %vm12370_vm8 = vmmov %vm12363_vm0 }
0x169a   :  { %v8072_v20 = vpop.f32.mrb[67].mxu1 }
0x169b   :  { %v2617_v20 = vpack.c.bf16 %v10309_v19, %v10306_v58 }
0x169f   :  { %8104 = vmatmul.mubr.msk.bf16.gmra.mrb[72].mxu0 %vm412_vm6, %v10192_v43 }
0x16a0   :  { %8107 = vmatprep.mubr.msk.bf16.mxu0 %vm12324_vm1, %v12241_v0 }
0x16a7   :  { %8108 = vmatmul.mubr.msk.bf16.gmra.mrb[76].mxu0 %vm412_vm6, %v10200_v54 }
0x16a8   :  { %8131 = vmatprep.mubr.msk.bf16.mxu0 %vm12324_vm1, %v12241_v0 }
0x1762   :  { %v2247_v22 = vpop.f32.mrb[64].mxu0 }
0x1763   :  { %v8095_v23 = vpop.f32.mrb[65].mxu0  ;;  %v2248_v25 = vadd.f32 %v7285_v21, %v2247_v22  ;;  %v10332_v22 = vadd.f32 %v7275_v63, %v10216_v62  ;;  %v10351_v62 = vadd.f32 %v7275_v63, %v10222_v18 }
0x1764   :  { %v2250_v24 = vpop.f32.mrb[66].mxu0  ;;  %v10343_v23 = vadd.f32 %v7275_v63, %v10220_v15 }
0x1765   :  { %v2251_v27 = vadd.f32 %v7285_v21, %v2250_v24  ;;  %v8096_v29 = vpop.f32.mrb[67].mxu0  ;;  %v10321_v21 = vadd.f32 %v7275_v63, %v10212_v2  ;;  %v10340_v2 = vadd.f32 %v7275_v63, %v10218_v10  ;;  %v10354_v24 = vadd.f32 %v7275_v63, %v10224_v53 }
0x1767   :  { %v2550_v28 = vpack.c.bf16 %v2251_v27, %v2248_v25  ;;  %v2620_v59 = vpack.c.bf16 %v10343_v23, %v10340_v2  ;;  %v2621_v10 = vpack.c.bf16 %v10354_v24, %v10351_v62 }
0x1769   :  { %v2552_v6 = vsel %vm12358_vm7, %v2550_v28, 0  ;;  %vm2426_vm7 = vmand %vm2407_vm10, %vm2421_vm15 }
0x176a   :  { %v2521_v31 = vpop.f32.mrb[68].mxu0  ;;  %8112 = vmatpush3.bf16.msra.mxu1 %v2552_v6  ;;  %vm2433_vm10 = vmand %vm2426_vm7, %vm2428_vm11 }
0x176b   :  { %v8101_v32 = vpop.f32.mrb[69].mxu0  ;;  %8151 = vmatprep.subr.bf16.mxu1 %v12241_v0  ;;  %v2544_v34 = vmul.f32 %v10241_v30, %v2521_v31  ;;  %vm2445_vm5 = vmor %vm2382_vm4, %vm2433_vm10 }
0x176c   :  { %v2524_v33 = vpop.f32.mrb[70].mxu0  ;;  %v7291_v50 = vsel %vm2445_vm5, 1.0, %v12241_v0  ;;  %vm12367_vm7 = vmmov %vm12363_vm0  ;;  %vm2732_vm5 = vcmask 392192  }
0x176d   :  { %v2545_v35 = vmul.f32 %v10244_v60, %v2524_v33  ;;  %v8102_v36 = vpop.f32.mrb[71].mxu0  ;;  %8114 = vmatmul.mubr.msk.bf16.vlgmr.msra.gmra.mrb[68].mxu1 %vm412_vm6, %v10164_v8  ;;  %vm12368_vm4 = vmmov %vm12363_vm0 }
0x176e   :  { %8117 = vmatprep.mubr.msk.bf16.mxu1 %vm12324_vm1, %v12241_v0  ;;  %vm12369_vm10 = vmmov %vm12363_vm0 }
0x176f   :  { %v2622_v61 = vpack.c.bf16 %v2545_v35, %v2544_v34 }
0x1771   :  { %v2641_v37 = vsel %vm12360_vm12, %v2622_v61, 0  ;;  %vm12365_vm12 = vmmov %vm12363_vm0 }
0x1772   :  { %v2529_v39 = vpop.f32.mrb[72].mxu0  ;;  %8126 = vmatpush3.bf16.xpose.msra.mxu0 %v2641_v37 }
0x1773   :  { %v8105_v41 = vpop.f32.mrb[73].mxu0  ;;  %8127 = vmatprep.subr.bf16.mxu0 %v12241_v0  ;;  %v2546_v48 = vmul.f32 %v10273_v38, %v2529_v39 }
0x1774   :  { %v2532_v44 = vpop.f32.mrb[74].mxu0 }
0x1775   :  { %v2547_v46 = vmul.f32 %v10276_v40, %v2532_v44  ;;  %v8106_v8 = vpop.f32.mrb[75].mxu0  ;;  %8118 = vmatmul.mubr.msk.bf16.gmra.mrb[72].mxu1 %vm412_vm6, %v10192_v43 }
0x1776   :  { %8121 = vmatprep.mubr.msk.bf16.mxu1 %vm12324_vm1, %v12241_v0 }
0x1777   :  { %v2623_v11 = vpack.c.bf16 %v2547_v46, %v2546_v48 }
0x1779   :  { %v2644_v49 = vsel %vm12363_vm0, %v2623_v11, 0 }
0x177a   :  { %v2537_v51 = vpop.f32.mrb[76].mxu0  ;;  %8128 = vmatpush3.bf16.xpose.msra.mxu0 %v2644_v49 }
0x177b   :  { %v8109_v43 = vpop.f32.mrb[77].mxu0  ;;  %8129 = vmatprep.subr.bf16.mxu0 %v12241_v0  ;;  %v2548_v17 = vmul.f32 %v7291_v50, %v2537_v51 }
0x177c   :  { %v2540_v14 = vpop.f32.mrb[78].mxu0 }
0x177d   :  { %v2549_v57 = vmul.f32 %v10296_v1, %v2540_v14  ;;  %v8110_v55 = vpop.f32.mrb[79].mxu0  ;;  %8122 = vmatmul.mubr.msk.bf16.gmra.mrb[76].mxu1 %vm412_vm6, %v10200_v54  ;;  %vm12366_vm6 = vmmov %vm12363_vm0  ;;  %v10318_v54 = vadd.f32 %v7275_v63, %v10210_v56  ;;  %v2619_v56 = vpack.c.bf16 %v10332_v22, %v10329_v16  ;;  %vm2747_vm0 = vcmask 387072  }
0x177e   :  { %8157 = vmatprep.mubr.msk.bf16.mxu1 %vm12324_vm1, %v12241_v0 }
0x177f   :  { %v2624_v52 = vpack.c.bf16 %v2549_v57, %v2548_v17  ;;  %v2618_v3 = vpack.c.bf16 %v10321_v21, %v10318_v54 }
0x1781   :  { %v2647_v13 = vsel %vm12365_vm12, %v2624_v52, 0  ;;  %vm12372_vm12 = vmmov %vm12368_vm4 }
0x1782   :  { %8130 = vmatpush3.bf16.xpose.msra.mxu0 %v2647_v13 }
0x1783   :  { %8177 = vmatprep.subr.bf16.mxu0 %v12241_v0 }
0x1789   :  { %8132 = vmatmul.mubr.msk.bf16.vlgmr.msra.gmra.mrb[80].mxu0 %vm12366_vm6, %v2617_v20  ;;  %vm12373_vm6 = vmmov %vm12368_vm4 }
0x178a   :  { %8135 = vmatprep.mubr.msk.bf16.mxu0 %vm12324_vm1, %v12241_v0 }
0x1791   :  { %8136 = vmatmul.mubr.msk.bf16.gmra.mrb[84].mxu0 %vm12367_vm7, %v2618_v3  ;;  %vm12374_vm7 = vmmov %vm12368_vm4 }
0x1792   :  { %8139 = vmatprep.mubr.msk.bf16.mxu0 %vm12324_vm1, %v12241_v0 }
0x1799   :  { %8140 = vmatmul.mubr.msk.bf16.gmra.mrb[88].mxu0 %vm12368_vm4, %v2619_v56 }
0x179a   :  { %8143 = vmatprep.mubr.msk.bf16.mxu0 %vm12324_vm1, %v12241_v0 }
0x17a1   :  { %8144 = vmatmul.mubr.msk.bf16.gmra.mrb[92].mxu0 %vm12369_vm10, %v2620_v59  ;;  %vm12377_vm10 = vmmov %vm12368_vm4 }
0x17a2   :  { %8147 = vmatprep.mubr.msk.bf16.mxu0 %vm12324_vm1, %v12241_v0 }
0x17a9   :  { %8148 = vmatmul.mubr.msk.bf16.gmra.mrb[96].mxu0 %vm12370_vm8, %v2621_v10  ;;  %vm12379_vm8 = vmmov %vm12368_vm4 }
0x17aa   :  { %8179 = vmatprep.mubr.msk.bf16.mxu0 %vm12324_vm1, %v12241_v0 }
0x1840   :  { %v2588_v15 = vpop.f32.mrb[68].mxu1 }
0x1841   :  { %v2611_v25 = vmul.f32 %v10241_v30, %v2588_v15  ;;  %v8115_v27 = vpop.f32.mrb[69].mxu1 }
0x1842   :  { %v2591_v29 = vpop.f32.mrb[70].mxu1 }
0x1843   :  { %v2612_v28 = vmul.f32 %v10244_v60, %v2591_v29  ;;  %v8116_v18 = vpop.f32.mrb[71].mxu1 }
0x1845   :  { %v2830_v6 = vpack.c.bf16 %v2612_v28, %v2611_v25 }
0x1847   :  { %8152 = vmatpush3.bf16.msra.mxu1 %v2830_v6 }
0x1848   :  { %v2596_v53 = vpop.f32.mrb[72].mxu1  ;;  %8153 = vmatprep.subr.bf16.mxu1 %v12241_v0 }
0x1849   :  { %v2613_v31 = vmul.f32 %v10273_v38, %v2596_v53  ;;  %v8119_v32 = vpop.f32.mrb[73].mxu1 }
0x184a   :  { %v2599_v33 = vpop.f32.mrb[74].mxu1 }
0x184b   :  { %v2614_v34 = vmul.f32 %v10276_v40, %v2599_v33  ;;  %v8120_v35 = vpop.f32.mrb[75].mxu1 }
0x184d   :  { %v2831_v36 = vpack.c.bf16 %v2614_v34, %v2613_v31 }
0x184f   :  { %8154 = vmatpush3.bf16.msra.mxu1 %v2831_v36 }
0x1850   :  { %v2604_v61 = vpop.f32.mrb[76].mxu1  ;;  %8155 = vmatprep.subr.bf16.mxu1 %v12241_v0 }
0x1851   :  { %v2615_v37 = vmul.f32 %v7291_v50, %v2604_v61  ;;  %v8123_v60 = vpop.f32.mrb[77].mxu1 }
0x1852   :  { %v2607_v39 = vpop.f32.mrb[78].mxu1 }
0x1853   :  { %v2616_v41 = vmul.f32 %v10296_v1, %v2607_v39  ;;  %v8124_v44 = vpop.f32.mrb[79].mxu1 }
0x1855   :  { %v2832_v48 = vpack.c.bf16 %v2616_v41, %v2615_v37 }
0x1857   :  { %8156 = vmatpush3.bf16.msra.mxu1 %v2832_v48 }
0x1858   :  { %8199 = vmatprep.subr.bf16.mxu1 %v12241_v0 }
0x185c   :  { %v2683_v46 = vpop.f32.mrb[80].mxu0 }
0x185d   :  { %v8133_v8 = vpop.f32.mrb[81].mxu0  ;;  %v2722_v57 = vmul.f32 0.25, %v2683_v46 }
0x185e   :  { %v2686_v11 = vpop.f32.mrb[82].mxu0 }
0x185f   :  { %v8134_v49 = vpop.f32.mrb[83].mxu0  ;;  %v2723_v55 = vmul.f32 0.25, %v2686_v11  ;;  %v2733_v20 = vsel %vm2732_vm5, %v2722_v57, -inf }
0x1861   :  { %v2734_v15 = vsel %vm2732_vm5, %v2723_v55, -inf }
0x1864   :  { %v2691_v51 = vpop.f32.mrb[84].mxu0 }
0x1865   :  { %v8137_v43 = vpop.f32.mrb[85].mxu0  ;;  %v2724_v29 = vmul.f32 0.25, %v2691_v51 }
0x1866   :  { %v2694_v14 = vpop.f32.mrb[86].mxu0 }
0x1867   :  { %v8138_v17 = vpop.f32.mrb[87].mxu0  ;;  %v2725_v18 = vmul.f32 0.25, %v2694_v14  ;;  %v2735_v32 = vsel %vm2732_vm5, %v2724_v29, -inf }
0x1869   :  { %v2736_v61 = vsel %vm2732_vm5, %v2725_v18, -inf }
0x186c   :  { %v2699_v50 = vpop.f32.mrb[88].mxu0 }
0x186d   :  { %v2726_v52 = vmul.f32 0.25, %v2699_v50  ;;  %v8141_v63 = vpop.f32.mrb[89].mxu0 }
0x186e   :  { %v2702_v13 = vpop.f32.mrb[90].mxu0 }
0x186f   :  { %v2737_v3 = vsel %vm2732_vm5, %v2726_v52, -inf  ;;  %v2727_v56 = vmul.f32 0.25, %v2702_v13  ;;  %v8142_v59 = vpop.f32.mrb[91].mxu0 }
0x1870   :  { %v2738_v10 = vmax.f32 %v2733_v20, %v2737_v3 }
0x1871   :  { %v2739_v25 = vsel %vm2732_vm5, %v2727_v56, -inf }
0x1872   :  { %v2740_v27 = vmax.f32 %v2734_v15, %v2739_v25 }
0x1874   :  { %v2707_v28 = vpop.f32.mrb[92].mxu0 }
0x1875   :  { %v2728_v6 = vmul.f32 0.25, %v2707_v28  ;;  %v8145_v53 = vpop.f32.mrb[93].mxu0 }
0x1876   :  { %v2710_v31 = vpop.f32.mrb[94].mxu0 }
0x1877   :  { %v2741_v33 = vsel %vm2732_vm5, %v2728_v6, -inf  ;;  %v2729_v34 = vmul.f32 0.25, %v2710_v31  ;;  %v8146_v35 = vpop.f32.mrb[95].mxu0 }
0x1878   :  { %v2742_v36 = vmax.f32 %v2735_v32, %v2741_v33 }
0x1879   :  { %v2743_v37 = vsel %vm2732_vm5, %v2729_v34, -inf }
0x187a   :  { %v2744_v60 = vmax.f32 %v2736_v61, %v2743_v37 }
0x187c   :  { %v2751_v39 = vmax.f32 %v2742_v36, %v2744_v60  ;;  %v2715_v41 = vpop.f32.mrb[96].mxu0 }
0x187d   :  { %v2730_v44 = vmul.f32 0.25, %v2715_v41  ;;  %v8149_v48 = vpop.f32.mrb[97].mxu0 }
0x187e   :  { %v2718_v46 = vpop.f32.mrb[98].mxu0 }
0x187f   :  { %v2745_v8 = vsel %vm2732_vm5, %v2730_v44, -inf  ;;  %v2731_v11 = vmul.f32 0.25, %v2718_v46  ;;  %v8150_v49 = vpop.f32.mrb[99].mxu0 }
0x1880   :  { %v2746_v51 = vmax.f32 %v2738_v10, %v2745_v8 }
0x1881   :  { %v2748_v43 = vsel %vm2747_vm0, %v2731_v11, -inf }
0x1882   :  { %v2749_v14 = vmax.f32 %v2740_v27, %v2748_v43 }
0x1884   :  { %v2750_v17 = vmax.f32 %v2746_v51, %v2749_v14 }
0x1886   :  { %v2752_v50 = vmax.f32 %v2750_v17, %v2751_v39 }
0x1888   :  { %v2753_v63 = vrot.slane %v2752_v50, 4 }
0x188a   :  { %v2754_v13 = vmax.f32 %v2752_v50, %v2753_v63 }
0x188c   :  { %v2755_v20 = vrot.slane %v2754_v13, 2 }
0x188e   :  { %v2756_v3 = vmax.f32 %v2754_v13, %v2755_v20 }
0x1890   :  { %v2757_v59 = vrot.slane %v2756_v3, 1 }
0x1892   :  { %v2758_v15 = vmax.f32 %v2756_v3, %v2757_v59 }
0x1894   :  { %v2759_v25 = vsub.f32 %v2722_v57, %v2758_v15  ;;  %v2760_v28 = vsub.f32 %v2723_v55, %v2758_v15  ;;  %v2761_v53 = vsub.f32 %v2724_v29, %v2758_v15  ;;  %v2762_v31 = vsub.f32 %v2725_v18, %v2758_v15 }
0x1895   :  { %v2763_v32 = vsub.f32 %v2726_v52, %v2758_v15  ;;  %v2764_v33 = vsub.f32 %v2727_v56, %v2758_v15  ;;  %v2765_v35 = vsub.f32 %v2728_v6, %v2758_v15  ;;  %v2766_v36 = vsub.f32 %v2729_v34, %v2758_v15 }
0x1896   :  { %v2767_v10 = vsub.f32 %v2730_v44, %v2758_v15  ;;  %v2768_v61 = vsub.f32 %v2731_v11, %v2758_v15  ;;  %v2769_v37 = vmul.f32 1.442695, %v2759_v25  ;;  %v2771_v27 = vmul.f32 1.442695, %v2760_v28 }
0x1897   :  { %v2773_v60 = vmul.f32 1.442695, %v2761_v53  ;;  %v2775_v39 = vmul.f32 1.442695, %v2762_v31  ;;  %v2777_v41 = vmul.f32 1.442695, %v2763_v32 }
0x1898   :  { %8893 = vpow2.f32 %v2769_v37  ;;  %v2779_v48 = vmul.f32 1.442695, %v2764_v33  ;;  %v2781_v57 = vmul.f32 1.442695, %v2765_v35  ;;  %v2783_v55 = vmul.f32 1.442695, %v2766_v36 }
0x1899   :  { %8895 = vpow2.f32 %v2771_v27  ;;  %v2785_v52 = vmul.f32 1.442695, %v2767_v10  ;;  %v2787_v18 = vmul.f32 1.442695, %v2768_v61 }
0x189a   :  { %8897 = vpow2.f32 %v2773_v60 }
0x189b   :  { %8899 = vpow2.f32 %v2775_v39 }
0x189c   :  { %8901 = vpow2.f32 %v2777_v41 }
0x189d   :  { %8903 = vpow2.f32 %v2779_v48 }
0x189e   :  { %8905 = vpow2.f32 %v2781_v57 }
0x189f   :  { %8907 = vpow2.f32 %v2783_v55 }
0x18a0   :  { %8909 = vpow2.f32 %v2785_v52 }
0x18a1   :  { %8911 = vpow2.f32 %v2787_v18 }
0x18a2   :  { %v8894_v56 = vpop.eup %8893 }
0x18a3   :  { %v8896_v29 = vpop.eup %8895  ;;  %v2789_v6 = vsel %vm2732_vm5, %v8894_v56, 0.0 }
0x18a4   :  { %v8898_v34 = vpop.eup %8897  ;;  %v2790_v44 = vsel %vm2732_vm5, %v8896_v29, 0.0 }
0x18a5   :  { %v8900_v46 = vpop.eup %8899  ;;  %v2791_v8 = vadd.f32 %v2790_v44, %v2789_v6  ;;  %v2792_v11 = vsel %vm2732_vm5, %v8898_v34, 0.0 }
0x18a6   :  { %v8902_v49 = vpop.eup %8901  ;;  %v2794_v43 = vsel %vm2732_vm5, %v8900_v46, 0.0 }
0x18a7   :  { %v2793_v51 = vadd.f32 %v2792_v11, %v2791_v8  ;;  %v8904_v14 = vpop.eup %8903  ;;  %v2796_v50 = vsel %vm2732_vm5, %v8902_v49, 0.0 }
0x18a8   :  { %v8906_v63 = vpop.eup %8905  ;;  %v2798_v20 = vsel %vm2732_vm5, %v8904_v14, 0.0 }
0x18a9   :  { %v2795_v17 = vadd.f32 %v2794_v43, %v2793_v51  ;;  %v8908_v3 = vpop.eup %8907  ;;  %v2800_v15 = vsel %vm2732_vm5, %v8906_v63, 0.0 }
0x18aa   :  { %v8910_v25 = vpop.eup %8909  ;;  %v2802_v53 = vsel %vm2732_vm5, %v8908_v3, 0.0 }
0x18ab   :  { %v2797_v13 = vadd.f32 %v2796_v50, %v2795_v17  ;;  %v8912_v31 = vpop.eup %8911  ;;  %v2804_v33 = vsel %vm2732_vm5, %v8910_v25, 0.0 }
0x18ac   :  { %v2806_v36 = vsel %vm2747_vm0, %v8912_v31, 0.0  ;;  %vm12381_vm0 = vmmov %vm12368_vm4 }
0x18ad   :  { %v2799_v59 = vadd.f32 %v2798_v20, %v2797_v13 }
0x18af   :  { %v2801_v28 = vadd.f32 %v2800_v15, %v2799_v59 }
0x18b1   :  { %v2803_v32 = vadd.f32 %v2802_v53, %v2801_v28 }
0x18b3   :  { %v2805_v35 = vadd.f32 %v2804_v33, %v2803_v32 }
0x18b5   :  { %v2807_v10 = vadd.f32 %v2806_v36, %v2805_v35 }
0x18b7   :  { %v2808_v61 = vrot.slane %v2807_v10, 4 }
0x18b9   :  { %v2809_v37 = vadd.f32 %v2808_v61, %v2807_v10 }
0x18bb   :  { %v2810_v27 = vrot.slane %v2809_v37, 2 }
0x18bd   :  { %v2811_v60 = vadd.f32 %v2810_v27, %v2809_v37 }
0x18bf   :  { %v2812_v39 = vrot.slane %v2811_v60, 1 }
0x18c1   :  { %v2813_v41 = vadd.f32 %v2812_v39, %v2811_v60 }
0x18c3   :  { %8913 = vrcp.f32 %v2813_v41 }
0x18cd   :  { %v8914_v48 = vpop.eup %8913 }
0x18ce   :  { %v2815_v57 = vmul.f32 %v8914_v48, %v8894_v56  ;;  %v2816_v55 = vmul.f32 %v8914_v48, %v8896_v29  ;;  %v2817_v52 = vmul.f32 %v8914_v48, %v8898_v34  ;;  %v2818_v18 = vmul.f32 %v8914_v48, %v8900_v46  ;;  %v2931_v56 = vld [vmem:[%s12371_s7] sm:$0xff]  ;;  %v2932_v29 = vld [vmem:[%s12371_s7 + $0x8] sm:$0xff] }
0x18cf   :  { %v2819_v6 = vmul.f32 %v8914_v48, %v8902_v49  ;;  %v2820_v44 = vmul.f32 %v8914_v48, %v8904_v14  ;;  %v2821_v8 = vmul.f32 %v8914_v48, %v8906_v63  ;;  %v2822_v11 = vmul.f32 %v8914_v48, %v8908_v3 }
0x18d0   :  { %v2825_v51 = vpack.c.bf16 %v2816_v55, %v2815_v57  ;;  %v2826_v43 = vpack.c.bf16 %v2818_v18, %v2817_v52  ;;  %v2823_v17 = vmul.f32 %v8914_v48, %v8910_v25  ;;  %v2824_v50 = vmul.f32 %v8914_v48, %v8912_v31 }
0x18d1   :  { %v2827_v13 = vpack.c.bf16 %v2820_v44, %v2819_v6  ;;  %v2828_v20 = vpack.c.bf16 %v2822_v11, %v2821_v8  ;;  %v2938_v34 = vpack.c.bf16 %v2932_v29, %v2931_v56  ;;  %v3054_v44 = vld [vmem:[%s12375_s24] sm:$0xff]  ;;  %v3055_v8 = vld [vmem:[%s12375_s24 + $0x8] sm:$0xff] }
0x18d2   :  { %8158 = vmatmul.mubr.msk.bf16.vlgmr.msra.gmra.mrb[80].mxu1 %vm2732_vm5, %v2825_v51  ;;  %v2829_v59 = vpack.c.bf16 %v2824_v50, %v2823_v17  ;;  %v3157_v11 = vld [vmem:[%s12376_s4] sm:$0xff]  ;;  %v3061_v51 = vpack.c.bf16 %v3055_v8, %v3054_v44 }
0x18d3   :  { %8161 = vmatprep.mubr.msk.bf16.mxu1 %vm12324_vm1, %v12241_v0  ;;  %8178 = vmatpush3.bf16.msra.mxu0 %v2938_v34 }
0x18d4   :  { %8221 = vmatprep.subr.bf16.mxu0 %v12241_v0  ;;  %8200 = vmatpush3.bf16.msra.mxu1 %v3061_v51 }
0x18d5   :  { %8243 = vmatprep.subr.bf16.mxu1 %v12241_v0 }
0x18da   :  { %8162 = vmatmul.mubr.msk.bf16.gmra.mrb[84].mxu1 %vm2732_vm5, %v2826_v43  ;;  %v3158_v43 = vld [vmem:[%s12376_s4 + $0x8] sm:$0xff] }
0x18db   :  { %8165 = vmatprep.mubr.msk.bf16.mxu1 %vm12324_vm1, %v12241_v0 }
0x18e2   :  { %8166 = vmatmul.mubr.msk.bf16.gmra.mrb[88].mxu1 %vm2732_vm5, %v2827_v13 }
0x18e3   :  { %8169 = vmatprep.mubr.msk.bf16.mxu1 %vm12324_vm1, %v12241_v0 }
0x18ea   :  { %8170 = vmatmul.mubr.msk.bf16.gmra.mrb[92].mxu1 %vm2732_vm5, %v2828_v20 }
0x18eb   :  { %8173 = vmatprep.mubr.msk.bf16.mxu1 %vm12324_vm1, %v12241_v0 }
0x18f2   :  { %8174 = vmatmul.mubr.msk.bf16.gmra.mrb[96].mxu1 %vm2732_vm5, %v2829_v59  ;;  %vm12380_vm5 = vmmov %vm12368_vm4 }
0x18f3   :  { %8201 = vmatprep.mubr.msk.bf16.mxu1 %vm12324_vm1, %v12241_v0 }
0x19a5   :  { %v2882_v46 = vpop.f32.mrb[80].mxu1 }
0x19a6   :  { %v8159_v49 = vpop.f32.mrb[81].mxu1  ;;  %v10408_v63 = vadd.f32 %v2882_v46, %v10306_v58  ;;  %v3240_v46 = vld [vmem:[%s12378_s25] sm:$0xff] }
0x19a7   :  { %v2885_v14 = vpop.f32.mrb[82].mxu1  ;;  %v3241_v49 = vld [vmem:[%s12378_s25 + $0x8] sm:$0xff] }
0x19a8   :  { %v10411_v3 = vadd.f32 %v2885_v14, %v10309_v19  ;;  %v8160_v15 = vpop.f32.mrb[83].mxu1 }
0x19aa   :  { %v2933_v25 = vpack.c.bf16 %v10411_v3, %v10408_v63 }
0x19ac   :  { %8180 = vmatmul.mubr.msk.bf16.vlgmr.msra.gmra.mrb[100].mxu0 %vm12372_vm12, %v2933_v25  ;;  %vm12382_vm12 = vmmov %vm12381_vm0 }
0x19ad   :  { %v2890_v28 = vpop.f32.mrb[84].mxu1  ;;  %8183 = vmatprep.mubr.msk.bf16.mxu0 %vm12324_vm1, %v12241_v0 }
0x19ae   :  { %v8163_v53 = vpop.f32.mrb[85].mxu1  ;;  %v10419_v32 = vadd.f32 %v2890_v28, %v10318_v54 }
0x19af   :  { %v2893_v31 = vpop.f32.mrb[86].mxu1 }
0x19b0   :  { %v10422_v58 = vadd.f32 %v2893_v31, %v10321_v21  ;;  %v8164_v19 = vpop.f32.mrb[87].mxu1 }
0x19b1   :  { %v3242_v19 = vpack.c.bf16 %v3241_v49, %v3240_v46 }
0x19b2   :  { %v2934_v33 = vpack.c.bf16 %v10422_v58, %v10419_v32 }
0x19b4   :  { %8184 = vmatmul.mubr.msk.bf16.gmra.mrb[104].mxu0 %vm12373_vm6, %v2934_v33  ;;  %vm12383_vm6 = vmmov %vm12381_vm0 }
0x19b5   :  { %v2898_v35 = vpop.f32.mrb[88].mxu1  ;;  %8187 = vmatprep.mubr.msk.bf16.mxu0 %vm12324_vm1, %v12241_v0 }
0x19b6   :  { %v8167_v36 = vpop.f32.mrb[89].mxu1  ;;  %v10430_v61 = vadd.f32 %v2898_v35, %v10329_v16 }
0x19b7   :  { %v2901_v10 = vpop.f32.mrb[90].mxu1 }
0x19b8   :  { %v10433_v54 = vadd.f32 %v2901_v10, %v10332_v22  ;;  %v8168_v21 = vpop.f32.mrb[91].mxu1 }
0x19ba   :  { %v2935_v37 = vpack.c.bf16 %v10433_v54, %v10430_v61 }
0x19bc   :  { %8188 = vmatmul.mubr.msk.bf16.gmra.mrb[108].mxu0 %vm12374_vm7, %v2935_v37  ;;  %vm12384_vm7 = vmmov %vm12381_vm0 }
0x19bd   :  { %v2906_v27 = vpop.f32.mrb[92].mxu1  ;;  %8191 = vmatprep.mubr.msk.bf16.mxu0 %vm12324_vm1, %v12241_v0 }
0x19be   :  { %v8171_v60 = vpop.f32.mrb[93].mxu1  ;;  %v10441_v41 = vadd.f32 %v2906_v27, %v10340_v2 }
0x19bf   :  { %v2909_v39 = vpop.f32.mrb[94].mxu1 }
0x19c0   :  { %v10444_v16 = vadd.f32 %v2909_v39, %v10343_v23  ;;  %v8172_v22 = vpop.f32.mrb[95].mxu1 }
0x19c2   :  { %v2936_v48 = vpack.c.bf16 %v10444_v16, %v10441_v41 }
0x19c4   :  { %8192 = vmatmul.mubr.msk.bf16.gmra.mrb[112].mxu0 %vm12368_vm4, %v2936_v48  ;;  %vm12385_vm4 = vmmov %vm12381_vm0 }
0x19c5   :  { %v2914_v57 = vpop.f32.mrb[96].mxu1  ;;  %8195 = vmatprep.mubr.msk.bf16.mxu0 %vm12324_vm1, %v12241_v0 }
0x19c6   :  { %v8175_v55 = vpop.f32.mrb[97].mxu1  ;;  %v10452_v2 = vadd.f32 %v2914_v57, %v10351_v62  ;;  %v3159_v62 = vpack.c.bf16 %v3158_v43, %v3157_v11 }
0x19c7   :  { %v2917_v52 = vpop.f32.mrb[98].mxu1 }
0x19c8   :  { %v10455_v23 = vadd.f32 %v2917_v52, %v10354_v24  ;;  %v8176_v18 = vpop.f32.mrb[99].mxu1  ;;  %8222 = vmatpush3.bf16.msra.mxu0 %v3159_v62  ;;  %v10468_v24 = vld [vmem:[#allocation16] ss:$0 sm:$0xff] }
0x19c9   :  { %8265 = vmatprep.subr.bf16.mxu0 %v12241_v0 }
0x19ca   :  { %v2937_v6 = vpack.c.bf16 %v10455_v23, %v10452_v2 }
0x19cc   :  { %8196 = vmatmul.mubr.msk.bf16.gmra.mrb[116].mxu0 %vm12377_vm10, %v2937_v6  ;;  %vm12386_vm10 = vmmov %vm12381_vm0 }
0x19cd   :  { %8223 = vmatprep.mubr.msk.bf16.mxu0 %vm12324_vm1, %v12241_v0 }
0x1a7f   :  { %v2995_v17 = vpop.f32.mrb[100].mxu0 }
0x1a80   :  { %v2996_v50 = vadd.f32 %v10468_v24, %v2995_v17  ;;  %v8181_v13 = vpop.f32.mrb[101].mxu0 }
0x1a81   :  { %v2998_v20 = vpop.f32.mrb[102].mxu0 }
0x1a82   :  { %v3034_v59 = vmax.f32 %v2996_v50, 0.0  ;;  %v2999_v56 = vadd.f32 %v10468_v24, %v2998_v20  ;;  %v8182_v29 = vpop.f32.mrb[103].mxu0 }
0x1a84   :  { %v3035_v34 = vmax.f32 %v2999_v56, 0.0  ;;  %v3044_v14 = vadd.f32 %v3034_v59, %v10408_v63 }
0x1a86   :  { %v3045_v15 = vadd.f32 %v3035_v34, %v10411_v3 }
0x1a87   :  { %v3003_v25 = vpop.f32.mrb[104].mxu0 }
0x1a88   :  { %v10476_v28 = vpack.c.bf16 %v3045_v15, %v3044_v14  ;;  %v3004_v53 = vadd.f32 %v10468_v24, %v3003_v25  ;;  %v8185_v31 = vpop.f32.mrb[105].mxu0 }
0x1a89   :  { %v3006_v33 = vpop.f32.mrb[106].mxu0 }
0x1a8a   :  { %v3036_v35 = vmax.f32 %v3004_v53, 0.0  ;;  %v3007_v36 = vadd.f32 %v10468_v24, %v3006_v33  ;;  %v8186_v10 = vpop.f32.mrb[107].mxu0  ;;  %8202 = vmatmul.mubr.msk.bf16.vlgmr.msra.gmra.mrb[100].mxu1 %vm12379_vm8, %v10476_v28  ;;  %8224 = vmatmul.mubr.msk.bf16.vlgmr.msra.gmra.mrb[120].mxu0 %vm12380_vm5, %v10476_v28  ;;  %vm12387_vm8 = vmmov %vm12381_vm0 }
0x1a8b   :  { %8205 = vmatprep.mubr.msk.bf16.mxu1 %vm12324_vm1, %v12241_v0  ;;  %8227 = vmatprep.mubr.msk.bf16.mxu0 %vm12324_vm1, %v12241_v0  ;;  %vm12389_vm5 = vmmov %vm12381_vm0  ;;  %v10553_v10 = vld [vmem:[%s12394_s10] ss:$0 sm:$0xff] }
0x1a8c   :  { %v3037_v63 = vmax.f32 %v3007_v36, 0.0  ;;  %8244 = vmatpush3.bf16.msra.mxu1 %v3242_v19  ;;  %v3046_v3 = vadd.f32 %v3036_v35, %v10419_v32 }
0x1a8d   :  { %8351 = vmatprep.subr.bf16.mxu1 %v12241_v0 }
0x1a8e   :  { %v3047_v21 = vadd.f32 %v3037_v63, %v10422_v58 }
0x1a8f   :  { %v3011_v37 = vpop.f32.mrb[108].mxu0 }
0x1a90   :  { %v3012_v27 = vadd.f32 %v10468_v24, %v3011_v37  ;;  %v8189_v60 = vpop.f32.mrb[109].mxu0  ;;  %v3057_v39 = vpack.c.bf16 %v3047_v21, %v3046_v3 }
0x1a91   :  { %v3014_v22 = vpop.f32.mrb[110].mxu0 }
0x1a92   :  { %v3038_v48 = vmax.f32 %v3012_v27, 0.0  ;;  %v3015_v57 = vadd.f32 %v10468_v24, %v3014_v22  ;;  %v8190_v55 = vpop.f32.mrb[111].mxu0  ;;  %8206 = vmatmul.mubr.msk.bf16.gmra.mrb[104].mxu1 %vm12381_vm0, %v3057_v39  ;;  %8228 = vmatmul.mubr.msk.bf16.gmra.mrb[124].mxu0 %vm12382_vm12, %v3057_v39  ;;  %vm12390_vm12 = vmmov %vm12381_vm0 }
0x1a93   :  { %8209 = vmatprep.mubr.msk.bf16.mxu1 %vm12324_vm1, %v12241_v0  ;;  %8231 = vmatprep.mubr.msk.bf16.mxu0 %vm12324_vm1, %v12241_v0 }
0x1a94   :  { %v3039_v32 = vmax.f32 %v3015_v57, 0.0  ;;  %v3048_v58 = vadd.f32 %v3038_v48, %v10430_v61 }
0x1a96   :  { %v3049_v52 = vadd.f32 %v3039_v32, %v10433_v54 }
0x1a97   :  { %v3019_v18 = vpop.f32.mrb[112].mxu0 }
0x1a98   :  { %v3020_v6 = vadd.f32 %v10468_v24, %v3019_v18  ;;  %v8193_v44 = vpop.f32.mrb[113].mxu0  ;;  %v3058_v8 = vpack.c.bf16 %v3049_v52, %v3048_v58 }
0x1a99   :  { %v3022_v11 = vpop.f32.mrb[114].mxu0 }
0x1a9a   :  { %v3040_v51 = vmax.f32 %v3020_v6, 0.0  ;;  %v3023_v43 = vadd.f32 %v10468_v24, %v3022_v11  ;;  %v8194_v62 = vpop.f32.mrb[115].mxu0  ;;  %8210 = vmatmul.mubr.msk.bf16.gmra.mrb[108].mxu1 %vm12383_vm6, %v3058_v8  ;;  %8232 = vmatmul.mubr.msk.bf16.gmra.mrb[128].mxu0 %vm12384_vm7, %v3058_v8  ;;  %vm12391_vm6 = vmmov %vm12381_vm0 }
0x1a9b   :  { %8213 = vmatprep.mubr.msk.bf16.mxu1 %vm12324_vm1, %v12241_v0  ;;  %8235 = vmatprep.mubr.msk.bf16.mxu0 %vm12324_vm1, %v12241_v0  ;;  %vm12392_vm7 = vmmov %vm12381_vm0 }
0x1a9c   :  { %v3041_v61 = vmax.f32 %v3023_v43, 0.0  ;;  %v3050_v54 = vadd.f32 %v3040_v51, %v10441_v41 }
0x1a9e   :  { %v3051_v17 = vadd.f32 %v3041_v61, %v10444_v16 }
0x1a9f   :  { %v3027_v50 = vpop.f32.mrb[116].mxu0 }
0x1aa0   :  { %v3028_v13 = vadd.f32 %v10468_v24, %v3027_v50  ;;  %v8197_v20 = vpop.f32.mrb[117].mxu0  ;;  %v3059_v59 = vpack.c.bf16 %v3051_v17, %v3050_v54 }
0x1aa1   :  { %v3030_v56 = vpop.f32.mrb[118].mxu0 }
0x1aa2   :  { %v3042_v29 = vmax.f32 %v3028_v13, 0.0  ;;  %v3031_v34 = vadd.f32 %v10468_v24, %v3030_v56  ;;  %v8198_v46 = vpop.f32.mrb[119].mxu0  ;;  %8214 = vmatmul.mubr.msk.bf16.gmra.mrb[112].mxu1 %vm12385_vm4, %v3059_v59  ;;  %8236 = vmatmul.mubr.msk.bf16.gmra.mrb[132].mxu0 %vm12386_vm10, %v3059_v59  ;;  %vm12393_vm4 = vmmov %vm12381_vm0  ;;  %vm4720_vm10 = vcmask 1044480  }
0x1aa3   :  { %8217 = vmatprep.mubr.msk.bf16.mxu1 %vm12324_vm1, %v12241_v0  ;;  %8239 = vmatprep.mubr.msk.bf16.mxu0 %vm12324_vm1, %v12241_v0 }
0x1aa4   :  { %v3043_v41 = vmax.f32 %v3031_v34, 0.0  ;;  %v3052_v16 = vadd.f32 %v3042_v29, %v10452_v2 }
0x1aa6   :  { %v3053_v49 = vadd.f32 %v3043_v41, %v10455_v23  ;;  %v10546_v23 = vld [vmem:[%s12388_s13] ss:$0 sm:$0xff] }
0x1aa8   :  { %v3060_v14 = vpack.c.bf16 %v3053_v49, %v3052_v16 }
0x1aaa   :  { %8218 = vmatmul.mubr.msk.bf16.gmra.mrb[116].mxu1 %vm12387_vm8, %v3060_v14  ;;  %8240 = vmatmul.mubr.msk.bf16.gmra.mrb[136].mxu0 %vm12389_vm5, %v3060_v14  ;;  %vm12396_vm8 = vcmask 1045504   ;;  %vm4662_vm5 = vcmask 613376  }
0x1aab   :  { %8245 = vmatprep.mubr.msk.bf16.mxu1 %vm12324_vm1, %v12241_v0  ;;  %8275 = vmatprep.mubr.msk.bf16.mxu0 %vm12324_vm1, %v12241_v0 }
0x1ab2   :  { %8246 = vmatmul.mubr.msk.bf16.vlgmr.msra.gmra.mrb[120].mxu1 %vm12381_vm0, %v10476_v28  ;;  %vm12397_vm0 = vcmp.eq.s32.totalorder %v10138_v42, %v9800_v5 }
0x1ab3   :  { %8249 = vmatprep.mubr.msk.bf16.mxu1 %vm12324_vm1, %v12241_v0 }
0x1aba   :  { %8250 = vmatmul.mubr.msk.bf16.gmra.mrb[124].mxu1 %vm12390_vm12, %v3057_v39  ;;  %vm12398_vm12 = vcmp.eq.s32.totalorder %v10131_v9, %v9800_v5 }
0x1abb   :  { %8253 = vmatprep.mubr.msk.bf16.mxu1 %vm12324_vm1, %v12241_v0 }
0x1ac2   :  { %8254 = vmatmul.mubr.msk.bf16.gmra.mrb[128].mxu1 %vm12391_vm6, %v3058_v8  ;;  %vm12399_vm6 = vcmp.eq.s32.totalorder %v10147_v45, %v9800_v5 }
0x1ac3   :  { %8257 = vmatprep.mubr.msk.bf16.mxu1 %vm12324_vm1, %v12241_v0  ;;  %v7381_v9 = vsel %vm12399_vm6, 1.0, %v12241_v0 }
0x1aca   :  { %8258 = vmatmul.mubr.msk.bf16.gmra.mrb[132].mxu1 %vm12392_vm7, %v3059_v59 }
0x1acb   :  { %8261 = vmatprep.mubr.msk.bf16.mxu1 %vm12324_vm1, %v12241_v0 }
0x1ad2   :  { %8262 = vmatmul.mubr.msk.bf16.gmra.mrb[136].mxu1 %vm12393_vm4, %v3060_v14 }
0x1ad3   :  { %8361 = vmatprep.mubr.msk.bf16.mxu1 %vm12324_vm1, %v12241_v0 }
0x1b5d   :  { %v10543_v2 = vpop.f32.mrb[100].mxu1  ;;  %v3201_v24 = vpop.f32.mrb[120].mxu0 }
0x1b5e   :  { %v8203_v15 = vpop.f32.mrb[101].mxu1  ;;  %v8225_v25 = vpop.f32.mrb[121].mxu0  ;;  %v3202_v31 = vadd.f32 %v10546_v23, %v3201_v24 }
0x1b5f   :  { %v10548_v28 = vpop.f32.mrb[102].mxu1  ;;  %v3204_v53 = vpop.f32.mrb[122].mxu0 }
0x1b60   :  { %v3205_v19 = vadd.f32 %v10546_v23, %v3204_v53  ;;  %v8204_v33 = vpop.f32.mrb[103].mxu1  ;;  %v8226_v35 = vpop.f32.mrb[123].mxu0 }
0x1b61   :  { %v4721_v35 = vsel %vm4720_vm10, 4294967295, %v9479_v26 }
0x1b62   :  { %v4657_v36 = vpack.c.bf16 %v3205_v19, %v3202_v31 }
0x1b64   :  { %8266 = vmatpush3.bf16.msra.mxu0 %v4657_v36 }
0x1b65   :  { %v3126_v63 = vpop.f32.mrb[104].mxu1  ;;  %v3209_v3 = vpop.f32.mrb[124].mxu0  ;;  %8267 = vmatprep.subr.bf16.mxu0 %v12241_v0 }
0x1b66   :  { %v10557_v21 = vadd.f32 %v10553_v10, %v3126_v63  ;;  %v8207_v37 = vpop.f32.mrb[105].mxu1  ;;  %v8229_v27 = vpop.f32.mrb[125].mxu0  ;;  %v3210_v22 = vadd.f32 %v10546_v23, %v3209_v3 }
0x1b67   :  { %v3129_v60 = vpop.f32.mrb[106].mxu1  ;;  %v3212_v39 = vpop.f32.mrb[126].mxu0 }
0x1b68   :  { %v10561_v48 = vadd.f32 %v10553_v10, %v3129_v60  ;;  %v3213_v57 = vadd.f32 %v10546_v23, %v3212_v39  ;;  %v8208_v55 = vpop.f32.mrb[107].mxu1  ;;  %v8230_v32 = vpop.f32.mrb[127].mxu0 }
0x1b69   :  { %v10597_v32 = vld [vmem:[%s12395_s11] ss:$0 sm:$0xff] }
0x1b6a   :  { %v4658_v58 = vpack.c.bf16 %v3213_v57, %v3210_v22  ;;  %v10593_v22 = vsel %vm12396_vm8, %v4721_v35, 0 }
0x1b6c   :  { %8268 = vmatpush3.bf16.msra.mxu0 %v4658_v58  ;;  %v10601_v58 = vpack.c.bf16 %v9830_v12, %v9813_v7  ;;  %v7379_v7 = vsel %vm12397_vm0, 1.0, %v12241_v0  ;;  %v7380_v12 = vsel %vm12398_vm12, 1.0, %v12241_v0 }
0x1b6d   :  { %v3134_v52 = vpop.f32.mrb[108].mxu1  ;;  %v3217_v18 = vpop.f32.mrb[128].mxu0  ;;  %8269 = vmatprep.subr.bf16.mxu0 %v12241_v0 }
0x1b6e   :  { %v10566_v6 = vadd.f32 %v10553_v10, %v3134_v52  ;;  %v8211_v44 = vpop.f32.mrb[109].mxu1  ;;  %v8233_v8 = vpop.f32.mrb[129].mxu0  ;;  %v3218_v43 = vadd.f32 %v10546_v23, %v3217_v18 }
0x1b6f   :  { %v3137_v11 = vpop.f32.mrb[110].mxu1  ;;  %v3220_v51 = vpop.f32.mrb[130].mxu0 }
0x1b70   :  { %v10570_v62 = vadd.f32 %v10553_v10, %v3137_v11  ;;  %v3221_v61 = vadd.f32 %v10546_v23, %v3220_v51  ;;  %v8212_v54 = vpop.f32.mrb[111].mxu1  ;;  %v8234_v17 = vpop.f32.mrb[131].mxu0 }
0x1b72   :  { %v4659_v50 = vpack.c.bf16 %v3221_v61, %v3218_v43  ;;  %v10617_v43 = vpack.c.bf16 %v7380_v12, %v7379_v7  ;;  %v3329_v7 = vadd.s32 96, %v9798_v4 }
0x1b74   :  { %8270 = vmatpush3.bf16.msra.mxu0 %v4659_v50 }
0x1b75   :  { %v3142_v13 = vpop.f32.mrb[112].mxu1  ;;  %v3225_v20 = vpop.f32.mrb[132].mxu0  ;;  %8271 = vmatprep.subr.bf16.mxu0 %v12241_v0 }
0x1b76   :  { %v10575_v59 = vadd.f32 %v10553_v10, %v3142_v13  ;;  %v8215_v56 = vpop.f32.mrb[113].mxu1  ;;  %v8237_v29 = vpop.f32.mrb[133].mxu0  ;;  %v3226_v41 = vadd.f32 %v10546_v23, %v3225_v20  ;;  %v7382_v20 = vsel %vm2261_vm9, 1.0, %v12241_v0 }
0x1b77   :  { %v3145_v34 = vpop.f32.mrb[114].mxu1  ;;  %v3228_v46 = vpop.f32.mrb[134].mxu0  ;;  %v3323_v56 = vadd.s32 48, %v9798_v4  ;;  %v3324_v29 = vadd.s32 56, %v9798_v4 }
0x1b78   :  { %v10579_v16 = vadd.f32 %v10553_v10, %v3145_v34  ;;  %v3229_v49 = vadd.f32 %v10546_v23, %v3228_v46  ;;  %v8216_v14 = vpop.f32.mrb[115].mxu1  ;;  %v8238_v24 = vpop.f32.mrb[135].mxu0  ;;  %v10636_v46 = vpack.c.bf16 %v7382_v20, %v7381_v9  ;;  %v3331_v9 = vadd.s32 112, %v9798_v4 }
0x1b79   :  { %vm3355_vm7 = vcmp.eq.s32.totalorder %v3323_v56, %v9800_v5  ;;  %vm3356_vm4 = vcmp.eq.s32.totalorder %v3324_v29, %v9800_v5  ;;  %v10644_v24 = vadd.s32 72, %v9798_v4  ;;  %v3332_v20 = vadd.s32 120, %v9798_v4 }
0x1b7a   :  { %v4660_v15 = vpack.c.bf16 %v3229_v49, %v3226_v41 }
0x1b7b   :  { %vm3358_vm9 = vcmp.eq.s32.totalorder %v10644_v24, %v9800_v5 }
0x1b7c   :  { %8272 = vmatpush3.bf16.msra.mxu0 %v4660_v15  ;;  %v10647_v15 = vadd.s32 75, %v9800_v5 }
0x1b7d   :  { %v3150_v25 = vpop.f32.mrb[116].mxu1  ;;  %v3233_v53 = vpop.f32.mrb[136].mxu0  ;;  %8273 = vmatprep.subr.bf16.mxu0 %v12241_v0 }
0x1b7e   :  { %v10584_v31 = vadd.f32 %v10553_v10, %v3150_v25  ;;  %v8219_v19 = vpop.f32.mrb[117].mxu1  ;;  %v8241_v33 = vpop.f32.mrb[137].mxu0  ;;  %v3234_v3 = vadd.f32 %v10546_v23, %v3233_v53  ;;  %v7383_v53 = vsel %vm3355_vm7, 1.0, %v12241_v0  ;;  %vm3581_vm10 = vcmp.eq.s32.totalorder %v10644_v24, %v10647_v15 }
0x1b7f   :  { %v3153_v36 = vpop.f32.mrb[118].mxu1  ;;  %v3236_v63 = vpop.f32.mrb[138].mxu0  ;;  %v7384_v19 = vsel %vm3356_vm4, 1.0, %v12241_v0  ;;  %v3325_v33 = vadd.s32 64, %v9798_v4  ;;  %vm3809_vm0 = vmor %vm3358_vm9, %vm3581_vm10 }
0x1b80   :  { %v10589_v37 = vadd.f32 %v10553_v10, %v3153_v36  ;;  %v3237_v27 = vadd.f32 %v10546_v23, %v3236_v63  ;;  %v8220_v60 = vpop.f32.mrb[119].mxu1  ;;  %v8242_v39 = vpop.f32.mrb[139].mxu0  ;;  %v10660_v36 = vpack.c.bf16 %v7384_v19, %v7383_v53  ;;  %v10737_v53 = vadd.s32 150, %v9800_v5 }
0x1b81   :  { %vm3357_vm8 = vcmp.eq.s32.totalorder %v3325_v33, %v9800_v5  ;;  %v3336_v19 = vadd.s32 152, %v9798_v4 }
0x1b82   :  { %v4661_v57 = vpack.c.bf16 %v3237_v27, %v3234_v3  ;;  %v3327_v27 = vadd.s32 80, %v9798_v4 }
0x1b84   :  { %v4724_v55 = vand.u32 %v10593_v22, %v4661_v57  ;;  %vm3359_vm12 = vcmp.eq.s32.totalorder %v3327_v27, %v9800_v5  ;;  %vm3582_vm6 = vcmp.eq.s32.totalorder %v3327_v27, %v10647_v15  ;;  %v3338_v27 = vadd.s32 168, %v9798_v4 }
0x1b85   :  { %v3284_v26 = vpop.f32.mrb[120].mxu1  ;;  %vm3810_vm9 = vmor %vm3359_vm12, %vm3582_vm6 }
0x1b86   :  { %v8247_v52 = vpop.f32.mrb[121].mxu1  ;;  %8274 = vmatpush3.bf16.msra.mxu0 %v4724_v55  ;;  %v3285_v23 = vadd.f32 %v10597_v32, %v3284_v26  ;;  %v3328_v55 = vadd.s32 88, %v9798_v4 }
0x1b87   :  { %v3287_v18 = vpop.f32.mrb[122].mxu1  ;;  %v7385_v52 = vsel %vm3357_vm8, 1.0, %v12241_v0  ;;  %vm3361_vm8 = vcmp.eq.s32.totalorder %v3329_v7, %v9800_v5 }
0x1b88   :  { %v3288_v44 = vadd.f32 %v10597_v32, %v3287_v18  ;;  %v8248_v8 = vpop.f32.mrb[123].mxu1  ;;  %v7386_v18 = vsel %vm3809_vm0, 1.0, %v12241_v0  ;;  %vm3360_vm7 = vcmp.eq.s32.totalorder %v3328_v55, %v9800_v5  ;;  %vm3583_vm4 = vcmp.eq.s32.totalorder %v3328_v55, %v10647_v15 }
0x1b89   :  { %8276 = vmatmul.mubr.msk.bf16.vlgmr.msra.gmra.mrb[140].mxu0 %vm4662_vm5, %v10601_v58  ;;  %vm3811_vm10 = vmor %vm3360_vm7, %vm3583_vm4  ;;  %vm3584_vm0 = vcmp.eq.s32.totalorder %v3329_v7, %v10647_v15  ;;  %v3339_v55 = vadd.s32 176, %v9798_v4 }
0x1b8a   :  { %v4949_v11 = vpack.c.bf16 %v3288_v44, %v3285_v23  ;;  %8279 = vmatprep.mubr.msk.bf16.mxu0 %vm12324_vm1, %v12241_v0  ;;  %v10678_v44 = vpack.c.bf16 %v7386_v18, %v7385_v52  ;;  %vm3812_vm7 = vmor %vm3361_vm8, %vm3584_vm0  ;;  %vm3364_vm8 = vcmp.eq.s32.totalorder %v3332_v20, %v9800_v5  ;;  %vm3587_vm0 = vcmp.eq.s32.totalorder %v3332_v20, %v10647_v15 }
0x1b8b   :  { %v7389_v56 = vsel %vm3812_vm7, 1.0, %v12241_v0 }
0x1b8c   :  { %8352 = vmatpush3.bf16.msra.mxu1 %v4949_v11  ;;  %12400 = vst [vmem:[#allocation73_spill] sm:$0xff] %v10678_v44 }
0x1b8d   :  { %v3292_v51 = vpop.f32.mrb[124].mxu1  ;;  %8353 = vmatprep.subr.bf16.mxu1 %v12241_v0 }
0x1b8e   :  { %v8251_v61 = vpop.f32.mrb[125].mxu1  ;;  %v3293_v17 = vadd.f32 %v10597_v32, %v3292_v51 }
0x1b8f   :  { %v3295_v54 = vpop.f32.mrb[126].mxu1 }
0x1b90   :  { %v3296_v50 = vadd.f32 %v10597_v32, %v3295_v54  ;;  %v8252_v13 = vpop.f32.mrb[127].mxu1  ;;  %v3330_v54 = vadd.s32 104, %v9798_v4 }
0x1b91   :  { %8280 = vmatmul.mubr.msk.bf16.gmra.mrb[144].mxu0 %vm4662_vm5, %v10617_v43  ;;  %v7388_v13 = vsel %vm3811_vm10, 1.0, %v12241_v0  ;;  %vm3586_vm10 = vcmp.eq.s32.totalorder %v3331_v9, %v10647_v15 }
0x1b92   :  { %v4950_v42 = vpack.c.bf16 %v3296_v50, %v3293_v17  ;;  %8283 = vmatprep.mubr.msk.bf16.mxu0 %vm12324_vm1, %v12241_v0  ;;  %v7387_v50 = vsel %vm3810_vm9, 1.0, %v12241_v0  ;;  %vm3362_vm12 = vcmp.eq.s32.totalorder %v3330_v54, %v9800_v5  ;;  %vm3585_vm6 = vcmp.eq.s32.totalorder %v3330_v54, %v10647_v15 }
0x1b93   :  { %vm3813_vm4 = vmor %vm3362_vm12, %vm3585_vm6  ;;  %vm3363_vm9 = vcmp.eq.s32.totalorder %v3331_v9, %v9800_v5  ;;  %v3346_v9 = vadd.s32 232, %v9798_v4 }
0x1b94   :  { %8354 = vmatpush3.bf16.msra.mxu1 %v4950_v42  ;;  %v10696_v42 = vpack.c.bf16 %v7388_v13, %v7387_v50  ;;  %v7390_v29 = vsel %vm3813_vm4, 1.0, %v12241_v0  ;;  %vm3814_vm12 = vmor %vm3363_vm9, %vm3586_vm10  ;;  %v10829_v13 = vadd.s32 224, %v9798_v4 }
0x1b95   :  { %v3300_v34 = vpop.f32.mrb[128].mxu1  ;;  %8355 = vmatprep.subr.bf16.mxu1 %v12241_v0  ;;  %vm3815_vm6 = vmor %vm3364_vm8, %vm3587_vm0  ;;  %vm3591_vm8 = vcmp.eq.s32.totalorder %v3336_v19, %v10647_v15  ;;  %vm3896_vm0 = vcmp.eq.s32.totalorder %v3336_v19, %v10737_v53 }
0x1b96   :  { %v8255_v41 = vpop.f32.mrb[129].mxu1  ;;  %v3301_v45 = vadd.f32 %v10597_v32, %v3300_v34  ;;  %12401 = vst [vmem:[#allocation74_spill] sm:$0xff] %v10696_v42  ;;  %v10715_v34 = vpack.c.bf16 %v7390_v29, %v7389_v56 }
0x1b97   :  { %v3303_v49 = vpop.f32.mrb[130].mxu1  ;;  %v7391_v41 = vsel %vm3814_vm12, 1.0, %v12241_v0 }
0x1b98   :  { %v3304_v47 = vadd.f32 %v10597_v32, %v3303_v49  ;;  %v8256_v14 = vpop.f32.mrb[131].mxu1  ;;  %12402 = vst [vmem:[#allocation75_spill] sm:$0xff] %v10715_v34  ;;  %v7392_v49 = vsel %vm3815_vm6, 1.0, %v12241_v0  ;;  %vm4124_vm6 = vmor %vm3591_vm8, %vm3896_vm0 }
0x1b99   :  { %8284 = vmatmul.mubr.msk.bf16.gmra.mrb[148].mxu0 %vm4662_vm5, %v10636_v46  ;;  %v10729_v14 = vpack.c.bf16 %v7392_v49, %v7391_v41  ;;  %v3347_v41 = vadd.s32 240, %v9798_v4  ;;  %v3348_v49 = vadd.s32 248, %v9798_v4 }
0x1b9a   :  { %v4951_v25 = vpack.c.bf16 %v3304_v47, %v3301_v45  ;;  %8287 = vmatprep.mubr.msk.bf16.mxu0 %vm12324_vm1, %v12241_v0  ;;  %v3333_v45 = vadd.s32 128, %v9798_v4  ;;  %v3334_v47 = vadd.s32 136, %v9798_v4 }
0x1b9b   :  { %12403 = vst [vmem:[#allocation76_spill] sm:$0xff] %v10729_v14 }
0x1b9c   :  { %8356 = vmatpush3.bf16.msra.mxu1 %v4951_v25  ;;  %vm3588_vm7 = vcmp.eq.s32.totalorder %v3333_v45, %v10647_v15  ;;  %vm3589_vm4 = vcmp.eq.s32.totalorder %v3334_v47, %v10647_v15  ;;  %v10734_v25 = vadd.s32 144, %v9798_v4 }
0x1b9d   :  { %v3308_v35 = vpop.f32.mrb[132].mxu1  ;;  %8357 = vmatprep.subr.bf16.mxu1 %v12241_v0  ;;  %v7393_v33 = vsel %vm3588_vm7, 1.0, %v12241_v0 }
0x1b9e   :  { %v8259_v63 = vpop.f32.mrb[133].mxu1  ;;  %v3309_v60 = vadd.f32 %v10597_v32, %v3308_v35  ;;  %v7394_v35 = vsel %vm3589_vm4, 1.0, %v12241_v0  ;;  %vm3590_vm9 = vcmp.eq.s32.totalorder %v10734_v25, %v10647_v15  ;;  %vm3895_vm10 = vcmp.eq.s32.totalorder %v10734_v25, %v10737_v53 }
0x1b9f   :  { %v3311_v3 = vpop.f32.mrb[134].mxu1  ;;  %v10756_v63 = vpack.c.bf16 %v7394_v35, %v7393_v33  ;;  %vm4123_vm12 = vmor %vm3590_vm9, %vm3895_vm10  ;;  %vm3593_vm9 = vcmp.eq.s32.totalorder %v3338_v27, %v10647_v15  ;;  %vm3898_vm10 = vcmp.eq.s32.totalorder %v3338_v27, %v10737_v53  ;;  %v3349_v33 = vadd.s32 256, %v9798_v4 }
0x1ba0   :  { %v3312_v39 = vadd.f32 %v10597_v32, %v3311_v3  ;;  %v8260_v57 = vpop.f32.mrb[135].mxu1  ;;  %v3337_v3 = vadd.s32 160, %v9798_v4  ;;  %vm4126_vm0 = vmor %vm3593_vm9, %vm3898_vm10  ;;  %v3350_v35 = vadd.s32 264, %v9798_v4 }
0x1ba1   :  { %8288 = vmatmul.mubr.msk.bf16.gmra.mrb[152].mxu0 %vm4662_vm5, %v10660_v36  ;;  %12404 = vst [vmem:[#allocation77_spill] sm:$0xff] %v10756_v63  ;;  %v7398_v18 = vsel %vm4126_vm0, 1.0, %v12241_v0 }
0x1ba2   :  { %v4952_v26 = vpack.c.bf16 %v3312_v39, %v3309_v60  ;;  %8291 = vmatprep.mubr.msk.bf16.mxu0 %vm12324_vm1, %v12241_v0  ;;  %v7395_v60 = vsel %vm4123_vm12, 1.0, %v12241_v0  ;;  %v7396_v39 = vsel %vm4124_vm6, 1.0, %v12241_v0  ;;  %vm3592_vm7 = vcmp.eq.s32.totalorder %v3337_v3, %v10647_v15 }
0x1ba3   :  { %vm3897_vm4 = vcmp.eq.s32.totalorder %v3337_v3, %v10737_v53  ;;  %v10774_v57 = vpack.c.bf16 %v7396_v39, %v7395_v60  ;;  %vm3594_vm12 = vcmp.eq.s32.totalorder %v3339_v55, %v10647_v15  ;;  %vm3899_vm6 = vcmp.eq.s32.totalorder %v3339_v55, %v10737_v53 }
0x1ba4   :  { %8358 = vmatpush3.bf16.msra.mxu1 %v4952_v26  ;;  %vm4125_vm8 = vmor %vm3592_vm7, %vm3897_vm4  ;;  %v3340_v26 = vadd.s32 184, %v9798_v4  ;;  %v3351_v39 = vadd.s32 272, %v9798_v4 }
0x1ba5   :  { %v3316_v23 = vpop.f32.mrb[136].mxu1  ;;  %8359 = vmatprep.subr.bf16.mxu1 %v12241_v0  ;;  %12405 = vst [vmem:[#allocation78_spill] sm:$0xff] %v10774_v57  ;;  %v7397_v52 = vsel %vm4125_vm8, 1.0, %v12241_v0  ;;  %vm4127_vm9 = vmor %vm3594_vm12, %vm3899_vm6 }
0x1ba6   :  { %v8263_v8 = vpop.f32.mrb[137].mxu1  ;;  %v3317_v12 = vadd.f32 %v10597_v32, %v3316_v23  ;;  %vm3595_vm7 = vcmp.eq.s32.totalorder %v3340_v26, %v10647_v15  ;;  %vm3900_vm4 = vcmp.eq.s32.totalorder %v3340_v26, %v10737_v53  ;;  %v10792_v23 = vpack.c.bf16 %v7398_v18, %v7397_v52 }
0x1ba7   :  { %v3319_v11 = vpop.f32.mrb[138].mxu1  ;;  %vm4128_vm10 = vmor %vm3595_vm7, %vm3900_vm4  ;;  %v3341_v8 = vadd.s32 192, %v9798_v4  ;;  %v7399_v7 = vsel %vm4127_vm9, 1.0, %v12241_v0  ;;  %v3352_v52 = vadd.s32 280, %v9798_v4 }
0x1ba8   :  { %v3320_v51 = vadd.f32 %v10597_v32, %v3319_v11  ;;  %v8264_v61 = vpop.f32.mrb[139].mxu1  ;;  %12406 = vst [vmem:[#allocation79_spill] sm:$0xff] %v10792_v23  ;;  %v3342_v11 = vadd.s32 200, %v9798_v4 }
0x1ba9   :  { %8292 = vmatmul.mubr.msk.bf16.gmra.mrb[156].mxu0 %vm4662_vm5, %v10678_v44  ;;  %vm3596_vm8 = vcmp.eq.s32.totalorder %v3341_v8, %v10647_v15  ;;  %vm3901_vm0 = vcmp.eq.s32.totalorder %v3341_v8, %v10737_v53 }
0x1baa   :  { %v4953_v17 = vpack.c.bf16 %v3320_v51, %v3317_v12  ;;  %8295 = vmatprep.mubr.msk.bf16.mxu0 %vm12324_vm1, %v12241_v0  ;;  %v7400_v12 = vsel %vm4128_vm10, 1.0, %v12241_v0  ;;  %vm3597_vm12 = vcmp.eq.s32.totalorder %v3342_v11, %v10647_v15  ;;  %vm3902_vm6 = vcmp.eq.s32.totalorder %v3342_v11, %v10737_v53  ;;  %vm4129_vm7 = vmor %vm3596_vm8, %vm3901_vm0 }
0x1bab   :  { %v10810_v51 = vpack.c.bf16 %v7400_v12, %v7399_v7  ;;  %vm4130_vm4 = vmor %vm3597_vm12, %vm3902_vm6  ;;  %v7401_v61 = vsel %vm4129_vm7, 1.0, %v12241_v0  ;;  %v3343_v15 = vadd.s32 208, %v9798_v4  ;;  %vm3905_vm8 = vcmp.eq.s32.totalorder %v10829_v13, %v10737_v53 }
0x1bac   :  { %v4955_v32 = vand.u32 %v4953_v17, %v10593_v22  ;;  %v7402_v54 = vsel %vm4130_vm4, 1.0, %v12241_v0  ;;  %v3344_v17 = vadd.s32 216, %v9798_v4  ;;  %vm3906_vm12 = vcmp.eq.s32.totalorder %v3346_v9, %v10737_v53 }
0x1bad   :  { %12407 = vst [vmem:[#allocation80_spill] sm:$0xff] %v10810_v51  ;;  %v10824_v50 = vpack.c.bf16 %v7402_v54, %v7401_v61  ;;  %vm3903_vm9 = vcmp.eq.s32.totalorder %v3343_v15, %v10737_v53  ;;  %v3353_v11 = vadd.s32 288, %v9798_v4  ;;  %v10918_v7 = vadd.s32 296, %v9798_v4 }
0x1bae   :  { %8360 = vmatpush3.bf16.msra.mxu1 %v4955_v32  ;;  %vm3904_vm10 = vcmp.eq.s32.totalorder %v3344_v17, %v10737_v53  ;;  %v10832_v32 = vadd.s32 225, %v9800_v5  ;;  %v7403_v20 = vsel %vm3903_vm9, 1.0, %v12241_v0  ;;  %vm3907_vm9 = vcmp.eq.s32.totalorder %v3347_v41, %v10737_v53 }
0x1baf   :  { %8437 = vmatprep.subr.bf16.mxu1 %v12241_v0  ;;  %12408 = vst [vmem:[#allocation81_spill] sm:$0xff] %v10824_v50  ;;  %v7404_v56 = vsel %vm3904_vm10, 1.0, %v12241_v0  ;;  %v10937_v54 = vadd.f32 %v10553_v10, %v10548_v28  ;;  %v10943_v17 = vadd.f32 %v10553_v10, %v10543_v2 }
0x1bb0   :  { %vm4210_vm0 = vcmp.eq.s32.totalorder %v10829_v13, %v10832_v32  ;;  %vm4211_vm6 = vcmp.eq.s32.totalorder %v3346_v9, %v10832_v32  ;;  %v10851_v29 = vpack.c.bf16 %v7404_v56, %v7403_v20  ;;  %vm4212_vm10 = vcmp.eq.s32.totalorder %v3347_v41, %v10832_v32 }
0x1bb1   :  { %8296 = vmatmul.mubr.msk.bf16.gmra.mrb[160].mxu0 %vm4662_vm5, %v10696_v42  ;;  %8362 = vmatmul.mubr.msk.bf16.vlgmr.msra.gmra.mrb[140].mxu1 %vm4662_vm5, %v10601_v58  ;;  %vm4438_vm7 = vmor %vm3905_vm8, %vm4210_vm0  ;;  %vm3908_vm8 = vcmp.eq.s32.totalorder %v3348_v49, %v10737_v53  ;;  %vm4213_vm0 = vcmp.eq.s32.totalorder %v3348_v49, %v10832_v32 }
0x1bb2   :  { %8299 = vmatprep.mubr.msk.bf16.mxu0 %vm12324_vm1, %v12241_v0  ;;  %8365 = vmatprep.mubr.msk.bf16.mxu1 %vm12324_vm1, %v12241_v0  ;;  %12409 = vst [vmem:[#allocation82_spill] sm:$0xff] %v10851_v29  ;;  %vm4439_vm4 = vmor %vm3906_vm12, %vm4211_vm6  ;;  %v7405_v45 = vsel %vm4438_vm7, 1.0, %v12241_v0  ;;  %vm3909_vm7 = vcmp.eq.s32.totalorder %v3349_v33, %v10737_v53 }
0x1bb3   :  { %v7406_v47 = vsel %vm4439_vm4, 1.0, %v12241_v0  ;;  %vm4440_vm12 = vmor %vm3907_vm9, %vm4212_vm10  ;;  %vm4214_vm4 = vcmp.eq.s32.totalorder %v3349_v33, %v10832_v32  ;;  %vm3910_vm9 = vcmp.eq.s32.totalorder %v3350_v35, %v10737_v53  ;;  %vm4215_vm10 = vcmp.eq.s32.totalorder %v3350_v35, %v10832_v32 }
0x1bb4   :  { %v10869_v19 = vpack.c.bf16 %v7406_v47, %v7405_v45  ;;  %vm4441_vm6 = vmor %vm3908_vm8, %vm4213_vm0  ;;  %v7407_v3 = vsel %vm4440_vm12, 1.0, %v12241_v0  ;;  %vm3911_vm12 = vcmp.eq.s32.totalorder %v3351_v39, %v10737_v53 }
0x1bb5   :  { %v7408_v27 = vsel %vm4441_vm6, 1.0, %v12241_v0  ;;  %vm4442_vm8 = vmor %vm3909_vm7, %vm4214_vm4  ;;  %vm4216_vm6 = vcmp.eq.s32.totalorder %v3351_v39, %v10832_v32  ;;  %vm4217_vm7 = vcmp.eq.s32.totalorder %v3352_v52, %v10832_v32 }
0x1bb6   :  { %12410 = vst [vmem:[#allocation83_spill] sm:$0xff] %v10869_v19  ;;  %v10887_v60 = vpack.c.bf16 %v7408_v27, %v7407_v3  ;;  %vm4443_vm0 = vmor %vm3910_vm9, %vm4215_vm10  ;;  %v7409_v55 = vsel %vm4442_vm8, 1.0, %v12241_v0  ;;  %v7412_v53 = vsel %vm4217_vm7, 1.0, %v12241_v0  ;;  %vm4218_vm9 = vcmp.eq.s32.totalorder %v3353_v11, %v10832_v32 }
0x1bb7   :  { %v7410_v26 = vsel %vm4443_vm0, 1.0, %v12241_v0  ;;  %vm4444_vm4 = vmor %vm3911_vm12, %vm4216_vm6  ;;  %vm4219_vm10 = vcmp.eq.s32.totalorder %v10918_v7, %v10832_v32  ;;  %v7413_v61 = vsel %vm4218_vm9, 1.0, %v12241_v0  ;;  %v10947_v32 = vpack.c.bf16 %v10937_v54, %v10943_v17 }
0x1bb8   :  { %12411 = vst [vmem:[#allocation84_spill] sm:$0xff] %v10887_v60  ;;  %v10903_v18 = vpack.c.bf16 %v7410_v26, %v7409_v55  ;;  %v7411_v8 = vsel %vm4444_vm4, 1.0, %v12241_v0  ;;  %v7414_v4 = vsel %vm4219_vm10, 1.0, %v12241_v0  ;;  %vm12415_vm8 = vcmask 130048  }
0x1bb9   :  { %8300 = vmatmul.mubr.msk.bf16.gmra.mrb[164].mxu0 %vm4662_vm5, %v10715_v34  ;;  %8366 = vmatmul.mubr.msk.bf16.gmra.mrb[144].mxu1 %vm4662_vm5, %v10617_v43  ;;  %v10920_v12 = vpack.c.bf16 %v7412_v53, %v7411_v8  ;;  %v10939_v15 = vpack.c.bf16 %v7414_v4, %v7413_v61  ;;  %vm3619_vm0 = vcmp.ge.s32.totalorder %v10644_v24, 75  ;;  %vm3428_vm12 = vcmp.lt.s32.totalorder %v10644_v24, 75 }
0x1bba   :  { %8303 = vmatprep.mubr.msk.bf16.mxu0 %vm12324_vm1, %v12241_v0  ;;  %8369 = vmatprep.mubr.msk.bf16.mxu1 %vm12324_vm1, %v12241_v0  ;;  %12412 = vst [vmem:[#allocation85_spill] sm:$0xff] %v10903_v18  ;;  %vm3733_vm6 = vmand %vm3619_vm0, %vm2319_vm3  ;;  %vm12416_vm4 = vcmp.lt.s32.totalorder %v9800_v5, 8 }
0x1bbb   :  { %12413 = vst [vmem:[#allocation86_spill] sm:$0xff] %v10920_v12  ;;  %12414 = vst [vmem:[#allocation87_spill] sm:$0xff] %v10939_v15 }
0x1bbc   :  { %vm3542_vm7 = vmand %vm3428_vm12, %vm2287_vm13  ;;  %vm3666_vm13 = vcmp.lt.s32.totalorder %v10734_v25, 150 }
0x1bbd   :  { %vm3771_vm9 = vmand %vm3733_vm6, %vm12416_vm4 }
0x1bbe   :  { %vm3847_vm10 = vmor %vm3542_vm7, %vm3771_vm9  ;;  %vm12423_vm9 = vcmask 130048  }
0x1bbf   :  { %vm3742_vm0 = vmand %vm3666_vm13, %vm2319_vm3 }
0x1bc0   :  { %vm12418_vm6 = vmmov %vm12416_vm4 }
0x1bc1   :  { %8304 = vmatmul.mubr.msk.bf16.gmra.mrb[168].mxu0 %vm4662_vm5, %v10729_v14  ;;  %8370 = vmatmul.mubr.msk.bf16.gmra.mrb[148].mxu1 %vm4662_vm5, %v10636_v46  ;;  %vm11063_vm7 = vmand %vm3742_vm0, %vm12418_vm6 }
0x1bc2   :  { %8307 = vmatprep.mubr.msk.bf16.mxu0 %vm12324_vm1, %v12241_v0  ;;  %8373 = vmatprep.mubr.msk.bf16.mxu1 %vm12324_vm1, %v12241_v0  ;;  %vm12428_vm13 = vmmov %vm12423_vm9 }
0x1bc9   :  { %8308 = vmatmul.mubr.msk.bf16.gmra.mrb[172].mxu0 %vm4662_vm5, %v10756_v63  ;;  %8374 = vmatmul.mubr.msk.bf16.gmra.mrb[152].mxu1 %vm4662_vm5, %v10660_v36 }
0x1bca   :  { %8311 = vmatprep.mubr.msk.bf16.mxu0 %vm12324_vm1, %v12241_v0  ;;  %8377 = vmatprep.mubr.msk.bf16.mxu1 %vm12324_vm1, %v12241_v0 }
0x1bd1   :  { %8312 = vmatmul.mubr.msk.bf16.gmra.mrb[176].mxu0 %vm4662_vm5, %v10774_v57  ;;  %8378 = vmatmul.mubr.msk.bf16.gmra.mrb[156].mxu1 %vm4662_vm5, %v10678_v44 }
0x1bd2   :  { %8315 = vmatprep.mubr.msk.bf16.mxu0 %vm12324_vm1, %v12241_v0  ;;  %8381 = vmatprep.mubr.msk.bf16.mxu1 %vm12324_vm1, %v12241_v0 }
0x1bd9   :  { %8316 = vmatmul.mubr.msk.bf16.gmra.mrb[180].mxu0 %vm4662_vm5, %v10792_v23  ;;  %8382 = vmatmul.mubr.msk.bf16.gmra.mrb[160].mxu1 %vm4662_vm5, %v10696_v42 }
0x1bda   :  { %8319 = vmatprep.mubr.msk.bf16.mxu0 %vm12324_vm1, %v12241_v0  ;;  %8385 = vmatprep.mubr.msk.bf16.mxu1 %vm12324_vm1, %v12241_v0 }
0x1be1   :  { %8320 = vmatmul.mubr.msk.bf16.gmra.mrb[184].mxu0 %vm4662_vm5, %v10810_v51  ;;  %8386 = vmatmul.mubr.msk.bf16.gmra.mrb[164].mxu1 %vm4662_vm5, %v10715_v34 }
0x1be2   :  { %8323 = vmatprep.mubr.msk.bf16.mxu0 %vm12324_vm1, %v12241_v0  ;;  %8389 = vmatprep.mubr.msk.bf16.mxu1 %vm12324_vm1, %v12241_v0 }
0x1be9   :  { %8324 = vmatmul.mubr.msk.bf16.gmra.mrb[188].mxu0 %vm4662_vm5, %v10824_v50  ;;  %8390 = vmatmul.mubr.msk.bf16.gmra.mrb[168].mxu1 %vm4662_vm5, %v10729_v14 }
0x1bea   :  { %8327 = vmatprep.mubr.msk.bf16.mxu0 %vm12324_vm1, %v12241_v0  ;;  %8393 = vmatprep.mubr.msk.bf16.mxu1 %vm12324_vm1, %v12241_v0 }
0x1bf1   :  { %8328 = vmatmul.mubr.msk.bf16.gmra.mrb[192].mxu0 %vm4662_vm5, %v10851_v29  ;;  %8394 = vmatmul.mubr.msk.bf16.gmra.mrb[172].mxu1 %vm4662_vm5, %v10756_v63 }
0x1bf2   :  { %8331 = vmatprep.mubr.msk.bf16.mxu0 %vm12324_vm1, %v12241_v0  ;;  %8397 = vmatprep.mubr.msk.bf16.mxu1 %vm12324_vm1, %v12241_v0 }
0x1bf9   :  { %8332 = vmatmul.mubr.msk.bf16.gmra.mrb[196].mxu0 %vm4662_vm5, %v10869_v19  ;;  %8398 = vmatmul.mubr.msk.bf16.gmra.mrb[176].mxu1 %vm4662_vm5, %v10774_v57 }
0x1bfa   :  { %8335 = vmatprep.mubr.msk.bf16.mxu0 %vm12324_vm1, %v12241_v0  ;;  %8401 = vmatprep.mubr.msk.bf16.mxu1 %vm12324_vm1, %v12241_v0 }
0x1c01   :  { %8336 = vmatmul.mubr.msk.bf16.gmra.mrb[200].mxu0 %vm4662_vm5, %v10887_v60  ;;  %8402 = vmatmul.mubr.msk.bf16.gmra.mrb[180].mxu1 %vm4662_vm5, %v10792_v23 }
0x1c02   :  { %8339 = vmatprep.mubr.msk.bf16.mxu0 %vm12324_vm1, %v12241_v0  ;;  %8405 = vmatprep.mubr.msk.bf16.mxu1 %vm12324_vm1, %v12241_v0 }
0x1c09   :  { %8340 = vmatmul.mubr.msk.bf16.gmra.mrb[204].mxu0 %vm4662_vm5, %v10903_v18  ;;  %8406 = vmatmul.mubr.msk.bf16.gmra.mrb[184].mxu1 %vm4662_vm5, %v10810_v51 }
0x1c0a   :  { %8343 = vmatprep.mubr.msk.bf16.mxu0 %vm12324_vm1, %v12241_v0  ;;  %8409 = vmatprep.mubr.msk.bf16.mxu1 %vm12324_vm1, %v12241_v0 }
0x1c11   :  { %8344 = vmatmul.mubr.msk.bf16.gmra.mrb[208].mxu0 %vm4662_vm5, %v10920_v12  ;;  %8410 = vmatmul.mubr.msk.bf16.gmra.mrb[188].mxu1 %vm4662_vm5, %v10824_v50 }
0x1c12   :  { %8347 = vmatprep.mubr.msk.bf16.mxu0 %vm12324_vm1, %v12241_v0  ;;  %8413 = vmatprep.mubr.msk.bf16.mxu1 %vm12324_vm1, %v12241_v0 }
0x1c19   :  { %8348 = vmatmul.mubr.msk.bf16.gmra.mrb[212].mxu0 %vm4662_vm5, %v10939_v15  ;;  %8414 = vmatmul.mubr.msk.bf16.gmra.mrb[192].mxu1 %vm4662_vm5, %v10851_v29 }
0x1c1a   :  { %7707 = vmatprep.mubr.msk.bf16.mxu0 %vm12415_vm8, %v10947_v32  ;;  %8417 = vmatprep.mubr.msk.bf16.mxu1 %vm12324_vm1, %v12241_v0  ;;  %vm3933_vm8 = vcmp.ge.s32.totalorder %v10734_v25, 150 }
0x1c1b   :  { %vm4047_vm12 = vmand %vm3933_vm8, %vm2370_vm2 }
0x1c1c   :  { %vm11069_vm3 = vmand %vm4047_vm12, %vm2377_vm14 }
0x1c1d   :  { %vm4161_vm4 = vmor %vm11063_vm7, %vm11069_vm3  ;;  %vm3981_vm3 = vcmp.lt.s32.totalorder %v10829_v13, 225 }
0x1c1e   :  { %vm12430_vm8 = vmmov %vm12423_vm9 }
0x1c1f   :  { %vm12431_vm0 = vmmov %vm12430_vm8 }
0x1c20   :  { %vm12433_vm12 = vmmov %vm12431_vm0 }
0x1c21   :  { %8418 = vmatmul.mubr.msk.bf16.gmra.mrb[196].mxu1 %vm4662_vm5, %v10869_v19  ;;  %vm12434_vm6 = vmmov %vm12431_vm0 }
0x1c22   :  { %8421 = vmatprep.mubr.msk.bf16.mxu1 %vm12324_vm1, %v12241_v0  ;;  %vm12436_vm7 = vmmov %vm12431_vm0 }
0x1c29   :  { %8422 = vmatmul.mubr.msk.bf16.gmra.mrb[200].mxu1 %vm4662_vm5, %v10887_v60 }
0x1c2a   :  { %8425 = vmatprep.mubr.msk.bf16.mxu1 %vm12324_vm1, %v12241_v0 }
0x1c31   :  { %8426 = vmatmul.mubr.msk.bf16.gmra.mrb[204].mxu1 %vm4662_vm5, %v10903_v18 }
0x1c32   :  { %8429 = vmatprep.mubr.msk.bf16.mxu1 %vm12324_vm1, %v12241_v0 }
0x1c39   :  { %8430 = vmatmul.mubr.msk.bf16.gmra.mrb[208].mxu1 %vm4662_vm5, %v10920_v12 }
0x1c3a   :  { %8433 = vmatprep.mubr.msk.bf16.mxu1 %vm12324_vm1, %v12241_v0 }
0x1c41   :  { %8434 = vmatmul.mubr.msk.bf16.gmra.mrb[212].mxu1 %vm4662_vm5, %v10939_v15 }
0x1c42   :  { %8443 = vmatprep.mubr.msk.bf16.mxu1 %vm12324_vm1, %v12241_v0 }
0x1c5c   :  { %v4760_v2 = vpop.f32.mrb[140].mxu0 }
0x1c5d   :  { %v8277_v28 = vpop.f32.mrb[141].mxu0  ;;  %v10978_v9 = vmul.f32 %v10241_v30, %v4760_v2 }
0x1c5e   :  { %v4763_v10 = vpop.f32.mrb[142].mxu0 }
0x1c5f   :  { %v10981_v20 = vmul.f32 %v10241_v30, %v4763_v10  ;;  %v8278_v56 = vpop.f32.mrb[143].mxu0 }
0x1c64   :  { %v4768_v49 = vpop.f32.mrb[144].mxu0 }
0x1c65   :  { %v8281_v45 = vpop.f32.mrb[145].mxu0  ;;  %v10986_v33 = vmul.f32 %v10241_v30, %v4768_v49 }
0x1c66   :  { %v4771_v47 = vpop.f32.mrb[146].mxu0  ;;  %v11018_v45 = vsel %vm3847_vm10, 1.0, %v12241_v0  ;;  %vm12425_vm10 = vmmov %vm12423_vm9 }
0x1c67   :  { %v10989_v35 = vmul.f32 %v10241_v30, %v4771_v47  ;;  %v8282_v3 = vpop.f32.mrb[147].mxu0  ;;  %12417 = vst [vmem:[#allocation88_spill] sm:$0xff] %v11018_v45 }
0x1c6c   :  { %v4776_v39 = vpop.f32.mrb[148].mxu0 }
0x1c6d   :  { %v8285_v55 = vpop.f32.mrb[149].mxu0  ;;  %v10994_v52 = vmul.f32 %v10241_v30, %v4776_v39 }
0x1c6e   :  { %v4779_v26 = vpop.f32.mrb[150].mxu0 }
0x1c6f   :  { %v10997_v8 = vmul.f32 %v10241_v30, %v4779_v26  ;;  %v8286_v53 = vpop.f32.mrb[151].mxu0 }
0x1c74   :  { %v4784_v61 = vpop.f32.mrb[152].mxu0 }
0x1c75   :  { %v8289_v4 = vpop.f32.mrb[153].mxu0  ;;  %v11010_v28 = vmul.f32 %v10241_v30, %v4784_v61 }
0x1c76   :  { %v4787_v2 = vpop.f32.mrb[154].mxu0 }
0x1c77   :  { %v11013_v10 = vmul.f32 %v10241_v30, %v4787_v2  ;;  %v8290_v56 = vpop.f32.mrb[155].mxu0 }
0x1c7c   :  { %v4792_v49 = vpop.f32.mrb[156].mxu0 }
0x1c7d   :  { %v8293_v47 = vpop.f32.mrb[157].mxu0  ;;  %v11021_v39 = vmul.f32 %v10241_v30, %v4792_v49 }
0x1c7e   :  { %v4795_v3 = vpop.f32.mrb[158].mxu0 }
0x1c7f   :  { %v11024_v55 = vmul.f32 %v11018_v45, %v4795_v3  ;;  %v8294_v26 = vpop.f32.mrb[159].mxu0 }
0x1c84   :  { %v4800_v61 = vpop.f32.mrb[160].mxu0 }
0x1c85   :  { %v8297_v4 = vpop.f32.mrb[161].mxu0  ;;  %v11029_v56 = vmul.f32 %v10273_v38, %v4800_v61 }
0x1c86   :  { %v4803_v2 = vpop.f32.mrb[162].mxu0 }
0x1c87   :  { %v11032_v24 = vmul.f32 %v10273_v38, %v4803_v2  ;;  %v8298_v47 = vpop.f32.mrb[163].mxu0 }
0x1c8c   :  { %v4808_v11 = vpop.f32.mrb[164].mxu0 }
0x1c8d   :  { %v8301_v3 = vpop.f32.mrb[165].mxu0  ;;  %v11037_v26 = vmul.f32 %v10273_v38, %v4808_v11  ;;  %v4991_v11 = vpop.f32.mrb[140].mxu1 }
0x1c8e   :  { %v4811_v27 = vpop.f32.mrb[166].mxu0 }
0x1c8f   :  { %v11040_v53 = vmul.f32 %v10273_v38, %v4811_v27  ;;  %v8302_v4 = vpop.f32.mrb[167].mxu0 }
0x1c90   :  { %v11059_v4 = vmul.f32 %v10241_v30, %v4991_v11 }
0x1c94   :  { %v4816_v0 = vpop.f32.mrb[168].mxu0 }
0x1c95   :  { %v8305_v2 = vpop.f32.mrb[169].mxu0  ;;  %v11045_v47 = vmul.f32 %v10273_v38, %v4816_v0 }
0x1c96   :  { %v4819_v41 = vpop.f32.mrb[170].mxu0 }
0x1c97   :  { %v11048_v49 = vmul.f32 %v10273_v38, %v4819_v41  ;;  %v8306_v3 = vpop.f32.mrb[171].mxu0  ;;  %v8363_v41 = vpop.f32.mrb[141].mxu1 }
0x1c98   :  { %v4994_v3 = vpop.f32.mrb[142].mxu1 }
0x1c99   :  { %v11074_v15 = vmul.f32 %v10241_v30, %v4994_v3  ;;  %v8364_v11 = vpop.f32.mrb[143].mxu1 }
0x1c9a   :  { %v4999_v18 = vpop.f32.mrb[144].mxu1 }
0x1c9b   :  { %v11081_v19 = vmul.f32 %v10241_v30, %v4999_v18  ;;  %v8367_v29 = vpop.f32.mrb[145].mxu1 }
0x1c9c   :  { %v4824_v0 = vpop.f32.mrb[172].mxu0  ;;  %v5002_v3 = vpop.f32.mrb[146].mxu1  ;;  %v12426_v29 = vmov 0.0  }
0x1c9d   :  { %v8309_v2 = vpop.f32.mrb[173].mxu0  ;;  %v4927_v41 = vmul.f32 %v10273_v38, %v4824_v0  ;;  %v11088_v0 = vmul.f32 %v10241_v30, %v5002_v3 }
0x1c9e   :  { %v4827_v27 = vpop.f32.mrb[174].mxu0 }
0x1c9f   :  { %v4928_v2 = vmul.f32 %v10273_v38, %v4827_v27  ;;  %v8310_v12 = vpop.f32.mrb[175].mxu0  ;;  %v8368_v27 = vpop.f32.mrb[147].mxu1 }
0x1ca0   :  { %v12424_v12 = vpack.c.bf16 %v10981_v20, %v10978_v9  ;;  %v5007_v11 = vpop.f32.mrb[148].mxu1 }
0x1ca1   :  { %v5193_v50 = vpack.c.bf16 %v4928_v2, %v4927_v41  ;;  %v11096_v41 = vsel %vm4161_vm4, 1.0, %v12426_v29  ;;  %v11101_v2 = vmul.f32 %v10241_v30, %v5007_v11  ;;  %v8371_v3 = vpop.f32.mrb[149].mxu1  ;;  %vm4248_vm4 = vcmp.ge.s32.totalorder %v10829_v13, 225 }
0x1ca2   :  { %v5220_v18 = vsel %vm12425_vm10, %v12424_v12, 0  ;;  %12427 = vst [vmem:[#allocation89_spill] sm:$0xff] %v11096_v41  ;;  %vm12437_vm10 = vmmov %vm12431_vm0 }
0x1ca3   :  { %8771 = vmatprep.subr.msk.bf16.mxu0 %vm12423_vm9, %v5193_v50  ;;  %v5010_v50 = vpop.f32.mrb[150].mxu1  ;;  %vm4057_vm9 = vmand %vm3981_vm3, %vm2370_vm2 }
0x1ca4   :  { %v4832_v61 = vpop.f32.mrb[176].mxu0  ;;  %7692 = vmatpush3.bf16.xpose.msra.mxu0 %v5220_v18  ;;  %v11104_v9 = vmul.f32 %v10241_v30, %v5010_v50  ;;  %v8372_v20 = vpop.f32.mrb[151].mxu1  ;;  %vm12447_vm3 = vmmov %vm12434_vm6 }
0x1ca5   :  { %v8313_v27 = vpop.f32.mrb[177].mxu0  ;;  %v4929_v12 = vmul.f32 %v11096_v41, %v4832_v61  ;;  %v5015_v18 = vpop.f32.mrb[152].mxu1 }
0x1ca6   :  { %v4835_v60 = vpop.f32.mrb[178].mxu0  ;;  %v11111_v11 = vmul.f32 %v10241_v30, %v5015_v18  ;;  %v8375_v3 = vpop.f32.mrb[153].mxu1 }
0x1ca7   :  { %v4930_v51 = vmul.f32 %v10276_v40, %v4835_v60  ;;  %v8314_v23 = vpop.f32.mrb[179].mxu0  ;;  %v5018_v57 = vpop.f32.mrb[154].mxu1  ;;  %v12429_v60 = vpack.c.bf16 %v10989_v35, %v10986_v33 }
0x1ca8   :  { %v11114_v63 = vmul.f32 %v10241_v30, %v5018_v57  ;;  %v8376_v50 = vpop.f32.mrb[155].mxu1 }
0x1ca9   :  { %v5194_v27 = vpack.c.bf16 %v4930_v51, %v4929_v12  ;;  %v5223_v23 = vsel %vm12430_vm8, %v12429_v60, 0  ;;  %v5023_v61 = vpop.f32.mrb[156].mxu1  ;;  %vm4362_vm8 = vmand %vm4248_vm4, %vm2421_vm15 }
0x1caa   :  { %v11124_v51 = vmul.f32 %v10241_v30, %v5023_v61  ;;  %v8379_v12 = vpop.f32.mrb[157].mxu1  ;;  %vm4400_vm2 = vmand %vm4362_vm8, %vm2428_vm11  ;;  %vm4295_vm8 = vcmp.lt.s32.totalorder %v10918_v7, 300 }
0x1cab   :  { %8772 = vmatprep.subr.msk.bf16.mxu0 %vm12428_vm13, %v5194_v27  ;;  %v5026_v3 = vpop.f32.mrb[158].mxu1  ;;  %vm12439_vm13 = vmmov %vm12431_vm0 }
0x1cac   :  { %v4840_v20 = vpop.f32.mrb[180].mxu0  ;;  %7694 = vmatpush3.bf16.xpose.msra.mxu0 %v5223_v23  ;;  %v11127_v27 = vmul.f32 %v11018_v45, %v5026_v3  ;;  %v8380_v25 = vpop.f32.mrb[159].mxu1  ;;  %vm12448_vm4 = vmmov %vm12447_vm3 }
0x1cad   :  { %v8317_v57 = vpop.f32.mrb[181].mxu0  ;;  %v4931_v33 = vmul.f32 %v10276_v40, %v4840_v20  ;;  %v5031_v23 = vpop.f32.mrb[160].mxu1  ;;  %v12432_v25 = vpack.c.bf16 %v10997_v8, %v10994_v52 }
0x1cae   :  { %v4843_v50 = vpop.f32.mrb[182].mxu0  ;;  %v11134_v61 = vmul.f32 %v10273_v38, %v5031_v23  ;;  %v8383_v12 = vpop.f32.mrb[161].mxu1 }
0x1caf   :  { %v4932_v35 = vmul.f32 %v10276_v40, %v4843_v50  ;;  %v8318_v60 = vpop.f32.mrb[183].mxu0  ;;  %v5034_v30 = vpop.f32.mrb[162].mxu1  ;;  %v5226_v20 = vsel %vm12433_vm12, %v12432_v25, 0  ;;  %vm12442_vm12 = vmmov %vm12434_vm6 }
0x1cb0   :  { %v11137_v14 = vmul.f32 %v10273_v38, %v5034_v30  ;;  %v8384_v3 = vpop.f32.mrb[163].mxu1 }
0x1cb1   :  { %v5195_v57 = vpack.c.bf16 %v4932_v35, %v4931_v33 }
0x1cb3   :  { %8773 = vmatprep.subr.msk.bf16.mxu0 %vm12431_vm0, %v5195_v57  ;;  %vm11184_vm0 = vmand %vm4057_vm9, %vm2377_vm14 }
0x1cb4   :  { %v4848_v50 = vpop.f32.mrb[184].mxu0  ;;  %7696 = vmatpush3.bf16.xpose.msra.mxu0 %v5226_v20  ;;  %v5039_v23 = vpop.f32.mrb[164].mxu1  ;;  %vm4476_vm14 = vmor %vm11184_vm0, %vm4400_vm2 }
0x1cb5   :  { %v8321_v12 = vpop.f32.mrb[185].mxu0  ;;  %v11147_v33 = vmul.f32 %v10273_v38, %v5039_v23  ;;  %v8387_v30 = vpop.f32.mrb[165].mxu1  ;;  %v4933_v57 = vmul.f32 %v10276_v40, %v4848_v50  ;;  %v12435_v23 = vpack.c.bf16 %v11013_v10, %v11010_v28  ;;  %vm12450_vm9 = vmmov %vm12447_vm3 }
0x1cb6   :  { %v4851_v35 = vpop.f32.mrb[186].mxu0  ;;  %v5042_v3 = vpop.f32.mrb[166].mxu1  ;;  %vm12453_vm0 = vmmov %vm12447_vm3 }
0x1cb7   :  { %v4934_v18 = vmul.f32 %v10276_v40, %v4851_v35  ;;  %v8322_v52 = vpop.f32.mrb[187].mxu0  ;;  %v11152_v8 = vmul.f32 %v10273_v38, %v5042_v3  ;;  %v8388_v25 = vpop.f32.mrb[167].mxu1  ;;  %v5229_v12 = vsel %vm12436_vm7, %v12435_v23, 0  ;;  %vm12445_vm7 = vmmov %vm12434_vm6 }
0x1cb8   :  { %vm4371_vm2 = vmand %vm4295_vm8, %vm2421_vm15 }
0x1cb9   :  { %v5196_v20 = vpack.c.bf16 %v4934_v18, %v4933_v57  ;;  %vm12456_vm15 = vmmov %vm12453_vm0 }
0x1cba   :  { %vm12472_vm8 = vmmov %vm12453_vm0 }
0x1cbb   :  { %8774 = vmatprep.subr.msk.bf16.mxu0 %vm12434_vm6, %v5196_v20 }
0x1cbc   :  { %v4856_v30 = vpop.f32.mrb[188].mxu0  ;;  %7698 = vmatpush3.bf16.xpose.msra.mxu0 %v5229_v12  ;;  %v5047_v50 = vpop.f32.mrb[168].mxu1 }
0x1cbd   :  { %v8325_v35 = vpop.f32.mrb[189].mxu0  ;;  %v11162_v52 = vmul.f32 %v10273_v38, %v5047_v50  ;;  %v8391_v3 = vpop.f32.mrb[169].mxu1  ;;  %v4935_v57 = vmul.f32 %v10276_v40, %v4856_v30  ;;  %v12438_v30 = vpack.c.bf16 %v11024_v55, %v11021_v39 }
0x1cbe   :  { %v4859_v25 = vpop.f32.mrb[190].mxu0  ;;  %v5050_v18 = vpop.f32.mrb[170].mxu1 }
0x1cbf   :  { %v4936_v60 = vmul.f32 %v10276_v40, %v4859_v25  ;;  %v8326_v20 = vpop.f32.mrb[191].mxu0  ;;  %v11168_v28 = vmul.f32 %v10273_v38, %v5050_v18  ;;  %v8392_v10 = vpop.f32.mrb[171].mxu1  ;;  %v5232_v50 = vsel %vm12439_vm13, %v12438_v30, 0  ;;  %vm12452_vm13 = vmmov %vm12447_vm3 }
0x1cc1   :  { %v5197_v23 = vpack.c.bf16 %v4936_v60, %v4935_v57 }
0x1cc3   :  { %8775 = vmatprep.subr.msk.bf16.mxu0 %vm12437_vm10, %v5197_v23  ;;  %vm12451_vm10 = vmmov %vm12447_vm3 }
0x1cc4   :  { %v4864_v35 = vpop.f32.mrb[192].mxu0  ;;  %7700 = vmatpush3.bf16.xpose.msra.mxu0 %v5232_v50  ;;  %v5055_v13 = vpop.f32.mrb[172].mxu1 }
0x1cc5   :  { %v8329_v60 = vpop.f32.mrb[193].mxu0  ;;  %v5158_v25 = vmul.f32 %v10273_v38, %v5055_v13  ;;  %v8395_v18 = vpop.f32.mrb[173].mxu1  ;;  %v4937_v55 = vmul.f32 %v10276_v40, %v4864_v35  ;;  %v12443_v13 = vpack.c.bf16 %v11032_v24, %v11029_v56  ;;  %v11202_v35 = vsel %vm4476_vm14, 1.0, %v12426_v29  ;;  %vm4409_vm14 = vmand %vm4371_vm2, %vm2428_vm11 }
0x1cc6   :  { %v4867_v57 = vpop.f32.mrb[194].mxu0  ;;  %v5058_v39 = vpop.f32.mrb[174].mxu1  ;;  %12444 = vst [vmem:[#allocation90_spill] sm:$0xff] %v11202_v35  ;;  %v11258_v5 = vsel %vm4409_vm14, 1.0, %v12426_v29  ;;  %vm12462_vm11 = vmmov %vm12453_vm0 }
0x1cc7   :  { %v4938_v20 = vmul.f32 %v10276_v40, %v4867_v57  ;;  %v8330_v10 = vpop.f32.mrb[195].mxu0  ;;  %v5159_v23 = vmul.f32 %v10273_v38, %v5058_v39  ;;  %v8396_v30 = vpop.f32.mrb[175].mxu1  ;;  %v5235_v18 = vsel %vm12434_vm6, %v12443_v13, 0  ;;  %vm12458_vm6 = vmmov %vm12453_vm0  ;;  %12459 = vst [vmem:[#allocation91_spill] sm:$0xff] %v11258_v5 }
0x1cc8   :  { %vm12474_vm2 = vmmov %vm12453_vm0 }
0x1cc9   :  { %v5198_v50 = vpack.c.bf16 %v4938_v20, %v4937_v55  ;;  %v5724_v60 = vpack.c.bf16 %v5159_v23, %v5158_v25  ;;  %vm12475_vm14 = vmmov %vm12453_vm0 }
0x1ccb   :  { %8776 = vmatprep.subr.msk.bf16.mxu0 %vm12442_vm12, %v5198_v50  ;;  %vm12457_vm12 = vmmov %vm12453_vm0 }
0x1ccc   :  { %v4872_v57 = vpop.f32.mrb[196].mxu0  ;;  %7702 = vmatpush3.bf16.xpose.msra.mxu0 %v5235_v18  ;;  %v5063_v10 = vpop.f32.mrb[176].mxu1  ;;  %v12446_v18 = vpack.c.bf16 %v11040_v53, %v11037_v26 }
0x1ccd   :  { %v8333_v39 = vpop.f32.mrb[197].mxu0  ;;  %v5160_v55 = vmul.f32 %v11096_v41, %v5063_v10  ;;  %v8399_v20 = vpop.f32.mrb[177].mxu1  ;;  %v4939_v25 = vmul.f32 %v11202_v35, %v4872_v57 }
0x1cce   :  { %v4875_v3 = vpop.f32.mrb[198].mxu0  ;;  %v5066_v30 = vpop.f32.mrb[178].mxu1  ;;  %v5238_v10 = vsel %vm12447_vm3, %v12446_v18, 0  ;;  %vm12464_vm3 = vmmov %vm12453_vm0 }
0x1ccf   :  { %v4940_v23 = vmul.f32 %v10296_v1, %v4875_v3  ;;  %v8334_v50 = vpop.f32.mrb[199].mxu0  ;;  %v5161_v24 = vmul.f32 %v10276_v40, %v5066_v30  ;;  %v8400_v56 = vpop.f32.mrb[179].mxu1 }
0x1cd1   :  { %v5199_v13 = vpack.c.bf16 %v4940_v23, %v4939_v25  ;;  %v5725_v12 = vpack.c.bf16 %v5161_v24, %v5160_v55 }
0x1cd3   :  { %8777 = vmatprep.subr.msk.bf16.mxu0 %vm12445_vm7, %v5199_v13  ;;  %vm12463_vm7 = vmmov %vm12453_vm0 }
0x1cd4   :  { %v4880_v39 = vpop.f32.mrb[200].mxu0  ;;  %7704 = vmatpush3.bf16.xpose.msra.mxu0 %v5238_v10  ;;  %v5071_v20 = vpop.f32.mrb[180].mxu1 }
0x1cd5   :  { %v8337_v41 = vpop.f32.mrb[201].mxu0  ;;  %v5162_v57 = vmul.f32 %v10276_v40, %v5071_v20  ;;  %v8403_v3 = vpop.f32.mrb[181].mxu1  ;;  %v4941_v30 = vmul.f32 %v10296_v1, %v4880_v39 }
0x1cd6   :  { %v4883_v50 = vpop.f32.mrb[202].mxu0  ;;  %v5074_v38 = vpop.f32.mrb[182].mxu1  ;;  %v12449_v41 = vpack.c.bf16 %v11048_v49, %v11045_v47 }
0x1cd7   :  { %v4942_v55 = vmul.f32 %v10296_v1, %v4883_v50  ;;  %v8338_v25 = vpop.f32.mrb[203].mxu0  ;;  %v5163_v23 = vmul.f32 %v10276_v40, %v5074_v38  ;;  %v8404_v24 = vpop.f32.mrb[183].mxu1 }
0x1cd8   :  { %v5241_v56 = vsel %vm12450_vm9, %v12449_v41, 0  ;;  %vm12468_vm9 = vmmov %vm12453_vm0 }
0x1cd9   :  { %v5200_v53 = vpack.c.bf16 %v4942_v55, %v4941_v30  ;;  %v5726_v26 = vpack.c.bf16 %v5163_v23, %v5162_v57  ;;  %v11228_v23 = vpack.c.bf16 %v10561_v48, %v10557_v21 }
0x1cdb   :  { %8778 = vmatprep.subr.msk.bf16.mxu0 %vm12448_vm4, %v5200_v53  ;;  %vm12467_vm4 = vmmov %vm12453_vm0 }
0x1cdc   :  { %v4888_v13 = vpop.f32.mrb[204].mxu0  ;;  %7706 = vmatpush3.bf16.xpose.msra.mxu0 %v5241_v56  ;;  %v5079_v18 = vpop.f32.mrb[184].mxu1  ;;  %v12454_v56 = vpack.c.bf16 %v11074_v15, %v11059_v4  ;;  %v12455_v15 = vpack.c.bf16 %v11088_v0, %v11081_v19  ;;  %v12460_v0 = vpack.c.bf16 %v11104_v9, %v11101_v2  ;;  %v5183_v9 = vpack.c.bf16 %v10579_v16, %v10575_v59 }
0x1cdd   :  { %v8341_v10 = vpop.f32.mrb[205].mxu0  ;;  %7725 = vmatprep.subr.bf16.mxu0 %v5724_v60  ;;  %v5164_v39 = vmul.f32 %v10276_v40, %v5079_v18  ;;  %v8407_v20 = vpop.f32.mrb[185].mxu1  ;;  %v4943_v50 = vmul.f32 %v10296_v1, %v4888_v13 }
0x1cde   :  { %v4891_v3 = vpop.f32.mrb[206].mxu0  ;;  %v5082_v38 = vpop.f32.mrb[186].mxu1 }
0x1cdf   :  { %v4944_v57 = vmul.f32 %v10296_v1, %v4891_v3  ;;  %v8342_v30 = vpop.f32.mrb[207].mxu0  ;;  %v5165_v55 = vmul.f32 %v10276_v40, %v5082_v38  ;;  %v8408_v49 = vpop.f32.mrb[187].mxu1 }
0x1ce1   :  { %v5201_v47 = vpack.c.bf16 %v4944_v57, %v4943_v50  ;;  %v5727_v25 = vpack.c.bf16 %v5165_v55, %v5164_v39 }
0x1ce3   :  { %7708 = vmatmul.mubr.msk.bf16.vlgmr.msra.gmra.mrb[216].mxu0 %vm12451_vm10, %v10947_v32  ;;  %v5268_v60 = vsel %vm12452_vm13, %v5201_v47, 0  ;;  %vm12469_vm10 = vmmov %vm12453_vm0 }
0x1ce4   :  { %v4896_v24 = vpop.f32.mrb[208].mxu0  ;;  %7709 = vmatprep.mubr.msk.bf16.mxu0 %vm12453_vm0, %v11228_v23  ;;  %8438 = vmatpush3.bf16.xpose.msra.mxu1 %v5268_v60  ;;  %v5087_v53 = vpop.f32.mrb[188].mxu1  ;;  %vm12471_vm13 = vmmov %vm12453_vm0 }
0x1ce5   :  { %v8345_v41 = vpop.f32.mrb[209].mxu0  ;;  %8439 = vmatprep.subr.bf16.mxu1 %v12426_v29  ;;  %7726 = vmatpush3.bf16.msra.mxu0 %v12454_v56  ;;  %v5166_v13 = vmul.f32 %v10276_v40, %v5087_v53  ;;  %v8411_v18 = vpop.f32.mrb[189].mxu1  ;;  %v4945_v39 = vmul.f32 %v10296_v1, %v4896_v24 }
0x1ce6   :  { %v4899_v10 = vpop.f32.mrb[210].mxu0  ;;  %7727 = vmatprep.subr.bf16.mxu0 %v5725_v12  ;;  %v5090_v7 = vpop.f32.mrb[190].mxu1  ;;  %v5182_v12 = vpack.c.bf16 %v10570_v62, %v10566_v6 }
0x1ce7   :  { %v4946_v20 = vmul.f32 %v10296_v1, %v4899_v10  ;;  %v8346_v3 = vpop.f32.mrb[211].mxu0  ;;  %v5167_v38 = vmul.f32 %v10276_v40, %v5090_v7  ;;  %v8412_v50 = vpop.f32.mrb[191].mxu1  ;;  %v12461_v7 = vpack.c.bf16 %v11114_v63, %v11111_v11 }
0x1ce9   :  { %v5202_v57 = vpack.c.bf16 %v4946_v20, %v4945_v39  ;;  %7728 = vmatpush3.bf16.msra.mxu0 %v12455_v15  ;;  %v5728_v4 = vpack.c.bf16 %v5167_v38, %v5166_v13  ;;  %v12465_v20 = vpack.c.bf16 %v11127_v27, %v11124_v51 }
0x1cea   :  { %7729 = vmatprep.subr.bf16.mxu0 %v5726_v26 }
0x1ceb   :  { %7710 = vmatmul.mubr.msk.bf16.gmra.mrb[220].mxu0 %vm12456_vm15, %v11228_v23  ;;  %v5271_v30 = vsel %vm12457_vm12, %v5202_v57, 0  ;;  %v12466_v57 = vpack.c.bf16 %v11137_v14, %v11134_v61  ;;  %v12470_v61 = vpack.c.bf16 %v11152_v8, %v11147_v33  ;;  %vm12476_vm15 = vcmask 1045504  }
0x1cec   :  { %v4904_v55 = vpop.f32.mrb[212].mxu0  ;;  %7711 = vmatprep.mubr.msk.bf16.mxu0 %vm12458_vm6, %v5182_v12  ;;  %8440 = vmatpush3.bf16.xpose.msra.mxu1 %v5271_v30  ;;  %v5095_v49 = vpop.f32.mrb[192].mxu1  ;;  %vm5494_vm12 = vcmask 359424   ;;  %vm12477_vm6 = vcmask 1042432  }
0x1ced   :  { %v8349_v19 = vpop.f32.mrb[213].mxu0  ;;  %8441 = vmatprep.subr.bf16.mxu1 %v12426_v29  ;;  %7730 = vmatpush3.bf16.msra.mxu0 %v12460_v0  ;;  %v5168_v26 = vmul.f32 %v10276_v40, %v5095_v49  ;;  %v8415_v47 = vpop.f32.mrb[193].mxu1  ;;  %v4947_v53 = vmul.f32 %v10296_v1, %v4904_v55 }
0x1cee   :  { %v4907_v60 = vpop.f32.mrb[214].mxu0  ;;  %7731 = vmatprep.subr.bf16.mxu0 %v5727_v25  ;;  %v5098_v24 = vpop.f32.mrb[194].mxu1 }
0x1cef   :  { %v4948_v41 = vmul.f32 %v11258_v5, %v4907_v60  ;;  %v8350_v56 = vpop.f32.mrb[215].mxu0  ;;  %v5169_v13 = vmul.f32 %v10276_v40, %v5098_v24  ;;  %v8416_v18 = vpop.f32.mrb[195].mxu1 }
0x1cf1   :  { %v5203_v10 = vpack.c.bf16 %v4948_v41, %v4947_v53  ;;  %7732 = vmatpush3.bf16.msra.mxu0 %v12461_v7  ;;  %v5729_v2 = vpack.c.bf16 %v5169_v13, %v5168_v26 }
0x1cf2   :  { %7733 = vmatprep.subr.bf16.mxu0 %v5728_v4  ;;  %v5184_v4 = vpack.c.bf16 %v10589_v37, %v10584_v31 }
0x1cf3   :  { %7712 = vmatmul.mubr.msk.bf16.gmra.mrb[224].mxu0 %vm12462_vm11, %v5182_v12  ;;  %v5274_v25 = vsel %vm12463_vm7, %v5203_v10, 0  ;;  %vm12478_vm11 = vmmov %vm12477_vm6  ;;  %vm5511_vm7 = vcmask 354304  }
0x1cf4   :  { %7713 = vmatprep.mubr.msk.bf16.mxu0 %vm12464_vm3, %v5183_v9  ;;  %8442 = vmatpush3.bf16.xpose.msra.mxu1 %v5274_v25  ;;  %v5103_v39 = vpop.f32.mrb[196].mxu1  ;;  %vm12479_vm3 = vmmov %vm12477_vm6 }
0x1cf5   :  { %7734 = vmatpush3.bf16.msra.mxu0 %v12465_v20  ;;  %v5170_v63 = vmul.f32 %v11202_v35, %v5103_v39  ;;  %v8419_v11 = vpop.f32.mrb[197].mxu1  ;;  %8463 = vmatprep.subr.bf16.mxu1 %v12426_v29 }
0x1cf6   :  { %7735 = vmatprep.subr.bf16.mxu0 %v5729_v2  ;;  %v5106_v3 = vpop.f32.mrb[198].mxu1 }
0x1cf7   :  { %v5171_v38 = vmul.f32 %v10296_v1, %v5106_v3  ;;  %v8420_v50 = vpop.f32.mrb[199].mxu1 }
0x1cf9   :  { %7736 = vmatpush3.bf16.msra.mxu0 %v12466_v57  ;;  %v5730_v15 = vpack.c.bf16 %v5171_v38, %v5170_v63 }
0x1cfb   :  { %7714 = vmatmul.mubr.msk.bf16.gmra.mrb[228].mxu0 %vm12467_vm4, %v5183_v9  ;;  %8444 = vmatmul.mubr.msk.bf16.vlgmr.msra.gmra.mrb[216].mxu1 %vm12468_vm9, %v10947_v32  ;;  %v12473_v32 = vpack.c.bf16 %v11168_v28, %v11162_v52  ;;  %vm12480_vm4 = vmmov %vm12479_vm3 }
0x1cfc   :  { %7715 = vmatprep.mubr.msk.bf16.mxu0 %vm12469_vm10, %v5184_v4  ;;  %8447 = vmatprep.mubr.msk.bf16.mxu1 %vm12324_vm1, %v12426_v29  ;;  %v5111_v51 = vpop.f32.mrb[200].mxu1  ;;  %vm12482_vm9 = vmmov %vm12453_vm0 }
0x1cfd   :  { %7737 = vmatprep.subr.bf16.mxu0 %v5730_v15  ;;  %v5172_v27 = vmul.f32 %v10296_v1, %v5111_v51  ;;  %v8423_v14 = vpop.f32.mrb[201].mxu1  ;;  %vm12483_vm10 = vmmov %vm12453_vm0 }
0x1cfe   :  { %7738 = vmatpush3.bf16.msra.mxu0 %v12470_v61  ;;  %v5114_v30 = vpop.f32.mrb[202].mxu1 }
0x1cff   :  { %v5173_v55 = vmul.f32 %v10296_v1, %v5114_v30  ;;  %v8424_v49 = vpop.f32.mrb[203].mxu1 }
0x1d01   :  { %v5731_v19 = vpack.c.bf16 %v5173_v55, %v5172_v27 }
0x1d03   :  { %7716 = vmatmul.mubr.msk.bf16.gmra.mrb[232].mxu0 %vm12471_vm13, %v5184_v4  ;;  %8448 = vmatmul.mubr.msk.bf16.gmra.mrb[220].mxu1 %vm12472_vm8, %v11228_v23  ;;  %vm12484_vm13 = vmmov %vm12453_vm0 }
0x1d04   :  { %8451 = vmatprep.mubr.msk.bf16.mxu1 %vm12324_vm1, %v12426_v29  ;;  %7739 = vmatprep.subr.bf16.mxu0 %v5731_v19  ;;  %v5119_v33 = vpop.f32.mrb[204].mxu1  ;;  %vm12487_vm8 = vmmov %vm12453_vm0 }
0x1d05   :  { %7740 = vmatpush3.bf16.msra.mxu0 %v12473_v32  ;;  %v8427_v8 = vpop.f32.mrb[205].mxu1  ;;  %v5174_v23 = vmul.f32 %v10296_v1, %v5119_v33 }
0x1d06   :  { %8489 = vmatprep.subr.bf16.mxu0 %v12426_v29  ;;  %v5122_v52 = vpop.f32.mrb[206].mxu1 }
0x1d07   :  { %v8428_v28 = vpop.f32.mrb[207].mxu1 }
0x1d0b   :  { %8452 = vmatmul.mubr.msk.bf16.gmra.mrb[224].mxu1 %vm12453_vm0, %v5182_v12  ;;  %v5175_v12 = vmul.f32 %v10296_v1, %v5122_v52 }
0x1d0c   :  { %8455 = vmatprep.mubr.msk.bf16.mxu1 %vm12324_vm1, %v12426_v29  ;;  %v5127_v26 = vpop.f32.mrb[208].mxu1 }
0x1d0d   :  { %v5732_v0 = vpack.c.bf16 %v5175_v12, %v5174_v23  ;;  %v8431_v47 = vpop.f32.mrb[209].mxu1  ;;  %v5176_v60 = vmul.f32 %v10296_v1, %v5127_v26 }
0x1d0e   :  { %v5130_v24 = vpop.f32.mrb[210].mxu1 }
0x1d0f   :  { %8464 = vmatpush3.bf16.msra.mxu1 %v5732_v0  ;;  %v8432_v53 = vpop.f32.mrb[211].mxu1  ;;  %v5177_v41 = vmul.f32 %v10296_v1, %v5130_v24 }
0x1d10   :  { %8465 = vmatprep.subr.bf16.mxu1 %v12426_v29 }
0x1d11   :  { %v5733_v56 = vpack.c.bf16 %v5177_v41, %v5176_v60 }
0x1d13   :  { %8456 = vmatmul.mubr.msk.bf16.gmra.mrb[228].mxu1 %vm12474_vm2, %v5183_v9  ;;  %vm12491_vm2 = vmmov %vm12453_vm0 }
0x1d14   :  { %8459 = vmatprep.mubr.msk.bf16.mxu1 %vm12324_vm1, %v12426_v29  ;;  %v5135_v13 = vpop.f32.mrb[212].mxu1  ;;  %8466 = vmatpush3.bf16.msra.mxu1 %v5733_v56 }
0x1d15   :  { %v5178_v18 = vmul.f32 %v10296_v1, %v5135_v13  ;;  %v8435_v10 = vpop.f32.mrb[213].mxu1  ;;  %8467 = vmatprep.subr.bf16.mxu1 %v12426_v29 }
0x1d16   :  { %v5138_v7 = vpop.f32.mrb[214].mxu1 }
0x1d17   :  { %v5179_v2 = vmul.f32 %v11258_v5, %v5138_v7  ;;  %v8436_v9 = vpop.f32.mrb[215].mxu1 }
0x1d19   :  { %v5734_v25 = vpack.c.bf16 %v5179_v2, %v5178_v18 }
0x1d1b   :  { %8460 = vmatmul.mubr.msk.bf16.gmra.mrb[232].mxu1 %vm12475_vm14, %v5184_v4  ;;  %v5751_v39 = vsel %vm12476_vm15, %v5734_v25, 0  ;;  %vm12492_vm14 = vmmov %vm12453_vm0 }
0x1d1c   :  { %8469 = vmatprep.mubr.msk.bf16.mxu1 %vm12324_vm1, %v12426_v29  ;;  %8468 = vmatpush3.bf16.msra.mxu1 %v5751_v39  ;;  %vm12493_vm15 = vmmov %vm12453_vm0 }
0x1d1d   :  { %8511 = vmatprep.subr.bf16.mxu1 %v12426_v29 }
0x1db6   :  { %v5310_v20 = vpop.f32.mrb[216].mxu0 }
0x1db7   :  { %v5312_v63 = vpop.f32.mrb[217].mxu0  ;;  %v11326_v50 = vmul.f32 0.25, %v5310_v20 }
0x1db8   :  { %v5314_v11 = vpop.f32.mrb[218].mxu0  ;;  %v11330_v4 = vmul.f32 0.25, %v5312_v63 }
0x1db9   :  { %v5316_v3 = vpop.f32.mrb[219].mxu0  ;;  %v11334_v14 = vmul.f32 0.25, %v5314_v11 }
0x1dba   :  { %v11340_v49 = vmul.f32 0.25, %v5316_v3 }
0x1dbe   :  { %v5320_v38 = vpop.f32.mrb[220].mxu0 }
0x1dbf   :  { %v11328_v57 = vmul.f32 0.25, %v5320_v38  ;;  %v5322_v15 = vpop.f32.mrb[221].mxu0 }
0x1dc0   :  { %v11332_v51 = vmul.f32 0.25, %v5322_v15  ;;  %v5324_v27 = vpop.f32.mrb[222].mxu0 }
0x1dc1   :  { %v5462_v61 = vmax.f32 %v11326_v50, %v11328_v57  ;;  %v11338_v30 = vmul.f32 0.25, %v5324_v27  ;;  %v5326_v55 = vpop.f32.mrb[223].mxu0 }
0x1dc2   :  { %v5478_v19 = vmax.f32 %v11330_v4, %v11332_v51  ;;  %v11344_v32 = vmul.f32 0.25, %v5326_v55 }
0x1dc3   :  { %v5463_v33 = vmax.f32 %v11334_v14, %v11338_v30 }
0x1dc4   :  { %v5479_v8 = vmax.f32 %v11340_v49, %v11344_v32 }
0x1dc6   :  { %v5330_v52 = vpop.f32.mrb[224].mxu0 }
0x1dc7   :  { %v11350_v28 = vmul.f32 0.25, %v5330_v52  ;;  %v5332_v23 = vpop.f32.mrb[225].mxu0 }
0x1dc8   :  { %v11352_v12 = vmul.f32 0.25, %v5332_v23  ;;  %v5334_v0 = vpop.f32.mrb[226].mxu0 }
0x1dc9   :  { %v5464_v26 = vmax.f32 %v5462_v61, %v11350_v28  ;;  %v11355_v47 = vmul.f32 0.25, %v5334_v0  ;;  %v5336_v60 = vpop.f32.mrb[227].mxu0 }
0x1dca   :  { %v5480_v24 = vmax.f32 %v5478_v19, %v11352_v12  ;;  %v11358_v53 = vmul.f32 0.25, %v5336_v60 }
0x1dcb   :  { %v5465_v41 = vmax.f32 %v5463_v33, %v11355_v47 }
0x1dcc   :  { %v5481_v56 = vmax.f32 %v5479_v8, %v11358_v53 }
0x1dce   :  { %v5340_v13 = vpop.f32.mrb[228].mxu0  ;;  %v5393_v18 = vpop.f32.mrb[216].mxu1 }
0x1dcf   :  { %v11362_v10 = vmul.f32 0.25, %v5340_v13  ;;  %v5342_v7 = vpop.f32.mrb[229].mxu0  ;;  %v8445_v2 = vpop.f32.mrb[217].mxu1  ;;  %v11373_v61 = vmul.f32 0.25, %v5393_v18 }
0x1dd0   :  { %v11364_v9 = vmul.f32 0.25, %v5342_v7  ;;  %v5344_v25 = vpop.f32.mrb[230].mxu0  ;;  %v5396_v39 = vpop.f32.mrb[218].mxu1 }
0x1dd1   :  { %v5466_v20 = vmax.f32 %v5464_v26, %v11362_v10  ;;  %v11367_v63 = vmul.f32 0.25, %v5344_v25  ;;  %v5346_v11 = vpop.f32.mrb[231].mxu0  ;;  %v8446_v3 = vpop.f32.mrb[219].mxu1  ;;  %v11376_v8 = vmul.f32 0.25, %v5396_v39  ;;  %v5495_v60 = vsel %vm5494_vm12, %v11373_v61, -inf }
0x1dd2   :  { %v5482_v38 = vmax.f32 %v5480_v24, %v11364_v9  ;;  %v11370_v15 = vmul.f32 0.25, %v5346_v11 }
0x1dd3   :  { %v5467_v27 = vmax.f32 %v5465_v41, %v11367_v63 }
0x1dd4   :  { %v5483_v55 = vmax.f32 %v5481_v56, %v11370_v15 }
0x1dd6   :  { %v5350_v19 = vpop.f32.mrb[232].mxu0  ;;  %v5401_v33 = vpop.f32.mrb[220].mxu1 }
0x1dd7   :  { %v11378_v52 = vmul.f32 0.25, %v5350_v19  ;;  %v11380_v23 = vmul.f32 0.25, %v5401_v33  ;;  %v5352_v0 = vpop.f32.mrb[233].mxu0  ;;  %v8449_v26 = vpop.f32.mrb[221].mxu1  ;;  %v5496_v33 = vsel %vm5494_vm12, %v11376_v8, -inf }
0x1dd8   :  { %v11384_v24 = vmul.f32 0.25, %v5352_v0  ;;  %v5354_v41 = vpop.f32.mrb[234].mxu0  ;;  %v5404_v13 = vpop.f32.mrb[222].mxu1 }
0x1dd9   :  { %v5468_v56 = vmax.f32 %v5466_v20, %v11378_v52  ;;  %v5497_v18 = vsel %vm5494_vm12, %v11380_v23, -inf  ;;  %v11389_v7 = vmul.f32 0.25, %v5354_v41  ;;  %v11391_v2 = vmul.f32 0.25, %v5404_v13  ;;  %v5356_v25 = vpop.f32.mrb[235].mxu0  ;;  %v8450_v39 = vpop.f32.mrb[223].mxu1 }
0x1dda   :  { %v5498_v11 = vmax.f32 %v5495_v60, %v5497_v18  ;;  %v5484_v3 = vmax.f32 %v5482_v38, %v11384_v24  ;;  %v11394_v19 = vmul.f32 0.25, %v5356_v25 }
0x1ddb   :  { %v5469_v20 = vsel %vm12477_vm6, %v11389_v7, -inf  ;;  %v5499_v0 = vsel %vm5494_vm12, %v11391_v2, -inf  ;;  %vm12494_vm6 = vmmov %vm12453_vm0 }
0x1ddc   :  { %v5470_v26 = vmax.f32 %v5467_v27, %v5469_v20  ;;  %v5500_v41 = vmax.f32 %v5496_v33, %v5499_v0  ;;  %v5485_v13 = vsel %vm12478_vm11, %v11394_v19, -inf  ;;  %vm12495_vm11 = vmmov %vm12453_vm0 }
0x1ddd   :  { %v5486_v39 = vmax.f32 %v5483_v55, %v5485_v13 }
0x1dde   :  { %v5471_v60 = vmax.f32 %v5468_v56, %v5470_v26  ;;  %v5409_v18 = vpop.f32.mrb[224].mxu1 }
0x1ddf   :  { %v5487_v38 = vmax.f32 %v5484_v3, %v5486_v39  ;;  %v11404_v25 = vmul.f32 0.25, %v5409_v18  ;;  %v8453_v5 = vpop.f32.mrb[225].mxu1 }
0x1de0   :  { %v5472_v1 = vrot.slane %v5471_v60, 4  ;;  %v5412_v35 = vpop.f32.mrb[226].mxu1 }
0x1de1   :  { %v5488_v40 = vrot.slane %v5487_v38, 4  ;;  %v5501_v45 = vsel %vm5494_vm12, %v11404_v25, -inf  ;;  %v11408_v34 = vmul.f32 0.25, %v5412_v35  ;;  %v8454_v27 = vpop.f32.mrb[227].mxu1 }
0x1de2   :  { %v5473_v33 = vmax.f32 %v5471_v60, %v5472_v1  ;;  %v11410_v20 = vmax.f32 %v5498_v11, %v5501_v45 }
0x1de3   :  { %v5489_v0 = vmax.f32 %v5487_v38, %v5488_v40  ;;  %v5503_v55 = vsel %vm5494_vm12, %v11408_v34, -inf }
0x1de4   :  { %v5474_v56 = vrot.slane %v5473_v33, 2  ;;  %v11414_v3 = vmax.f32 %v5500_v41, %v5503_v55 }
0x1de5   :  { %v5490_v5 = vrot.slane %v5489_v0, 2 }
0x1de6   :  { %v5475_v26 = vmax.f32 %v5473_v33, %v5474_v56  ;;  %v5417_v13 = vpop.f32.mrb[228].mxu1 }
0x1de7   :  { %v5491_v39 = vmax.f32 %v5489_v0, %v5490_v5  ;;  %v11416_v18 = vmul.f32 0.25, %v5417_v13  ;;  %v8457_v42 = vpop.f32.mrb[229].mxu1 }
0x1de8   :  { %v5476_v35 = vrot.slane %v5475_v26, 1  ;;  %v5420_v44 = vpop.f32.mrb[230].mxu1 }
0x1de9   :  { %v5492_v27 = vrot.slane %v5491_v39, 1  ;;  %v11420_v1 = vsel %vm5494_vm12, %v11416_v18, -inf  ;;  %v8458_v40 = vpop.f32.mrb[231].mxu1 }
0x1dea   :  { %v5477_v45 = vmax.f32 %v5475_v26, %v5476_v35  ;;  %v5506_v11 = vmax.f32 %v11410_v20, %v11420_v1 }
0x1deb   :  { %v11424_v41 = vmax.f32 %v5491_v39, %v5492_v27 }
0x1dec   :  { %v5521_v60 = vsub.f32 %v11326_v50, %v5477_v45  ;;  %v5524_v38 = vsub.f32 %v11334_v14, %v5477_v45  ;;  %v5527_v42 = vsub.f32 %v11328_v57, %v5477_v45  ;;  %v5530_v33 = vsub.f32 %v11338_v30, %v5477_v45 }
0x1ded   :  { %v5533_v0 = vsub.f32 %v11350_v28, %v5477_v45  ;;  %v5536_v55 = vsub.f32 %v11355_v47, %v5477_v45  ;;  %v5539_v56 = vsub.f32 %v11362_v10, %v5477_v45  ;;  %v5542_v5 = vsub.f32 %v11367_v63, %v5477_v45 }
0x1dee   :  { %v5545_v20 = vsub.f32 %v11378_v52, %v5477_v45  ;;  %v5548_v26 = vsub.f32 %v11389_v7, %v5477_v45  ;;  %v5551_v13 = vmul.f32 1.442695, %v5521_v60  ;;  %v5557_v50 = vmul.f32 1.442695, %v5524_v38  ;;  %v5425_v39 = vpop.f32.mrb[232].mxu1 }
0x1def   :  { %v5563_v14 = vmul.f32 1.442695, %v5527_v42  ;;  %v5522_v57 = vsub.f32 %v11330_v4, %v11424_v41  ;;  %v11438_v30 = vmul.f32 0.25, %v5420_v44  ;;  %v5569_v28 = vmul.f32 1.442695, %v5530_v33  ;;  %v8461_v63 = vpop.f32.mrb[233].mxu1 }
0x1df0   :  { %8915 = vpow2.f32 %v5551_v13  ;;  %v5575_v47 = vmul.f32 1.442695, %v5533_v0  ;;  %v5525_v10 = vsub.f32 %v11340_v49, %v11424_v41  ;;  %v5581_v52 = vmul.f32 1.442695, %v5536_v55  ;;  %v5428_v27 = vpop.f32.mrb[234].mxu1 }
0x1df1   :  { %8917 = vpow2.f32 %v5557_v50  ;;  %v5528_v7 = vsub.f32 %v11332_v51, %v11424_v41  ;;  %v5531_v35 = vsub.f32 %v11344_v32, %v11424_v41  ;;  %v5534_v4 = vsub.f32 %v11352_v12, %v11424_v41  ;;  %v8462_v40 = vpop.f32.mrb[235].mxu1 }
0x1df2   :  { %8919 = vpow2.f32 %v5563_v14  ;;  %v5537_v44 = vsub.f32 %v11358_v53, %v11424_v41  ;;  %v5540_v1 = vsub.f32 %v11364_v9, %v11424_v41  ;;  %v5543_v49 = vsub.f32 %v11370_v15, %v11424_v41 }
0x1df3   :  { %v5587_v45 = vmul.f32 1.442695, %v5539_v56  ;;  %v5546_v51 = vsub.f32 %v11384_v24, %v11424_v41  ;;  %v5549_v32 = vsub.f32 %v11394_v19, %v11424_v41  ;;  %8921 = vpow2.f32 %v5569_v28 }
0x1df4   :  { %v5593_v12 = vmul.f32 1.442695, %v5542_v5  ;;  %v5507_v60 = vsel %vm5494_vm12, %v11438_v30, -inf  ;;  %8923 = vpow2.f32 %v5575_v47  ;;  %v5553_v53 = vmul.f32 1.442695, %v5522_v57 }
0x1df5   :  { %8925 = vpow2.f32 %v5581_v52  ;;  %v5605_v9 = vmul.f32 1.442695, %v5548_v26  ;;  %v5559_v38 = vmul.f32 1.442695, %v5525_v10  ;;  %v5508_v15 = vmax.f32 %v11414_v3, %v5507_v60 }
0x1df6   :  { %8927 = vpow2.f32 %v5587_v45  ;;  %v11461_v42 = vmul.f32 0.25, %v5425_v39  ;;  %v11463_v24 = vmul.f32 0.25, %v5428_v27  ;;  %v5565_v19 = vmul.f32 1.442695, %v5528_v7 }
0x1df7   :  { %8929 = vpow2.f32 %v5593_v12  ;;  %v5599_v33 = vmul.f32 1.442695, %v5545_v20  ;;  %v5571_v3 = vmul.f32 1.442695, %v5531_v35  ;;  %v5577_v20 = vmul.f32 1.442695, %v5534_v4 }
0x1df8   :  { %8931 = vpow2.f32 %v5553_v53  ;;  %v5509_v0 = vsel %vm5494_vm12, %v11461_v42, -inf  ;;  %v5512_v55 = vsel %vm5511_vm7, %v11463_v24, -inf  ;;  %v5583_v28 = vmul.f32 1.442695, %v5537_v44 }
0x1df9   :  { %8933 = vpow2.f32 %v5559_v38  ;;  %v5510_v5 = vmax.f32 %v5506_v11, %v5509_v0  ;;  %v5513_v26 = vmax.f32 %v5508_v15, %v5512_v55  ;;  %v5589_v52 = vmul.f32 1.442695, %v5540_v1 }
0x1dfa   :  { %v11465_v41 = vpop.eup %8915  ;;  %8935 = vpow2.f32 %v5605_v9  ;;  %v5595_v40 = vmul.f32 1.442695, %v5543_v49  ;;  %v5607_v60 = vmul.f32 1.442695, %v5549_v32  ;;  %v5601_v9 = vmul.f32 1.442695, %v5546_v51 }
0x1dfb   :  { %v11471_v56 = vpop.eup %8917  ;;  %8937 = vpow2.f32 %v5565_v19  ;;  %v5514_v39 = vmax.f32 %v5510_v5, %v5513_v26 }
0x1dfc   :  { %v5611_v13 = vadd.f32 %v11471_v56, %v11465_v41  ;;  %v11475_v50 = vpop.eup %8919  ;;  %8939 = vpow2.f32 %v5599_v33 }
0x1dfd   :  { %v11478_v57 = vpop.eup %8921  ;;  %8941 = vpow2.f32 %v5571_v3  ;;  %v5515_v47 = vrot.slane %v5514_v39, 4 }
0x1dfe   :  { %v5612_v14 = vadd.f32 %v11475_v50, %v5611_v13  ;;  %v11480_v10 = vpop.eup %8923  ;;  %8943 = vpow2.f32 %v5577_v20 }
0x1dff   :  { %v11483_v63 = vpop.eup %8925  ;;  %v5516_v7 = vmax.f32 %v5514_v39, %v5515_v47  ;;  %8945 = vpow2.f32 %v5583_v28 }
0x1e00   :  { %v5613_v11 = vadd.f32 %v11478_v57, %v5612_v14  ;;  %v11485_v35 = vpop.eup %8927  ;;  %8947 = vpow2.f32 %v5589_v52 }
0x1e01   :  { %v11488_v27 = vpop.eup %8929  ;;  %v5517_v45 = vrot.slane %v5516_v7, 2  ;;  %8949 = vpow2.f32 %v5595_v40 }
0x1e02   :  { %v5614_v4 = vadd.f32 %v11480_v10, %v5613_v11  ;;  %v11490_v44 = vpop.eup %8931  ;;  %8951 = vpow2.f32 %v5607_v60 }
0x1e03   :  { %v11493_v53 = vpop.eup %8933  ;;  %v5518_v1 = vmax.f32 %v5516_v7, %v5517_v45  ;;  %8953 = vpow2.f32 %v5601_v9 }
0x1e04   :  { %v5615_v12 = vadd.f32 %v11483_v63, %v5614_v4  ;;  %v11495_v38 = vpop.eup %8935  ;;  %v5627_v19 = vadd.f32 %v11493_v53, %v11490_v44 }
0x1e05   :  { %v11500_v33 = vpop.eup %8937  ;;  %v5519_v49 = vrot.slane %v5518_v1, 1  ;;  %v5619_v26 = vsel %vm12479_vm3, %v11495_v38, 0.0  ;;  %vm12497_vm3 = vmmov %vm12453_vm0 }
0x1e06   :  { %v5616_v15 = vadd.f32 %v11485_v35, %v5615_v12  ;;  %v11502_v0 = vpop.eup %8939  ;;  %v5628_v55 = vadd.f32 %v11500_v33, %v5627_v19 }
0x1e07   :  { %v11506_v51 = vpop.eup %8941  ;;  %v5520_v3 = vmax.f32 %v5518_v1, %v5519_v49 }
0x1e08   :  { %v5617_v32 = vadd.f32 %v11488_v27, %v5616_v15  ;;  %v5629_v13 = vadd.f32 %v11506_v51, %v5628_v55  ;;  %v11512_v20 = vpop.eup %8943 }
0x1e09   :  { %v5523_v39 = vsub.f32 %v11373_v61, %v5520_v3  ;;  %v5526_v14 = vsub.f32 %v11376_v8, %v5520_v3  ;;  %v5529_v28 = vsub.f32 %v11380_v23, %v5520_v3  ;;  %v5532_v47 = vsub.f32 %v11391_v2, %v5520_v3  ;;  %v11521_v40 = vpop.eup %8945 }
0x1e0a   :  { %v5618_v5 = vadd.f32 %v11502_v0, %v5617_v32  ;;  %v5630_v52 = vadd.f32 %v11512_v20, %v5629_v13  ;;  %v5535_v7 = vsub.f32 %v11404_v25, %v5520_v3  ;;  %v5538_v4 = vsub.f32 %v11408_v34, %v5520_v3  ;;  %v11528_v9 = vpop.eup %8947 }
0x1e0b   :  { %v5541_v45 = vsub.f32 %v11416_v18, %v5520_v3  ;;  %v5544_v12 = vsub.f32 %v11438_v30, %v5520_v3  ;;  %v5547_v61 = vsub.f32 %v11461_v42, %v5520_v3  ;;  %v5550_v8 = vsub.f32 %v11463_v24, %v5520_v3  ;;  %v11531_v18 = vpop.eup %8949 }
0x1e0c   :  { %v5620_v11 = vadd.f32 %v5619_v26, %v5618_v5  ;;  %v5631_v2 = vadd.f32 %v11521_v40, %v5630_v52  ;;  %v5555_v60 = vmul.f32 1.442695, %v5523_v39  ;;  %v5561_v1 = vmul.f32 1.442695, %v5526_v14  ;;  %v11533_v42 = vpop.eup %8951 }
0x1e0d   :  { %v5567_v25 = vmul.f32 1.442695, %v5529_v28  ;;  %v5573_v15 = vmul.f32 1.442695, %v5532_v47  ;;  %v5579_v30 = vmul.f32 1.442695, %v5535_v7  ;;  %v11536_v55 = vpop.eup %8953 }
0x1e0e   :  { %v5621_v23 = vrot.slane %v5620_v11, 4  ;;  %v5632_v19 = vadd.f32 %v11528_v9, %v5631_v2  ;;  %8955 = vpow2.f32 %v5555_v60  ;;  %v5585_v32 = vmul.f32 1.442695, %v5538_v4 }
0x1e0f   :  { %8957 = vpow2.f32 %v5561_v1  ;;  %v5591_v3 = vmul.f32 1.442695, %v5541_v45  ;;  %v5635_v13 = vsel %vm12480_vm4, %v11533_v42, 0.0  ;;  %v5597_v28 = vmul.f32 1.442695, %v5544_v12  ;;  %vm12498_vm4 = vmmov %vm12453_vm0 }
0x1e10   :  { %v5622_v34 = vadd.f32 %v5621_v23, %v5620_v11  ;;  %v5633_v49 = vadd.f32 %v11531_v18, %v5632_v19  ;;  %8959 = vpow2.f32 %v5567_v25  ;;  %v5603_v52 = vmul.f32 1.442695, %v5547_v61 }
0x1e11   :  { %8961 = vpow2.f32 %v5573_v15  ;;  %v5609_v23 = vmul.f32 1.442695, %v5550_v8 }
0x1e12   :  { %v5623_v24 = vrot.slane %v5622_v34, 2  ;;  %v5634_v26 = vadd.f32 %v11536_v55, %v5633_v49  ;;  %8963 = vpow2.f32 %v5579_v30 }
0x1e13   :  { %8965 = vpow2.f32 %v5585_v32 }
0x1e14   :  { %v5624_v5 = vadd.f32 %v5623_v24, %v5622_v34  ;;  %v5636_v14 = vadd.f32 %v5635_v13, %v5634_v26  ;;  %8967 = vpow2.f32 %v5591_v3 }
0x1e16   :  { %v5625_v39 = vrot.slane %v5624_v5, 1  ;;  %v5637_v11 = vrot.slane %v5636_v14, 4 }
0x1e18   :  { %v5626_v47 = vadd.f32 %v5625_v39, %v5624_v5  ;;  %v11541_v7 = vpop.eup %8955  ;;  %v5638_v4 = vadd.f32 %v5637_v11, %v5636_v14 }
0x1e19   :  { %v11543_v45 = vpop.eup %8957  ;;  %v5643_v2 = vsel %vm5494_vm12, %v11541_v7, 0.0 }
0x1e1a   :  { %8969 = vrcp.f32 %v5626_v47  ;;  %v11547_v60 = vpop.eup %8959  ;;  %v5639_v1 = vrot.slane %v5638_v4, 2  ;;  %v5644_v12 = vsel %vm5494_vm12, %v11543_v45, 0.0 }
0x1e1b   :  { %8971 = vpow2.f32 %v5597_v28  ;;  %v11551_v25 = vpop.eup %8961  ;;  %v5645_v61 = vadd.f32 %v5644_v12, %v5643_v2  ;;  %v5646_v34 = vsel %vm5494_vm12, %v11547_v60, 0.0 }
0x1e1c   :  { %8973 = vpow2.f32 %v5603_v52  ;;  %v5640_v15 = vadd.f32 %v5639_v1, %v5638_v4  ;;  %v11555_v19 = vpop.eup %8963  ;;  %v5648_v49 = vsel %vm5494_vm12, %v11551_v25, 0.0 }
0x1e1d   :  { %8975 = vpow2.f32 %v5609_v23  ;;  %v5647_v8 = vadd.f32 %v5646_v34, %v5645_v61  ;;  %v11557_v30 = vpop.eup %8965  ;;  %v5650_v26 = vsel %vm5494_vm12, %v11555_v19, 0.0 }
0x1e1e   :  { %v5641_v24 = vrot.slane %v5640_v15, 1  ;;  %v11561_v32 = vpop.eup %8967  ;;  %v5652_v14 = vsel %vm5494_vm12, %v11557_v30, 0.0 }
0x1e1f   :  { %v5649_v3 = vadd.f32 %v5648_v49, %v5647_v8  ;;  %v5654_v28 = vsel %vm5494_vm12, %v11561_v32, 0.0 }
0x1e20   :  { %v5642_v5 = vadd.f32 %v5641_v24, %v5640_v15 }
0x1e21   :  { %v5651_v13 = vadd.f32 %v5650_v26, %v5649_v3 }
0x1e22   :  { %8977 = vrcp.f32 %v5642_v5 }
0x1e23   :  { %v5653_v11 = vadd.f32 %v5652_v14, %v5651_v13 }
0x1e24   :  { %v8970_v39 = vpop.eup %8969 }
0x1e25   :  { %v11569_v47 = vpop.eup %8971  ;;  %v5671_v52 = vmul.f32 %v8970_v39, %v11465_v41  ;;  %v5674_v4 = vmul.f32 %v8970_v39, %v11471_v56  ;;  %v5677_v23 = vmul.f32 %v8970_v39, %v11475_v50  ;;  %v5680_v2 = vmul.f32 %v8970_v39, %v11478_v57 }
0x1e26   :  { %v5683_v1 = vmul.f32 %v8970_v39, %v11480_v10  ;;  %v5686_v12 = vmul.f32 %v8970_v39, %v11483_v63  ;;  %v11578_v61 = vmul.f32 %v8970_v39, %v11485_v35  ;;  %v8974_v15 = vpop.eup %8973  ;;  %v5655_v34 = vadd.f32 %v5654_v28, %v5653_v11 }
0x1e27   :  { %v5701_v8 = vpack.c.bf16 %v5674_v4, %v5671_v52  ;;  %v5692_v24 = vmul.f32 %v8970_v39, %v11488_v27  ;;  %v11582_v41 = vmul.f32 %v8970_v39, %v11502_v0  ;;  %v5656_v56 = vsel %vm5494_vm12, %v11569_v47, 0.0  ;;  %v8976_v49 = vpop.eup %8975 }
0x1e28   :  { %v5704_v50 = vpack.c.bf16 %v5680_v2, %v5677_v23  ;;  %v5707_v57 = vpack.c.bf16 %v5686_v12, %v5683_v1  ;;  %v5698_v10 = vmul.f32 %v8970_v39, %v11495_v38  ;;  %v5657_v63 = vadd.f32 %v5656_v56, %v5655_v34 }
0x1e29   :  { %v5710_v35 = vpack.c.bf16 %v5692_v24, %v11578_v61  ;;  %v5658_v3 = vsel %vm5494_vm12, %v8974_v15, 0.0  ;;  %v5660_v27 = vsel %vm5511_vm7, %v8976_v49, 0.0  ;;  %vm12496_vm7 = vmmov %vm12453_vm0 }
0x1e2a   :  { %v5713_v5 = vpack.c.bf16 %v5698_v10, %v11582_v41  ;;  %v5659_v26 = vadd.f32 %v5658_v3, %v5657_v63 }
0x1e2c   :  { %v5661_v0 = vadd.f32 %v5660_v27, %v5659_v26  ;;  %v8978_v13 = vpop.eup %8977 }
0x1e2d   :  { %v5672_v28 = vmul.f32 %v8978_v13, %v11490_v44  ;;  %v5675_v11 = vmul.f32 %v8978_v13, %v11493_v53  ;;  %v5678_v38 = vmul.f32 %v8978_v13, %v11500_v33  ;;  %v5681_v39 = vmul.f32 %v8978_v13, %v11506_v51 }
0x1e2e   :  { %v5662_v14 = vrot.slane %v5661_v0, 4  ;;  %v5684_v52 = vmul.f32 %v8978_v13, %v11512_v20  ;;  %v5687_v4 = vmul.f32 %v8978_v13, %v11521_v40  ;;  %v5690_v23 = vmul.f32 %v8978_v13, %v11528_v9 }
0x1e2f   :  { %v5702_v1 = vpack.c.bf16 %v5675_v11, %v5672_v28  ;;  %v5693_v12 = vmul.f32 %v8978_v13, %v11531_v18  ;;  %v5696_v61 = vmul.f32 %v8978_v13, %v11536_v55  ;;  %v5705_v34 = vpack.c.bf16 %v5681_v39, %v5678_v38 }
0x1e30   :  { %v5663_v2 = vadd.f32 %v5662_v14, %v5661_v0  ;;  %v5708_v44 = vpack.c.bf16 %v5687_v4, %v5684_v52  ;;  %v5699_v53 = vmul.f32 %v8978_v13, %v11533_v42 }
0x1e31   :  { %5785 = vmatprep.mubr.bf16.mxu0 %v5702_v1  ;;  %v5711_v33 = vpack.c.bf16 %v5693_v12, %v5690_v23 }
0x1e32   :  { %v5664_v24 = vrot.slane %v5663_v2, 2  ;;  %5786 = vmatmul.mubr.bf16.vlgmr.msra.gmra.mrb[236].mxu0 %v5701_v8  ;;  %v5714_v51 = vpack.c.bf16 %v5699_v53, %v5696_v61 }
0x1e33   :  { %5793 = vmatprep.mubr.bf16.mxu0 %v5705_v34 }
0x1e34   :  { %v5665_v20 = vadd.f32 %v5664_v24, %v5663_v2 }
0x1e36   :  { %v5666_v40 = vrot.slane %v5665_v20, 1 }
0x1e38   :  { %v5667_v41 = vadd.f32 %v5666_v40, %v5665_v20 }
0x1e3a   :  { %8979 = vrcp.f32 %v5667_v41  ;;  %5794 = vmatmul.mubr.bf16.gmra.mrb[240].mxu0 %v5704_v50 }
0x1e3b   :  { %5801 = vmatprep.mubr.bf16.mxu0 %v5708_v44 }
0x1e42   :  { %5802 = vmatmul.mubr.bf16.gmra.mrb[244].mxu0 %v5707_v57 }
0x1e43   :  { %5809 = vmatprep.mubr.bf16.mxu0 %v5711_v33 }
0x1e44   :  { %v8980_v9 = vpop.eup %8979 }
0x1e45   :  { %v5673_v18 = vmul.f32 %v8980_v9, %v11541_v7  ;;  %v5676_v55 = vmul.f32 %v8980_v9, %v11543_v45  ;;  %v5679_v42 = vmul.f32 %v8980_v9, %v11547_v60  ;;  %v5682_v56 = vmul.f32 %v8980_v9, %v11551_v25  ;;  %v5909_v60 = vld [vmem:[%s12481_s12] sm:$0xff]  ;;  %v5910_v25 = vld [vmem:[%s12481_s12 + $0x8] sm:$0xff] }
0x1e46   :  { %v5685_v8 = vmul.f32 %v8980_v9, %v11555_v19  ;;  %v5688_v10 = vmul.f32 %v8980_v9, %v11557_v30  ;;  %v5691_v63 = vmul.f32 %v8980_v9, %v11561_v32  ;;  %v5694_v50 = vmul.f32 %v8980_v9, %v11569_v47 }
0x1e47   :  { %v5703_v3 = vpack.c.bf16 %v5676_v55, %v5673_v18  ;;  %v5706_v57 = vpack.c.bf16 %v5682_v56, %v5679_v42  ;;  %v5697_v26 = vmul.f32 %v8980_v9, %v8974_v15  ;;  %v5700_v27 = vmul.f32 %v8980_v9, %v8976_v49 }
0x1e48   :  { %v5709_v0 = vpack.c.bf16 %v5688_v10, %v5685_v8  ;;  %v5712_v7 = vpack.c.bf16 %v5694_v50, %v5691_v63  ;;  %v5916_v19 = vpack.c.bf16 %v5910_v25, %v5909_v60 }
0x1e49   :  { %8470 = vmatmul.mubr.msk.bf16.vlgmr.msra.gmra.mrb[236].mxu1 %vm5494_vm12, %v5703_v3  ;;  %v5715_v45 = vpack.c.bf16 %v5700_v27, %v5697_v26 }
0x1e4a   :  { %8473 = vmatprep.mubr.msk.bf16.mxu1 %vm12324_vm1, %v12426_v29  ;;  %5810 = vmatmul.mubr.bf16.gmra.mrb[248].mxu0 %v5710_v35 }
0x1e4b   :  { %5817 = vmatprep.mubr.bf16.mxu0 %v5714_v51  ;;  %8490 = vmatpush3.bf16.msra.mxu0 %v5916_v19 }
0x1e4c   :  { %8539 = vmatprep.subr.bf16.mxu0 %v12426_v29 }
0x1e51   :  { %8474 = vmatmul.mubr.msk.bf16.gmra.mrb[240].mxu1 %vm5494_vm12, %v5706_v57 }
0x1e52   :  { %8477 = vmatprep.mubr.msk.bf16.mxu1 %vm12324_vm1, %v12426_v29  ;;  %5818 = vmatmul.mubr.bf16.gmra.mrb[252].mxu0 %v5713_v5 }
0x1e53   :  { %8491 = vmatprep.mubr.msk.bf16.mxu0 %vm12324_vm1, %v12426_v29 }
0x1e59   :  { %8478 = vmatmul.mubr.msk.bf16.gmra.mrb[244].mxu1 %vm5494_vm12, %v5709_v0 }
0x1e5a   :  { %8481 = vmatprep.mubr.msk.bf16.mxu1 %vm12324_vm1, %v12426_v29 }
0x1e61   :  { %8482 = vmatmul.mubr.msk.bf16.gmra.mrb[248].mxu1 %vm5494_vm12, %v5712_v7 }
0x1e62   :  { %8485 = vmatprep.mubr.msk.bf16.mxu1 %vm12324_vm1, %v12426_v29 }
0x1e69   :  { %8486 = vmatmul.mubr.msk.bf16.gmra.mrb[252].mxu1 %vm5494_vm12, %v5715_v45 }
0x1e6a   :  { %8513 = vmatprep.mubr.msk.bf16.mxu1 %vm12324_vm1, %v12426_v29 }
0x1f05   :  { %v7741_v30 = vpop.f32.mrb[236].mxu0 }
0x1f06   :  { %v7742_v32 = vpop.f32.mrb[237].mxu0 }
0x1f07   :  { %v7743_v47 = vadd.f32 %v7742_v32, %v7741_v30  ;;  %v7744_v15 = vpop.f32.mrb[238].mxu0 }
0x1f08   :  { %v7745_v49 = vpop.f32.mrb[239].mxu0 }
0x1f09   :  { %v7746_v35 = vadd.f32 %v7745_v49, %v7744_v15 }
0x1f0d   :  { %v7747_v5 = vpop.f32.mrb[240].mxu0 }
0x1f0e   :  { %v7748_v13 = vpop.f32.mrb[241].mxu0 }
0x1f0f   :  { %v7749_v14 = vadd.f32 %v7748_v13, %v7747_v5  ;;  %v7750_v28 = vpop.f32.mrb[242].mxu0 }
0x1f10   :  { %v7751_v11 = vpop.f32.mrb[243].mxu0 }
0x1f11   :  { %v7752_v38 = vadd.f32 %v7751_v11, %v7750_v28 }
0x1f15   :  { %v7753_v39 = vpop.f32.mrb[244].mxu0 }
0x1f16   :  { %v7754_v52 = vpop.f32.mrb[245].mxu0 }
0x1f17   :  { %v7755_v4 = vadd.f32 %v7754_v52, %v7753_v39  ;;  %v7756_v23 = vpop.f32.mrb[246].mxu0 }
0x1f18   :  { %v7757_v2 = vpop.f32.mrb[247].mxu0 }
0x1f19   :  { %v7758_v1 = vadd.f32 %v7757_v2, %v7756_v23 }
0x1f1c   :  { %v5860_v12 = vpop.f32.mrb[236].mxu1 }
0x1f1d   :  { %v5861_v61 = vadd.f32 %v7743_v47, %v5860_v12  ;;  %v8471_v34 = vpop.f32.mrb[237].mxu1  ;;  %v7759_v44 = vpop.f32.mrb[248].mxu0 }
0x1f1e   :  { %v5863_v53 = vpop.f32.mrb[238].mxu1  ;;  %v7760_v24 = vpop.f32.mrb[249].mxu0  ;;  %v6034_v34 = vld [vmem:[%s12485_s15 + $0x8] sm:$0xff] }
0x1f1f   :  { %v5864_v33 = vadd.f32 %v7746_v35, %v5863_v53  ;;  %v8472_v51 = vpop.f32.mrb[239].mxu1  ;;  %v7761_v20 = vadd.f32 %v7760_v24, %v7759_v44  ;;  %v7762_v40 = vpop.f32.mrb[250].mxu0  ;;  %v11630_v41 = vadd.f32 %v5861_v61, %v10943_v17  ;;  %v6033_v61 = vld [vmem:[%s12485_s15] sm:$0xff]  ;;  %v6082_v24 = vld [vmem:[%s12488_s16 + $0x8] sm:$0xff] }
0x1f20   :  { %v7763_v18 = vpop.f32.mrb[251].mxu0  ;;  %v6036_v44 = vpack.c.bf16 %v6034_v34, %v6033_v61 }
0x1f21   :  { %v11633_v9 = vadd.f32 %v5864_v33, %v10937_v54  ;;  %v7764_v55 = vadd.f32 %v7763_v18, %v7762_v40  ;;  %v6184_v33 = vld [vmem:[%s12489_s29] sm:$0xff] }
0x1f22   :  { %8512 = vmatpush3.bf16.msra.mxu1 %v6036_v44  ;;  %v7468_v18 = vld [vmem:[%s12490_s9] ss:$0 sm:$0xff] }
0x1f23   :  { %v5911_v42 = vpack.c.bf16 %v11633_v9, %v11630_v41  ;;  %8517 = vmatprep.subr.bf16.mxu1 %v12426_v29 }
0x1f24   :  { %v5868_v56 = vpop.f32.mrb[240].mxu1 }
0x1f25   :  { %v5869_v8 = vadd.f32 %v7749_v14, %v5868_v56  ;;  %v8475_v10 = vpop.f32.mrb[241].mxu1  ;;  %8492 = vmatmul.mubr.msk.bf16.vlgmr.msra.gmra.mrb[0].mxu0 %vm12482_vm9, %v5911_v42  ;;  %v7765_v63 = vpop.f32.mrb[252].mxu0  ;;  %vm12499_vm9 = vmmov %vm12453_vm0 }
0x1f26   :  { %v5871_v50 = vpop.f32.mrb[242].mxu1  ;;  %8495 = vmatprep.mubr.msk.bf16.mxu0 %vm12324_vm1, %v12426_v29  ;;  %v7766_v17 = vpop.f32.mrb[253].mxu0 }
0x1f27   :  { %v5872_v3 = vadd.f32 %v7752_v38, %v5871_v50  ;;  %v8476_v57 = vpop.f32.mrb[243].mxu1  ;;  %v7767_v54 = vadd.f32 %v7766_v17, %v7765_v63  ;;  %v7768_v26 = vpop.f32.mrb[254].mxu0  ;;  %v11641_v27 = vadd.f32 %v5869_v8, %v10557_v21 }
0x1f28   :  { %v7769_v7 = vpop.f32.mrb[255].mxu0 }
0x1f29   :  { %v11644_v0 = vadd.f32 %v5872_v3, %v10561_v48  ;;  %v7770_v45 = vadd.f32 %v7769_v7, %v7768_v26 }
0x1f2b   :  { %v5912_v60 = vpack.c.bf16 %v11644_v0, %v11641_v27 }
0x1f2c   :  { %v5876_v25 = vpop.f32.mrb[244].mxu1 }
0x1f2d   :  { %v5877_v19 = vadd.f32 %v7755_v4, %v5876_v25  ;;  %v8479_v30 = vpop.f32.mrb[245].mxu1  ;;  %8496 = vmatmul.mubr.msk.bf16.gmra.mrb[4].mxu0 %vm12483_vm10, %v5912_v60  ;;  %vm12500_vm10 = vmmov %vm12453_vm0 }
0x1f2e   :  { %v5879_v32 = vpop.f32.mrb[246].mxu1  ;;  %8499 = vmatprep.mubr.msk.bf16.mxu0 %vm12324_vm1, %v12426_v29 }
0x1f2f   :  { %v5880_v47 = vadd.f32 %v7758_v1, %v5879_v32  ;;  %v8480_v21 = vpop.f32.mrb[247].mxu1  ;;  %v11652_v15 = vadd.f32 %v5877_v19, %v10566_v6 }
0x1f31   :  { %v11655_v48 = vadd.f32 %v5880_v47, %v10570_v62 }
0x1f33   :  { %v5913_v49 = vpack.c.bf16 %v11655_v48, %v11652_v15 }
0x1f34   :  { %v5884_v35 = vpop.f32.mrb[248].mxu1 }
0x1f35   :  { %v5885_v5 = vadd.f32 %v7761_v20, %v5884_v35  ;;  %v8483_v13 = vpop.f32.mrb[249].mxu1  ;;  %8500 = vmatmul.mubr.msk.bf16.gmra.mrb[8].mxu0 %vm12484_vm13, %v5913_v49  ;;  %v6185_v20 = vld [vmem:[%s12489_s29 + $0x8] sm:$0xff]  ;;  %vm12501_vm13 = vmmov %vm12453_vm0 }
0x1f36   :  { %v5887_v14 = vpop.f32.mrb[250].mxu1  ;;  %8503 = vmatprep.mubr.msk.bf16.mxu0 %vm12324_vm1, %v12426_v29  ;;  %v6186_v40 = vpack.c.bf16 %v6185_v20, %v6184_v33 }
0x1f37   :  { %v5888_v28 = vadd.f32 %v7764_v55, %v5887_v14  ;;  %v8484_v11 = vpop.f32.mrb[251].mxu1  ;;  %v11663_v6 = vadd.f32 %v5885_v5, %v10575_v59 }
0x1f38   :  { %8540 = vmatpush3.bf16.msra.mxu0 %v6186_v40 }
0x1f39   :  { %v11666_v62 = vadd.f32 %v5888_v28, %v10579_v16  ;;  %8647 = vmatprep.subr.bf16.mxu0 %v12426_v29 }
0x1f3b   :  { %v5914_v38 = vpack.c.bf16 %v11666_v62, %v11663_v6 }
0x1f3c   :  { %v5892_v39 = vpop.f32.mrb[252].mxu1 }
0x1f3d   :  { %v5893_v52 = vadd.f32 %v7767_v54, %v5892_v39  ;;  %v8487_v4 = vpop.f32.mrb[253].mxu1  ;;  %8504 = vmatmul.mubr.msk.bf16.gmra.mrb[12].mxu0 %vm12487_vm8, %v5914_v38  ;;  %vm12517_vm8 = vmmov %vm12453_vm0 }
0x1f3e   :  { %v5895_v23 = vpop.f32.mrb[254].mxu1  ;;  %8507 = vmatprep.mubr.msk.bf16.mxu0 %vm12324_vm1, %v12426_v29 }
0x1f3f   :  { %v5896_v59 = vadd.f32 %v7770_v45, %v5895_v23  ;;  %v8488_v2 = vpop.f32.mrb[255].mxu1  ;;  %v11674_v16 = vadd.f32 %v5893_v52, %v10584_v31  ;;  %v6032_v31 = vld [vmem:[%s12486_s21] sm:$0x1] }
0x1f40   :  { %v6035_v53 = vpack.c.bf16 %v6032_v31, %v6032_v31 }
0x1f41   :  { %v11677_v1 = vadd.f32 %v5896_v59, %v10589_v37  ;;  %v6081_v37 = vld [vmem:[%s12488_s16] sm:$0xff] }
0x1f42   :  { %8514 = vmatmul.mubr.msk.bf16.vlgmr.msra.gmra.mrb[0].mxu1 %vm12491_vm2, %v6035_v53  ;;  %v6088_v51 = vpack.c.bf16 %v6082_v24, %v6081_v37  ;;  %vm12524_vm2 = vmmov %vm12453_vm0 }
0x1f43   :  { %v5915_v12 = vpack.c.bf16 %v11677_v1, %v11674_v16  ;;  %8519 = vmatprep.mubr.msk.bf16.mxu1 %vm12324_vm1, %v12426_v29 }
0x1f44   :  { %8518 = vmatpush3.bf16.msra.mxu1 %v6088_v51 }
0x1f45   :  { %8508 = vmatmul.mubr.msk.bf16.gmra.mrb[16].mxu0 %vm12453_vm0, %v5915_v12  ;;  %8561 = vmatprep.subr.bf16.mxu1 %v12426_v29 }
0x1f46   :  { %8541 = vmatprep.mubr.msk.bf16.mxu0 %vm12324_vm1, %v12426_v29 }
0x1ff8   :  { %v5973_v55 = vpop.f32.mrb[0].mxu0 }
0x1ff9   :  { %v5974_v42 = vadd.f32 %v7468_v18, %v5973_v55  ;;  %v8493_v56 = vpop.f32.mrb[1].mxu0 }
0x1ffa   :  { %v5976_v8 = vpop.f32.mrb[2].mxu0 }
0x1ffb   :  { %v6012_v10 = vmax.f32 %v5974_v42, 0.0  ;;  %v5977_v63 = vadd.f32 %v7468_v18, %v5976_v8  ;;  %v8494_v50 = vpop.f32.mrb[3].mxu0  ;;  %v11740_v8 = vld [vmem:[#allocation19] ss:$0 sm:$0xff] }
0x1ffd   :  { %v6013_v17 = vmax.f32 %v5977_v63, 0.0  ;;  %v6022_v3 = vadd.f32 %v6012_v10, %v11630_v41 }
0x1fff   :  { %v6023_v57 = vadd.f32 %v6013_v17, %v11633_v9 }
0x2000   :  { %v5981_v54 = vpop.f32.mrb[4].mxu0 }
0x2001   :  { %v6083_v26 = vpack.c.bf16 %v6023_v57, %v6022_v3  ;;  %v5982_v7 = vadd.f32 %v7468_v18, %v5981_v54  ;;  %v8497_v45 = vpop.f32.mrb[5].mxu0 }
0x2002   :  { %v5984_v60 = vpop.f32.mrb[6].mxu0 }
0x2003   :  { %v6014_v25 = vmax.f32 %v5982_v7, 0.0  ;;  %v5985_v19 = vadd.f32 %v7468_v18, %v5984_v60  ;;  %v8498_v30 = vpop.f32.mrb[7].mxu0  ;;  %8520 = vmatmul.mubr.msk.bf16.vlgmr.msra.gmra.mrb[4].mxu1 %vm12492_vm14, %v6083_v26  ;;  %8542 = vmatmul.mubr.msk.bf16.vlgmr.msra.gmra.mrb[20].mxu0 %vm12493_vm15, %v6083_v26  ;;  %vm12525_vm14 = vmmov %vm12453_vm0 }
0x2004   :  { %8523 = vmatprep.mubr.msk.bf16.mxu1 %vm12324_vm1, %v12426_v29  ;;  %8545 = vmatprep.mubr.msk.bf16.mxu0 %vm12324_vm1, %v12426_v29  ;;  %vm12526_vm15 = vmmov %vm12453_vm0 }
0x2005   :  { %v6015_v41 = vmax.f32 %v5985_v19, 0.0  ;;  %v6024_v9 = vadd.f32 %v6014_v25, %v11641_v27 }
0x2007   :  { %v6025_v32 = vadd.f32 %v6015_v41, %v11644_v0 }
0x2008   :  { %v5989_v47 = vpop.f32.mrb[8].mxu0 }
0x2009   :  { %v6084_v21 = vpack.c.bf16 %v6025_v32, %v6024_v9  ;;  %v5990_v49 = vadd.f32 %v7468_v18, %v5989_v47  ;;  %v8501_v35 = vpop.f32.mrb[9].mxu0 }
0x200a   :  { %v5992_v5 = vpop.f32.mrb[10].mxu0 }
0x200b   :  { %v6016_v13 = vmax.f32 %v5990_v49, 0.0  ;;  %v5993_v14 = vadd.f32 %v7468_v18, %v5992_v5  ;;  %v8502_v28 = vpop.f32.mrb[11].mxu0  ;;  %8524 = vmatmul.mubr.msk.bf16.gmra.mrb[8].mxu1 %vm12494_vm6, %v6084_v21  ;;  %8546 = vmatmul.mubr.msk.bf16.gmra.mrb[24].mxu0 %vm12495_vm11, %v6084_v21  ;;  %vm12527_vm6 = vmmov %vm12453_vm0 }
0x200c   :  { %8527 = vmatprep.mubr.msk.bf16.mxu1 %vm12324_vm1, %v12426_v29  ;;  %8549 = vmatprep.mubr.msk.bf16.mxu0 %vm12324_vm1, %v12426_v29  ;;  %vm12528_vm11 = vmmov %vm12453_vm0 }
0x200d   :  { %v6017_v27 = vmax.f32 %v5993_v14, 0.0  ;;  %v6026_v0 = vadd.f32 %v6016_v13, %v11652_v15 }
0x200f   :  { %v6027_v11 = vadd.f32 %v6017_v27, %v11655_v48 }
0x2010   :  { %v5997_v38 = vpop.f32.mrb[12].mxu0 }
0x2011   :  { %v6085_v39 = vpack.c.bf16 %v6027_v11, %v6026_v0  ;;  %v5998_v52 = vadd.f32 %v7468_v18, %v5997_v38  ;;  %v8505_v4 = vpop.f32.mrb[13].mxu0 }
0x2012   :  { %v6000_v23 = vpop.f32.mrb[14].mxu0 }
0x2013   :  { %v6018_v59 = vmax.f32 %v5998_v52, 0.0  ;;  %v6001_v2 = vadd.f32 %v7468_v18, %v6000_v23  ;;  %v8506_v12 = vpop.f32.mrb[15].mxu0  ;;  %8528 = vmatmul.mubr.msk.bf16.gmra.mrb[12].mxu1 %vm12496_vm7, %v6085_v39  ;;  %8550 = vmatmul.mubr.msk.bf16.gmra.mrb[28].mxu0 %vm12497_vm3, %v6085_v39  ;;  %vm12529_vm7 = vmmov %vm12453_vm0 }
0x2014   :  { %8531 = vmatprep.mubr.msk.bf16.mxu1 %vm12324_vm1, %v12426_v29  ;;  %8553 = vmatprep.mubr.msk.bf16.mxu0 %vm12324_vm1, %v12426_v29  ;;  %vm12530_vm3 = vmmov %vm12453_vm0 }
0x2015   :  { %v6019_v15 = vmax.f32 %v6001_v2, 0.0  ;;  %v6028_v48 = vadd.f32 %v6018_v59, %v11663_v6 }
0x2017   :  { %v6029_v61 = vadd.f32 %v6019_v15, %v11666_v62 }
0x2018   :  { %v6005_v34 = vpop.f32.mrb[16].mxu0 }
0x2019   :  { %v6086_v44 = vpack.c.bf16 %v6029_v61, %v6028_v48  ;;  %v6006_v31 = vadd.f32 %v7468_v18, %v6005_v34  ;;  %v8509_v53 = vpop.f32.mrb[17].mxu0 }
0x201a   :  { %v6008_v37 = vpop.f32.mrb[18].mxu0 }
0x201b   :  { %v6020_v24 = vmax.f32 %v6006_v31, 0.0  ;;  %v6009_v33 = vadd.f32 %v7468_v18, %v6008_v37  ;;  %v8510_v51 = vpop.f32.mrb[19].mxu0  ;;  %8532 = vmatmul.mubr.msk.bf16.gmra.mrb[16].mxu1 %vm12498_vm4, %v6086_v44  ;;  %8554 = vmatmul.mubr.msk.bf16.gmra.mrb[32].mxu0 %vm12499_vm9, %v6086_v44  ;;  %v11738_v18 = vpop.f32.mrb[0].mxu1  ;;  %vm12531_vm4 = vmmov %vm12453_vm0 }
0x201c   :  { %8535 = vmatprep.mubr.msk.bf16.mxu1 %vm12324_vm1, %v12426_v29  ;;  %8557 = vmatprep.mubr.msk.bf16.mxu0 %vm12324_vm1, %v12426_v29  ;;  %v8515_v55 = vpop.f32.mrb[1].mxu1  ;;  %vm12532_vm9 = vmmov %vm12453_vm0 }
0x201d   :  { %v6021_v6 = vmax.f32 %v6009_v33, 0.0  ;;  %v6030_v62 = vadd.f32 %v6020_v24, %v11674_v16  ;;  %v6078_v42 = vpop.f32.mrb[2].mxu1 }
0x201e   :  { %v8516_v56 = vpop.f32.mrb[3].mxu1 }
0x201f   :  { %v6031_v20 = vadd.f32 %v6021_v6, %v11677_v1  ;;  %v11742_v1 = vld [vmem:[#allocation20] ss:$0 sm:$0xff] }
0x2021   :  { %v6087_v40 = vpack.c.bf16 %v6031_v20, %v6030_v62 }
0x2023   :  { %8536 = vmatmul.mubr.msk.bf16.gmra.mrb[20].mxu1 %vm12500_vm10, %v6087_v40  ;;  %8558 = vmatmul.mubr.msk.bf16.gmra.mrb[36].mxu0 %vm12501_vm13, %v6087_v40  ;;  %vm12533_vm10 = vmmov %vm12453_vm0 }
0x2024   :  { %8571 = vmatprep.mubr.msk.bf16.mxu1 %vm12324_vm1, %v12426_v29  ;;  %8657 = vmatprep.mubr.msk.bf16.mxu0 %vm12324_vm1, %v12426_v29  ;;  %vm12536_vm13 = vmmov %vm12453_vm0 }
0x20d6   :  { %v6145_v16 = vpop.f32.mrb[4].mxu1  ;;  %v6228_v10 = vpop.f32.mrb[20].mxu0 }
0x20d7   :  { %v8521_v63 = vpop.f32.mrb[5].mxu1  ;;  %v8543_v50 = vpop.f32.mrb[21].mxu0  ;;  %v6146_v57 = vadd.f32 %v11740_v8, %v6145_v16  ;;  %v6229_v54 = vadd.f32 %v11742_v1, %v6228_v10 }
0x20d8   :  { %v6148_v17 = vpop.f32.mrb[6].mxu1  ;;  %v6231_v3 = vpop.f32.mrb[22].mxu0 }
0x20d9   :  { %v6149_v26 = vadd.f32 %v11740_v8, %v6148_v17  ;;  %v6232_v7 = vadd.f32 %v11742_v1, %v6231_v3  ;;  %v8522_v45 = vpop.f32.mrb[7].mxu1  ;;  %v8544_v60 = vpop.f32.mrb[23].mxu0 }
0x20db   :  { %v6267_v25 = vpack.c.bf16 %v6149_v26, %v6146_v57  ;;  %v6498_v19 = vpack.c.bf16 %v6232_v7, %v6229_v54 }
0x20dd   :  { %8562 = vmatpush3.bf16.msra.mxu1 %v6267_v25  ;;  %8648 = vmatpush3.bf16.msra.mxu0 %v6498_v19 }
0x20de   :  { %v6153_v30 = vpop.f32.mrb[8].mxu1  ;;  %v6236_v41 = vpop.f32.mrb[24].mxu0  ;;  %8563 = vmatprep.subr.bf16.mxu1 %v12426_v29  ;;  %8649 = vmatprep.subr.bf16.mxu0 %v12426_v29 }
0x20df   :  { %v8525_v9 = vpop.f32.mrb[9].mxu1  ;;  %v8547_v32 = vpop.f32.mrb[25].mxu0  ;;  %v6154_v49 = vadd.f32 %v11740_v8, %v6153_v30  ;;  %v6237_v35 = vadd.f32 %v11742_v1, %v6236_v41 }
0x20e0   :  { %v6156_v47 = vpop.f32.mrb[10].mxu1  ;;  %v6239_v21 = vpop.f32.mrb[26].mxu0  ;;  %v12509_v32 = vld [vmem:[#allocation80_spill] sm:$0xff] }
0x20e1   :  { %v6157_v5 = vadd.f32 %v11740_v8, %v6156_v47  ;;  %v6240_v13 = vadd.f32 %v11742_v1, %v6239_v21  ;;  %v8526_v14 = vpop.f32.mrb[11].mxu1  ;;  %v8548_v28 = vpop.f32.mrb[27].mxu0  ;;  %v12510_v47 = vld [vmem:[#allocation81_spill] sm:$0xff]  ;;  %v12511_v21 = vld [vmem:[#allocation82_spill] sm:$0xff] }
0x20e2   :  { %v12515_v14 = vld [vmem:[#allocation86_spill] sm:$0xff] }
0x20e3   :  { %v6268_v27 = vpack.c.bf16 %v6157_v5, %v6154_v49  ;;  %v6499_v0 = vpack.c.bf16 %v6240_v13, %v6237_v35  ;;  %v12512_v49 = vld [vmem:[#allocation83_spill] sm:$0xff]  ;;  %v12513_v35 = vld [vmem:[#allocation84_spill] sm:$0xff]  ;;  %v12514_v5 = vld [vmem:[#allocation85_spill] sm:$0xff] }
0x20e4   :  { %v6037_v13 = vld [vmem:[#allocation17] sm:$0x1] }
0x20e5   :  { %8564 = vmatpush3.bf16.msra.mxu1 %v6268_v27  ;;  %8650 = vmatpush3.bf16.msra.mxu0 %v6499_v0  ;;  %v11919_v28 = vadd.f32 %v11738_v18, %v6037_v13  ;;  %v12516_v0 = vld [vmem:[#allocation87_spill] sm:$0xff] }
0x20e6   :  { %v6161_v11 = vpop.f32.mrb[12].mxu1  ;;  %v6244_v38 = vpop.f32.mrb[28].mxu0  ;;  %8565 = vmatprep.subr.bf16.mxu1 %v12426_v29  ;;  %8651 = vmatprep.subr.bf16.mxu0 %v12426_v29 }
0x20e7   :  { %v8529_v39 = vpop.f32.mrb[13].mxu1  ;;  %v8551_v52 = vpop.f32.mrb[29].mxu0  ;;  %v6162_v59 = vadd.f32 %v11740_v8, %v6161_v11  ;;  %v6245_v2 = vadd.f32 %v11742_v1, %v6244_v38  ;;  %v11923_v27 = vpack.c.bf16 %v11919_v28, %v11919_v28 }
0x20e8   :  { %v6164_v4 = vpop.f32.mrb[14].mxu1  ;;  %v6247_v23 = vpop.f32.mrb[30].mxu0  ;;  %v12518_v52 = vld [vmem:[#allocation69_spill] sm:$0xff] }
0x20e9   :  { %v6165_v12 = vadd.f32 %v11740_v8, %v6164_v4  ;;  %v6248_v15 = vadd.f32 %v11742_v1, %v6247_v23  ;;  %v8530_v48 = vpop.f32.mrb[15].mxu1  ;;  %v8552_v61 = vpop.f32.mrb[31].mxu0 }
0x20eb   :  { %v6269_v34 = vpack.c.bf16 %v6165_v12, %v6162_v59  ;;  %v6500_v44 = vpack.c.bf16 %v6248_v15, %v6245_v2 }
0x20ed   :  { %8566 = vmatpush3.bf16.msra.mxu1 %v6269_v34  ;;  %8652 = vmatpush3.bf16.msra.mxu0 %v6500_v44 }
0x20ee   :  { %v6169_v31 = vpop.f32.mrb[16].mxu1  ;;  %v6252_v53 = vpop.f32.mrb[32].mxu0  ;;  %8567 = vmatprep.subr.bf16.mxu1 %v12426_v29  ;;  %8653 = vmatprep.subr.bf16.mxu0 %v12426_v29 }
0x20ef   :  { %v8533_v37 = vpop.f32.mrb[17].mxu1  ;;  %v8555_v24 = vpop.f32.mrb[33].mxu0  ;;  %v6170_v6 = vadd.f32 %v11740_v8, %v6169_v31  ;;  %v6253_v62 = vadd.f32 %v11742_v1, %v6252_v53 }
0x20f0   :  { %v6172_v33 = vpop.f32.mrb[18].mxu1  ;;  %v6255_v51 = vpop.f32.mrb[34].mxu0 }
0x20f1   :  { %v6173_v20 = vadd.f32 %v11740_v8, %v6172_v33  ;;  %v6256_v40 = vadd.f32 %v11742_v1, %v6255_v51  ;;  %v8534_v55 = vpop.f32.mrb[19].mxu1  ;;  %v8556_v42 = vpop.f32.mrb[35].mxu0 }
0x20f3   :  { %v6270_v56 = vpack.c.bf16 %v6173_v20, %v6170_v6  ;;  %v6501_v16 = vpack.c.bf16 %v6256_v40, %v6253_v62 }
0x20f5   :  { %8568 = vmatpush3.bf16.msra.mxu1 %v6270_v56  ;;  %8654 = vmatpush3.bf16.msra.mxu0 %v6501_v16 }
0x20f6   :  { %v6177_v10 = vpop.f32.mrb[20].mxu1  ;;  %v6260_v63 = vpop.f32.mrb[36].mxu0  ;;  %8569 = vmatprep.subr.bf16.mxu1 %v12426_v29  ;;  %8655 = vmatprep.subr.bf16.mxu0 %v12426_v29 }
0x20f7   :  { %v8537_v50 = vpop.f32.mrb[21].mxu1  ;;  %v8559_v17 = vpop.f32.mrb[37].mxu0  ;;  %v6178_v54 = vadd.f32 %v11740_v8, %v6177_v10  ;;  %v6261_v26 = vadd.f32 %v11742_v1, %v6260_v63 }
0x20f8   :  { %v6180_v3 = vpop.f32.mrb[22].mxu1  ;;  %v6263_v57 = vpop.f32.mrb[38].mxu0 }
0x20f9   :  { %v6181_v7 = vadd.f32 %v11740_v8, %v6180_v3  ;;  %v6264_v45 = vadd.f32 %v11742_v1, %v6263_v57  ;;  %v8538_v60 = vpop.f32.mrb[23].mxu1  ;;  %v8560_v25 = vpop.f32.mrb[39].mxu0  ;;  %v12507_v8 = vld [vmem:[#allocation78_spill] sm:$0xff]  ;;  %v12508_v1 = vld [vmem:[#allocation79_spill] sm:$0xff] }
0x20fa   :  { %v12519_v60 = vld [vmem:[#allocation88_spill] sm:$0xff] }
0x20fb   :  { %v6271_v19 = vpack.c.bf16 %v6181_v7, %v6178_v54  ;;  %v6502_v30 = vpack.c.bf16 %v6264_v45, %v6261_v26 }
0x20fd   :  { %v6273_v41 = vand.u32 %v6271_v19, %v10593_v22  ;;  %v6504_v9 = vand.u32 %v6502_v30, %v10593_v22  ;;  %v12502_v22 = vld [vmem:[#allocation73_spill] sm:$0xff] }
0x20ff   :  { %8570 = vmatpush3.bf16.msra.mxu1 %v6273_v41  ;;  %8656 = vmatpush3.bf16.msra.mxu0 %v6504_v9 }
0x2102   :  { %8572 = vmatmul.mubr.msk.bf16.vlgmr.msra.gmra.mrb[24].mxu1 %vm4662_vm5, %v10601_v58  ;;  %8658 = vmatmul.mubr.msk.bf16.vlgmr.msra.gmra.mrb[40].mxu0 %vm4662_vm5, %v10601_v58  ;;  %v12503_v58 = vld [vmem:[#allocation74_spill] sm:$0xff] }
0x2103   :  { %8575 = vmatprep.mubr.msk.bf16.mxu1 %vm12324_vm1, %v12426_v29  ;;  %8661 = vmatprep.mubr.msk.bf16.mxu0 %vm12324_vm1, %v12426_v29 }
0x210a   :  { %8576 = vmatmul.mubr.msk.bf16.gmra.mrb[28].mxu1 %vm4662_vm5, %v10617_v43  ;;  %8662 = vmatmul.mubr.msk.bf16.gmra.mrb[44].mxu0 %vm4662_vm5, %v10617_v43  ;;  %v12504_v43 = vld [vmem:[#allocation75_spill] sm:$0xff] }
0x210b   :  { %8579 = vmatprep.mubr.msk.bf16.mxu1 %vm12324_vm1, %v12426_v29  ;;  %8665 = vmatprep.mubr.msk.bf16.mxu0 %vm12324_vm1, %v12426_v29 }
0x2112   :  { %8580 = vmatmul.mubr.msk.bf16.gmra.mrb[32].mxu1 %vm4662_vm5, %v10636_v46  ;;  %8666 = vmatmul.mubr.msk.bf16.gmra.mrb[48].mxu0 %vm4662_vm5, %v10636_v46  ;;  %v12505_v46 = vld [vmem:[#allocation76_spill] sm:$0xff] }
0x2113   :  { %8583 = vmatprep.mubr.msk.bf16.mxu1 %vm12324_vm1, %v12426_v29  ;;  %8669 = vmatprep.mubr.msk.bf16.mxu0 %vm12324_vm1, %v12426_v29 }
0x211a   :  { %8584 = vmatmul.mubr.msk.bf16.gmra.mrb[36].mxu1 %vm4662_vm5, %v10660_v36  ;;  %8670 = vmatmul.mubr.msk.bf16.gmra.mrb[52].mxu0 %vm4662_vm5, %v10660_v36  ;;  %v12506_v36 = vld [vmem:[#allocation77_spill] sm:$0xff] }
0x211b   :  { %8587 = vmatprep.mubr.msk.bf16.mxu1 %vm12324_vm1, %v12426_v29  ;;  %8673 = vmatprep.mubr.msk.bf16.mxu0 %vm12324_vm1, %v12426_v29 }
0x2122   :  { %8588 = vmatmul.mubr.msk.bf16.gmra.mrb[40].mxu1 %vm4662_vm5, %v12502_v22  ;;  %8674 = vmatmul.mubr.msk.bf16.gmra.mrb[56].mxu0 %vm4662_vm5, %v12502_v22 }
0x2123   :  { %8591 = vmatprep.mubr.msk.bf16.mxu1 %vm12324_vm1, %v12426_v29  ;;  %8677 = vmatprep.mubr.msk.bf16.mxu0 %vm12324_vm1, %v12426_v29 }
0x212a   :  { %8592 = vmatmul.mubr.msk.bf16.gmra.mrb[44].mxu1 %vm4662_vm5, %v12503_v58  ;;  %8678 = vmatmul.mubr.msk.bf16.gmra.mrb[60].mxu0 %vm4662_vm5, %v12503_v58 }
0x212b   :  { %8595 = vmatprep.mubr.msk.bf16.mxu1 %vm12324_vm1, %v12426_v29  ;;  %8681 = vmatprep.mubr.msk.bf16.mxu0 %vm12324_vm1, %v12426_v29 }
0x2132   :  { %8596 = vmatmul.mubr.msk.bf16.gmra.mrb[48].mxu1 %vm4662_vm5, %v12504_v43  ;;  %8682 = vmatmul.mubr.msk.bf16.gmra.mrb[64].mxu0 %vm4662_vm5, %v12504_v43 }
0x2133   :  { %8599 = vmatprep.mubr.msk.bf16.mxu1 %vm12324_vm1, %v12426_v29  ;;  %8685 = vmatprep.mubr.msk.bf16.mxu0 %vm12324_vm1, %v12426_v29 }
0x213a   :  { %8600 = vmatmul.mubr.msk.bf16.gmra.mrb[52].mxu1 %vm4662_vm5, %v12505_v46  ;;  %8686 = vmatmul.mubr.msk.bf16.gmra.mrb[68].mxu0 %vm4662_vm5, %v12505_v46 }
0x213b   :  { %8603 = vmatprep.mubr.msk.bf16.mxu1 %vm12324_vm1, %v12426_v29  ;;  %8689 = vmatprep.mubr.msk.bf16.mxu0 %vm12324_vm1, %v12426_v29 }
0x2142   :  { %8604 = vmatmul.mubr.msk.bf16.gmra.mrb[56].mxu1 %vm4662_vm5, %v12506_v36  ;;  %8690 = vmatmul.mubr.msk.bf16.gmra.mrb[72].mxu0 %vm4662_vm5, %v12506_v36 }
0x2143   :  { %8607 = vmatprep.mubr.msk.bf16.mxu1 %vm12324_vm1, %v12426_v29  ;;  %8693 = vmatprep.mubr.msk.bf16.mxu0 %vm12324_vm1, %v12426_v29 }
0x214a   :  { %8608 = vmatmul.mubr.msk.bf16.gmra.mrb[60].mxu1 %vm4662_vm5, %v12507_v8  ;;  %8694 = vmatmul.mubr.msk.bf16.gmra.mrb[76].mxu0 %vm4662_vm5, %v12507_v8 }
0x214b   :  { %8611 = vmatprep.mubr.msk.bf16.mxu1 %vm12324_vm1, %v12426_v29  ;;  %8697 = vmatprep.mubr.msk.bf16.mxu0 %vm12324_vm1, %v12426_v29 }
0x2152   :  { %8612 = vmatmul.mubr.msk.bf16.gmra.mrb[64].mxu1 %vm4662_vm5, %v12508_v1  ;;  %8698 = vmatmul.mubr.msk.bf16.gmra.mrb[80].mxu0 %vm4662_vm5, %v12508_v1 }
0x2153   :  { %8615 = vmatprep.mubr.msk.bf16.mxu1 %vm12324_vm1, %v12426_v29  ;;  %8701 = vmatprep.mubr.msk.bf16.mxu0 %vm12324_vm1, %v12426_v29 }
0x215a   :  { %8616 = vmatmul.mubr.msk.bf16.gmra.mrb[68].mxu1 %vm4662_vm5, %v12509_v32  ;;  %8702 = vmatmul.mubr.msk.bf16.gmra.mrb[84].mxu0 %vm4662_vm5, %v12509_v32 }
0x215b   :  { %8619 = vmatprep.mubr.msk.bf16.mxu1 %vm12324_vm1, %v12426_v29  ;;  %8705 = vmatprep.mubr.msk.bf16.mxu0 %vm12324_vm1, %v12426_v29 }
0x2162   :  { %8620 = vmatmul.mubr.msk.bf16.gmra.mrb[72].mxu1 %vm4662_vm5, %v12510_v47  ;;  %8706 = vmatmul.mubr.msk.bf16.gmra.mrb[88].mxu0 %vm4662_vm5, %v12510_v47 }
0x2163   :  { %8623 = vmatprep.mubr.msk.bf16.mxu1 %vm12324_vm1, %v12426_v29  ;;  %8709 = vmatprep.mubr.msk.bf16.mxu0 %vm12324_vm1, %v12426_v29 }
0x216a   :  { %8624 = vmatmul.mubr.msk.bf16.gmra.mrb[76].mxu1 %vm4662_vm5, %v12511_v21  ;;  %8710 = vmatmul.mubr.msk.bf16.gmra.mrb[92].mxu0 %vm4662_vm5, %v12511_v21 }
0x216b   :  { %8627 = vmatprep.mubr.msk.bf16.mxu1 %vm12324_vm1, %v12426_v29  ;;  %8713 = vmatprep.mubr.msk.bf16.mxu0 %vm12324_vm1, %v12426_v29 }
0x2172   :  { %8628 = vmatmul.mubr.msk.bf16.gmra.mrb[80].mxu1 %vm4662_vm5, %v12512_v49  ;;  %8714 = vmatmul.mubr.msk.bf16.gmra.mrb[96].mxu0 %vm4662_vm5, %v12512_v49 }
0x2173   :  { %8631 = vmatprep.mubr.msk.bf16.mxu1 %vm12324_vm1, %v12426_v29  ;;  %8717 = vmatprep.mubr.msk.bf16.mxu0 %vm12324_vm1, %v12426_v29 }
0x217a   :  { %8632 = vmatmul.mubr.msk.bf16.gmra.mrb[84].mxu1 %vm4662_vm5, %v12513_v35  ;;  %8718 = vmatmul.mubr.msk.bf16.gmra.mrb[100].mxu0 %vm4662_vm5, %v12513_v35 }
0x217b   :  { %8635 = vmatprep.mubr.msk.bf16.mxu1 %vm12324_vm1, %v12426_v29  ;;  %8721 = vmatprep.mubr.msk.bf16.mxu0 %vm12324_vm1, %v12426_v29 }
0x2182   :  { %8636 = vmatmul.mubr.msk.bf16.gmra.mrb[88].mxu1 %vm4662_vm5, %v12514_v5  ;;  %8722 = vmatmul.mubr.msk.bf16.gmra.mrb[104].mxu0 %vm4662_vm5, %v12514_v5 }
0x2183   :  { %8639 = vmatprep.mubr.msk.bf16.mxu1 %vm12324_vm1, %v12426_v29  ;;  %8725 = vmatprep.mubr.msk.bf16.mxu0 %vm12324_vm1, %v12426_v29 }
0x218a   :  { %8640 = vmatmul.mubr.msk.bf16.gmra.mrb[92].mxu1 %vm4662_vm5, %v12515_v14  ;;  %8726 = vmatmul.mubr.msk.bf16.gmra.mrb[108].mxu0 %vm4662_vm5, %v12515_v14 }
0x218b   :  { %8643 = vmatprep.mubr.msk.bf16.mxu1 %vm12324_vm1, %v12426_v29  ;;  %8729 = vmatprep.mubr.msk.bf16.mxu0 %vm12324_vm1, %v12426_v29 }
0x2192   :  { %8644 = vmatmul.mubr.msk.bf16.gmra.mrb[96].mxu1 %vm4662_vm5, %v12516_v0  ;;  %8730 = vmatmul.mubr.msk.bf16.gmra.mrb[112].mxu0 %vm4662_vm5, %v12516_v0  ;;  %v12520_v0 = vld [vmem:[#allocation70_spill] sm:$0xff]  ;;  %vm12521_vm5 = vmmov %vm12453_vm0 }
0x2193   :  { %7863 = vmatprep.mubr.msk.bf16.mxu1 %vm12517_vm8, %v11923_v27  ;;  %vm12537_vm8 = vmmov %vm12453_vm0 }
0x21d5   :  { %v6309_v11 = vpop.f32.mrb[24].mxu1  ;;  %v6540_v10 = vpop.f32.mrb[40].mxu0 }
0x21d6   :  { %v8573_v38 = vpop.f32.mrb[25].mxu1  ;;  %v11932_v4 = vmul.f32 %v12518_v52, %v6309_v11  ;;  %v11964_v50 = vmul.f32 %v12518_v52, %v6540_v10  ;;  %v8659_v17 = vpop.f32.mrb[41].mxu0 }
0x21d7   :  { %v6312_v39 = vpop.f32.mrb[26].mxu1  ;;  %v6543_v57 = vpop.f32.mrb[42].mxu0 }
0x21d8   :  { %v11935_v18 = vmul.f32 %v12518_v52, %v6312_v39  ;;  %v8574_v23 = vpop.f32.mrb[27].mxu1  ;;  %v11967_v26 = vmul.f32 %v12518_v52, %v6543_v57  ;;  %v8660_v7 = vpop.f32.mrb[43].mxu0 }
0x21da   :  { %v6730_v59 = vpack.c.bf16 %v11935_v18, %v11932_v4  ;;  %v6914_v41 = vpack.c.bf16 %v11967_v26, %v11964_v50 }
0x21dd   :  { %v6317_v2 = vpop.f32.mrb[28].mxu1  ;;  %v6548_v30 = vpop.f32.mrb[44].mxu0 }
0x21de   :  { %v8577_v12 = vpop.f32.mrb[29].mxu1  ;;  %v11940_v48 = vmul.f32 %v12518_v52, %v6317_v2  ;;  %v11978_v9 = vmul.f32 %v12518_v52, %v6548_v30  ;;  %v8663_v22 = vpop.f32.mrb[45].mxu0 }
0x21df   :  { %v6320_v15 = vpop.f32.mrb[30].mxu1  ;;  %v6551_v43 = vpop.f32.mrb[46].mxu0 }
0x21e0   :  { %v11943_v61 = vmul.f32 %v12518_v52, %v6320_v15  ;;  %v8578_v34 = vpop.f32.mrb[31].mxu1  ;;  %v11983_v46 = vmul.f32 %v12518_v52, %v6551_v43  ;;  %v8664_v36 = vpop.f32.mrb[47].mxu0 }
0x21e2   :  { %v6731_v44 = vpack.c.bf16 %v11943_v61, %v11940_v48  ;;  %v6915_v32 = vpack.c.bf16 %v11983_v46, %v11978_v9 }
0x21e4   :  { %v6756_v50 = vsel %vm12525_vm14, %v6731_v44, 0  ;;  %vm12541_vm14 = vmmov %vm12453_vm0 }
0x21e5   :  { %v6325_v31 = vpop.f32.mrb[32].mxu1  ;;  %v6556_v8 = vpop.f32.mrb[48].mxu0 }
0x21e6   :  { %v8581_v53 = vpop.f32.mrb[33].mxu1  ;;  %v11948_v24 = vmul.f32 %v12518_v52, %v6325_v31  ;;  %v11988_v47 = vmul.f32 %v12518_v52, %v6556_v8  ;;  %v8667_v21 = vpop.f32.mrb[49].mxu0 }
0x21e7   :  { %v6328_v37 = vpop.f32.mrb[34].mxu1  ;;  %v6559_v35 = vpop.f32.mrb[50].mxu0 }
0x21e8   :  { %v11951_v33 = vmul.f32 %v12518_v52, %v6328_v37  ;;  %v8582_v51 = vpop.f32.mrb[35].mxu1  ;;  %v11991_v13 = vmul.f32 %v12518_v52, %v6559_v35  ;;  %v8668_v14 = vpop.f32.mrb[51].mxu0 }
0x21ea   :  { %v6732_v6 = vpack.c.bf16 %v11951_v33, %v11948_v24  ;;  %v6916_v2 = vpack.c.bf16 %v11991_v13, %v11988_v47 }
0x21ec   :  { %v6759_v9 = vsel %vm12527_vm6, %v6732_v6, 0  ;;  %vm12544_vm6 = vmmov %vm12453_vm0 }
0x21ed   :  { %v6333_v62 = vpop.f32.mrb[36].mxu1  ;;  %v6564_v23 = vpop.f32.mrb[52].mxu0 }
0x21ee   :  { %v8585_v20 = vpop.f32.mrb[37].mxu1  ;;  %v11956_v55 = vmul.f32 %v12518_v52, %v6333_v62  ;;  %v12002_v12 = vmul.f32 %v12518_v52, %v6564_v23  ;;  %v8671_v15 = vpop.f32.mrb[53].mxu0 }
0x21ef   :  { %v6336_v40 = vpop.f32.mrb[38].mxu1  ;;  %v6567_v31 = vpop.f32.mrb[54].mxu0 }
0x21f0   :  { %v11959_v42 = vmul.f32 %v12518_v52, %v6336_v40  ;;  %v8586_v56 = vpop.f32.mrb[39].mxu1  ;;  %v12007_v53 = vmul.f32 %v12518_v52, %v6567_v31  ;;  %v8672_v37 = vpop.f32.mrb[55].mxu0 }
0x21f2   :  { %v6733_v16 = vpack.c.bf16 %v11959_v42, %v11956_v55  ;;  %v6917_v20 = vpack.c.bf16 %v12007_v53, %v12002_v12 }
0x21f4   :  { %v6762_v47 = vsel %vm12529_vm7, %v6733_v16, 0  ;;  %vm12547_vm7 = vcmask 1045504  }
0x21f5   :  { %v6341_v63 = vpop.f32.mrb[40].mxu1  ;;  %v6572_v51 = vpop.f32.mrb[56].mxu0 }
0x21f6   :  { %v8589_v3 = vpop.f32.mrb[41].mxu1  ;;  %v11970_v45 = vmul.f32 %v12518_v52, %v6341_v63  ;;  %v12012_v40 = vmul.f32 %v12518_v52, %v6572_v51  ;;  %v8675_v56 = vpop.f32.mrb[57].mxu0 }
0x21f7   :  { %v6344_v54 = vpop.f32.mrb[42].mxu1  ;;  %v6575_v63 = vpop.f32.mrb[58].mxu0 }
0x21f8   :  { %v11973_v25 = vmul.f32 %v12519_v60, %v6344_v54  ;;  %v8590_v19 = vpop.f32.mrb[43].mxu1  ;;  %v12015_v3 = vmul.f32 %v12519_v60, %v6575_v63  ;;  %v8676_v57 = vpop.f32.mrb[59].mxu0 }
0x21fa   :  { %v6734_v58 = vpack.c.bf16 %v11973_v25, %v11970_v45  ;;  %v6918_v52 = vpack.c.bf16 %v12015_v3, %v12012_v40 }
0x21fc   :  { %v6765_v12 = vsel %vm12531_vm4, %v6734_v58, 0  ;;  %vm7166_vm4 = vcmask 16384  }
0x21fd   :  { %v6349_v1 = vpop.f32.mrb[44].mxu1  ;;  %v6580_v30 = vpop.f32.mrb[60].mxu0 }
0x21fe   :  { %v8593_v49 = vpop.f32.mrb[45].mxu1  ;;  %v11994_v11 = vmul.f32 %v12520_v0, %v6349_v1  ;;  %v12026_v22 = vmul.f32 %v12520_v0, %v6580_v30  ;;  %v8679_v43 = vpop.f32.mrb[61].mxu0 }
0x21ff   :  { %v6352_v5 = vpop.f32.mrb[46].mxu1  ;;  %v6583_v36 = vpop.f32.mrb[62].mxu0 }
0x2200   :  { %v11997_v38 = vmul.f32 %v12520_v0, %v6352_v5  ;;  %v8594_v39 = vpop.f32.mrb[47].mxu1  ;;  %v12031_v8 = vmul.f32 %v12520_v0, %v6583_v36  ;;  %v8680_v1 = vpop.f32.mrb[63].mxu0 }
0x2202   :  { %v6735_v34 = vpack.c.bf16 %v11997_v38, %v11994_v11  ;;  %v6919_v35 = vpack.c.bf16 %v12031_v8, %v12026_v22 }
0x2204   :  { %v6768_v40 = vsel %vm12533_vm10, %v6735_v34, 0 }
0x2205   :  { %v6357_v62 = vpop.f32.mrb[48].mxu1  ;;  %v6588_v21 = vpop.f32.mrb[64].mxu0 }
0x2206   :  { %v8597_v10 = vpop.f32.mrb[49].mxu1  ;;  %v12018_v54 = vmul.f32 %v12520_v0, %v6357_v62  ;;  %v12036_v5 = vmul.f32 %v12520_v0, %v6588_v21  ;;  %v8683_v14 = vpop.f32.mrb[65].mxu0 }
0x2207   :  { %v6360_v17 = vpop.f32.mrb[50].mxu1  ;;  %v6591_v23 = vpop.f32.mrb[66].mxu0 }
0x2208   :  { %v12021_v7 = vmul.f32 %v12520_v0, %v6360_v17  ;;  %v8598_v19 = vpop.f32.mrb[51].mxu1  ;;  %v12039_v31 = vmul.f32 %v12520_v0, %v6591_v23  ;;  %v8684_v37 = vpop.f32.mrb[67].mxu0 }
0x220a   :  { %v6736_v60 = vpack.c.bf16 %v12021_v7, %v12018_v54 }
0x220c   :  { %v6771_v11 = vsel %vm12537_vm8, %v6736_v60, 0 }
0x220d   :  { %v6365_v49 = vpop.f32.mrb[52].mxu1  ;;  %v6596_v10 = vpop.f32.mrb[68].mxu0 }
0x220e   :  { %v8601_v39 = vpop.f32.mrb[53].mxu1  ;;  %v12042_v51 = vmul.f32 %v12520_v0, %v6365_v49  ;;  %v12050_v17 = vmul.f32 %v12520_v0, %v6596_v10  ;;  %v8687_v57 = vpop.f32.mrb[69].mxu0 }
0x220f   :  { %v6368_v15 = vpop.f32.mrb[54].mxu1  ;;  %v6599_v30 = vpop.f32.mrb[70].mxu0 }
0x2210   :  { %v12045_v62 = vmul.f32 %v12520_v0, %v6368_v15  ;;  %v8602_v56 = vpop.f32.mrb[55].mxu1  ;;  %v12055_v43 = vmul.f32 %v12520_v0, %v6599_v30  ;;  %v8688_v36 = vpop.f32.mrb[71].mxu0 }
0x2212   :  { %v6921_v21 = vpack.c.bf16 %v12055_v43, %v12050_v17 }
0x2215   :  { %v6373_v1 = vpop.f32.mrb[56].mxu1  ;;  %v6604_v49 = vpop.f32.mrb[72].mxu0 }
0x2216   :  { %v8605_v14 = vpop.f32.mrb[57].mxu1  ;;  %v6707_v39 = vmul.f32 %v12520_v0, %v6604_v49  ;;  %v8691_v23 = vpop.f32.mrb[73].mxu0  ;;  %v6476_v56 = vmul.f32 %v12520_v0, %v6373_v1  ;;  %v6753_v49 = vsel %vm12453_vm0, %v6730_v59, 0 }
0x2217   :  { %v6376_v15 = vpop.f32.mrb[58].mxu1  ;;  %v6607_v37 = vpop.f32.mrb[74].mxu0 }
0x2218   :  { %v6477_v10 = vmul.f32 %v12520_v0, %v6376_v15  ;;  %v8606_v57 = vpop.f32.mrb[59].mxu1  ;;  %v6708_v30 = vmul.f32 %v12520_v0, %v6607_v37  ;;  %v8692_v63 = vpop.f32.mrb[75].mxu0  ;;  %v12522_v0 = vld [vmem:[#allocation89_spill] sm:$0xff] }
0x221a   :  { %v6738_v36 = vpack.c.bf16 %v6477_v10, %v6476_v56  ;;  %v6922_v19 = vpack.c.bf16 %v6708_v30, %v6707_v39  ;;  %v12523_v10 = vld [vmem:[#allocation71_spill] sm:$0xff] }
0x221c   :  { %8779 = vmatprep.subr.msk.bf16.mxu1 %vm12521_vm5, %v6738_v36  ;;  %7869 = vmatprep.subr.bf16.mxu0 %v6922_v19  ;;  %vm12538_vm5 = vmmov %vm12453_vm0 }
0x221d   :  { %v6381_v14 = vpop.f32.mrb[60].mxu1  ;;  %7848 = vmatpush3.bf16.xpose.msra.mxu1 %v6753_v49  ;;  %v6612_v23 = vpop.f32.mrb[76].mxu0  ;;  %7870 = vmatpush3.bf16.msra.mxu0 %v6914_v41 }
0x221e   :  { %v8609_v1 = vpop.f32.mrb[61].mxu1  ;;  %v6709_v63 = vmul.f32 %v12522_v0, %v6612_v23  ;;  %v8695_v15 = vpop.f32.mrb[77].mxu0  ;;  %v6478_v56 = vmul.f32 %v12522_v0, %v6381_v14 }
0x221f   :  { %v6384_v39 = vpop.f32.mrb[62].mxu1  ;;  %v6615_v37 = vpop.f32.mrb[78].mxu0 }
0x2220   :  { %v6479_v4 = vmul.f32 %v12523_v10, %v6384_v39  ;;  %v8610_v18 = vpop.f32.mrb[63].mxu1  ;;  %v6710_v59 = vmul.f32 %v12523_v10, %v6615_v37  ;;  %v8696_v19 = vpop.f32.mrb[79].mxu0 }
0x2222   :  { %v6739_v57 = vpack.c.bf16 %v6479_v4, %v6478_v56  ;;  %v6923_v30 = vpack.c.bf16 %v6710_v59, %v6709_v63 }
0x2224   :  { %8780 = vmatprep.subr.msk.bf16.mxu1 %vm12524_vm2, %v6739_v57  ;;  %7871 = vmatprep.subr.bf16.mxu0 %v6923_v30  ;;  %vm12540_vm2 = vmmov %vm12453_vm0 }
0x2225   :  { %v6389_v26 = vpop.f32.mrb[64].mxu1  ;;  %7850 = vmatpush3.bf16.xpose.msra.mxu1 %v6756_v50  ;;  %v6620_v41 = vpop.f32.mrb[80].mxu0  ;;  %7872 = vmatpush3.bf16.msra.mxu0 %v6915_v32 }
0x2226   :  { %v8613_v36 = vpop.f32.mrb[65].mxu1  ;;  %v6711_v49 = vmul.f32 %v12523_v10, %v6620_v41  ;;  %v8699_v14 = vpop.f32.mrb[81].mxu0  ;;  %v6480_v0 = vmul.f32 %v12523_v10, %v6389_v26 }
0x2227   :  { %v6392_v23 = vpop.f32.mrb[66].mxu1  ;;  %v6623_v1 = vpop.f32.mrb[82].mxu0 }
0x2228   :  { %v6481_v48 = vmul.f32 %v12523_v10, %v6392_v23  ;;  %v8614_v61 = vpop.f32.mrb[67].mxu1  ;;  %v6712_v44 = vmul.f32 %v12523_v10, %v6623_v1  ;;  %v8700_v63 = vpop.f32.mrb[83].mxu0 }
0x222a   :  { %v6740_v15 = vpack.c.bf16 %v6481_v48, %v6480_v0  ;;  %v6924_v39 = vpack.c.bf16 %v6712_v44, %v6711_v49 }
0x222c   :  { %8781 = vmatprep.subr.msk.bf16.mxu1 %vm12526_vm15, %v6740_v15  ;;  %7873 = vmatprep.subr.bf16.mxu0 %v6924_v39  ;;  %vm12542_vm15 = vmmov %vm12453_vm0 }
0x222d   :  { %v6397_v46 = vpop.f32.mrb[68].mxu1  ;;  %7852 = vmatpush3.bf16.xpose.msra.mxu1 %v6759_v9  ;;  %v6628_v32 = vpop.f32.mrb[84].mxu0  ;;  %7874 = vmatpush3.bf16.msra.mxu0 %v6916_v2 }
0x222e   :  { %v8617_v37 = vpop.f32.mrb[69].mxu1  ;;  %v6713_v56 = vmul.f32 %v12523_v10, %v6628_v32  ;;  %v8703_v4 = vpop.f32.mrb[85].mxu0  ;;  %v6482_v19 = vmul.f32 %v12523_v10, %v6397_v46 }
0x222f   :  { %v6400_v18 = vpop.f32.mrb[70].mxu1  ;;  %v6631_v59 = vpop.f32.mrb[86].mxu0 }
0x2230   :  { %v6483_v24 = vmul.f32 %v12523_v10, %v6400_v18  ;;  %v8618_v33 = vpop.f32.mrb[71].mxu1  ;;  %v6714_v6 = vmul.f32 %v12523_v10, %v6631_v59  ;;  %v8704_v57 = vpop.f32.mrb[87].mxu0  ;;  %v12535_v18 = vld [vmem:[#allocation72_spill] sm:$0xff] }
0x2231   :  { %v12539_v57 = vpack.c.bf16 %v12045_v62, %v12042_v51 }
0x2232   :  { %v6741_v30 = vpack.c.bf16 %v6483_v24, %v6482_v19  ;;  %v6925_v50 = vpack.c.bf16 %v6714_v6, %v6713_v56 }
0x2234   :  { %8782 = vmatprep.subr.msk.bf16.mxu1 %vm12528_vm11, %v6741_v30  ;;  %7875 = vmatprep.subr.bf16.mxu0 %v6925_v50  ;;  %v6774_v30 = vsel %vm12453_vm0, %v12539_v57, 0  ;;  %vm12545_vm11 = vmmov %vm12453_vm0 }
0x2235   :  { %v6405_v13 = vpop.f32.mrb[72].mxu1  ;;  %7854 = vmatpush3.bf16.xpose.msra.mxu1 %v6762_v47  ;;  %v6636_v2 = vpop.f32.mrb[88].mxu0  ;;  %7876 = vmatpush3.bf16.msra.mxu0 %v6917_v20 }
0x2236   :  { %v8621_v26 = vpop.f32.mrb[73].mxu1  ;;  %v6715_v41 = vmul.f32 %v12523_v10, %v6636_v2  ;;  %v8707_v36 = vpop.f32.mrb[89].mxu0  ;;  %v6484_v23 = vmul.f32 %v12523_v10, %v6405_v13 }
0x2237   :  { %v6408_v49 = vpop.f32.mrb[74].mxu1  ;;  %v6639_v14 = vpop.f32.mrb[90].mxu0 }
0x2238   :  { %v6485_v55 = vmul.f32 %v12523_v10, %v6408_v49  ;;  %v8622_v42 = vpop.f32.mrb[75].mxu1  ;;  %v6716_v16 = vmul.f32 %v12523_v10, %v6639_v14  ;;  %v8708_v1 = vpop.f32.mrb[91].mxu0 }
0x223a   :  { %v6742_v0 = vpack.c.bf16 %v6485_v55, %v6484_v23  ;;  %v6926_v48 = vpack.c.bf16 %v6716_v16, %v6715_v41 }
0x223c   :  { %8783 = vmatprep.subr.msk.bf16.mxu1 %vm12530_vm3, %v6742_v0  ;;  %7877 = vmatprep.subr.bf16.mxu0 %v6926_v48  ;;  %v12543_v48 = vld [vmem:[#allocation91_spill] sm:$0xff]  ;;  %vm12549_vm3 = vmmov %vm12453_vm0 }
0x223d   :  { %v6413_v53 = vpop.f32.mrb[76].mxu1  ;;  %7856 = vmatpush3.bf16.xpose.msra.mxu1 %v6765_v12  ;;  %v6644_v20 = vpop.f32.mrb[92].mxu0  ;;  %7878 = vmatpush3.bf16.msra.mxu0 %v6918_v52 }
0x223e   :  { %v8625_v61 = vpop.f32.mrb[77].mxu1  ;;  %v6717_v44 = vmul.f32 %v12523_v10, %v6644_v20  ;;  %v8711_v63 = vpop.f32.mrb[93].mxu0  ;;  %v6486_v9 = vmul.f32 %v12523_v10, %v6413_v53 }
0x223f   :  { %v6416_v15 = vpop.f32.mrb[78].mxu1  ;;  %v6647_v39 = vpop.f32.mrb[94].mxu0 }
0x2240   :  { %v6487_v45 = vmul.f32 %v12523_v10, %v6416_v15  ;;  %v8626_v25 = vpop.f32.mrb[79].mxu1  ;;  %v6718_v58 = vmul.f32 %v12523_v10, %v6647_v39  ;;  %v8712_v46 = vpop.f32.mrb[95].mxu0  ;;  %v12534_v10 = vld [vmem:[#allocation90_spill] sm:$0xff] }
0x2241   :  { %v12546_v46 = vpack.c.bf16 %v12039_v31, %v12036_v5 }
0x2242   :  { %v6743_v32 = vpack.c.bf16 %v6487_v45, %v6486_v9  ;;  %v6927_v37 = vpack.c.bf16 %v6718_v58, %v6717_v44 }
0x2244   :  { %8784 = vmatprep.subr.msk.bf16.mxu1 %vm12532_vm9, %v6743_v32  ;;  %7879 = vmatprep.subr.bf16.mxu0 %v6927_v37 }
0x2245   :  { %v6421_v3 = vpop.f32.mrb[80].mxu1  ;;  %7858 = vmatpush3.bf16.xpose.msra.mxu1 %v6768_v40  ;;  %7880 = vmatpush3.bf16.msra.mxu0 %v6919_v35  ;;  %v6652_v44 = vpop.f32.mrb[96].mxu0 }
0x2246   :  { %v8629_v52 = vpop.f32.mrb[81].mxu1  ;;  %v6488_v4 = vmul.f32 %v12534_v10, %v6421_v3  ;;  %v8715_v63 = vpop.f32.mrb[97].mxu0  ;;  %v6719_v39 = vmul.f32 %v12534_v10, %v6652_v44 }
0x2247   :  { %v6424_v56 = vpop.f32.mrb[82].mxu1  ;;  %v6655_v15 = vpop.f32.mrb[98].mxu0 }
0x2248   :  { %v6489_v59 = vmul.f32 %v12535_v18, %v6424_v56  ;;  %v8630_v19 = vpop.f32.mrb[83].mxu1  ;;  %v6720_v9 = vmul.f32 %v12535_v18, %v6655_v15  ;;  %v8716_v45 = vpop.f32.mrb[99].mxu0 }
0x2249   :  { %v7021_v45 = vld [vmem:[#allocation22 + $0x8] sm:$0xff] }
0x224a   :  { %v6744_v24 = vpack.c.bf16 %v6489_v59, %v6488_v4  ;;  %v6928_v25 = vpack.c.bf16 %v6720_v9, %v6719_v39  ;;  %v7020_v9 = vld [vmem:[#allocation22] sm:$0xff] }
0x224c   :  { %8785 = vmatprep.subr.msk.bf16.mxu1 %vm12536_vm13, %v6744_v24  ;;  %7881 = vmatprep.subr.bf16.mxu0 %v6928_v25  ;;  %v7023_v25 = vpack.c.bf16 %v7021_v45, %v7020_v9 }
0x224d   :  { %v6429_v38 = vpop.f32.mrb[84].mxu1  ;;  %7860 = vmatpush3.bf16.xpose.msra.mxu1 %v6771_v11  ;;  %v6660_v58 = vpop.f32.mrb[100].mxu0  ;;  %7882 = vmatpush3.bf16.msra.mxu0 %v12546_v46 }
0x224e   :  { %v8633_v34 = vpop.f32.mrb[85].mxu1  ;;  %v6490_v8 = vmul.f32 %v12535_v18, %v6429_v38  ;;  %v8719_v32 = vpop.f32.mrb[101].mxu0  ;;  %v6721_v37 = vmul.f32 %v12535_v18, %v6660_v58 }
0x224f   :  { %v6432_v22 = vpop.f32.mrb[86].mxu1 }
0x2250   :  { %v6491_v35 = vmul.f32 %v12535_v18, %v6432_v22  ;;  %v8634_v33 = vpop.f32.mrb[87].mxu1 }
0x2252   :  { %v6745_v6 = vpack.c.bf16 %v6491_v35, %v6490_v8 }
0x2254   :  { %8786 = vmatprep.subr.msk.bf16.mxu1 %vm12538_vm5, %v6745_v6 }
0x2255   :  { %v6437_v54 = vpop.f32.mrb[88].mxu1  ;;  %7862 = vmatpush3.bf16.xpose.msra.mxu1 %v6774_v30 }
0x2256   :  { %v8637_v7 = vpop.f32.mrb[89].mxu1  ;;  %8733 = vmatprep.subr.bf16.mxu1 %v12426_v29  ;;  %v6492_v50 = vmul.f32 %v12535_v18, %v6437_v54 }
0x2257   :  { %v6440_v60 = vpop.f32.mrb[90].mxu1 }
0x2258   :  { %v6493_v47 = vmul.f32 %v12535_v18, %v6440_v60  ;;  %v8638_v13 = vpop.f32.mrb[91].mxu1 }
0x225a   :  { %v6746_v2 = vpack.c.bf16 %v6493_v47, %v6492_v50 }
0x225c   :  { %7864 = vmatmul.mubr.msk.bf16.vlgmr.msra.gmra.mrb[100].mxu1 %vm12540_vm2, %v11923_v27  ;;  %v6801_v26 = vsel %vm12541_vm14, %v6746_v2, 0 }
0x225d   :  { %v6445_v51 = vpop.f32.mrb[92].mxu1  ;;  %8734 = vmatpush3.bf16.xpose.msra.mxu1 %v6801_v26  ;;  %8739 = vmatprep.mubr.msk.bf16.mxu1 %vm12324_vm1, %v12426_v29 }
0x225e   :  { %v8641_v62 = vpop.f32.mrb[93].mxu1  ;;  %8735 = vmatprep.subr.bf16.mxu1 %v12426_v29  ;;  %v6494_v36 = vmul.f32 %v12535_v18, %v6445_v51 }
0x225f   :  { %v6448_v41 = vpop.f32.mrb[94].mxu1 }
0x2260   :  { %v6495_v49 = vmul.f32 %v12535_v18, %v6448_v41  ;;  %v8642_v14 = vpop.f32.mrb[95].mxu1 }
0x2262   :  { %v6747_v23 = vpack.c.bf16 %v6495_v49, %v6494_v36 }
0x2264   :  { %v6804_v55 = vsel %vm12542_vm15, %v6747_v23, 0 }
0x2265   :  { %v6453_v42 = vpop.f32.mrb[96].mxu1  ;;  %8736 = vmatpush3.bf16.xpose.msra.mxu1 %v6804_v55 }
0x2266   :  { %v8645_v16 = vpop.f32.mrb[97].mxu1  ;;  %8737 = vmatprep.subr.bf16.mxu1 %v12426_v29  ;;  %v6496_v0 = vmul.f32 %v12535_v18, %v6453_v42 }
0x2267   :  { %v6456_v1 = vpop.f32.mrb[98].mxu1 }
0x2268   :  { %v6497_v12 = vmul.f32 %v12543_v48, %v6456_v1  ;;  %v8646_v53 = vpop.f32.mrb[99].mxu1 }
0x226a   :  { %v6748_v20 = vpack.c.bf16 %v6497_v12, %v6496_v0 }
0x226c   :  { %v6807_v61 = vsel %vm12544_vm6, %v6748_v20, 0 }
0x226d   :  { %8738 = vmatpush3.bf16.xpose.msra.mxu1 %v6807_v61 }
0x226e   :  { %8743 = vmatprep.subr.bf16.mxu1 %v12426_v29 }
0x2274   :  { %8740 = vmatmul.mubr.msk.bf16.vlgmr.msra.gmra.mrb[104].mxu1 %vm12545_vm11, %v11923_v27  ;;  %v6663_v27 = vpop.f32.mrb[102].mxu0 }
0x2275   :  { %8749 = vmatprep.mubr.msk.bf16.mxu1 %vm12324_vm1, %v12426_v29  ;;  %v6722_v40 = vmul.f32 %v12535_v18, %v6663_v27  ;;  %v8720_v3 = vpop.f32.mrb[103].mxu0 }
0x2276   :  { %v6668_v56 = vpop.f32.mrb[104].mxu0 }
0x2277   :  { %v6929_v52 = vpack.c.bf16 %v6722_v40, %v6721_v37  ;;  %v8723_v10 = vpop.f32.mrb[105].mxu0  ;;  %v6723_v31 = vmul.f32 %v12535_v18, %v6668_v56 }
0x2278   :  { %v6671_v4 = vpop.f32.mrb[106].mxu0 }
0x2279   :  { %7883 = vmatprep.subr.bf16.mxu0 %v6929_v52  ;;  %v8724_v5 = vpop.f32.mrb[107].mxu0  ;;  %v6724_v59 = vmul.f32 %v12535_v18, %v6671_v4 }
0x227a   :  { %7884 = vmatpush3.bf16.msra.mxu0 %v6921_v21  ;;  %v6676_v24 = vpop.f32.mrb[108].mxu0 }
0x227b   :  { %8753 = vmatprep.subr.bf16.mxu0 %v12426_v29  ;;  %v6930_v19 = vpack.c.bf16 %v6724_v59, %v6723_v31  ;;  %v8727_v11 = vpop.f32.mrb[109].mxu0  ;;  %v6725_v17 = vmul.f32 %v12535_v18, %v6676_v24  ;;  %v7070_v31 = vld [vmem:[#allocation25] sm:$0xff]  ;;  %v7071_v59 = vld [vmem:[#allocation25 + $0x8] sm:$0xff]  ;;  %v7024_v24 = vld [vmem:[#allocation23] sm:$0x1] }
0x227c   :  { %v6679_v38 = vpop.f32.mrb[110].mxu0 }
0x227d   :  { %8744 = vmatpush3.bf16.msra.mxu1 %v6930_v19  ;;  %v8728_v34 = vpop.f32.mrb[111].mxu0  ;;  %v6726_v43 = vmul.f32 %v12535_v18, %v6679_v38  ;;  %v7073_v19 = vpack.c.bf16 %v7071_v59, %v7070_v31 }
0x227e   :  { %8745 = vmatprep.subr.bf16.mxu1 %v12426_v29  ;;  %v6684_v22 = vpop.f32.mrb[112].mxu0 }
0x227f   :  { %v6931_v21 = vpack.c.bf16 %v6726_v43, %v6725_v17  ;;  %v8731_v8 = vpop.f32.mrb[113].mxu0  ;;  %v6727_v33 = vmul.f32 %v12535_v18, %v6684_v22 }
0x2280   :  { %v6687_v35 = vpop.f32.mrb[114].mxu0  ;;  %v7118_v8 = vld [vmem:[%s9709_s5] sm:$0xff] }
0x2281   :  { %8746 = vmatpush3.bf16.msra.mxu1 %v6931_v21  ;;  %v6728_v6 = vmul.f32 %v12543_v48, %v6687_v35  ;;  %v8732_v57 = vpop.f32.mrb[115].mxu0  ;;  %v7119_v35 = vld [vmem:[%s9709_s5 + $0x8] sm:$0xff]  ;;  %s9369_s5 = scalar_lea.vmem %s7175_s3, 16 }
0x2282   :  { %8747 = vmatprep.subr.bf16.mxu1 %v12426_v29  ;;  %p9370_p10 = scmp.ne.s32.totalorder %s7175_s3, %s9369_s5  ;;  %p9375_p12 = scmp.lt.s32.totalorder %s9373_s22, %s9369_s5 }
0x2283   :  { %v6932_v30 = vpack.c.bf16 %v6728_v6, %v6727_v33  ;;  %v7121_v33 = vpack.c.bf16 %v7119_v35, %v7118_v8 }
0x2284   :  { %p9376_p13 = por %p9375_p12, %p9374_p11 }
0x2285   :  { %v6937_v54 = vsel %vm12547_vm7, %v6932_v30, 0 }
0x2286   :  { %8748 = vmatpush3.bf16.msra.mxu1 %v6937_v54  ;;  %p9377_p0 = pnand %p9376_p13, %p9370_p10 }
0x2287   :  { %8759 = vmatprep.subr.bf16.mxu1 %v12426_v29 }
0x232f   :  { %v6843_v7 = vpop.f32.mrb[100].mxu1 }
0x2330   :  { %v6890_v60 = vmul.f32 0.25, %v6843_v7  ;;  %v6845_v50 = vpop.f32.mrb[101].mxu1 }
0x2331   :  { %v6891_v47 = vmul.f32 0.25, %v6845_v50  ;;  %v6847_v13 = vpop.f32.mrb[102].mxu1  ;;  %v7122_v50 = vld [vmem:[#allocation28] sm:$0x1] }
0x2332   :  { %v6893_v2 = vsub.f32 %v6890_v60, %v6890_v60  ;;  %v6848_v26 = vpop.f32.mrb[103].mxu1 }
0x2333   :  { %v6894_v51 = vsub.f32 %v6891_v47, %v6891_v47 }
0x2334   :  { %v6896_v62 = vmul.f32 1.442695, %v6893_v2 }
0x2335   :  { %v6898_v41 = vmul.f32 1.442695, %v6894_v51 }
0x2336   :  { %8981 = vpow2.f32 %v6896_v62 }
0x2337   :  { %8983 = vpow2.f32 %v6898_v41 }
0x2340   :  { %v8982_v18 = vpop.eup %8981 }
0x2341   :  { %v8984_v36 = vpop.eup %8983  ;;  %8985 = vrcp.f32 %v8982_v18 }
0x2342   :  { %8987 = vrcp.f32 %v8984_v36 }
0x2347   :  { %v6884_v49 = vpop.f32.mrb[104].mxu1 }
0x2348   :  { %v6892_v14 = vmul.f32 0.25, %v6884_v49  ;;  %v8741_v23 = vpop.f32.mrb[105].mxu1 }
0x2349   :  { %v6887_v55 = vpop.f32.mrb[106].mxu1 }
0x234a   :  { %v6895_v42 = vsub.f32 %v6892_v14, %v6892_v14  ;;  %v8742_v16 = vpop.f32.mrb[107].mxu1 }
0x234b   :  { %v8986_v1 = vpop.eup %8985 }
0x234c   :  { %v8988_v0 = vpop.eup %8987  ;;  %v6908_v48 = vmul.f32 %v8986_v1, %v8982_v18  ;;  %v6900_v12 = vmul.f32 1.442695, %v6895_v42 }
0x234d   :  { %v6909_v53 = vmul.f32 %v8988_v0, %v8984_v36 }
0x234e   :  { %8989 = vpow2.f32 %v6900_v12  ;;  %v6911_v61 = vpack.c.bf16 %v6908_v48, %v6908_v48 }
0x234f   :  { %v6912_v20 = vpack.c.bf16 %v6909_v53, %v6909_v53 }
0x2351   :  { %6971 = vmatprep.mubr.bf16.mxu0 %v6912_v20 }
0x2352   :  { %6972 = vmatmul.mubr.bf16.vlgmr.msra.gmra.mrb[116].mxu0 %v6911_v61 }
0x2353   :  { %8755 = vmatprep.mubr.msk.bf16.mxu0 %vm12324_vm1, %v12426_v29  ;;  %8754 = vmatpush3.bf16.msra.mxu0 %v7023_v25 }
0x2354   :  { %8765 = vmatprep.subr.bf16.mxu0 %v12426_v29 }
0x2358   :  { %v8990_v44 = vpop.eup %8989 }
0x2359   :  { %8991 = vrcp.f32 %v8990_v44 }
0x2363   :  { %v8992_v63 = vpop.eup %8991 }
0x2364   :  { %v6910_v15 = vmul.f32 %v8992_v63, %v8990_v44 }
0x2366   :  { %v6913_v39 = vpack.c.bf16 %v6910_v15, %v6910_v15 }
0x2368   :  { %8750 = vmatmul.mubr.msk.bf16.vlgmr.msra.gmra.mrb[108].mxu1 %vm5494_vm12, %v6913_v39  ;;  %vm12548_vm12 = vmmov %vm12453_vm0 }
0x2369   :  { %8761 = vmatprep.mubr.msk.bf16.mxu1 %vm12324_vm1, %v12426_v29  ;;  %8760 = vmatpush3.bf16.msra.mxu1 %v7073_v19 }
0x2425   :  { %v7885_v58 = vpop.f32.mrb[116].mxu0 }
0x2426   :  { %v7886_v46 = vpop.f32.mrb[117].mxu0 }
0x2427   :  { %v7887_v32 = vadd.f32 %v7886_v46, %v7885_v58  ;;  %v7888_v27 = vpop.f32.mrb[118].mxu0 }
0x2428   :  { %v7889_v37 = vpop.f32.mrb[119].mxu0 }
0x243b   :  { %v7013_v40 = vpop.f32.mrb[108].mxu1 }
0x243c   :  { %v7014_v3 = vadd.f32 %v7887_v32, %v7013_v40  ;;  %v8751_v52 = vpop.f32.mrb[109].mxu1 }
0x243d   :  { %v7016_v56 = vpop.f32.mrb[110].mxu1 }
0x243e   :  { %v7019_v10 = vadd.f32 %v7014_v3, %v11919_v28  ;;  %v8752_v4 = vpop.f32.mrb[111].mxu1 }
0x2440   :  { %v7022_v5 = vpack.c.bf16 %v7019_v10, %v7019_v10 }
0x2442   :  { %8756 = vmatmul.mubr.msk.bf16.vlgmr.msra.gmra.mrb[120].mxu0 %vm12548_vm12, %v7022_v5 }
0x2443   :  { %8767 = vmatprep.mubr.msk.bf16.mxu0 %vm12324_vm1, %v12426_v29  ;;  %8766 = vmatpush3.bf16.msra.mxu0 %v7121_v33  ;;  %v7074_v29 = vld [vmem:[#allocation26] sm:$0x1]  ;;  %vm12550_vm1 = vmmov %vm12453_vm0 }
0x2515   :  { %v7062_v11 = vpop.f32.mrb[120].mxu0 }
0x2516   :  { %v7063_v38 = vadd.f32 %v7062_v11, %v7024_v24  ;;  %v8757_v34 = vpop.f32.mrb[121].mxu0 }
0x2517   :  { %v7065_v17 = vpop.f32.mrb[122].mxu0 }
0x2518   :  { %v7068_v43 = vmax.f32 %v7063_v38, 0.0  ;;  %v8758_v28 = vpop.f32.mrb[123].mxu0 }
0x251a   :  { %v7069_v21 = vadd.f32 %v7068_v43, %v7019_v10 }
0x251c   :  { %v7072_v22 = vpack.c.bf16 %v7069_v21, %v7069_v21 }
0x251e   :  { %8762 = vmatmul.mubr.msk.bf16.vlgmr.msra.gmra.mrb[112].mxu1 %vm12549_vm3, %v7072_v22 }
0x25f1   :  { %v7112_v6 = vpop.f32.mrb[112].mxu1 }
0x25f2   :  { %v7113_v57 = vadd.f32 %v7112_v6, %v7074_v29  ;;  %v8763_v30 = vpop.f32.mrb[113].mxu1 }
0x25f3   :  { %v7115_v54 = vpop.f32.mrb[114].mxu1 }
0x25f4   :  { %v7120_v7 = vpack.c.bf16 %v7113_v57, %v7113_v57  ;;  %v8764_v60 = vpop.f32.mrb[115].mxu1 }
0x25f6   :  { %8768 = vmatmul.mubr.msk.bf16.vlgmr.msra.gmra.mrb[124].mxu0 %vm12550_vm1, %v7120_v7 }
0x26c9   :  { %v7160_v47 = vpop.f32.mrb[124].mxu0 }
0x26ca   :  { %v7161_v13 = vadd.f32 %v7160_v47, %v7122_v50  ;;  %v8769_v2 = vpop.f32.mrb[125].mxu0 }
0x26cb   :  { %v7163_v26 = vpop.f32.mrb[126].mxu0 }
0x26cc   :  { %v8770_v51 = vpop.f32.mrb[127].mxu0  ;;  %7167 = vst.msk [vmem:[#allocation29] sm:$0x1] %vm7166_vm4, %v7161_v13 }
0x26cd   :  { %9380 = shalt.err (!%p9377_p0)
}
0x26ce   :  { %s9381_s20 = scalar_lea.hbm %s9719_s19, 16 }
0x26cf   :  { %p9382_p1 = scmp.ne.s32.totalorder %s9719_s19, %s9381_s20  ;;  %p9385_p2 = scmp.lt.u32.totalorder %s9381_s20, %s9719_s19 }
0x26d1   :  { %p9387_p3 = pnand %p9385_p2, %p9382_p1 }
0x26d3   :  { %9390 = shalt.err (!%p9387_p3)
}
0x26d4   :  { %7177 = dma.vmem_to_hbm [thread:$0]  %s7175_s3, 16, %s9719_s19, [#allocation4]  }
0x26d5   :  { %9409 = dma.done.wait [#allocation4], 16  }
0x26d6   :  { %9410 = vsyncadd [#allocation4], 4294967280 }
0x26d7   :  { %7181 = vsyncpa [#allocation3], 1 }
0x26d8   :  { %7182 = vsyncpa [#allocation6], 1 }
0x26d9   :  { %7183 = vsyncpa [#allocation9], 1 }
0x26da   :  { %7184 = vsyncpa [#allocation12], 1 }
0x26db   :  { %7185 = vsyncpa [#allocation15], 1 }
0x26dc   :  { %7186 = vsyncpa [#allocation18], 1 }
0x26dd   :  { %7187 = vsyncpa [#allocation21], 1 }
0x26de   :  { %7188 = vsyncpa [#allocation24], 1 }
0x26df   :  { %7189 = vsyncpa [#allocation27], 1 }
0x26e0   :  { %7190 = vsyncpa [#allocation4], 1 }

</bundles_post_ra>
